<compile_context>
chip_gen: v7x
topology: tpu7x:2x2x1
jax: 0.10.0
libtpu: 0.0.40
codegen_flags: <defaults>
</compile_context>

<pallas_src>
import functools

import jax
import jax.numpy as jnp
import numpy as np
from jax import lax
from jax.experimental import pallas as pl
from jax.experimental.pallas import tpu as pltpu


# ----------------------------------------------------------------------------
# Fused RA kernel
# ----------------------------------------------------------------------------
def ra_fused_kernel(
    x_ref, y_ref, masks_ref,
    wc_ref, bc_ref,
    w1_ref, b1_ref, w2_ref, b2_ref, w3_ref, b3_ref,
    w4_ref, b4_ref, w5_ref, b5_ref, w6_ref, b6_ref, w7_ref, b7_ref,
    o_ref,
    cat_ref,
    *, W,
):
    L = x_ref.shape[-1]                 # lanes per grid step (NB * H * W)
    C = wc_ref.shape[0]                 # RA channel count
    # Tap offsets of a 3x3 SAME conv on the row-major flattened spatial axis.
    offs = [di * W + dj for di in (-1, 0, 1) for dj in (-1, 0, 1)]

    masks = masks_ref[...]              # (9, L) 0/1; zeros every out-of-image
                                        # (and hence every cross-image) tap.

    def conv3x3(a, w_ref, b_ref):
        """3x3 SAME conv of a (Cin, L) activation as 9 accumulated MXU dots."""
        cout = w_ref.shape[1]
        acc = jnp.zeros((cout, L), jnp.float32)
        for t, off in enumerate(offs):
            if off == 0:                # center tap: always valid, no roll
                acc = acc + jnp.dot(w_ref[t], a,
                                    preferred_element_type=jnp.float32)
            else:
                # Roll so lane p reads lane (p + off) mod L; the wrapped /
                # out-of-image lanes are exactly the mask zeros, applied after
                # the dot (mask is per-column so it commutes with the matvec).
                patch = pltpu.roll(a, (-off) % L, axis=1)
                acc = acc + jnp.dot(w_ref[t], patch,
                                    preferred_element_type=jnp.float32
                                    ) * masks[t:t + 1, :]
        return acc + b_ref[...]

    x = x_ref[...]                      # (Cin, L)
    yv = y_ref[...]                     # (1,   L)

    # --- 1x1 convert ---------------------------------------------------------
    xc = jnp.dot(wc_ref[...], x,
                 preferred_element_type=jnp.float32) + bc_ref[...]   # (C, L)

    # --- reverse-attention gating (single sigmoid) ---------------------------
    s = jax.nn.sigmoid(yv)
    p1 = xc * s                         # sigmoid(y)  * x
    p0 = xc - p1                        # sigmoid(-y) * x

    # --- fused concat([p0, p1, y, xc]) — assembled as [p0, p1, xc, y] so every
    # multi-row piece sits at an 8-row-aligned sublane offset; cat1's weight is
    # permuted on the host to match this order.
    cat_ref[0:C, :] = p0
    cat_ref[C:2 * C, :] = p1
    cat_ref[2 * C:3 * C, :] = xc
    cat_ref[3 * C:3 * C + 1, :] = yv

    # --- convs_cat: conv-relu, conv-relu, conv-sigmoid ------------------------
    h = jnp.maximum(conv3x3(cat_ref[...], w1_ref, b1_ref), 0.0)   # (2C, L)
    h = jnp.maximum(conv3x3(h, w2_ref, b2_ref), 0.0)              # (2C, L)
    h = jax.nn.sigmoid(conv3x3(h, w3_ref, b3_ref))                # (C, L)

    # --- convs: 3x (conv-relu), conv-sigmoid ----------------------------------
    h = jnp.maximum(conv3x3(h, w4_ref, b4_ref), 0.0)              # (C, L)
    h = jnp.maximum(conv3x3(h, w5_ref, b5_ref), 0.0)              # (C, L)
    h = jnp.maximum(conv3x3(h, w6_ref, b6_ref), 0.0)              # (C, L)
    o_ref[...] = jax.nn.sigmoid(conv3x3(h, w7_ref, b7_ref))       # (1, L)


# ----------------------------------------------------------------------------
# Host-side parameter / mask preparation (glue)
# ----------------------------------------------------------------------------
def _tap_masks(H, W):
    """(9, H*W) 0/1 masks marking in-image taps for a SAME 3x3 conv."""
    ii, jj = np.meshgrid(np.arange(H), np.arange(W), indexing="ij")
    masks = []
    for di in (-1, 0, 1):
        for dj in (-1, 0, 1):
            valid = ((ii + di >= 0) & (ii + di < H) &
                     (jj + dj >= 0) & (jj + dj < W))
            masks.append(valid.reshape(-1))
    return np.stack(masks).astype(np.float32)


def _w3_taps(w_oihw):
    """(Cout, Cin, 3, 3) OIHW -> (9, Cout, Cin), tap index t = kh*3 + kw."""
    cout, cin = w_oihw.shape[:2]
    return jnp.transpose(w_oihw, (2, 3, 0, 1)).reshape(9, cout, cin)


def _prep_kernel_params(params):
    C = params["channel"]
    wc, bc = params["convert"]
    w1, b1 = params["cat1"]
    # Kernel's fused-concat channel order is [p0, p1, xc, y]; the PyTorch layer
    # expects [p0, p1, y, xc] -> permute cat1's input channels to match.
    perm = np.array(list(range(0, 2 * C)) + list(range(2 * C + 1, 3 * C + 1))
                    + [2 * C])
    # TODO(synk): optionally pre-cast weights (and the per-tap dot operands) to
    # bf16 for v6e/v7x MXU throughput; kept f32 to match the f32 reference.
    args = [wc[:, :, 0, 0], bc.reshape(-1, 1),
            _w3_taps(w1[:, perm, :, :]), b1.reshape(-1, 1)]
    for name in ("cat2", "cat3", "s1", "s2", "s3", "s4"):
        w, b = params[name]
        args += [_w3_taps(w), b.reshape(-1, 1)]
    return args


def _choose_images_per_step(N, HW, max_lanes):
    """Largest divisor of N with nb*HW <= max_lanes lanes, but keep >= 2 grid
    steps when N >= 2 so both v7x TensorCores get work."""
    cands = [d for d in range(1, N + 1) if N % d == 0 and d * HW <= max_lanes]
    if not cands:
        return 1
    multi = [d for d in cands if N // d >= 2]
    return max(multi) if multi else max(cands)


# ----------------------------------------------------------------------------
# Pallas wrapper
# ----------------------------------------------------------------------------
def ra_forward(params, x, y, *, max_lanes_per_step=4096):
    """Pallas RA forward. x: (N, Cin, H, W), y: (N, 1, H, W) -> (N, 1, H, W)."""
    N, Cin, H, W = x.shape
    C = params["channel"]
    HW = H * W
    nb = _choose_images_per_step(N, HW, max_lanes_per_step)
    grid = N // nb
    L = nb * HW

    weights = _prep_kernel_params(params)
    masks = jnp.asarray(np.tile(_tap_masks(H, W), (1, nb)))      # (9, L)

    # Image-major lane order: lane index = n*HW + i*W + j.
    x2 = jnp.transpose(x.reshape(N, Cin, HW), (1, 0, 2)).reshape(Cin, N * HW)
    y2 = jnp.transpose(y.reshape(N, 1, HW), (1, 0, 2)).reshape(1, N * HW)

    def full_spec(a):
        # Grid-invariant operand (masks / weights / biases).
        # TODO(synk): single-buffer these (pipeline_mode=pl.Buffered(1)) once
        # larger-C configs make the doubled footprint matter.
        zeros = (0,) * a.ndim
        return pl.BlockSpec(a.shape, lambda g, _z=zeros: _z)

    in_specs = ([pl.BlockSpec((Cin, L), lambda g: (0, g)),
                 pl.BlockSpec((1, L), lambda g: (0, g)),
                 full_spec(masks)]
                + [full_spec(a) for a in weights])

    kern = functools.partial(ra_fused_kernel, W=W)
    # TODO(synk): at production resolutions (HW not a multiple of 128, or maps
    # too large for one chunk) tile over spatial row strips with a 1-row halo
    # instead of whole images per chunk.
    out = pl.pallas_call(
        kern,
        out_shape=jax.ShapeDtypeStruct((1, N * HW), jnp.float32),
        grid=(grid,),
        in_specs=in_specs,
        out_specs=pl.BlockSpec((1, L), lambda g: (0, g)),
        scratch_shapes=[
            pltpu.VMEM((3 * C + 1, L), jnp.float32),   # fused-concat staging
        ],
        compiler_params=pltpu.CompilerParams(
            dimension_semantics=("parallel",),
            vmem_limit_bytes=32 * 1024 * 1024),
    )(x2, y2, masks, *weights)
    return jnp.transpose(out.reshape(1, N, HW), (1, 0, 2)).reshape(N, 1, H, W)


# ----------------------------------------------------------------------------
# Deterministic init (PyTorch-Conv2d-like uniform) and pure-JAX reference
# ----------------------------------------------------------------------------
def init_params(key, in_ch, C):
    keys = jax.random.split(key, 8)

    def conv_init(k, cout, cin, ksz):
        kw, kb = jax.random.split(k)
        bound = 1.0 / float(np.sqrt(cin * ksz * ksz))
        w = jax.random.uniform(kw, (cout, cin, ksz, ksz), jnp.float32,
                               -bound, bound)
        b = jax.random.uniform(kb, (cout,), jnp.float32, -bound, bound)
        return w, b

    return {
        "channel": C,
        "convert": conv_init(keys[0], C, in_ch, 1),
        "cat1": conv_init(keys[1], 2 * C, 3 * C + 1, 3),
        "cat2": conv_init(keys[2], 2 * C, 2 * C, 3),
        "cat3": conv_init(keys[3], C, 2 * C, 3),
        "s1": conv_init(keys[4], C, C, 3),
        "s2": conv_init(keys[5], C, C, 3),
        "s3": conv_init(keys[6], C, C, 3),
        "s4": conv_init(keys[7], 1, C, 3),
    }


def _conv_ref(x, w, b, padding):
    z = lax.conv_general_dilated(
        x, w, window_strides=(1, 1), padding=padding,
        dimension_numbers=("NCHW", "OIHW", "NCHW"),
        precision=lax.Precision.HIGHEST)
    return z + b.reshape(1, -1, 1, 1)


def ra_reference(params, x, y):
    xc = _conv_ref(x, *params["convert"], "VALID")
    p0 = jax.nn.sigmoid(-y) * xc
    p1 = jax.nn.sigmoid(y) * xc
    connect = jnp.concatenate([p0, p1, y, xc], axis=1)
    h = jax.nn.relu(_conv_ref(connect, *params["cat1"], "SAME"))
    h = jax.nn.relu(_conv_ref(h, *params["cat2"], "SAME"))
    h = jax.nn.sigmoid(_conv_ref(h, *params["cat3"], "SAME"))
    h = jax.nn.relu(_conv_ref(h, *params["s1"], "SAME"))
    h = jax.nn.relu(_conv_ref(h, *params["s2"], "SAME"))
    h = jax.nn.relu(_conv_ref(h, *params["s3"], "SAME"))
    return jax.nn.sigmoid(_conv_ref(h, *params["s4"], "SAME"))


# ----------------------------------------------------------------------------
if __name__ == "__main__":
    key = jax.random.PRNGKey(0)
    kx, ky, kp = jax.random.split(key, 3)

    N, H, W = 4, 16, 16
    in_ch, C = 4, 8

    x = jax.random.normal(kx, (N, in_ch, H, W), jnp.float32)   # NCHW
    y = jax.random.normal(ky, (N, 1, H, W), jnp.float32)       # NCHW, 1 chan
    params = init_params(kp, in_ch, C)

    out = jax.block_until_ready(ra_forward(params, x, y))
    assert out.shape == (N, 1, H, W)

    ref = ra_reference(params, x, y)
    np.testing.assert_allclose(np.asarray(out), np.asarray(ref),
                               rtol=1e-4, atol=1e-4)

    print("KERNEL_OK")
</pallas_src>

<mosaic_0001>
module attributes {stable_mosaic.version = 11 : i64} {
  func.func @ra_fused_kernel(%arg0: i32, %arg1: memref<4x512xf32, #tpu.memory_space<vmem>>, %arg2: memref<1x512xf32, #tpu.memory_space<vmem>>, %arg3: memref<9x512xf32, #tpu.memory_space<vmem>>, %arg4: memref<8x4xf32, #tpu.memory_space<vmem>>, %arg5: memref<8x1xf32, #tpu.memory_space<vmem>>, %arg6: memref<9x16x25xf32, #tpu.memory_space<vmem>>, %arg7: memref<16x1xf32, #tpu.memory_space<vmem>>, %arg8: memref<9x16x16xf32, #tpu.memory_space<vmem>>, %arg9: memref<16x1xf32, #tpu.memory_space<vmem>>, %arg10: memref<9x8x16xf32, #tpu.memory_space<vmem>>, %arg11: memref<8x1xf32, #tpu.memory_space<vmem>>, %arg12: memref<9x8x8xf32, #tpu.memory_space<vmem>>, %arg13: memref<8x1xf32, #tpu.memory_space<vmem>>, %arg14: memref<9x8x8xf32, #tpu.memory_space<vmem>>, %arg15: memref<8x1xf32, #tpu.memory_space<vmem>>, %arg16: memref<9x8x8xf32, #tpu.memory_space<vmem>>, %arg17: memref<8x1xf32, #tpu.memory_space<vmem>>, %arg18: memref<9x1x8xf32, #tpu.memory_space<vmem>>, %arg19: memref<1x1xf32, #tpu.memory_space<vmem>>, %arg20: memref<1x512xf32, #tpu.memory_space<vmem>>, %arg21: memref<25x512xf32, #tpu.memory_space<vmem>>) attributes {dimension_semantics = [#tpu.dimension_semantics<parallel>], iteration_bounds = array<i64: 2>, scalar_prefetch = 0 : i64, scratch_operands = 1 : i64, tpu.core_type = #tpu.core_type<tc>, window_params = [{transform_indices = @transform_0, window_bounds = array<i64: 4, 512>}, {transform_indices = @transform_1, window_bounds = array<i64: 1, 512>}, {pipeline_mode = #tpu.pipeline_mode<synchronous>, transform_indices = @transform_2, window_bounds = array<i64: 9, 512>}, {pipeline_mode = #tpu.pipeline_mode<synchronous>, transform_indices = @transform_3, window_bounds = array<i64: 8, 4>}, {pipeline_mode = #tpu.pipeline_mode<synchronous>, transform_indices = @transform_4, window_bounds = array<i64: 8, 1>}, {pipeline_mode = #tpu.pipeline_mode<synchronous>, transform_indices = @transform_5, window_bounds = array<i64: 9, 16, 25>}, {pipeline_mode = #tpu.pipeline_mode<synchronous>, transform_indices = @transform_6, window_bounds = array<i64: 16, 1>}, {pipeline_mode = #tpu.pipeline_mode<synchronous>, transform_indices = @transform_7, window_bounds = array<i64: 9, 16, 16>}, {pipeline_mode = #tpu.pipeline_mode<synchronous>, transform_indices = @transform_8, window_bounds = array<i64: 16, 1>}, {pipeline_mode = #tpu.pipeline_mode<synchronous>, transform_indices = @transform_9, window_bounds = array<i64: 9, 8, 16>}, {pipeline_mode = #tpu.pipeline_mode<synchronous>, transform_indices = @transform_10, window_bounds = array<i64: 8, 1>}, {pipeline_mode = #tpu.pipeline_mode<synchronous>, transform_indices = @transform_11, window_bounds = array<i64: 9, 8, 8>}, {pipeline_mode = #tpu.pipeline_mode<synchronous>, transform_indices = @transform_12, window_bounds = array<i64: 8, 1>}, {pipeline_mode = #tpu.pipeline_mode<synchronous>, transform_indices = @transform_13, window_bounds = array<i64: 9, 8, 8>}, {pipeline_mode = #tpu.pipeline_mode<synchronous>, transform_indices = @transform_14, window_bounds = array<i64: 8, 1>}, {pipeline_mode = #tpu.pipeline_mode<synchronous>, transform_indices = @transform_15, window_bounds = array<i64: 9, 8, 8>}, {pipeline_mode = #tpu.pipeline_mode<synchronous>, transform_indices = @transform_16, window_bounds = array<i64: 8, 1>}, {pipeline_mode = #tpu.pipeline_mode<synchronous>, transform_indices = @transform_17, window_bounds = array<i64: 9, 1, 8>}, {pipeline_mode = #tpu.pipeline_mode<synchronous>, transform_indices = @transform_18, window_bounds = array<i64: 1, 1>}, {transform_indices = @transform_19, window_bounds = array<i64: 1, 512>}]} {
    %c0 = arith.constant 0 : index
    %c0_0 = arith.constant 0 : index
    %0 = vector.load %arg3[%c0, %c0_0] : memref<9x512xf32, #tpu.memory_space<vmem>>, vector<9x512xf32>
    %c0_1 = arith.constant 0 : index
    %c0_2 = arith.constant 0 : index
    %1 = vector.load %arg1[%c0_1, %c0_2] : memref<4x512xf32, #tpu.memory_space<vmem>>, vector<4x512xf32>
    %c0_3 = arith.constant 0 : index
    %c0_4 = arith.constant 0 : index
    %2 = vector.load %arg2[%c0_3, %c0_4] : memref<1x512xf32, #tpu.memory_space<vmem>>, vector<1x512xf32>
    %c0_5 = arith.constant 0 : index
    %c0_6 = arith.constant 0 : index
    %3 = vector.load %arg4[%c0_5, %c0_6] : memref<8x4xf32, #tpu.memory_space<vmem>>, vector<8x4xf32>
    %cst = arith.constant dense<0.000000e+00> : vector<8x512xf32>
    %4 = tpu.matmul %3, %1, %cst {dimension_numbers = #tpu.dot_dimension_numbers<[1], [0], [0], [1], [0, 0, 1, 1], [], []>} : vector<8x4xf32>, vector<4x512xf32>, vector<8x512xf32> -> vector<8x512xf32>
    %c0_7 = arith.constant 0 : index
    %c0_8 = arith.constant 0 : index
    %5 = vector.load %arg5[%c0_7, %c0_8] : memref<8x1xf32, #tpu.memory_space<vmem>>, vector<8x1xf32>
    %6 = vector.broadcast %5 : vector<8x1xf32> to vector<8x512xf32>
    %7 = arith.addf %4, %6 : vector<8x512xf32>
    %8 = arith.negf %2 : vector<1x512xf32>
    %9 = math.exp %8 : vector<1x512xf32>
    %cst_9 = arith.constant 1.000000e+00 : f32
    %10 = vector.broadcast %cst_9 : f32 to vector<1x512xf32>
    %11 = arith.addf %10, %9 : vector<1x512xf32>
    %12 = arith.divf %10, %11 : vector<1x512xf32>
    %13 = vector.broadcast %12 : vector<1x512xf32> to vector<8x512xf32>
    %14 = arith.mulf %7, %13 : vector<8x512xf32>
    %15 = arith.subf %7, %14 : vector<8x512xf32>
    %c0_10 = arith.constant 0 : index
    %c0_11 = arith.constant 0 : index
    %16 = vector.load %arg21[%c0_10, %c0_11] : memref<25x512xf32, #tpu.memory_space<vmem>>, vector<8x512xf32>
    tpu.vector_store %arg21[%c0_10, %c0_11], %15 {strides = array<i32>} : memref<25x512xf32, #tpu.memory_space<vmem>>, vector<8x512xf32>,
    %c8 = arith.constant 8 : index
    %c0_12 = arith.constant 0 : index
    %17 = vector.load %arg21[%c8, %c0_12] : memref<25x512xf32, #tpu.memory_space<vmem>>, vector<8x512xf32>
    tpu.vector_store %arg21[%c8, %c0_12], %14 {strides = array<i32>} : memref<25x512xf32, #tpu.memory_space<vmem>>, vector<8x512xf32>,
    %c16 = arith.constant 16 : index
    %c0_13 = arith.constant 0 : index
    %18 = vector.load %arg21[%c16, %c0_13] : memref<25x512xf32, #tpu.memory_space<vmem>>, vector<8x512xf32>
    tpu.vector_store %arg21[%c16, %c0_13], %7 {strides = array<i32>} : memref<25x512xf32, #tpu.memory_space<vmem>>, vector<8x512xf32>,
    %c24 = arith.constant 24 : index
    %c0_14 = arith.constant 0 : index
    %19 = vector.load %arg21[%c24, %c0_14] : memref<25x512xf32, #tpu.memory_space<vmem>>, vector<1x512xf32>
    tpu.vector_store %arg21[%c24, %c0_14], %2 {strides = array<i32>} : memref<25x512xf32, #tpu.memory_space<vmem>>, vector<1x512xf32>,
    %c0_15 = arith.constant 0 : index
    %c0_16 = arith.constant 0 : index
    %20 = vector.load %arg21[%c0_15, %c0_16] : memref<25x512xf32, #tpu.memory_space<vmem>>, vector<25x512xf32>
    %cst_17 = arith.constant 0.000000e+00 : f32
    %21 = vector.broadcast %cst_17 : f32 to vector<16x512xf32>
    %c17_i32 = arith.constant 17 : i32
    %22 = tpu.dynamic_rotate %20 by %c17_i32 dim 1 : vector<25x512xf32>, i32 -> vector<25x512xf32>
    %c0_18 = arith.constant 0 : index
    %c0_19 = arith.constant 0 : index
    %c0_20 = arith.constant 0 : index
    %23 = vector.load %arg6[%c0_18, %c0_19, %c0_20] : memref<9x16x25xf32, #tpu.memory_space<vmem>>, vector<1x16x25xf32>
    %24 = vector.shape_cast %23 : vector<1x16x25xf32> to vector<16x25xf32>
    %cst_21 = arith.constant dense<0.000000e+00> : vector<16x512xf32>
    %25 = tpu.matmul %24, %22, %cst_21 {dimension_numbers = #tpu.dot_dimension_numbers<[1], [0], [0], [1], [0, 0, 1, 1], [], []>} : vector<16x25xf32>, vector<25x512xf32>, vector<16x512xf32> -> vector<16x512xf32>
    %26 = vector.extract_strided_slice %0 {offsets = [0, 0], sizes = [1, 512], strides = [1, 1]} : vector<9x512xf32> to vector<1x512xf32>
    %27 = vector.broadcast %26 : vector<1x512xf32> to vector<16x512xf32>
    %28 = arith.mulf %25, %27 : vector<16x512xf32>
    %29 = arith.addf %21, %28 : vector<16x512xf32>
    %c16_i32 = arith.constant 16 : i32
    %30 = tpu.dynamic_rotate %20 by %c16_i32 dim 1 : vector<25x512xf32>, i32 -> vector<25x512xf32>
    %c1 = arith.constant 1 : index
    %c0_22 = arith.constant 0 : index
    %c0_23 = arith.constant 0 : index
    %31 = vector.load %arg6[%c1, %c0_22, %c0_23] : memref<9x16x25xf32, #tpu.memory_space<vmem>>, vector<1x16x25xf32>
    %32 = vector.shape_cast %31 : vector<1x16x25xf32> to vector<16x25xf32>
    %cst_24 = arith.constant dense<0.000000e+00> : vector<16x512xf32>
    %33 = tpu.matmul %32, %30, %cst_24 {dimension_numbers = #tpu.dot_dimension_numbers<[1], [0], [0], [1], [0, 0, 1, 1], [], []>} : vector<16x25xf32>, vector<25x512xf32>, vector<16x512xf32> -> vector<16x512xf32>
    %34 = vector.extract_strided_slice %0 {offsets = [1, 0], sizes = [1, 512], strides = [1, 1]} : vector<9x512xf32> to vector<1x512xf32>
    %35 = vector.broadcast %34 : vector<1x512xf32> to vector<16x512xf32>
    %36 = arith.mulf %33, %35 : vector<16x512xf32>
    %37 = arith.addf %29, %36 : vector<16x512xf32>
    %c15_i32 = arith.constant 15 : i32
    %38 = tpu.dynamic_rotate %20 by %c15_i32 dim 1 : vector<25x512xf32>, i32 -> vector<25x512xf32>
    %c2 = arith.constant 2 : index
    %c0_25 = arith.constant 0 : index
    %c0_26 = arith.constant 0 : index
    %39 = vector.load %arg6[%c2, %c0_25, %c0_26] : memref<9x16x25xf32, #tpu.memory_space<vmem>>, vector<1x16x25xf32>
    %40 = vector.shape_cast %39 : vector<1x16x25xf32> to vector<16x25xf32>
    %cst_27 = arith.constant dense<0.000000e+00> : vector<16x512xf32>
    %41 = tpu.matmul %40, %38, %cst_27 {dimension_numbers = #tpu.dot_dimension_numbers<[1], [0], [0], [1], [0, 0, 1, 1], [], []>} : vector<16x25xf32>, vector<25x512xf32>, vector<16x512xf32> -> vector<16x512xf32>
    %42 = vector.extract_strided_slice %0 {offsets = [2, 0], sizes = [1, 512], strides = [1, 1]} : vector<9x512xf32> to vector<1x512xf32>
    %43 = vector.broadcast %42 : vector<1x512xf32> to vector<16x512xf32>
    %44 = arith.mulf %41, %43 : vector<16x512xf32>
    %45 = arith.addf %37, %44 : vector<16x512xf32>
    %c1_i32 = arith.constant 1 : i32
    %46 = tpu.dynamic_rotate %20 by %c1_i32 dim 1 : vector<25x512xf32>, i32 -> vector<25x512xf32>
    %c3 = arith.constant 3 : index
    %c0_28 = arith.constant 0 : index
    %c0_29 = arith.constant 0 : index
    %47 = vector.load %arg6[%c3, %c0_28, %c0_29] : memref<9x16x25xf32, #tpu.memory_space<vmem>>, vector<1x16x25xf32>
    %48 = vector.shape_cast %47 : vector<1x16x25xf32> to vector<16x25xf32>
    %cst_30 = arith.constant dense<0.000000e+00> : vector<16x512xf32>
    %49 = tpu.matmul %48, %46, %cst_30 {dimension_numbers = #tpu.dot_dimension_numbers<[1], [0], [0], [1], [0, 0, 1, 1], [], []>} : vector<16x25xf32>, vector<25x512xf32>, vector<16x512xf32> -> vector<16x512xf32>
    %50 = vector.extract_strided_slice %0 {offsets = [3, 0], sizes = [1, 512], strides = [1, 1]} : vector<9x512xf32> to vector<1x512xf32>
    %51 = vector.broadcast %50 : vector<1x512xf32> to vector<16x512xf32>
    %52 = arith.mulf %49, %51 : vector<16x512xf32>
    %53 = arith.addf %45, %52 : vector<16x512xf32>
    %c4 = arith.constant 4 : index
    %c0_31 = arith.constant 0 : index
    %c0_32 = arith.constant 0 : index
    %54 = vector.load %arg6[%c4, %c0_31, %c0_32] : memref<9x16x25xf32, #tpu.memory_space<vmem>>, vector<1x16x25xf32>
    %55 = vector.shape_cast %54 : vector<1x16x25xf32> to vector<16x25xf32>
    %cst_33 = arith.constant dense<0.000000e+00> : vector<16x512xf32>
    %56 = tpu.matmul %55, %20, %cst_33 {dimension_numbers = #tpu.dot_dimension_numbers<[1], [0], [0], [1], [0, 0, 1, 1], [], []>} : vector<16x25xf32>, vector<25x512xf32>, vector<16x512xf32> -> vector<16x512xf32>
    %57 = arith.addf %53, %56 : vector<16x512xf32>
    %c511_i32 = arith.constant 511 : i32
    %58 = tpu.dynamic_rotate %20 by %c511_i32 dim 1 : vector<25x512xf32>, i32 -> vector<25x512xf32>
    %c5 = arith.constant 5 : index
    %c0_34 = arith.constant 0 : index
    %c0_35 = arith.constant 0 : index
    %59 = vector.load %arg6[%c5, %c0_34, %c0_35] : memref<9x16x25xf32, #tpu.memory_space<vmem>>, vector<1x16x25xf32>
    %60 = vector.shape_cast %59 : vector<1x16x25xf32> to vector<16x25xf32>
    %cst_36 = arith.constant dense<0.000000e+00> : vector<16x512xf32>
    %61 = tpu.matmul %60, %58, %cst_36 {dimension_numbers = #tpu.dot_dimension_numbers<[1], [0], [0], [1], [0, 0, 1, 1], [], []>} : vector<16x25xf32>, vector<25x512xf32>, vector<16x512xf32> -> vector<16x512xf32>
    %62 = vector.extract_strided_slice %0 {offsets = [5, 0], sizes = [1, 512], strides = [1, 1]} : vector<9x512xf32> to vector<1x512xf32>
    %63 = vector.broadcast %62 : vector<1x512xf32> to vector<16x512xf32>
    %64 = arith.mulf %61, %63 : vector<16x512xf32>
    %65 = arith.addf %57, %64 : vector<16x512xf32>
    %c497_i32 = arith.constant 497 : i32
    %66 = tpu.dynamic_rotate %20 by %c497_i32 dim 1 : vector<25x512xf32>, i32 -> vector<25x512xf32>
    %c6 = arith.constant 6 : index
    %c0_37 = arith.constant 0 : index
    %c0_38 = arith.constant 0 : index
    %67 = vector.load %arg6[%c6, %c0_37, %c0_38] : memref<9x16x25xf32, #tpu.memory_space<vmem>>, vector<1x16x25xf32>
    %68 = vector.shape_cast %67 : vector<1x16x25xf32> to vector<16x25xf32>
    %cst_39 = arith.constant dense<0.000000e+00> : vector<16x512xf32>
    %69 = tpu.matmul %68, %66, %cst_39 {dimension_numbers = #tpu.dot_dimension_numbers<[1], [0], [0], [1], [0, 0, 1, 1], [], []>} : vector<16x25xf32>, vector<25x512xf32>, vector<16x512xf32> -> vector<16x512xf32>
    %70 = vector.extract_strided_slice %0 {offsets = [6, 0], sizes = [1, 512], strides = [1, 1]} : vector<9x512xf32> to vector<1x512xf32>
    %71 = vector.broadcast %70 : vector<1x512xf32> to vector<16x512xf32>
    %72 = arith.mulf %69, %71 : vector<16x512xf32>
    %73 = arith.addf %65, %72 : vector<16x512xf32>
    %c496_i32 = arith.constant 496 : i32
    %74 = tpu.dynamic_rotate %20 by %c496_i32 dim 1 : vector<25x512xf32>, i32 -> vector<25x512xf32>
    %c7 = arith.constant 7 : index
    %c0_40 = arith.constant 0 : index
    %c0_41 = arith.constant 0 : index
    %75 = vector.load %arg6[%c7, %c0_40, %c0_41] : memref<9x16x25xf32, #tpu.memory_space<vmem>>, vector<1x16x25xf32>
    %76 = vector.shape_cast %75 : vector<1x16x25xf32> to vector<16x25xf32>
    %cst_42 = arith.constant dense<0.000000e+00> : vector<16x512xf32>
    %77 = tpu.matmul %76, %74, %cst_42 {dimension_numbers = #tpu.dot_dimension_numbers<[1], [0], [0], [1], [0, 0, 1, 1], [], []>} : vector<16x25xf32>, vector<25x512xf32>, vector<16x512xf32> -> vector<16x512xf32>
    %78 = vector.extract_strided_slice %0 {offsets = [7, 0], sizes = [1, 512], strides = [1, 1]} : vector<9x512xf32> to vector<1x512xf32>
    %79 = vector.broadcast %78 : vector<1x512xf32> to vector<16x512xf32>
    %80 = arith.mulf %77, %79 : vector<16x512xf32>
    %81 = arith.addf %73, %80 : vector<16x512xf32>
    %c495_i32 = arith.constant 495 : i32
    %82 = tpu.dynamic_rotate %20 by %c495_i32 dim 1 : vector<25x512xf32>, i32 -> vector<25x512xf32>
    %c8_43 = arith.constant 8 : index
    %c0_44 = arith.constant 0 : index
    %c0_45 = arith.constant 0 : index
    %83 = vector.load %arg6[%c8_43, %c0_44, %c0_45] : memref<9x16x25xf32, #tpu.memory_space<vmem>>, vector<1x16x25xf32>
    %84 = vector.shape_cast %83 : vector<1x16x25xf32> to vector<16x25xf32>
    %cst_46 = arith.constant dense<0.000000e+00> : vector<16x512xf32>
    %85 = tpu.matmul %84, %82, %cst_46 {dimension_numbers = #tpu.dot_dimension_numbers<[1], [0], [0], [1], [0, 0, 1, 1], [], []>} : vector<16x25xf32>, vector<25x512xf32>, vector<16x512xf32> -> vector<16x512xf32>
    %86 = vector.extract_strided_slice %0 {offsets = [8, 0], sizes = [1, 512], strides = [1, 1]} : vector<9x512xf32> to vector<1x512xf32>
    %87 = vector.broadcast %86 : vector<1x512xf32> to vector<16x512xf32>
    %88 = arith.mulf %85, %87 : vector<16x512xf32>
    %89 = arith.addf %81, %88 : vector<16x512xf32>
    %c0_47 = arith.constant 0 : index
    %c0_48 = arith.constant 0 : index
    %90 = vector.load %arg7[%c0_47, %c0_48] : memref<16x1xf32, #tpu.memory_space<vmem>>, vector<16x1xf32>
    %91 = vector.broadcast %90 : vector<16x1xf32> to vector<16x512xf32>
    %92 = arith.addf %89, %91 : vector<16x512xf32>
    %cst_49 = arith.constant 0.000000e+00 : f32
    %93 = vector.broadcast %cst_49 : f32 to vector<16x512xf32>
    %94 = arith.maximumf %92, %93 : vector<16x512xf32>
    %cst_50 = arith.constant 0.000000e+00 : f32
    %95 = vector.broadcast %cst_50 : f32 to vector<16x512xf32>
    %c17_i32_51 = arith.constant 17 : i32
    %96 = tpu.dynamic_rotate %94 by %c17_i32_51 dim 1 : vector<16x512xf32>, i32 -> vector<16x512xf32>
    %c0_52 = arith.constant 0 : index
    %c0_53 = arith.constant 0 : index
    %c0_54 = arith.constant 0 : index
    %97 = vector.load %arg8[%c0_52, %c0_53, %c0_54] : memref<9x16x16xf32, #tpu.memory_space<vmem>>, vector<1x16x16xf32>
    %98 = vector.shape_cast %97 : vector<1x16x16xf32> to vector<16x16xf32>
    %cst_55 = arith.constant dense<0.000000e+00> : vector<16x512xf32>
    %99 = tpu.matmul %98, %96, %cst_55 {dimension_numbers = #tpu.dot_dimension_numbers<[1], [0], [0], [1], [0, 0, 1, 1], [], []>} : vector<16x16xf32>, vector<16x512xf32>, vector<16x512xf32> -> vector<16x512xf32>
    %100 = vector.extract_strided_slice %0 {offsets = [0, 0], sizes = [1, 512], strides = [1, 1]} : vector<9x512xf32> to vector<1x512xf32>
    %101 = vector.broadcast %100 : vector<1x512xf32> to vector<16x512xf32>
    %102 = arith.mulf %99, %101 : vector<16x512xf32>
    %103 = arith.addf %95, %102 : vector<16x512xf32>
    %c16_i32_56 = arith.constant 16 : i32
    %104 = tpu.dynamic_rotate %94 by %c16_i32_56 dim 1 : vector<16x512xf32>, i32 -> vector<16x512xf32>
    %c1_57 = arith.constant 1 : index
    %c0_58 = arith.constant 0 : index
    %c0_59 = arith.constant 0 : index
    %105 = vector.load %arg8[%c1_57, %c0_58, %c0_59] : memref<9x16x16xf32, #tpu.memory_space<vmem>>, vector<1x16x16xf32>
    %106 = vector.shape_cast %105 : vector<1x16x16xf32> to vector<16x16xf32>
    %cst_60 = arith.constant dense<0.000000e+00> : vector<16x512xf32>
    %107 = tpu.matmul %106, %104, %cst_60 {dimension_numbers = #tpu.dot_dimension_numbers<[1], [0], [0], [1], [0, 0, 1, 1], [], []>} : vector<16x16xf32>, vector<16x512xf32>, vector<16x512xf32> -> vector<16x512xf32>
    %108 = vector.extract_strided_slice %0 {offsets = [1, 0], sizes = [1, 512], strides = [1, 1]} : vector<9x512xf32> to vector<1x512xf32>
    %109 = vector.broadcast %108 : vector<1x512xf32> to vector<16x512xf32>
    %110 = arith.mulf %107, %109 : vector<16x512xf32>
    %111 = arith.addf %103, %110 : vector<16x512xf32>
    %c15_i32_61 = arith.constant 15 : i32
    %112 = tpu.dynamic_rotate %94 by %c15_i32_61 dim 1 : vector<16x512xf32>, i32 -> vector<16x512xf32>
    %c2_62 = arith.constant 2 : index
    %c0_63 = arith.constant 0 : index
    %c0_64 = arith.constant 0 : index
    %113 = vector.load %arg8[%c2_62, %c0_63, %c0_64] : memref<9x16x16xf32, #tpu.memory_space<vmem>>, vector<1x16x16xf32>
    %114 = vector.shape_cast %113 : vector<1x16x16xf32> to vector<16x16xf32>
    %cst_65 = arith.constant dense<0.000000e+00> : vector<16x512xf32>
    %115 = tpu.matmul %114, %112, %cst_65 {dimension_numbers = #tpu.dot_dimension_numbers<[1], [0], [0], [1], [0, 0, 1, 1], [], []>} : vector<16x16xf32>, vector<16x512xf32>, vector<16x512xf32> -> vector<16x512xf32>
    %116 = vector.extract_strided_slice %0 {offsets = [2, 0], sizes = [1, 512], strides = [1, 1]} : vector<9x512xf32> to vector<1x512xf32>
    %117 = vector.broadcast %116 : vector<1x512xf32> to vector<16x512xf32>
    %118 = arith.mulf %115, %117 : vector<16x512xf32>
    %119 = arith.addf %111, %118 : vector<16x512xf32>
    %c1_i32_66 = arith.constant 1 : i32
    %120 = tpu.dynamic_rotate %94 by %c1_i32_66 dim 1 : vector<16x512xf32>, i32 -> vector<16x512xf32>
    %c3_67 = arith.constant 3 : index
    %c0_68 = arith.constant 0 : index
    %c0_69 = arith.constant 0 : index
    %121 = vector.load %arg8[%c3_67, %c0_68, %c0_69] : memref<9x16x16xf32, #tpu.memory_space<vmem>>, vector<1x16x16xf32>
    %122 = vector.shape_cast %121 : vector<1x16x16xf32> to vector<16x16xf32>
    %cst_70 = arith.constant dense<0.000000e+00> : vector<16x512xf32>
    %123 = tpu.matmul %122, %120, %cst_70 {dimension_numbers = #tpu.dot_dimension_numbers<[1], [0], [0], [1], [0, 0, 1, 1], [], []>} : vector<16x16xf32>, vector<16x512xf32>, vector<16x512xf32> -> vector<16x512xf32>
    %124 = vector.extract_strided_slice %0 {offsets = [3, 0], sizes = [1, 512], strides = [1, 1]} : vector<9x512xf32> to vector<1x512xf32>
    %125 = vector.broadcast %124 : vector<1x512xf32> to vector<16x512xf32>
    %126 = arith.mulf %123, %125 : vector<16x512xf32>
    %127 = arith.addf %119, %126 : vector<16x512xf32>
    %c4_71 = arith.constant 4 : index
    %c0_72 = arith.constant 0 : index
    %c0_73 = arith.constant 0 : index
    %128 = vector.load %arg8[%c4_71, %c0_72, %c0_73] : memref<9x16x16xf32, #tpu.memory_space<vmem>>, vector<1x16x16xf32>
    %129 = vector.shape_cast %128 : vector<1x16x16xf32> to vector<16x16xf32>
    %cst_74 = arith.constant dense<0.000000e+00> : vector<16x512xf32>
    %130 = tpu.matmul %129, %94, %cst_74 {dimension_numbers = #tpu.dot_dimension_numbers<[1], [0], [0], [1], [0, 0, 1, 1], [], []>} : vector<16x16xf32>, vector<16x512xf32>, vector<16x512xf32> -> vector<16x512xf32>
    %131 = arith.addf %127, %130 : vector<16x512xf32>
    %c511_i32_75 = arith.constant 511 : i32
    %132 = tpu.dynamic_rotate %94 by %c511_i32_75 dim 1 : vector<16x512xf32>, i32 -> vector<16x512xf32>
    %c5_76 = arith.constant 5 : index
    %c0_77 = arith.constant 0 : index
    %c0_78 = arith.constant 0 : index
    %133 = vector.load %arg8[%c5_76, %c0_77, %c0_78] : memref<9x16x16xf32, #tpu.memory_space<vmem>>, vector<1x16x16xf32>
    %134 = vector.shape_cast %133 : vector<1x16x16xf32> to vector<16x16xf32>
    %cst_79 = arith.constant dense<0.000000e+00> : vector<16x512xf32>
    %135 = tpu.matmul %134, %132, %cst_79 {dimension_numbers = #tpu.dot_dimension_numbers<[1], [0], [0], [1], [0, 0, 1, 1], [], []>} : vector<16x16xf32>, vector<16x512xf32>, vector<16x512xf32> -> vector<16x512xf32>
    %136 = vector.extract_strided_slice %0 {offsets = [5, 0], sizes = [1, 512], strides = [1, 1]} : vector<9x512xf32> to vector<1x512xf32>
    %137 = vector.broadcast %136 : vector<1x512xf32> to vector<16x512xf32>
    %138 = arith.mulf %135, %137 : vector<16x512xf32>
    %139 = arith.addf %131, %138 : vector<16x512xf32>
    %c497_i32_80 = arith.constant 497 : i32
    %140 = tpu.dynamic_rotate %94 by %c497_i32_80 dim 1 : vector<16x512xf32>, i32 -> vector<16x512xf32>
    %c6_81 = arith.constant 6 : index
    %c0_82 = arith.constant 0 : index
    %c0_83 = arith.constant 0 : index
    %141 = vector.load %arg8[%c6_81, %c0_82, %c0_83] : memref<9x16x16xf32, #tpu.memory_space<vmem>>, vector<1x16x16xf32>
    %142 = vector.shape_cast %141 : vector<1x16x16xf32> to vector<16x16xf32>
    %cst_84 = arith.constant dense<0.000000e+00> : vector<16x512xf32>
    %143 = tpu.matmul %142, %140, %cst_84 {dimension_numbers = #tpu.dot_dimension_numbers<[1], [0], [0], [1], [0, 0, 1, 1], [], []>} : vector<16x16xf32>, vector<16x512xf32>, vector<16x512xf32> -> vector<16x512xf32>
    %144 = vector.extract_strided_slice %0 {offsets = [6, 0], sizes = [1, 512], strides = [1, 1]} : vector<9x512xf32> to vector<1x512xf32>
    %145 = vector.broadcast %144 : vector<1x512xf32> to vector<16x512xf32>
    %146 = arith.mulf %143, %145 : vector<16x512xf32>
    %147 = arith.addf %139, %146 : vector<16x512xf32>
    %c496_i32_85 = arith.constant 496 : i32
    %148 = tpu.dynamic_rotate %94 by %c496_i32_85 dim 1 : vector<16x512xf32>, i32 -> vector<16x512xf32>
    %c7_86 = arith.constant 7 : index
    %c0_87 = arith.constant 0 : index
    %c0_88 = arith.constant 0 : index
    %149 = vector.load %arg8[%c7_86, %c0_87, %c0_88] : memref<9x16x16xf32, #tpu.memory_space<vmem>>, vector<1x16x16xf32>
    %150 = vector.shape_cast %149 : vector<1x16x16xf32> to vector<16x16xf32>
    %cst_89 = arith.constant dense<0.000000e+00> : vector<16x512xf32>
    %151 = tpu.matmul %150, %148, %cst_89 {dimension_numbers = #tpu.dot_dimension_numbers<[1], [0], [0], [1], [0, 0, 1, 1], [], []>} : vector<16x16xf32>, vector<16x512xf32>, vector<16x512xf32> -> vector<16x512xf32>
    %152 = vector.extract_strided_slice %0 {offsets = [7, 0], sizes = [1, 512], strides = [1, 1]} : vector<9x512xf32> to vector<1x512xf32>
    %153 = vector.broadcast %152 : vector<1x512xf32> to vector<16x512xf32>
    %154 = arith.mulf %151, %153 : vector<16x512xf32>
    %155 = arith.addf %147, %154 : vector<16x512xf32>
    %c495_i32_90 = arith.constant 495 : i32
    %156 = tpu.dynamic_rotate %94 by %c495_i32_90 dim 1 : vector<16x512xf32>, i32 -> vector<16x512xf32>
    %c8_91 = arith.constant 8 : index
    %c0_92 = arith.constant 0 : index
    %c0_93 = arith.constant 0 : index
    %157 = vector.load %arg8[%c8_91, %c0_92, %c0_93] : memref<9x16x16xf32, #tpu.memory_space<vmem>>, vector<1x16x16xf32>
    %158 = vector.shape_cast %157 : vector<1x16x16xf32> to vector<16x16xf32>
    %cst_94 = arith.constant dense<0.000000e+00> : vector<16x512xf32>
    %159 = tpu.matmul %158, %156, %cst_94 {dimension_numbers = #tpu.dot_dimension_numbers<[1], [0], [0], [1], [0, 0, 1, 1], [], []>} : vector<16x16xf32>, vector<16x512xf32>, vector<16x512xf32> -> vector<16x512xf32>
    %160 = vector.extract_strided_slice %0 {offsets = [8, 0], sizes = [1, 512], strides = [1, 1]} : vector<9x512xf32> to vector<1x512xf32>
    %161 = vector.broadcast %160 : vector<1x512xf32> to vector<16x512xf32>
    %162 = arith.mulf %159, %161 : vector<16x512xf32>
    %163 = arith.addf %155, %162 : vector<16x512xf32>
    %c0_95 = arith.constant 0 : index
    %c0_96 = arith.constant 0 : index
    %164 = vector.load %arg9[%c0_95, %c0_96] : memref<16x1xf32, #tpu.memory_space<vmem>>, vector<16x1xf32>
    %165 = vector.broadcast %164 : vector<16x1xf32> to vector<16x512xf32>
    %166 = arith.addf %163, %165 : vector<16x512xf32>
    %cst_97 = arith.constant 0.000000e+00 : f32
    %167 = vector.broadcast %cst_97 : f32 to vector<16x512xf32>
    %168 = arith.maximumf %166, %167 : vector<16x512xf32>
    %cst_98 = arith.constant 0.000000e+00 : f32
    %169 = vector.broadcast %cst_98 : f32 to vector<8x512xf32>
    %c17_i32_99 = arith.constant 17 : i32
    %170 = tpu.dynamic_rotate %168 by %c17_i32_99 dim 1 : vector<16x512xf32>, i32 -> vector<16x512xf32>
    %c0_100 = arith.constant 0 : index
    %c0_101 = arith.constant 0 : index
    %c0_102 = arith.constant 0 : index
    %171 = vector.load %arg10[%c0_100, %c0_101, %c0_102] : memref<9x8x16xf32, #tpu.memory_space<vmem>>, vector<1x8x16xf32>
    %172 = vector.shape_cast %171 : vector<1x8x16xf32> to vector<8x16xf32>
    %cst_103 = arith.constant dense<0.000000e+00> : vector<8x512xf32>
    %173 = tpu.matmul %172, %170, %cst_103 {dimension_numbers = #tpu.dot_dimension_numbers<[1], [0], [0], [1], [0, 0, 1, 1], [], []>} : vector<8x16xf32>, vector<16x512xf32>, vector<8x512xf32> -> vector<8x512xf32>
    %174 = vector.extract_strided_slice %0 {offsets = [0, 0], sizes = [1, 512], strides = [1, 1]} : vector<9x512xf32> to vector<1x512xf32>
    %175 = vector.broadcast %174 : vector<1x512xf32> to vector<8x512xf32>
    %176 = arith.mulf %173, %175 : vector<8x512xf32>
    %177 = arith.addf %169, %176 : vector<8x512xf32>
    %c16_i32_104 = arith.constant 16 : i32
    %178 = tpu.dynamic_rotate %168 by %c16_i32_104 dim 1 : vector<16x512xf32>, i32 -> vector<16x512xf32>
    %c1_105 = arith.constant 1 : index
    %c0_106 = arith.constant 0 : index
    %c0_107 = arith.constant 0 : index
    %179 = vector.load %arg10[%c1_105, %c0_106, %c0_107] : memref<9x8x16xf32, #tpu.memory_space<vmem>>, vector<1x8x16xf32>
    %180 = vector.shape_cast %179 : vector<1x8x16xf32> to vector<8x16xf32>
    %cst_108 = arith.constant dense<0.000000e+00> : vector<8x512xf32>
    %181 = tpu.matmul %180, %178, %cst_108 {dimension_numbers = #tpu.dot_dimension_numbers<[1], [0], [0], [1], [0, 0, 1, 1], [], []>} : vector<8x16xf32>, vector<16x512xf32>, vector<8x512xf32> -> vector<8x512xf32>
    %182 = vector.extract_strided_slice %0 {offsets = [1, 0], sizes = [1, 512], strides = [1, 1]} : vector<9x512xf32> to vector<1x512xf32>
    %183 = vector.broadcast %182 : vector<1x512xf32> to vector<8x512xf32>
    %184 = arith.mulf %181, %183 : vector<8x512xf32>
    %185 = arith.addf %177, %184 : vector<8x512xf32>
    %c15_i32_109 = arith.constant 15 : i32
    %186 = tpu.dynamic_rotate %168 by %c15_i32_109 dim 1 : vector<16x512xf32>, i32 -> vector<16x512xf32>
    %c2_110 = arith.constant 2 : index
    %c0_111 = arith.constant 0 : index
    %c0_112 = arith.constant 0 : index
    %187 = vector.load %arg10[%c2_110, %c0_111, %c0_112] : memref<9x8x16xf32, #tpu.memory_space<vmem>>, vector<1x8x16xf32>
    %188 = vector.shape_cast %187 : vector<1x8x16xf32> to vector<8x16xf32>
    %cst_113 = arith.constant dense<0.000000e+00> : vector<8x512xf32>
    %189 = tpu.matmul %188, %186, %cst_113 {dimension_numbers = #tpu.dot_dimension_numbers<[1], [0], [0], [1], [0, 0, 1, 1], [], []>} : vector<8x16xf32>, vector<16x512xf32>, vector<8x512xf32> -> vector<8x512xf32>
    %190 = vector.extract_strided_slice %0 {offsets = [2, 0], sizes = [1, 512], strides = [1, 1]} : vector<9x512xf32> to vector<1x512xf32>
    %191 = vector.broadcast %190 : vector<1x512xf32> to vector<8x512xf32>
    %192 = arith.mulf %189, %191 : vector<8x512xf32>
    %193 = arith.addf %185, %192 : vector<8x512xf32>
    %c1_i32_114 = arith.constant 1 : i32
    %194 = tpu.dynamic_rotate %168 by %c1_i32_114 dim 1 : vector<16x512xf32>, i32 -> vector<16x512xf32>
    %c3_115 = arith.constant 3 : index
    %c0_116 = arith.constant 0 : index
    %c0_117 = arith.constant 0 : index
    %195 = vector.load %arg10[%c3_115, %c0_116, %c0_117] : memref<9x8x16xf32, #tpu.memory_space<vmem>>, vector<1x8x16xf32>
    %196 = vector.shape_cast %195 : vector<1x8x16xf32> to vector<8x16xf32>
    %cst_118 = arith.constant dense<0.000000e+00> : vector<8x512xf32>
    %197 = tpu.matmul %196, %194, %cst_118 {dimension_numbers = #tpu.dot_dimension_numbers<[1], [0], [0], [1], [0, 0, 1, 1], [], []>} : vector<8x16xf32>, vector<16x512xf32>, vector<8x512xf32> -> vector<8x512xf32>
    %198 = vector.extract_strided_slice %0 {offsets = [3, 0], sizes = [1, 512], strides = [1, 1]} : vector<9x512xf32> to vector<1x512xf32>
    %199 = vector.broadcast %198 : vector<1x512xf32> to vector<8x512xf32>
    %200 = arith.mulf %197, %199 : vector<8x512xf32>
    %201 = arith.addf %193, %200 : vector<8x512xf32>
    %c4_119 = arith.constant 4 : index
    %c0_120 = arith.constant 0 : index
    %c0_121 = arith.constant 0 : index
    %202 = vector.load %arg10[%c4_119, %c0_120, %c0_121] : memref<9x8x16xf32, #tpu.memory_space<vmem>>, vector<1x8x16xf32>
    %203 = vector.shape_cast %202 : vector<1x8x16xf32> to vector<8x16xf32>
    %cst_122 = arith.constant dense<0.000000e+00> : vector<8x512xf32>
    %204 = tpu.matmul %203, %168, %cst_122 {dimension_numbers = #tpu.dot_dimension_numbers<[1], [0], [0], [1], [0, 0, 1, 1], [], []>} : vector<8x16xf32>, vector<16x512xf32>, vector<8x512xf32> -> vector<8x512xf32>
    %205 = arith.addf %201, %204 : vector<8x512xf32>
    %c511_i32_123 = arith.constant 511 : i32
    %206 = tpu.dynamic_rotate %168 by %c511_i32_123 dim 1 : vector<16x512xf32>, i32 -> vector<16x512xf32>
    %c5_124 = arith.constant 5 : index
    %c0_125 = arith.constant 0 : index
    %c0_126 = arith.constant 0 : index
    %207 = vector.load %arg10[%c5_124, %c0_125, %c0_126] : memref<9x8x16xf32, #tpu.memory_space<vmem>>, vector<1x8x16xf32>
    %208 = vector.shape_cast %207 : vector<1x8x16xf32> to vector<8x16xf32>
    %cst_127 = arith.constant dense<0.000000e+00> : vector<8x512xf32>
    %209 = tpu.matmul %208, %206, %cst_127 {dimension_numbers = #tpu.dot_dimension_numbers<[1], [0], [0], [1], [0, 0, 1, 1], [], []>} : vector<8x16xf32>, vector<16x512xf32>, vector<8x512xf32> -> vector<8x512xf32>
    %210 = vector.extract_strided_slice %0 {offsets = [5, 0], sizes = [1, 512], strides = [1, 1]} : vector<9x512xf32> to vector<1x512xf32>
    %211 = vector.broadcast %210 : vector<1x512xf32> to vector<8x512xf32>
    %212 = arith.mulf %209, %211 : vector<8x512xf32>
    %213 = arith.addf %205, %212 : vector<8x512xf32>
    %c497_i32_128 = arith.constant 497 : i32
    %214 = tpu.dynamic_rotate %168 by %c497_i32_128 dim 1 : vector<16x512xf32>, i32 -> vector<16x512xf32>
    %c6_129 = arith.constant 6 : index
    %c0_130 = arith.constant 0 : index
    %c0_131 = arith.constant 0 : index
    %215 = vector.load %arg10[%c6_129, %c0_130, %c0_131] : memref<9x8x16xf32, #tpu.memory_space<vmem>>, vector<1x8x16xf32>
    %216 = vector.shape_cast %215 : vector<1x8x16xf32> to vector<8x16xf32>
    %cst_132 = arith.constant dense<0.000000e+00> : vector<8x512xf32>
    %217 = tpu.matmul %216, %214, %cst_132 {dimension_numbers = #tpu.dot_dimension_numbers<[1], [0], [0], [1], [0, 0, 1, 1], [], []>} : vector<8x16xf32>, vector<16x512xf32>, vector<8x512xf32> -> vector<8x512xf32>
    %218 = vector.extract_strided_slice %0 {offsets = [6, 0], sizes = [1, 512], strides = [1, 1]} : vector<9x512xf32> to vector<1x512xf32>
    %219 = vector.broadcast %218 : vector<1x512xf32> to vector<8x512xf32>
    %220 = arith.mulf %217, %219 : vector<8x512xf32>
    %221 = arith.addf %213, %220 : vector<8x512xf32>
    %c496_i32_133 = arith.constant 496 : i32
    %222 = tpu.dynamic_rotate %168 by %c496_i32_133 dim 1 : vector<16x512xf32>, i32 -> vector<16x512xf32>
    %c7_134 = arith.constant 7 : index
    %c0_135 = arith.constant 0 : index
    %c0_136 = arith.constant 0 : index
    %223 = vector.load %arg10[%c7_134, %c0_135, %c0_136] : memref<9x8x16xf32, #tpu.memory_space<vmem>>, vector<1x8x16xf32>
    %224 = vector.shape_cast %223 : vector<1x8x16xf32> to vector<8x16xf32>
    %cst_137 = arith.constant dense<0.000000e+00> : vector<8x512xf32>
    %225 = tpu.matmul %224, %222, %cst_137 {dimension_numbers = #tpu.dot_dimension_numbers<[1], [0], [0], [1], [0, 0, 1, 1], [], []>} : vector<8x16xf32>, vector<16x512xf32>, vector<8x512xf32> -> vector<8x512xf32>
    %226 = vector.extract_strided_slice %0 {offsets = [7, 0], sizes = [1, 512], strides = [1, 1]} : vector<9x512xf32> to vector<1x512xf32>
    %227 = vector.broadcast %226 : vector<1x512xf32> to vector<8x512xf32>
    %228 = arith.mulf %225, %227 : vector<8x512xf32>
    %229 = arith.addf %221, %228 : vector<8x512xf32>
    %c495_i32_138 = arith.constant 495 : i32
    %230 = tpu.dynamic_rotate %168 by %c495_i32_138 dim 1 : vector<16x512xf32>, i32 -> vector<16x512xf32>
    %c8_139 = arith.constant 8 : index
    %c0_140 = arith.constant 0 : index
    %c0_141 = arith.constant 0 : index
    %231 = vector.load %arg10[%c8_139, %c0_140, %c0_141] : memref<9x8x16xf32, #tpu.memory_space<vmem>>, vector<1x8x16xf32>
    %232 = vector.shape_cast %231 : vector<1x8x16xf32> to vector<8x16xf32>
    %cst_142 = arith.constant dense<0.000000e+00> : vector<8x512xf32>
    %233 = tpu.matmul %232, %230, %cst_142 {dimension_numbers = #tpu.dot_dimension_numbers<[1], [0], [0], [1], [0, 0, 1, 1], [], []>} : vector<8x16xf32>, vector<16x512xf32>, vector<8x512xf32> -> vector<8x512xf32>
    %234 = vector.extract_strided_slice %0 {offsets = [8, 0], sizes = [1, 512], strides = [1, 1]} : vector<9x512xf32> to vector<1x512xf32>
    %235 = vector.broadcast %234 : vector<1x512xf32> to vector<8x512xf32>
    %236 = arith.mulf %233, %235 : vector<8x512xf32>
    %237 = arith.addf %229, %236 : vector<8x512xf32>
    %c0_143 = arith.constant 0 : index
    %c0_144 = arith.constant 0 : index
    %238 = vector.load %arg11[%c0_143, %c0_144] : memref<8x1xf32, #tpu.memory_space<vmem>>, vector<8x1xf32>
    %239 = vector.broadcast %238 : vector<8x1xf32> to vector<8x512xf32>
    %240 = arith.addf %237, %239 : vector<8x512xf32>
    %241 = arith.negf %240 : vector<8x512xf32>
    %242 = math.exp %241 : vector<8x512xf32>
    %cst_145 = arith.constant 1.000000e+00 : f32
    %243 = vector.broadcast %cst_145 : f32 to vector<8x512xf32>
    %244 = arith.addf %243, %242 : vector<8x512xf32>
    %245 = arith.divf %243, %244 : vector<8x512xf32>
    %cst_146 = arith.constant 0.000000e+00 : f32
    %246 = vector.broadcast %cst_146 : f32 to vector<8x512xf32>
    %c17_i32_147 = arith.constant 17 : i32
    %247 = tpu.dynamic_rotate %245 by %c17_i32_147 dim 1 : vector<8x512xf32>, i32 -> vector<8x512xf32>
    %c0_148 = arith.constant 0 : index
    %c0_149 = arith.constant 0 : index
    %c0_150 = arith.constant 0 : index
    %248 = vector.load %arg12[%c0_148, %c0_149, %c0_150] : memref<9x8x8xf32, #tpu.memory_space<vmem>>, vector<1x8x8xf32>
    %249 = vector.shape_cast %248 : vector<1x8x8xf32> to vector<8x8xf32>
    %cst_151 = arith.constant dense<0.000000e+00> : vector<8x512xf32>
    %250 = tpu.matmul %249, %247, %cst_151 {dimension_numbers = #tpu.dot_dimension_numbers<[1], [0], [0], [1], [0, 0, 1, 1], [], []>} : vector<8x8xf32>, vector<8x512xf32>, vector<8x512xf32> -> vector<8x512xf32>
    %251 = vector.extract_strided_slice %0 {offsets = [0, 0], sizes = [1, 512], strides = [1, 1]} : vector<9x512xf32> to vector<1x512xf32>
    %252 = vector.broadcast %251 : vector<1x512xf32> to vector<8x512xf32>
    %253 = arith.mulf %250, %252 : vector<8x512xf32>
    %254 = arith.addf %246, %253 : vector<8x512xf32>
    %c16_i32_152 = arith.constant 16 : i32
    %255 = tpu.dynamic_rotate %245 by %c16_i32_152 dim 1 : vector<8x512xf32>, i32 -> vector<8x512xf32>
    %c1_153 = arith.constant 1 : index
    %c0_154 = arith.constant 0 : index
    %c0_155 = arith.constant 0 : index
    %256 = vector.load %arg12[%c1_153, %c0_154, %c0_155] : memref<9x8x8xf32, #tpu.memory_space<vmem>>, vector<1x8x8xf32>
    %257 = vector.shape_cast %256 : vector<1x8x8xf32> to vector<8x8xf32>
    %cst_156 = arith.constant dense<0.000000e+00> : vector<8x512xf32>
    %258 = tpu.matmul %257, %255, %cst_156 {dimension_numbers = #tpu.dot_dimension_numbers<[1], [0], [0], [1], [0, 0, 1, 1], [], []>} : vector<8x8xf32>, vector<8x512xf32>, vector<8x512xf32> -> vector<8x512xf32>
    %259 = vector.extract_strided_slice %0 {offsets = [1, 0], sizes = [1, 512], strides = [1, 1]} : vector<9x512xf32> to vector<1x512xf32>
    %260 = vector.broadcast %259 : vector<1x512xf32> to vector<8x512xf32>
    %261 = arith.mulf %258, %260 : vector<8x512xf32>
    %262 = arith.addf %254, %261 : vector<8x512xf32>
    %c15_i32_157 = arith.constant 15 : i32
    %263 = tpu.dynamic_rotate %245 by %c15_i32_157 dim 1 : vector<8x512xf32>, i32 -> vector<8x512xf32>
    %c2_158 = arith.constant 2 : index
    %c0_159 = arith.constant 0 : index
    %c0_160 = arith.constant 0 : index
    %264 = vector.load %arg12[%c2_158, %c0_159, %c0_160] : memref<9x8x8xf32, #tpu.memory_space<vmem>>, vector<1x8x8xf32>
    %265 = vector.shape_cast %264 : vector<1x8x8xf32> to vector<8x8xf32>
    %cst_161 = arith.constant dense<0.000000e+00> : vector<8x512xf32>
    %266 = tpu.matmul %265, %263, %cst_161 {dimension_numbers = #tpu.dot_dimension_numbers<[1], [0], [0], [1], [0, 0, 1, 1], [], []>} : vector<8x8xf32>, vector<8x512xf32>, vector<8x512xf32> -> vector<8x512xf32>
    %267 = vector.extract_strided_slice %0 {offsets = [2, 0], sizes = [1, 512], strides = [1, 1]} : vector<9x512xf32> to vector<1x512xf32>
    %268 = vector.broadcast %267 : vector<1x512xf32> to vector<8x512xf32>
    %269 = arith.mulf %266, %268 : vector<8x512xf32>
    %270 = arith.addf %262, %269 : vector<8x512xf32>
    %c1_i32_162 = arith.constant 1 : i32
    %271 = tpu.dynamic_rotate %245 by %c1_i32_162 dim 1 : vector<8x512xf32>, i32 -> vector<8x512xf32>
    %c3_163 = arith.constant 3 : index
    %c0_164 = arith.constant 0 : index
    %c0_165 = arith.constant 0 : index
    %272 = vector.load %arg12[%c3_163, %c0_164, %c0_165] : memref<9x8x8xf32, #tpu.memory_space<vmem>>, vector<1x8x8xf32>
    %273 = vector.shape_cast %272 : vector<1x8x8xf32> to vector<8x8xf32>
    %cst_166 = arith.constant dense<0.000000e+00> : vector<8x512xf32>
    %274 = tpu.matmul %273, %271, %cst_166 {dimension_numbers = #tpu.dot_dimension_numbers<[1], [0], [0], [1], [0, 0, 1, 1], [], []>} : vector<8x8xf32>, vector<8x512xf32>, vector<8x512xf32> -> vector<8x512xf32>
    %275 = vector.extract_strided_slice %0 {offsets = [3, 0], sizes = [1, 512], strides = [1, 1]} : vector<9x512xf32> to vector<1x512xf32>
    %276 = vector.broadcast %275 : vector<1x512xf32> to vector<8x512xf32>
    %277 = arith.mulf %274, %276 : vector<8x512xf32>
    %278 = arith.addf %270, %277 : vector<8x512xf32>
    %c4_167 = arith.constant 4 : index
    %c0_168 = arith.constant 0 : index
    %c0_169 = arith.constant 0 : index
    %279 = vector.load %arg12[%c4_167, %c0_168, %c0_169] : memref<9x8x8xf32, #tpu.memory_space<vmem>>, vector<1x8x8xf32>
    %280 = vector.shape_cast %279 : vector<1x8x8xf32> to vector<8x8xf32>
    %cst_170 = arith.constant dense<0.000000e+00> : vector<8x512xf32>
    %281 = tpu.matmul %280, %245, %cst_170 {dimension_numbers = #tpu.dot_dimension_numbers<[1], [0], [0], [1], [0, 0, 1, 1], [], []>} : vector<8x8xf32>, vector<8x512xf32>, vector<8x512xf32> -> vector<8x512xf32>
    %282 = arith.addf %278, %281 : vector<8x512xf32>
    %c511_i32_171 = arith.constant 511 : i32
    %283 = tpu.dynamic_rotate %245 by %c511_i32_171 dim 1 : vector<8x512xf32>, i32 -> vector<8x512xf32>
    %c5_172 = arith.constant 5 : index
    %c0_173 = arith.constant 0 : index
    %c0_174 = arith.constant 0 : index
    %284 = vector.load %arg12[%c5_172, %c0_173, %c0_174] : memref<9x8x8xf32, #tpu.memory_space<vmem>>, vector<1x8x8xf32>
    %285 = vector.shape_cast %284 : vector<1x8x8xf32> to vector<8x8xf32>
    %cst_175 = arith.constant dense<0.000000e+00> : vector<8x512xf32>
    %286 = tpu.matmul %285, %283, %cst_175 {dimension_numbers = #tpu.dot_dimension_numbers<[1], [0], [0], [1], [0, 0, 1, 1], [], []>} : vector<8x8xf32>, vector<8x512xf32>, vector<8x512xf32> -> vector<8x512xf32>
    %287 = vector.extract_strided_slice %0 {offsets = [5, 0], sizes = [1, 512], strides = [1, 1]} : vector<9x512xf32> to vector<1x512xf32>
    %288 = vector.broadcast %287 : vector<1x512xf32> to vector<8x512xf32>
    %289 = arith.mulf %286, %288 : vector<8x512xf32>
    %290 = arith.addf %282, %289 : vector<8x512xf32>
    %c497_i32_176 = arith.constant 497 : i32
    %291 = tpu.dynamic_rotate %245 by %c497_i32_176 dim 1 : vector<8x512xf32>, i32 -> vector<8x512xf32>
    %c6_177 = arith.constant 6 : index
    %c0_178 = arith.constant 0 : index
    %c0_179 = arith.constant 0 : index
    %292 = vector.load %arg12[%c6_177, %c0_178, %c0_179] : memref<9x8x8xf32, #tpu.memory_space<vmem>>, vector<1x8x8xf32>
    %293 = vector.shape_cast %292 : vector<1x8x8xf32> to vector<8x8xf32>
    %cst_180 = arith.constant dense<0.000000e+00> : vector<8x512xf32>
    %294 = tpu.matmul %293, %291, %cst_180 {dimension_numbers = #tpu.dot_dimension_numbers<[1], [0], [0], [1], [0, 0, 1, 1], [], []>} : vector<8x8xf32>, vector<8x512xf32>, vector<8x512xf32> -> vector<8x512xf32>
    %295 = vector.extract_strided_slice %0 {offsets = [6, 0], sizes = [1, 512], strides = [1, 1]} : vector<9x512xf32> to vector<1x512xf32>
    %296 = vector.broadcast %295 : vector<1x512xf32> to vector<8x512xf32>
    %297 = arith.mulf %294, %296 : vector<8x512xf32>
    %298 = arith.addf %290, %297 : vector<8x512xf32>
    %c496_i32_181 = arith.constant 496 : i32
    %299 = tpu.dynamic_rotate %245 by %c496_i32_181 dim 1 : vector<8x512xf32>, i32 -> vector<8x512xf32>
    %c7_182 = arith.constant 7 : index
    %c0_183 = arith.constant 0 : index
    %c0_184 = arith.constant 0 : index
    %300 = vector.load %arg12[%c7_182, %c0_183, %c0_184] : memref<9x8x8xf32, #tpu.memory_space<vmem>>, vector<1x8x8xf32>
    %301 = vector.shape_cast %300 : vector<1x8x8xf32> to vector<8x8xf32>
    %cst_185 = arith.constant dense<0.000000e+00> : vector<8x512xf32>
    %302 = tpu.matmul %301, %299, %cst_185 {dimension_numbers = #tpu.dot_dimension_numbers<[1], [0], [0], [1], [0, 0, 1, 1], [], []>} : vector<8x8xf32>, vector<8x512xf32>, vector<8x512xf32> -> vector<8x512xf32>
    %303 = vector.extract_strided_slice %0 {offsets = [7, 0], sizes = [1, 512], strides = [1, 1]} : vector<9x512xf32> to vector<1x512xf32>
    %304 = vector.broadcast %303 : vector<1x512xf32> to vector<8x512xf32>
    %305 = arith.mulf %302, %304 : vector<8x512xf32>
    %306 = arith.addf %298, %305 : vector<8x512xf32>
    %c495_i32_186 = arith.constant 495 : i32
    %307 = tpu.dynamic_rotate %245 by %c495_i32_186 dim 1 : vector<8x512xf32>, i32 -> vector<8x512xf32>
    %c8_187 = arith.constant 8 : index
    %c0_188 = arith.constant 0 : index
    %c0_189 = arith.constant 0 : index
    %308 = vector.load %arg12[%c8_187, %c0_188, %c0_189] : memref<9x8x8xf32, #tpu.memory_space<vmem>>, vector<1x8x8xf32>
    %309 = vector.shape_cast %308 : vector<1x8x8xf32> to vector<8x8xf32>
    %cst_190 = arith.constant dense<0.000000e+00> : vector<8x512xf32>
    %310 = tpu.matmul %309, %307, %cst_190 {dimension_numbers = #tpu.dot_dimension_numbers<[1], [0], [0], [1], [0, 0, 1, 1], [], []>} : vector<8x8xf32>, vector<8x512xf32>, vector<8x512xf32> -> vector<8x512xf32>
    %311 = vector.extract_strided_slice %0 {offsets = [8, 0], sizes = [1, 512], strides = [1, 1]} : vector<9x512xf32> to vector<1x512xf32>
    %312 = vector.broadcast %311 : vector<1x512xf32> to vector<8x512xf32>
    %313 = arith.mulf %310, %312 : vector<8x512xf32>
    %314 = arith.addf %306, %313 : vector<8x512xf32>
    %c0_191 = arith.constant 0 : index
    %c0_192 = arith.constant 0 : index
    %315 = vector.load %arg13[%c0_191, %c0_192] : memref<8x1xf32, #tpu.memory_space<vmem>>, vector<8x1xf32>
    %316 = vector.broadcast %315 : vector<8x1xf32> to vector<8x512xf32>
    %317 = arith.addf %314, %316 : vector<8x512xf32>
    %cst_193 = arith.constant 0.000000e+00 : f32
    %318 = vector.broadcast %cst_193 : f32 to vector<8x512xf32>
    %319 = arith.maximumf %317, %318 : vector<8x512xf32>
    %cst_194 = arith.constant 0.000000e+00 : f32
    %320 = vector.broadcast %cst_194 : f32 to vector<8x512xf32>
    %c17_i32_195 = arith.constant 17 : i32
    %321 = tpu.dynamic_rotate %319 by %c17_i32_195 dim 1 : vector<8x512xf32>, i32 -> vector<8x512xf32>
    %c0_196 = arith.constant 0 : index
    %c0_197 = arith.constant 0 : index
    %c0_198 = arith.constant 0 : index
    %322 = vector.load %arg14[%c0_196, %c0_197, %c0_198] : memref<9x8x8xf32, #tpu.memory_space<vmem>>, vector<1x8x8xf32>
    %323 = vector.shape_cast %322 : vector<1x8x8xf32> to vector<8x8xf32>
    %cst_199 = arith.constant dense<0.000000e+00> : vector<8x512xf32>
    %324 = tpu.matmul %323, %321, %cst_199 {dimension_numbers = #tpu.dot_dimension_numbers<[1], [0], [0], [1], [0, 0, 1, 1], [], []>} : vector<8x8xf32>, vector<8x512xf32>, vector<8x512xf32> -> vector<8x512xf32>
    %325 = vector.extract_strided_slice %0 {offsets = [0, 0], sizes = [1, 512], strides = [1, 1]} : vector<9x512xf32> to vector<1x512xf32>
    %326 = vector.broadcast %325 : vector<1x512xf32> to vector<8x512xf32>
    %327 = arith.mulf %324, %326 : vector<8x512xf32>
    %328 = arith.addf %320, %327 : vector<8x512xf32>
    %c16_i32_200 = arith.constant 16 : i32
    %329 = tpu.dynamic_rotate %319 by %c16_i32_200 dim 1 : vector<8x512xf32>, i32 -> vector<8x512xf32>
    %c1_201 = arith.constant 1 : index
    %c0_202 = arith.constant 0 : index
    %c0_203 = arith.constant 0 : index
    %330 = vector.load %arg14[%c1_201, %c0_202, %c0_203] : memref<9x8x8xf32, #tpu.memory_space<vmem>>, vector<1x8x8xf32>
    %331 = vector.shape_cast %330 : vector<1x8x8xf32> to vector<8x8xf32>
    %cst_204 = arith.constant dense<0.000000e+00> : vector<8x512xf32>
    %332 = tpu.matmul %331, %329, %cst_204 {dimension_numbers = #tpu.dot_dimension_numbers<[1], [0], [0], [1], [0, 0, 1, 1], [], []>} : vector<8x8xf32>, vector<8x512xf32>, vector<8x512xf32> -> vector<8x512xf32>
    %333 = vector.extract_strided_slice %0 {offsets = [1, 0], sizes = [1, 512], strides = [1, 1]} : vector<9x512xf32> to vector<1x512xf32>
    %334 = vector.broadcast %333 : vector<1x512xf32> to vector<8x512xf32>
    %335 = arith.mulf %332, %334 : vector<8x512xf32>
    %336 = arith.addf %328, %335 : vector<8x512xf32>
    %c15_i32_205 = arith.constant 15 : i32
    %337 = tpu.dynamic_rotate %319 by %c15_i32_205 dim 1 : vector<8x512xf32>, i32 -> vector<8x512xf32>
    %c2_206 = arith.constant 2 : index
    %c0_207 = arith.constant 0 : index
    %c0_208 = arith.constant 0 : index
    %338 = vector.load %arg14[%c2_206, %c0_207, %c0_208] : memref<9x8x8xf32, #tpu.memory_space<vmem>>, vector<1x8x8xf32>
    %339 = vector.shape_cast %338 : vector<1x8x8xf32> to vector<8x8xf32>
    %cst_209 = arith.constant dense<0.000000e+00> : vector<8x512xf32>
    %340 = tpu.matmul %339, %337, %cst_209 {dimension_numbers = #tpu.dot_dimension_numbers<[1], [0], [0], [1], [0, 0, 1, 1], [], []>} : vector<8x8xf32>, vector<8x512xf32>, vector<8x512xf32> -> vector<8x512xf32>
    %341 = vector.extract_strided_slice %0 {offsets = [2, 0], sizes = [1, 512], strides = [1, 1]} : vector<9x512xf32> to vector<1x512xf32>
    %342 = vector.broadcast %341 : vector<1x512xf32> to vector<8x512xf32>
    %343 = arith.mulf %340, %342 : vector<8x512xf32>
    %344 = arith.addf %336, %343 : vector<8x512xf32>
    %c1_i32_210 = arith.constant 1 : i32
    %345 = tpu.dynamic_rotate %319 by %c1_i32_210 dim 1 : vector<8x512xf32>, i32 -> vector<8x512xf32>
    %c3_211 = arith.constant 3 : index
    %c0_212 = arith.constant 0 : index
    %c0_213 = arith.constant 0 : index
    %346 = vector.load %arg14[%c3_211, %c0_212, %c0_213] : memref<9x8x8xf32, #tpu.memory_space<vmem>>, vector<1x8x8xf32>
    %347 = vector.shape_cast %346 : vector<1x8x8xf32> to vector<8x8xf32>
    %cst_214 = arith.constant dense<0.000000e+00> : vector<8x512xf32>
    %348 = tpu.matmul %347, %345, %cst_214 {dimension_numbers = #tpu.dot_dimension_numbers<[1], [0], [0], [1], [0, 0, 1, 1], [], []>} : vector<8x8xf32>, vector<8x512xf32>, vector<8x512xf32> -> vector<8x512xf32>
    %349 = vector.extract_strided_slice %0 {offsets = [3, 0], sizes = [1, 512], strides = [1, 1]} : vector<9x512xf32> to vector<1x512xf32>
    %350 = vector.broadcast %349 : vector<1x512xf32> to vector<8x512xf32>
    %351 = arith.mulf %348, %350 : vector<8x512xf32>
    %352 = arith.addf %344, %351 : vector<8x512xf32>
    %c4_215 = arith.constant 4 : index
    %c0_216 = arith.constant 0 : index
    %c0_217 = arith.constant 0 : index
    %353 = vector.load %arg14[%c4_215, %c0_216, %c0_217] : memref<9x8x8xf32, #tpu.memory_space<vmem>>, vector<1x8x8xf32>
    %354 = vector.shape_cast %353 : vector<1x8x8xf32> to vector<8x8xf32>
    %cst_218 = arith.constant dense<0.000000e+00> : vector<8x512xf32>
    %355 = tpu.matmul %354, %319, %cst_218 {dimension_numbers = #tpu.dot_dimension_numbers<[1], [0], [0], [1], [0, 0, 1, 1], [], []>} : vector<8x8xf32>, vector<8x512xf32>, vector<8x512xf32> -> vector<8x512xf32>
    %356 = arith.addf %352, %355 : vector<8x512xf32>
    %c511_i32_219 = arith.constant 511 : i32
    %357 = tpu.dynamic_rotate %319 by %c511_i32_219 dim 1 : vector<8x512xf32>, i32 -> vector<8x512xf32>
    %c5_220 = arith.constant 5 : index
    %c0_221 = arith.constant 0 : index
    %c0_222 = arith.constant 0 : index
    %358 = vector.load %arg14[%c5_220, %c0_221, %c0_222] : memref<9x8x8xf32, #tpu.memory_space<vmem>>, vector<1x8x8xf32>
    %359 = vector.shape_cast %358 : vector<1x8x8xf32> to vector<8x8xf32>
    %cst_223 = arith.constant dense<0.000000e+00> : vector<8x512xf32>
    %360 = tpu.matmul %359, %357, %cst_223 {dimension_numbers = #tpu.dot_dimension_numbers<[1], [0], [0], [1], [0, 0, 1, 1], [], []>} : vector<8x8xf32>, vector<8x512xf32>, vector<8x512xf32> -> vector<8x512xf32>
    %361 = vector.extract_strided_slice %0 {offsets = [5, 0], sizes = [1, 512], strides = [1, 1]} : vector<9x512xf32> to vector<1x512xf32>
    %362 = vector.broadcast %361 : vector<1x512xf32> to vector<8x512xf32>
    %363 = arith.mulf %360, %362 : vector<8x512xf32>
    %364 = arith.addf %356, %363 : vector<8x512xf32>
    %c497_i32_224 = arith.constant 497 : i32
    %365 = tpu.dynamic_rotate %319 by %c497_i32_224 dim 1 : vector<8x512xf32>, i32 -> vector<8x512xf32>
    %c6_225 = arith.constant 6 : index
    %c0_226 = arith.constant 0 : index
    %c0_227 = arith.constant 0 : index
    %366 = vector.load %arg14[%c6_225, %c0_226, %c0_227] : memref<9x8x8xf32, #tpu.memory_space<vmem>>, vector<1x8x8xf32>
    %367 = vector.shape_cast %366 : vector<1x8x8xf32> to vector<8x8xf32>
    %cst_228 = arith.constant dense<0.000000e+00> : vector<8x512xf32>
    %368 = tpu.matmul %367, %365, %cst_228 {dimension_numbers = #tpu.dot_dimension_numbers<[1], [0], [0], [1], [0, 0, 1, 1], [], []>} : vector<8x8xf32>, vector<8x512xf32>, vector<8x512xf32> -> vector<8x512xf32>
    %369 = vector.extract_strided_slice %0 {offsets = [6, 0], sizes = [1, 512], strides = [1, 1]} : vector<9x512xf32> to vector<1x512xf32>
    %370 = vector.broadcast %369 : vector<1x512xf32> to vector<8x512xf32>
    %371 = arith.mulf %368, %370 : vector<8x512xf32>
    %372 = arith.addf %364, %371 : vector<8x512xf32>
    %c496_i32_229 = arith.constant 496 : i32
    %373 = tpu.dynamic_rotate %319 by %c496_i32_229 dim 1 : vector<8x512xf32>, i32 -> vector<8x512xf32>
    %c7_230 = arith.constant 7 : index
    %c0_231 = arith.constant 0 : index
    %c0_232 = arith.constant 0 : index
    %374 = vector.load %arg14[%c7_230, %c0_231, %c0_232] : memref<9x8x8xf32, #tpu.memory_space<vmem>>, vector<1x8x8xf32>
    %375 = vector.shape_cast %374 : vector<1x8x8xf32> to vector<8x8xf32>
    %cst_233 = arith.constant dense<0.000000e+00> : vector<8x512xf32>
    %376 = tpu.matmul %375, %373, %cst_233 {dimension_numbers = #tpu.dot_dimension_numbers<[1], [0], [0], [1], [0, 0, 1, 1], [], []>} : vector<8x8xf32>, vector<8x512xf32>, vector<8x512xf32> -> vector<8x512xf32>
    %377 = vector.extract_strided_slice %0 {offsets = [7, 0], sizes = [1, 512], strides = [1, 1]} : vector<9x512xf32> to vector<1x512xf32>
    %378 = vector.broadcast %377 : vector<1x512xf32> to vector<8x512xf32>
    %379 = arith.mulf %376, %378 : vector<8x512xf32>
    %380 = arith.addf %372, %379 : vector<8x512xf32>
    %c495_i32_234 = arith.constant 495 : i32
    %381 = tpu.dynamic_rotate %319 by %c495_i32_234 dim 1 : vector<8x512xf32>, i32 -> vector<8x512xf32>
    %c8_235 = arith.constant 8 : index
    %c0_236 = arith.constant 0 : index
    %c0_237 = arith.constant 0 : index
    %382 = vector.load %arg14[%c8_235, %c0_236, %c0_237] : memref<9x8x8xf32, #tpu.memory_space<vmem>>, vector<1x8x8xf32>
    %383 = vector.shape_cast %382 : vector<1x8x8xf32> to vector<8x8xf32>
    %cst_238 = arith.constant dense<0.000000e+00> : vector<8x512xf32>
    %384 = tpu.matmul %383, %381, %cst_238 {dimension_numbers = #tpu.dot_dimension_numbers<[1], [0], [0], [1], [0, 0, 1, 1], [], []>} : vector<8x8xf32>, vector<8x512xf32>, vector<8x512xf32> -> vector<8x512xf32>
    %385 = vector.extract_strided_slice %0 {offsets = [8, 0], sizes = [1, 512], strides = [1, 1]} : vector<9x512xf32> to vector<1x512xf32>
    %386 = vector.broadcast %385 : vector<1x512xf32> to vector<8x512xf32>
    %387 = arith.mulf %384, %386 : vector<8x512xf32>
    %388 = arith.addf %380, %387 : vector<8x512xf32>
    %c0_239 = arith.constant 0 : index
    %c0_240 = arith.constant 0 : index
    %389 = vector.load %arg15[%c0_239, %c0_240] : memref<8x1xf32, #tpu.memory_space<vmem>>, vector<8x1xf32>
    %390 = vector.broadcast %389 : vector<8x1xf32> to vector<8x512xf32>
    %391 = arith.addf %388, %390 : vector<8x512xf32>
    %cst_241 = arith.constant 0.000000e+00 : f32
    %392 = vector.broadcast %cst_241 : f32 to vector<8x512xf32>
    %393 = arith.maximumf %391, %392 : vector<8x512xf32>
    %cst_242 = arith.constant 0.000000e+00 : f32
    %394 = vector.broadcast %cst_242 : f32 to vector<8x512xf32>
    %c17_i32_243 = arith.constant 17 : i32
    %395 = tpu.dynamic_rotate %393 by %c17_i32_243 dim 1 : vector<8x512xf32>, i32 -> vector<8x512xf32>
    %c0_244 = arith.constant 0 : index
    %c0_245 = arith.constant 0 : index
    %c0_246 = arith.constant 0 : index
    %396 = vector.load %arg16[%c0_244, %c0_245, %c0_246] : memref<9x8x8xf32, #tpu.memory_space<vmem>>, vector<1x8x8xf32>
    %397 = vector.shape_cast %396 : vector<1x8x8xf32> to vector<8x8xf32>
    %cst_247 = arith.constant dense<0.000000e+00> : vector<8x512xf32>
    %398 = tpu.matmul %397, %395, %cst_247 {dimension_numbers = #tpu.dot_dimension_numbers<[1], [0], [0], [1], [0, 0, 1, 1], [], []>} : vector<8x8xf32>, vector<8x512xf32>, vector<8x512xf32> -> vector<8x512xf32>
    %399 = vector.extract_strided_slice %0 {offsets = [0, 0], sizes = [1, 512], strides = [1, 1]} : vector<9x512xf32> to vector<1x512xf32>
    %400 = vector.broadcast %399 : vector<1x512xf32> to vector<8x512xf32>
    %401 = arith.mulf %398, %400 : vector<8x512xf32>
    %402 = arith.addf %394, %401 : vector<8x512xf32>
    %c16_i32_248 = arith.constant 16 : i32
    %403 = tpu.dynamic_rotate %393 by %c16_i32_248 dim 1 : vector<8x512xf32>, i32 -> vector<8x512xf32>
    %c1_249 = arith.constant 1 : index
    %c0_250 = arith.constant 0 : index
    %c0_251 = arith.constant 0 : index
    %404 = vector.load %arg16[%c1_249, %c0_250, %c0_251] : memref<9x8x8xf32, #tpu.memory_space<vmem>>, vector<1x8x8xf32>
    %405 = vector.shape_cast %404 : vector<1x8x8xf32> to vector<8x8xf32>
    %cst_252 = arith.constant dense<0.000000e+00> : vector<8x512xf32>
    %406 = tpu.matmul %405, %403, %cst_252 {dimension_numbers = #tpu.dot_dimension_numbers<[1], [0], [0], [1], [0, 0, 1, 1], [], []>} : vector<8x8xf32>, vector<8x512xf32>, vector<8x512xf32> -> vector<8x512xf32>
    %407 = vector.extract_strided_slice %0 {offsets = [1, 0], sizes = [1, 512], strides = [1, 1]} : vector<9x512xf32> to vector<1x512xf32>
    %408 = vector.broadcast %407 : vector<1x512xf32> to vector<8x512xf32>
    %409 = arith.mulf %406, %408 : vector<8x512xf32>
    %410 = arith.addf %402, %409 : vector<8x512xf32>
    %c15_i32_253 = arith.constant 15 : i32
    %411 = tpu.dynamic_rotate %393 by %c15_i32_253 dim 1 : vector<8x512xf32>, i32 -> vector<8x512xf32>
    %c2_254 = arith.constant 2 : index
    %c0_255 = arith.constant 0 : index
    %c0_256 = arith.constant 0 : index
    %412 = vector.load %arg16[%c2_254, %c0_255, %c0_256] : memref<9x8x8xf32, #tpu.memory_space<vmem>>, vector<1x8x8xf32>
    %413 = vector.shape_cast %412 : vector<1x8x8xf32> to vector<8x8xf32>
    %cst_257 = arith.constant dense<0.000000e+00> : vector<8x512xf32>
    %414 = tpu.matmul %413, %411, %cst_257 {dimension_numbers = #tpu.dot_dimension_numbers<[1], [0], [0], [1], [0, 0, 1, 1], [], []>} : vector<8x8xf32>, vector<8x512xf32>, vector<8x512xf32> -> vector<8x512xf32>
    %415 = vector.extract_strided_slice %0 {offsets = [2, 0], sizes = [1, 512], strides = [1, 1]} : vector<9x512xf32> to vector<1x512xf32>
    %416 = vector.broadcast %415 : vector<1x512xf32> to vector<8x512xf32>
    %417 = arith.mulf %414, %416 : vector<8x512xf32>
    %418 = arith.addf %410, %417 : vector<8x512xf32>
    %c1_i32_258 = arith.constant 1 : i32
    %419 = tpu.dynamic_rotate %393 by %c1_i32_258 dim 1 : vector<8x512xf32>, i32 -> vector<8x512xf32>
    %c3_259 = arith.constant 3 : index
    %c0_260 = arith.constant 0 : index
    %c0_261 = arith.constant 0 : index
    %420 = vector.load %arg16[%c3_259, %c0_260, %c0_261] : memref<9x8x8xf32, #tpu.memory_space<vmem>>, vector<1x8x8xf32>
    %421 = vector.shape_cast %420 : vector<1x8x8xf32> to vector<8x8xf32>
    %cst_262 = arith.constant dense<0.000000e+00> : vector<8x512xf32>
    %422 = tpu.matmul %421, %419, %cst_262 {dimension_numbers = #tpu.dot_dimension_numbers<[1], [0], [0], [1], [0, 0, 1, 1], [], []>} : vector<8x8xf32>, vector<8x512xf32>, vector<8x512xf32> -> vector<8x512xf32>
    %423 = vector.extract_strided_slice %0 {offsets = [3, 0], sizes = [1, 512], strides = [1, 1]} : vector<9x512xf32> to vector<1x512xf32>
    %424 = vector.broadcast %423 : vector<1x512xf32> to vector<8x512xf32>
    %425 = arith.mulf %422, %424 : vector<8x512xf32>
    %426 = arith.addf %418, %425 : vector<8x512xf32>
    %c4_263 = arith.constant 4 : index
    %c0_264 = arith.constant 0 : index
    %c0_265 = arith.constant 0 : index
    %427 = vector.load %arg16[%c4_263, %c0_264, %c0_265] : memref<9x8x8xf32, #tpu.memory_space<vmem>>, vector<1x8x8xf32>
    %428 = vector.shape_cast %427 : vector<1x8x8xf32> to vector<8x8xf32>
    %cst_266 = arith.constant dense<0.000000e+00> : vector<8x512xf32>
    %429 = tpu.matmul %428, %393, %cst_266 {dimension_numbers = #tpu.dot_dimension_numbers<[1], [0], [0], [1], [0, 0, 1, 1], [], []>} : vector<8x8xf32>, vector<8x512xf32>, vector<8x512xf32> -> vector<8x512xf32>
    %430 = arith.addf %426, %429 : vector<8x512xf32>
    %c511_i32_267 = arith.constant 511 : i32
    %431 = tpu.dynamic_rotate %393 by %c511_i32_267 dim 1 : vector<8x512xf32>, i32 -> vector<8x512xf32>
    %c5_268 = arith.constant 5 : index
    %c0_269 = arith.constant 0 : index
    %c0_270 = arith.constant 0 : index
    %432 = vector.load %arg16[%c5_268, %c0_269, %c0_270] : memref<9x8x8xf32, #tpu.memory_space<vmem>>, vector<1x8x8xf32>
    %433 = vector.shape_cast %432 : vector<1x8x8xf32> to vector<8x8xf32>
    %cst_271 = arith.constant dense<0.000000e+00> : vector<8x512xf32>
    %434 = tpu.matmul %433, %431, %cst_271 {dimension_numbers = #tpu.dot_dimension_numbers<[1], [0], [0], [1], [0, 0, 1, 1], [], []>} : vector<8x8xf32>, vector<8x512xf32>, vector<8x512xf32> -> vector<8x512xf32>
    %435 = vector.extract_strided_slice %0 {offsets = [5, 0], sizes = [1, 512], strides = [1, 1]} : vector<9x512xf32> to vector<1x512xf32>
    %436 = vector.broadcast %435 : vector<1x512xf32> to vector<8x512xf32>
    %437 = arith.mulf %434, %436 : vector<8x512xf32>
    %438 = arith.addf %430, %437 : vector<8x512xf32>
    %c497_i32_272 = arith.constant 497 : i32
    %439 = tpu.dynamic_rotate %393 by %c497_i32_272 dim 1 : vector<8x512xf32>, i32 -> vector<8x512xf32>
    %c6_273 = arith.constant 6 : index
    %c0_274 = arith.constant 0 : index
    %c0_275 = arith.constant 0 : index
    %440 = vector.load %arg16[%c6_273, %c0_274, %c0_275] : memref<9x8x8xf32, #tpu.memory_space<vmem>>, vector<1x8x8xf32>
    %441 = vector.shape_cast %440 : vector<1x8x8xf32> to vector<8x8xf32>
    %cst_276 = arith.constant dense<0.000000e+00> : vector<8x512xf32>
    %442 = tpu.matmul %441, %439, %cst_276 {dimension_numbers = #tpu.dot_dimension_numbers<[1], [0], [0], [1], [0, 0, 1, 1], [], []>} : vector<8x8xf32>, vector<8x512xf32>, vector<8x512xf32> -> vector<8x512xf32>
    %443 = vector.extract_strided_slice %0 {offsets = [6, 0], sizes = [1, 512], strides = [1, 1]} : vector<9x512xf32> to vector<1x512xf32>
    %444 = vector.broadcast %443 : vector<1x512xf32> to vector<8x512xf32>
    %445 = arith.mulf %442, %444 : vector<8x512xf32>
    %446 = arith.addf %438, %445 : vector<8x512xf32>
    %c496_i32_277 = arith.constant 496 : i32
    %447 = tpu.dynamic_rotate %393 by %c496_i32_277 dim 1 : vector<8x512xf32>, i32 -> vector<8x512xf32>
    %c7_278 = arith.constant 7 : index
    %c0_279 = arith.constant 0 : index
    %c0_280 = arith.constant 0 : index
    %448 = vector.load %arg16[%c7_278, %c0_279, %c0_280] : memref<9x8x8xf32, #tpu.memory_space<vmem>>, vector<1x8x8xf32>
    %449 = vector.shape_cast %448 : vector<1x8x8xf32> to vector<8x8xf32>
    %cst_281 = arith.constant dense<0.000000e+00> : vector<8x512xf32>
    %450 = tpu.matmul %449, %447, %cst_281 {dimension_numbers = #tpu.dot_dimension_numbers<[1], [0], [0], [1], [0, 0, 1, 1], [], []>} : vector<8x8xf32>, vector<8x512xf32>, vector<8x512xf32> -> vector<8x512xf32>
    %451 = vector.extract_strided_slice %0 {offsets = [7, 0], sizes = [1, 512], strides = [1, 1]} : vector<9x512xf32> to vector<1x512xf32>
    %452 = vector.broadcast %451 : vector<1x512xf32> to vector<8x512xf32>
    %453 = arith.mulf %450, %452 : vector<8x512xf32>
    %454 = arith.addf %446, %453 : vector<8x512xf32>
    %c495_i32_282 = arith.constant 495 : i32
    %455 = tpu.dynamic_rotate %393 by %c495_i32_282 dim 1 : vector<8x512xf32>, i32 -> vector<8x512xf32>
    %c8_283 = arith.constant 8 : index
    %c0_284 = arith.constant 0 : index
    %c0_285 = arith.constant 0 : index
    %456 = vector.load %arg16[%c8_283, %c0_284, %c0_285] : memref<9x8x8xf32, #tpu.memory_space<vmem>>, vector<1x8x8xf32>
    %457 = vector.shape_cast %456 : vector<1x8x8xf32> to vector<8x8xf32>
    %cst_286 = arith.constant dense<0.000000e+00> : vector<8x512xf32>
    %458 = tpu.matmul %457, %455, %cst_286 {dimension_numbers = #tpu.dot_dimension_numbers<[1], [0], [0], [1], [0, 0, 1, 1], [], []>} : vector<8x8xf32>, vector<8x512xf32>, vector<8x512xf32> -> vector<8x512xf32>
    %459 = vector.extract_strided_slice %0 {offsets = [8, 0], sizes = [1, 512], strides = [1, 1]} : vector<9x512xf32> to vector<1x512xf32>
    %460 = vector.broadcast %459 : vector<1x512xf32> to vector<8x512xf32>
    %461 = arith.mulf %458, %460 : vector<8x512xf32>
    %462 = arith.addf %454, %461 : vector<8x512xf32>
    %c0_287 = arith.constant 0 : index
    %c0_288 = arith.constant 0 : index
    %463 = vector.load %arg17[%c0_287, %c0_288] : memref<8x1xf32, #tpu.memory_space<vmem>>, vector<8x1xf32>
    %464 = vector.broadcast %463 : vector<8x1xf32> to vector<8x512xf32>
    %465 = arith.addf %462, %464 : vector<8x512xf32>
    %cst_289 = arith.constant 0.000000e+00 : f32
    %466 = vector.broadcast %cst_289 : f32 to vector<8x512xf32>
    %467 = arith.maximumf %465, %466 : vector<8x512xf32>
    %cst_290 = arith.constant 0.000000e+00 : f32
    %468 = vector.broadcast %cst_290 : f32 to vector<1x512xf32>
    %c17_i32_291 = arith.constant 17 : i32
    %469 = tpu.dynamic_rotate %467 by %c17_i32_291 dim 1 : vector<8x512xf32>, i32 -> vector<8x512xf32>
    %c0_292 = arith.constant 0 : index
    %c0_293 = arith.constant 0 : index
    %c0_294 = arith.constant 0 : index
    %470 = vector.load %arg18[%c0_292, %c0_293, %c0_294] : memref<9x1x8xf32, #tpu.memory_space<vmem>>, vector<1x1x8xf32>
    %471 = vector.shape_cast %470 : vector<1x1x8xf32> to vector<1x8xf32>
    %cst_295 = arith.constant dense<0.000000e+00> : vector<1x512xf32>
    %472 = tpu.matmul %471, %469, %cst_295 {dimension_numbers = #tpu.dot_dimension_numbers<[1], [0], [0], [1], [0, 0, 1, 1], [], []>} : vector<1x8xf32>, vector<8x512xf32>, vector<1x512xf32> -> vector<1x512xf32>
    %473 = vector.extract_strided_slice %0 {offsets = [0, 0], sizes = [1, 512], strides = [1, 1]} : vector<9x512xf32> to vector<1x512xf32>
    %474 = arith.mulf %472, %473 : vector<1x512xf32>
    %475 = arith.addf %468, %474 : vector<1x512xf32>
    %c16_i32_296 = arith.constant 16 : i32
    %476 = tpu.dynamic_rotate %467 by %c16_i32_296 dim 1 : vector<8x512xf32>, i32 -> vector<8x512xf32>
    %c1_297 = arith.constant 1 : index
    %c0_298 = arith.constant 0 : index
    %c0_299 = arith.constant 0 : index
    %477 = vector.load %arg18[%c1_297, %c0_298, %c0_299] : memref<9x1x8xf32, #tpu.memory_space<vmem>>, vector<1x1x8xf32>
    %478 = vector.shape_cast %477 : vector<1x1x8xf32> to vector<1x8xf32>
    %cst_300 = arith.constant dense<0.000000e+00> : vector<1x512xf32>
    %479 = tpu.matmul %478, %476, %cst_300 {dimension_numbers = #tpu.dot_dimension_numbers<[1], [0], [0], [1], [0, 0, 1, 1], [], []>} : vector<1x8xf32>, vector<8x512xf32>, vector<1x512xf32> -> vector<1x512xf32>
    %480 = vector.extract_strided_slice %0 {offsets = [1, 0], sizes = [1, 512], strides = [1, 1]} : vector<9x512xf32> to vector<1x512xf32>
    %481 = arith.mulf %479, %480 : vector<1x512xf32>
    %482 = arith.addf %475, %481 : vector<1x512xf32>
    %c15_i32_301 = arith.constant 15 : i32
    %483 = tpu.dynamic_rotate %467 by %c15_i32_301 dim 1 : vector<8x512xf32>, i32 -> vector<8x512xf32>
    %c2_302 = arith.constant 2 : index
    %c0_303 = arith.constant 0 : index
    %c0_304 = arith.constant 0 : index
    %484 = vector.load %arg18[%c2_302, %c0_303, %c0_304] : memref<9x1x8xf32, #tpu.memory_space<vmem>>, vector<1x1x8xf32>
    %485 = vector.shape_cast %484 : vector<1x1x8xf32> to vector<1x8xf32>
    %cst_305 = arith.constant dense<0.000000e+00> : vector<1x512xf32>
    %486 = tpu.matmul %485, %483, %cst_305 {dimension_numbers = #tpu.dot_dimension_numbers<[1], [0], [0], [1], [0, 0, 1, 1], [], []>} : vector<1x8xf32>, vector<8x512xf32>, vector<1x512xf32> -> vector<1x512xf32>
    %487 = vector.extract_strided_slice %0 {offsets = [2, 0], sizes = [1, 512], strides = [1, 1]} : vector<9x512xf32> to vector<1x512xf32>
    %488 = arith.mulf %486, %487 : vector<1x512xf32>
    %489 = arith.addf %482, %488 : vector<1x512xf32>
    %c1_i32_306 = arith.constant 1 : i32
    %490 = tpu.dynamic_rotate %467 by %c1_i32_306 dim 1 : vector<8x512xf32>, i32 -> vector<8x512xf32>
    %c3_307 = arith.constant 3 : index
    %c0_308 = arith.constant 0 : index
    %c0_309 = arith.constant 0 : index
    %491 = vector.load %arg18[%c3_307, %c0_308, %c0_309] : memref<9x1x8xf32, #tpu.memory_space<vmem>>, vector<1x1x8xf32>
    %492 = vector.shape_cast %491 : vector<1x1x8xf32> to vector<1x8xf32>
    %cst_310 = arith.constant dense<0.000000e+00> : vector<1x512xf32>
    %493 = tpu.matmul %492, %490, %cst_310 {dimension_numbers = #tpu.dot_dimension_numbers<[1], [0], [0], [1], [0, 0, 1, 1], [], []>} : vector<1x8xf32>, vector<8x512xf32>, vector<1x512xf32> -> vector<1x512xf32>
    %494 = vector.extract_strided_slice %0 {offsets = [3, 0], sizes = [1, 512], strides = [1, 1]} : vector<9x512xf32> to vector<1x512xf32>
    %495 = arith.mulf %493, %494 : vector<1x512xf32>
    %496 = arith.addf %489, %495 : vector<1x512xf32>
    %c4_311 = arith.constant 4 : index
    %c0_312 = arith.constant 0 : index
    %c0_313 = arith.constant 0 : index
    %497 = vector.load %arg18[%c4_311, %c0_312, %c0_313] : memref<9x1x8xf32, #tpu.memory_space<vmem>>, vector<1x1x8xf32>
    %498 = vector.shape_cast %497 : vector<1x1x8xf32> to vector<1x8xf32>
    %cst_314 = arith.constant dense<0.000000e+00> : vector<1x512xf32>
    %499 = tpu.matmul %498, %467, %cst_314 {dimension_numbers = #tpu.dot_dimension_numbers<[1], [0], [0], [1], [0, 0, 1, 1], [], []>} : vector<1x8xf32>, vector<8x512xf32>, vector<1x512xf32> -> vector<1x512xf32>
    %500 = arith.addf %496, %499 : vector<1x512xf32>
    %c511_i32_315 = arith.constant 511 : i32
    %501 = tpu.dynamic_rotate %467 by %c511_i32_315 dim 1 : vector<8x512xf32>, i32 -> vector<8x512xf32>
    %c5_316 = arith.constant 5 : index
    %c0_317 = arith.constant 0 : index
    %c0_318 = arith.constant 0 : index
    %502 = vector.load %arg18[%c5_316, %c0_317, %c0_318] : memref<9x1x8xf32, #tpu.memory_space<vmem>>, vector<1x1x8xf32>
    %503 = vector.shape_cast %502 : vector<1x1x8xf32> to vector<1x8xf32>
    %cst_319 = arith.constant dense<0.000000e+00> : vector<1x512xf32>
    %504 = tpu.matmul %503, %501, %cst_319 {dimension_numbers = #tpu.dot_dimension_numbers<[1], [0], [0], [1], [0, 0, 1, 1], [], []>} : vector<1x8xf32>, vector<8x512xf32>, vector<1x512xf32> -> vector<1x512xf32>
    %505 = vector.extract_strided_slice %0 {offsets = [5, 0], sizes = [1, 512], strides = [1, 1]} : vector<9x512xf32> to vector<1x512xf32>
    %506 = arith.mulf %504, %505 : vector<1x512xf32>
    %507 = arith.addf %500, %506 : vector<1x512xf32>
    %c497_i32_320 = arith.constant 497 : i32
    %508 = tpu.dynamic_rotate %467 by %c497_i32_320 dim 1 : vector<8x512xf32>, i32 -> vector<8x512xf32>
    %c6_321 = arith.constant 6 : index
    %c0_322 = arith.constant 0 : index
    %c0_323 = arith.constant 0 : index
    %509 = vector.load %arg18[%c6_321, %c0_322, %c0_323] : memref<9x1x8xf32, #tpu.memory_space<vmem>>, vector<1x1x8xf32>
    %510 = vector.shape_cast %509 : vector<1x1x8xf32> to vector<1x8xf32>
    %cst_324 = arith.constant dense<0.000000e+00> : vector<1x512xf32>
    %511 = tpu.matmul %510, %508, %cst_324 {dimension_numbers = #tpu.dot_dimension_numbers<[1], [0], [0], [1], [0, 0, 1, 1], [], []>} : vector<1x8xf32>, vector<8x512xf32>, vector<1x512xf32> -> vector<1x512xf32>
    %512 = vector.extract_strided_slice %0 {offsets = [6, 0], sizes = [1, 512], strides = [1, 1]} : vector<9x512xf32> to vector<1x512xf32>
    %513 = arith.mulf %511, %512 : vector<1x512xf32>
    %514 = arith.addf %507, %513 : vector<1x512xf32>
    %c496_i32_325 = arith.constant 496 : i32
    %515 = tpu.dynamic_rotate %467 by %c496_i32_325 dim 1 : vector<8x512xf32>, i32 -> vector<8x512xf32>
    %c7_326 = arith.constant 7 : index
    %c0_327 = arith.constant 0 : index
    %c0_328 = arith.constant 0 : index
    %516 = vector.load %arg18[%c7_326, %c0_327, %c0_328] : memref<9x1x8xf32, #tpu.memory_space<vmem>>, vector<1x1x8xf32>
    %517 = vector.shape_cast %516 : vector<1x1x8xf32> to vector<1x8xf32>
    %cst_329 = arith.constant dense<0.000000e+00> : vector<1x512xf32>
    %518 = tpu.matmul %517, %515, %cst_329 {dimension_numbers = #tpu.dot_dimension_numbers<[1], [0], [0], [1], [0, 0, 1, 1], [], []>} : vector<1x8xf32>, vector<8x512xf32>, vector<1x512xf32> -> vector<1x512xf32>
    %519 = vector.extract_strided_slice %0 {offsets = [7, 0], sizes = [1, 512], strides = [1, 1]} : vector<9x512xf32> to vector<1x512xf32>
    %520 = arith.mulf %518, %519 : vector<1x512xf32>
    %521 = arith.addf %514, %520 : vector<1x512xf32>
    %c495_i32_330 = arith.constant 495 : i32
    %522 = tpu.dynamic_rotate %467 by %c495_i32_330 dim 1 : vector<8x512xf32>, i32 -> vector<8x512xf32>
    %c8_331 = arith.constant 8 : index
    %c0_332 = arith.constant 0 : index
    %c0_333 = arith.constant 0 : index
    %523 = vector.load %arg18[%c8_331, %c0_332, %c0_333] : memref<9x1x8xf32, #tpu.memory_space<vmem>>, vector<1x1x8xf32>
    %524 = vector.shape_cast %523 : vector<1x1x8xf32> to vector<1x8xf32>
    %cst_334 = arith.constant dense<0.000000e+00> : vector<1x512xf32>
    %525 = tpu.matmul %524, %522, %cst_334 {dimension_numbers = #tpu.dot_dimension_numbers<[1], [0], [0], [1], [0, 0, 1, 1], [], []>} : vector<1x8xf32>, vector<8x512xf32>, vector<1x512xf32> -> vector<1x512xf32>
    %526 = vector.extract_strided_slice %0 {offsets = [8, 0], sizes = [1, 512], strides = [1, 1]} : vector<9x512xf32> to vector<1x512xf32>
    %527 = arith.mulf %525, %526 : vector<1x512xf32>
    %528 = arith.addf %521, %527 : vector<1x512xf32>
    %c0_335 = arith.constant 0 : index
    %c0_336 = arith.constant 0 : index
    %529 = vector.load %arg19[%c0_335, %c0_336] : memref<1x1xf32, #tpu.memory_space<vmem>>, vector<1x1xf32>
    %530 = vector.broadcast %529 : vector<1x1xf32> to vector<1x512xf32>
    %531 = arith.addf %528, %530 : vector<1x512xf32>
    %532 = arith.negf %531 : vector<1x512xf32>
    %533 = math.exp %532 : vector<1x512xf32>
    %cst_337 = arith.constant 1.000000e+00 : f32
    %534 = vector.broadcast %cst_337 : f32 to vector<1x512xf32>
    %535 = arith.addf %534, %533 : vector<1x512xf32>
    %536 = arith.divf %534, %535 : vector<1x512xf32>
    %c0_338 = arith.constant 0 : index
    %c0_339 = arith.constant 0 : index
    %537 = vector.load %arg20[%c0_338, %c0_339] : memref<1x512xf32, #tpu.memory_space<vmem>>, vector<1x512xf32>
    tpu.vector_store %arg20[%c0_338, %c0_339], %536 {strides = array<i32>} : memref<1x512xf32, #tpu.memory_space<vmem>>, vector<1x512xf32>,
    return
  }
  func.func @transform_0(%arg0: i32) -> (i32, i32) {
    %c0_i32 = arith.constant 0 : i32
    %c0_i32_0 = arith.constant 0 : i32
    return %c0_i32, %arg0 : i32, i32
  }
  func.func @transform_1(%arg0: i32) -> (i32, i32) {
    %c0_i32 = arith.constant 0 : i32
    %c0_i32_0 = arith.constant 0 : i32
    return %c0_i32, %arg0 : i32, i32
  }
  func.func @transform_2(%arg0: i32) -> (i32, i32) {
    %c0_i32 = arith.constant 0 : i32
    %c0_i32_0 = arith.constant 0 : i32
    %c0_i32_1 = arith.constant 0 : i32
    return %c0_i32, %c0_i32_0 : i32, i32
  }
  func.func @transform_3(%arg0: i32) -> (i32, i32) {
    %c0_i32 = arith.constant 0 : i32
    %c0_i32_0 = arith.constant 0 : i32
    %c0_i32_1 = arith.constant 0 : i32
    return %c0_i32, %c0_i32_0 : i32, i32
  }
  func.func @transform_4(%arg0: i32) -> (i32, i32) {
    %c0_i32 = arith.constant 0 : i32
    %c0_i32_0 = arith.constant 0 : i32
    %c0_i32_1 = arith.constant 0 : i32
    return %c0_i32, %c0_i32_0 : i32, i32
  }
  func.func @transform_5(%arg0: i32) -> (i32, i32, i32) {
    %c0_i32 = arith.constant 0 : i32
    %c0_i32_0 = arith.constant 0 : i32
    %c0_i32_1 = arith.constant 0 : i32
    %c0_i32_2 = arith.constant 0 : i32
    return %c0_i32, %c0_i32_0, %c0_i32_1 : i32, i32, i32
  }
  func.func @transform_6(%arg0: i32) -> (i32, i32) {
    %c0_i32 = arith.constant 0 : i32
    %c0_i32_0 = arith.constant 0 : i32
    %c0_i32_1 = arith.constant 0 : i32
    return %c0_i32, %c0_i32_0 : i32, i32
  }
  func.func @transform_7(%arg0: i32) -> (i32, i32, i32) {
    %c0_i32 = arith.constant 0 : i32
    %c0_i32_0 = arith.constant 0 : i32
    %c0_i32_1 = arith.constant 0 : i32
    %c0_i32_2 = arith.constant 0 : i32
    return %c0_i32, %c0_i32_0, %c0_i32_1 : i32, i32, i32
  }
  func.func @transform_8(%arg0: i32) -> (i32, i32) {
    %c0_i32 = arith.constant 0 : i32
    %c0_i32_0 = arith.constant 0 : i32
    %c0_i32_1 = arith.constant 0 : i32
    return %c0_i32, %c0_i32_0 : i32, i32
  }
  func.func @transform_9(%arg0: i32) -> (i32, i32, i32) {
    %c0_i32 = arith.constant 0 : i32
    %c0_i32_0 = arith.constant 0 : i32
    %c0_i32_1 = arith.constant 0 : i32
    %c0_i32_2 = arith.constant 0 : i32
    return %c0_i32, %c0_i32_0, %c0_i32_1 : i32, i32, i32
  }
  func.func @transform_10(%arg0: i32) -> (i32, i32) {
    %c0_i32 = arith.constant 0 : i32
    %c0_i32_0 = arith.constant 0 : i32
    %c0_i32_1 = arith.constant 0 : i32
    return %c0_i32, %c0_i32_0 : i32, i32
  }
  func.func @transform_11(%arg0: i32) -> (i32, i32, i32) {
    %c0_i32 = arith.constant 0 : i32
    %c0_i32_0 = arith.constant 0 : i32
    %c0_i32_1 = arith.constant 0 : i32
    %c0_i32_2 = arith.constant 0 : i32
    return %c0_i32, %c0_i32_0, %c0_i32_1 : i32, i32, i32
  }
  func.func @transform_12(%arg0: i32) -> (i32, i32) {
    %c0_i32 = arith.constant 0 : i32
    %c0_i32_0 = arith.constant 0 : i32
    %c0_i32_1 = arith.constant 0 : i32
    return %c0_i32, %c0_i32_0 : i32, i32
  }
  func.func @transform_13(%arg0: i32) -> (i32, i32, i32) {
    %c0_i32 = arith.constant 0 : i32
    %c0_i32_0 = arith.constant 0 : i32
    %c0_i32_1 = arith.constant 0 : i32
    %c0_i32_2 = arith.constant 0 : i32
    return %c0_i32, %c0_i32_0, %c0_i32_1 : i32, i32, i32
  }
  func.func @transform_14(%arg0: i32) -> (i32, i32) {
    %c0_i32 = arith.constant 0 : i32
    %c0_i32_0 = arith.constant 0 : i32
    %c0_i32_1 = arith.constant 0 : i32
    return %c0_i32, %c0_i32_0 : i32, i32
  }
  func.func @transform_15(%arg0: i32) -> (i32, i32, i32) {
    %c0_i32 = arith.constant 0 : i32
    %c0_i32_0 = arith.constant 0 : i32
    %c0_i32_1 = arith.constant 0 : i32
    %c0_i32_2 = arith.constant 0 : i32
    return %c0_i32, %c0_i32_0, %c0_i32_1 : i32, i32, i32
  }
  func.func @transform_16(%arg0: i32) -> (i32, i32) {
    %c0_i32 = arith.constant 0 : i32
    %c0_i32_0 = arith.constant 0 : i32
    %c0_i32_1 = arith.constant 0 : i32
    return %c0_i32, %c0_i32_0 : i32, i32
  }
  func.func @transform_17(%arg0: i32) -> (i32, i32, i32) {
    %c0_i32 = arith.constant 0 : i32
    %c0_i32_0 = arith.constant 0 : i32
    %c0_i32_1 = arith.constant 0 : i32
    %c0_i32_2 = arith.constant 0 : i32
    return %c0_i32, %c0_i32_0, %c0_i32_1 : i32, i32, i32
  }
  func.func @transform_18(%arg0: i32) -> (i32, i32) {
    %c0_i32 = arith.constant 0 : i32
    %c0_i32_0 = arith.constant 0 : i32
    %c0_i32_1 = arith.constant 0 : i32
    return %c0_i32, %c0_i32_0 : i32, i32
  }
  func.func @transform_19(%arg0: i32) -> (i32, i32) {
    %c0_i32 = arith.constant 0 : i32
    %c0_i32_0 = arith.constant 0 : i32
    return %c0_i32, %arg0 : i32, i32
  }
}

</mosaic_0001>

<bundles_post_ra>
// kernel: tpu_custom_call.1
= control target key start
LH: loop header
LB: loop body
LE: loop exit
PB: predicated region body
PF: predicated region fallthrough
CT: control target
= control target key end

     0   :  { %s17620_s0 = inlined_call_operand.hbm [shape: f32[4,1024], index: 0, kind: input, shape index: {}]   ;;  %s17621_s1 = inlined_call_operand.hbm [shape: f32[1,1024], index: 1, kind: input, shape index: {}]   ;;  %s17622_s2 = inlined_call_operand.vmem [shape: f32[9,512], index: 2, kind: input, shape index: {}]   ;;  %s17623_s3 = inlined_call_operand.vmem [shape: f32[8,4], index: 3, kind: input, shape index: {}]   ;;  %s17624_s4 = inlined_call_operand.vmem [shape: f32[8,1], index: 4, kind: input, shape index: {}]   ;;  %s17625_s5 = inlined_call_operand.vmem [shape: f32[9,16,25], index: 5, kind: input, shape index: {}]   ;;  %s17626_s6 = inlined_call_operand.vmem [shape: f32[16,1], index: 6, kind: input, shape index: {}]   ;;  %s17627_s7 = inlined_call_operand.vmem [shape: f32[9,16,16], index: 7, kind: input, shape index: {}]   ;;  %s17628_s8 = inlined_call_operand.vmem [shape: f32[16,1], index: 8, kind: input, shape index: {}]   ;;  %s17629_s9 = inlined_call_operand.vmem [shape: f32[9,8,16], index: 9, kind: input, shape index: {}]   ;;  %s17630_s10 = inlined_call_operand.vmem [shape: f32[8,1], index: 10, kind: input, shape index: {}]   ;;  %s17631_s11 = inlined_call_operand.vmem [shape: f32[9,8,8], index: 11, kind: input, shape index: {}]   ;;  %s17632_s12 = inlined_call_operand.vmem [shape: f32[8,1], index: 12, kind: input, shape index: {}]   ;;  %s17633_s13 = inlined_call_operand.vmem [shape: f32[9,8,8], index: 13, kind: input, shape index: {}]   ;;  %s17634_s14 = inlined_call_operand.vmem [shape: f32[8,1], index: 14, kind: input, shape index: {}]   ;;  %s17635_s15 = inlined_call_operand.vmem [shape: f32[9,8,8], index: 15, kind: input, shape index: {}]   ;;  %s17636_s16 = inlined_call_operand.vmem [shape: f32[8,1], index: 16, kind: input, shape index: {}]   ;;  %s17637_s17 = inlined_call_operand.vmem [shape: f32[9,1,8], index: 17, kind: input, shape index: {}]   ;;  %s17638_s18 = inlined_call_operand.<no memory space> [shape: f32[1,1], index: 18, kind: input, shape index: {}]   ;;  %s17639_s19 = inlined_call_operand.hbm [shape: f32[1,1024], index: 19, kind: output, shape index: {}]  }
   0x1   :  { %17696 = sst [smem:[#allocation33_spill]] %s17620_s0  ;;  %v24_v0 = vstv %s17638_s18 }
   0x2   :  { %17697 = sst [smem:[#allocation34_spill]] %s17621_s1  ;;  %25 = vst [vmem:[#allocation3] sm:$0x1] %v24_v0 }
   0x3   :  { %17698 = sst [smem:[#allocation35_spill]] %s17622_s2 }
   0x4   :  { %17699 = sst [smem:[#allocation36_spill]] %s17623_s3 }
   0x5   :  { %17700 = sst [smem:[#allocation37_spill]] %s17639_s19 }
   0x6   :  { %26 = vsyncpa [#allocation5], 0 }
   0x7   :  { %28 = vsyncpa [#allocation5 + $0x1], 0 }
   0x8   :  { %29 = vsyncpa [#allocation8], 0 }
   0x9   :  { %31 = vsyncpa [#allocation8 + $0x1], 0 }
   0xa   :  { %32 = vsyncpa [#allocation6], 0 }
   0xb   :  { %34 = vsyncpa [#allocation6 + $0x1], 0  ;;  %s14460_s20 = smov 0   ;;  %s14462_s21 = smov 0  }
   0xc   :  { %s14464_s1 = smov 0   ;;  %s14466_s22 = smov 0  }
   0xd LB: > { %17701 = sst [smem:[#allocation13_spill]] %s14328_s20  ;;  %s14481_s18 = sadd.s32 4294967295, %s14340_s22   ;;  %s14340_s22 = sphi %s14466_s22, %s17794_s22   ;;  %s14336_s1 = sphi %s14464_s1, %s17796_s1   ;;  %s14332_s21 = sphi %s14462_s21, %s17798_s21   ;;  %s14328_s20 = sphi %s14460_s20, %s17797_s20  }
   0xe   : > { %17702 = sst [smem:[#allocation14_spill]] %s14336_s1  ;;  %s12825_s2 = sadd.s32 4294967294, %s14340_s22  }
   0xf   : > { %17703 = sst [smem:[#allocation15_spill]] %s14340_s22  ;;  %s14485_s23 = sadd.s32 1, %s14340_s22  }
  0x10   : > { %17704 = sst [smem:[#allocation16_spill]] %s14481_s18  ;;  %s47_s24 = sadd.s32 1, %s14336_s1 }
  0x11   : > { %17705 = sst [smem:[#allocation17_spill]] %s14485_s23  ;;  %s44_s25 = ssub.s32 %s14340_s22, %s14485_s23 }
  0x12   : > { %p54_p0 = scmp.ne.s32.totalorder %s14336_s1, %s14332_s21  ;;  %p45_p1 = scmp.eq.s32.totalorder %s44_s25, 0 }
  0x13   : > { %p55_p2 = scmp.eq.s32.totalorder %s14340_s22, 0  ;;  %p60_p3 = scmp.ne.s32.totalorder %s14332_s21, %s14328_s20 }
  0x14   : > { %p61_p4 = scmp.eq.s32.totalorder %s14481_s18, 0  ;;  %p467_p7 = scmp.eq.s32.totalorder %s14481_s18, 1 }
  0x15   : > { %s14497_s3 = scalar_select %p45_p1, %s14336_s1, %s47_s24  }
  0x16   : > { %p14499_p5 = por %p55_p2, %p54_p0  ;;  %p14503_p6 = por %p61_p4, %p60_p3 }
  0x17   : > { %17706 = sst [smem:[#allocation18_spill]] %s14497_s3  ;;  %p473_p8 = scmp.eq.s32.totalorder %s12825_s2, 1 }
  0x18   : > { %s17708_s27 = scalar_select %p14503_p6, 1, 0 }
  0x19   : > { %p13472_p10 = scmp.lt.s32.totalorder %s14340_s22, 2  ;;  %p14510_p11 = por %p467_p7, %p54_p0 }
  0x1a   : > { %p14514_p12 = por %p473_p8, %p60_p3  ;;  %s14519_s0 = sand.u32 1, %s14336_s1  }
  0x1b   : > { %s17709_s28 = scalar_select %p14510_p11, 1, 0 }
  0x1c   : > { %s17711_s29 = scalar_select %p14514_p12, 1, 0 }
  0x1d   : > { %17710 = sst [smem:[#allocation19_spill]] %s17709_s28  ;;  %s13128_s30 = sshll.u32 %s14340_s22, 8 }
  0x1e   : > { %17712 = sst [smem:[#allocation20_spill]] %s17711_s29  ;;  %s12828_s24 = sshll.u32 %s14519_s0, 4 }
  0x1f   : > { %s17713_s23 = sld [smem:[#allocation33_spill]]  ;;  %s548_s20 = scalar_lea.vmem [#allocation4], %s12828_s24 }
  0x20   : > { %s556_s19 = sshll.u32 %s548_s20, 4  ;;  %p14530_p13 = pnand %p13472_p10, %p14499_p5  ;;  %s14534_s19 = int_to_ptr.vmem [resolvable:$true] %s556_s19 }
  0x21   : > { %s545_s3 = scalar_lea.sflag [#allocation5], %s14519_s0 }
  0x22   : > { %p14212_p3 = pneg %p14530_p13 }
  0x25   : > { %s14526_s2 = scalar_lea.hbm %s17713_s23, %s13128_s30  ;;  %s14215_s24 = scalar_lea.hbm %s17713_s23, 512 }
  0x26   : > { %s14210_s30 = scalar_lea.hbm %s14526_s2, 256  ;;  %p14216_p5 = scmp.lt.u32.totalorder %s14526_s2, %s17713_s23 }
  0x27   : > { %p14211_p2 = scmp.ne.s32.totalorder %s14526_s2, %s14210_s30  ;;  %p14217_p8 = scmp.lt.u32.totalorder %s14215_s24, %s14210_s30 }
  0x28   : > { %p14219_p9 = scmp.lt.u32.totalorder %s14210_s30, %s14526_s2 }
  0x29   : > { %p14213_p4 = pnand %p14212_p3, %p14211_p2  ;;  %p14218_p10 = por %p14217_p8, %p14216_p5 }
  0x2b   : > { %p14214_p7 = pneg %p14213_p4  ;;  %p14220_p0 = por %p14219_p9, %p14218_p10 }
  0x2d   : > { %p14221_p1 = pnand %p14220_p0, %p14214_p7 }
  0x2f   : > { %14224 = shalt.err (!%p14221_p1)
}
  0x30   : > { %s14225_s28 = scalar_lea.vmem %s14534_s19, 256  ;;  %s14342_s20 = smov [#allocation4]  }
  0x31   : > { %p14226_p2 = scmp.ne.s32.totalorder %s14534_s19, %s14225_s28  ;;  %s14230_s26 = sshll.u32 %s14342_s20, 4  ;;  %s14231_s26 = int_to_ptr.vmem [resolvable:$false] %s14230_s26 }
  0x32   : > { %s14232_s1 = scalar_lea.vmem %s14231_s26, 512  ;;  %p14233_p11 = scmp.lt.s32.totalorder %s14534_s19, %s14231_s26 }
  0x33   : > { %p14228_p4 = pnand %p14226_p2, %p14212_p3  ;;  %p14234_p5 = scmp.lt.s32.totalorder %s14232_s1, %s14225_s28 }
  0x35   : > { %p14229_p12 = pneg %p14228_p4  ;;  %p14235_p8 = por %p14234_p5, %p14233_p11 }
  0x37   : > { %p14236_p9 = pnand %p14235_p8, %p14229_p12 }
  0x39   : > { %14239 = shalt.err (!%p14236_p9)
}
  0x3a   : > { %13464 = dma.hbm_to_vmem [thread:$0]  (!%p14530_p13), %s14526_s2, 256, %s14534_s19, %s545_s3  }
  0x3b   : > { %p17715_p0 = scmp.lt.s32.totalorder %s14340_s22, 3  ;;  %p17716_p1 = scmp.ge.s32.totalorder %s14340_s22, 1 }
  0x3c   : > { %s12831_s28 = sshll.u32 %s14519_s0, 2  ;;  %s13129_s24 = sshll.u32 %s14340_s22, 6 }
  0x3d   : > { %p14568_p7 = pnand %p17716_p1, %p17715_p0  ;;  %s17718_s26 = sld [smem:[#allocation34_spill]] }
  0x3e   : > { %s567_s23 = scalar_lea.vmem [#allocation7], %s12831_s28  ;;  %s564_s19 = scalar_lea.sflag [#allocation8], %s14519_s0 }
  0x3f   : > { %s17717_s30 = scalar_select %p14568_p7, 1, 0 }
  0x40   : > { %s575_s18 = sshll.u32 %s567_s23, 4  ;;  %s576_s18 = int_to_ptr.vmem [resolvable:$true] %s575_s18 }
  0x43   : > { %s14577_s1 = scalar_lea.hbm %s17718_s26, %s13129_s24  ;;  %s14245_s25 = scalar_lea.hbm %s17718_s26, 128 }
  0x44   : > { %s14240_s2 = scalar_lea.hbm %s14577_s1, 64  ;;  %p14246_p2 = scmp.lt.u32.totalorder %s14577_s1, %s17718_s26 }
  0x45   : > { %p14241_p11 = scmp.ne.s32.totalorder %s14577_s1, %s14240_s2  ;;  %p14247_p4 = scmp.lt.u32.totalorder %s14245_s25, %s14240_s2 }
  0x46   : > { %p14249_p8 = scmp.lt.u32.totalorder %s14240_s2, %s14577_s1 }
  0x47   : > { %p14243_p12 = pnand %p14241_p11, %p14212_p3  ;;  %p14248_p5 = por %p14247_p4, %p14246_p2 }
  0x49   : > { %p14244_p10 = pneg %p14243_p12  ;;  %p14250_p9 = por %p14249_p8, %p14248_p5 }
  0x4b   : > { %p14251_p0 = pnand %p14250_p9, %p14244_p10 }
  0x4d   : > { %14254 = shalt.err (!%p14251_p0)
}
  0x4e   : > { %s14255_s23 = scalar_lea.vmem %s576_s18, 64  ;;  %s14343_s0 = smov [#allocation7]  }
  0x4f   : > { %p14256_p1 = scmp.ne.s32.totalorder %s576_s18, %s14255_s23  ;;  %s14260_s22 = sshll.u32 %s14343_s0, 4  ;;  %s14261_s22 = int_to_ptr.vmem [resolvable:$false] %s14260_s22 }
  0x50   : > { %s14262_s28 = scalar_lea.vmem %s14261_s22, 128  ;;  %p14263_p6 = scmp.lt.s32.totalorder %s576_s18, %s14261_s22 }
  0x51   : > { %p14258_p11 = pnand %p14256_p1, %p14212_p3  ;;  %p14264_p7 = scmp.lt.s32.totalorder %s14262_s28, %s14255_s23 }
  0x53   : > { %p14259_p12 = pneg %p14258_p11  ;;  %p14265_p2 = por %p14264_p7, %p14263_p6 }
  0x55   : > { %p14266_p4 = pnand %p14265_p2, %p14259_p12 }
  0x57   : > { %14269 = shalt.err (!%p14266_p4)
}
  0x58   : > { %13467 = dma.hbm_to_vmem [thread:$0]  (!%p14530_p13), %s14577_s1, 64, %s576_s18, %s564_s19  }
  0x59   : > { %p17719_p10 = scmp.ne.s32.totalorder %s17717_s30, 0 }
  0x5b   : > { %584 = sbr.rel (%p17719_p10) target bundleno = 3297 (0xce1), region = 96 }
  0x62   : > { %s14602_s2 = sand.u32 1, %s14332_s21   ;;  %p17720_p3 = scmp.ne.s32.totalorder %s17708_s27, 0 }
  0x63   : > { %s12835_s3 = sshll.u32 %s14602_s2, 4  ;;  %s587_s25 = scalar_lea.sflag [#allocation5], %s14602_s2 }
  0x64   : > { %s590_s24 = scalar_lea.vmem [#allocation4], %s12835_s3 }
  0x65   : > { %14315 = dma.done.wait (%p17720_p3), %s587_s25, 256  }
  0x66   : > { %14317 = vsyncadd (%p17720_p3), %s587_s25, 4294967040  ;;  %s17677_s18 = sshll.u32 %s14602_s2, 2  ;;  %s596_s29 = scalar_lea.sflag [#allocation8], %s14602_s2 }
  0x67   : > { %s599_s30 = scalar_lea.vmem [#allocation7], %s17677_s18 }
  0x68   : > { %14319 = dma.done.wait (%p17720_p3), %s596_s29, 64  }
  0x69   : > { %14321 = vsyncadd (%p17720_p3), %s596_s29, 4294967232  ;;  %v17656_v1 = vmov 0.0   ;;  %v14345_v2 = vmov 0   ;;  %v670_v3 = vld [vmem:[%s590_s24] sm:$0xff]  ;;  %vm688_vm0 = vcmask 1043456   ;;  %v671_v4 = vld [vmem:[%s590_s24 + $0x8] sm:$0xff]  ;;  %v846_v9 = vlaneseq }
  0x6a   : > { %761 = vmatprep.mubr.f32.mxu0 %v17656_v1  ;;  %832 = vmatprep.mubr.f32.mxu1 %v17656_v1  ;;  %v682_v5 = vcombine.high %v670_v3, %v670_v3  ;;  %v683_v6 = vcombine.high %v671_v4, %v671_v4  ;;  %v674_v7 = vld [vmem:[%s17624_s4] sm:$0xff]  ;;  %s17721_s23 = sld [smem:[#allocation36_spill]]  ;;  %vm684_vm1 = vcmask 31744   ;;  %v17722_v11 = vmov 0  ;;  %s14346_s0 = smov 17  }
  0x6b   : > { %13518 = vset.pattern.permute.xlu0 %v14345_v2  ;;  %13839 = vset.pattern.permute.xlu1 %v14345_v2  ;;  %v672_v10 = vld [vmem:[%s599_s30] sm:$0xf]  ;;  %vm14629_vm2 = vcmp.lt.s32.totalorder %v846_v9, 512  ;;  %v14636_v15 = vshrl.u32 %v846_v9, 7  ;;  %s14347_s22 = smov 16   ;;  %s14348_s28 = smov 15  }
  0x6c   : > { %677 = vperm.xlu0 %13518, %v674_v7   ;;  %12838 = vmatprep.subr.msk.mxu0 %vm688_vm0, %v682_v5  ;;  %v17723_v11 = vsel %vm14629_vm2, 4294967295, %v17722_v11  ;;  %891 = vst.msk [vmem:[#allocation2 + $0x60] ss:$8 sm:$0xf] %vm14629_vm2, %v672_v10  ;;  %v12844_v12 = vmul.f32 -1.442695, %v672_v10 }
  0x6d   : > { %12841 = vmatprep.subr.msk.mxu1 %vm688_vm0, %v683_v6  ;;  %12839 = vmatpush1.msk.msra.mxu0 %vm688_vm0, %v670_v3  ;;  %17724 = vst [vmem:[#allocation21_spill] sm:$0xff] %v17723_v11  ;;  %17725 = vst [vmem:[#allocation22_spill] sm:$0xff] %v14636_v15  ;;  %v14639_v16 = vsub.s32 0, %v14636_v15  ;;  %v14642_v17 = vsub.s32 2, %v14636_v15  ;;  %v14645_v19 = vsub.s32 1, %v14636_v15  ;;  %v14648_v20 = vsub.s32 3, %v14636_v15 }
  0x6e   : > { %12842 = vmatpush1.msk.msra.mxu1 %vm688_vm0, %v671_v4  ;;  %14162 = vpow2.f32 %v12844_v12  ;;  %s14349_s3 = smov 1   ;;  %s17684_s25 = smov 127   ;;  %v3144_v6 = vld [vmem:[%s17626_s6 + $0x8] sm:$0xff]  ;;  %vm969_vm5 = vcmask 1040384   ;;  %vm14354_vm7 = vmmov 1   ;;  %vm962_vm9 = vcmask 203776  }
  0x6f   : > { %17726 = vst [vmem:[#allocation23_spill] sm:$0xff] %v14639_v16  ;;  %17727 = vst [vmem:[#allocation24_spill] sm:$0xff] %v14642_v17  ;;  %s17682_s24 = smov 113   ;;  %s17680_s29 = smov 112   ;;  %vm3197_vm15 = vcmask 130048   ;;  %vm6623_vm0 = vcmask 64512  }
  0x70   : > { %v673_v8 = vld [vmem:[%s17721_s23] sm:$0xff]  ;;  %17728 = vst [vmem:[#allocation25_spill] sm:$0xff] %v14645_v19  ;;  %17729 = vst [vmem:[#allocation26_spill] sm:$0xff] %v14648_v20  ;;  %s17678_s30 = smov 111   ;;  %s17762_s20 = sld [smem:[#allocation35_spill]] }
  0x71   : > { %12840 = vmatmul.mubr.msk.f32.vlgmr.msra.gmra.mrb[0].mxu0 %vm684_vm1, %v673_v8  ;;  %12843 = vmatmul.mubr.msk.f32.vlgmr.msra.gmra.mrb[0].mxu1 %vm684_vm1, %v673_v8  ;;  %v3143_v8 = vld [vmem:[%s17626_s6] sm:$0xff]  ;;  %vm15033_vm8 = vmpackc.low %vm969_vm5, %vm14354_vm7  ;;  %s17772_s23 = smov 127   ;;  %s17784_s1 = sld [smem:[#allocation19_spill]] }
  0x72   : > { %1046 = vmatprep.mubr.f32.mxu0 %v17656_v1  ;;  %1123 = vmatprep.mubr.f32.mxu1 %v17656_v1 }
  0x73   : > { %v14654_v28 = vld [vmem:[#allocation2 + $0x60] sm:$0x1]  ;;  %v14656_v29 = vld [vmem:[#allocation2 + $0x70] sm:$0x1]  ;;  %v14662_v34 = vld [vmem:[#allocation2 + $0x68] sm:$0x1] }
  0x74   : > { %17730 = vst [vmem:[#allocation27_spill] sm:$0xff] %v14654_v28  ;;  %17731 = vst [vmem:[#allocation28_spill] sm:$0xff] %v14656_v29  ;;  %v14664_v35 = vld [vmem:[#allocation2 + $0x78] sm:$0x1] }
  0x75   : > { %17734 = vst [vmem:[#allocation31_spill] sm:$0xff] %v14664_v35 }
  0x76   : > { %s17763_s18 = smov %s17762_s20 }
  0x77   : > { %p17788_p13 = scmp.ne.s32.totalorder %s17784_s1, 0 }
  0x78   : > { %v14163_v13 = vpop.eup %14162 }
  0x79   : > { %v842_v14 = vadd.f32 1.0, %v14163_v13 }
  0x7b   : > { %14164 = vrcp.f32 %v842_v14 }
  0x85   : > { %v14165_v18 = vpop.eup %14164 }
  0x86   : > { %v849_v22 = vrot.slane %v14165_v18, %v14639_v16  ;;  %v857_v23 = vrot.slane %v14165_v18, %v14642_v17  ;;  %v853_v26 = vrot.slane %v14165_v18, %v14645_v19  ;;  %v861_v27 = vrot.slane %v14165_v18, %v14648_v20 }
  0xeb   : > { %v678_v21 = vpop.permute.xlu0 %677 }
 0x144   : > { %v763_v24 = vpop.f32.mrb[0].mxu0  ;;  %v834_v25 = vpop.f32.mrb[0].mxu1 }
 0x145   : > { %v14658_v30 = vadd.f32 %v763_v24, %v678_v21  ;;  %v14660_v31 = vadd.f32 %v834_v25, %v678_v21  ;;  %v765_v32 = vpop.f32.mrb[1].mxu0  ;;  %v836_v33 = vpop.f32.mrb[1].mxu1 }
 0x146   : > { %v14666_v36 = vadd.f32 %v765_v32, %v678_v21  ;;  %v14668_v37 = vadd.f32 %v836_v33, %v678_v21 }
 0x147   : > { %17732 = vst [vmem:[#allocation29_spill] sm:$0xff] %v14658_v30  ;;  %17733 = vst [vmem:[#allocation30_spill] sm:$0xff] %v14660_v31  ;;  %v14671_v38 = vmul.f32 %v849_v22, %v14658_v30  ;;  %v14674_v39 = vmul.f32 %v857_v23, %v14660_v31  ;;  %v14678_v40 = vpack.i.bf16 %v14654_v28, %v14658_v30 }
 0x148   : > { %17735 = vst [vmem:[#allocation32_spill] sm:$0xff] %v14668_v37  ;;  %v14682_v41 = vpack.i.bf16 %v14656_v29, %v14660_v31  ;;  %v14685_v42 = vmul.f32 %v853_v26, %v14666_v36  ;;  %v14688_v43 = vmul.f32 %v861_v27, %v14668_v37  ;;  %v14692_v44 = vpack.i.bf16 %v14662_v34, %v14666_v36 }
 0x149   : > { %v14696_v45 = vpack.i.bf16 %v14664_v35, %v14668_v37  ;;  %v14700_v46 = vsub.f32 %v14658_v30, %v14671_v38  ;;  %v14704_v47 = vsub.f32 %v14660_v31, %v14674_v39  ;;  %13520 = vrot.lane.b32.xlu1 %v14678_v40, %s14346_s0 }
 0x14a   : > { %v14714_v50 = vsub.f32 %v14666_v36, %v14685_v42  ;;  %v14718_v51 = vsub.f32 %v14668_v37, %v14688_v43  ;;  %13555 = vrot.lane.b32.xlu0 %v14692_v44, %s14346_s0 }
 0x14b   : > { %v14728_v54 = vpack.i.bf16 %v14674_v39, %v14704_v47  ;;  %v14732_v55 = vpack.i.bf16 %v14671_v38, %v14700_v46 }
 0x14c   : > { %v14740_v58 = vpack.i.bf16 %v14685_v42, %v14714_v50  ;;  %v14744_v59 = vpack.i.bf16 %v14688_v43, %v14718_v51 }
 0x14d   : > { %13525 = vrot.lane.b32.xlu1 %v14682_v41, %s14346_s0 }
 0x14e   : > { %13560 = vrot.lane.b32.xlu0 %v14696_v45, %s14346_s0 }
 0x151   : > { %13530 = vrot.lane.b32.xlu1 %v14678_v40, %s14347_s22 }
 0x152   : > { %13565 = vrot.lane.b32.xlu0 %v14692_v44, %s14347_s22 }
 0x155   : > { %13535 = vrot.lane.b32.xlu1 %v14682_v41, %s14347_s22 }
 0x156   : > { %13570 = vrot.lane.b32.xlu0 %v14696_v45, %s14347_s22 }
 0x159   : > { %13540 = vrot.lane.b32.xlu1 %v14678_v40, %s14348_s28 }
 0x15a   : > { %13575 = vrot.lane.b32.xlu0 %v14692_v44, %s14348_s28 }
 0x15d   : > { %13545 = vrot.lane.b32.xlu1 %v14682_v41, %s14348_s28 }
 0x15e   : > { %13580 = vrot.lane.b32.xlu0 %v14696_v45, %s14348_s28 }
 0x161   : > { %13550 = vrot.lane.b32.xlu1 %v14678_v40, %s14349_s3 }
 0x162   : > { %13585 = vrot.lane.b32.xlu0 %v14692_v44, %s14349_s3 }
 0x165   : > { %13595 = vrot.lane.b32.xlu1 %v14728_v54, %s14346_s0 }
 0x166   : > { %13590 = vrot.lane.b32.xlu0 %v14732_v55, %s14346_s0 }
 0x169   : > { %13600 = vrot.lane.b32.xlu1 %v14732_v55, %s14347_s22 }
 0x16a   : > { %13640 = vrot.lane.b32.xlu0 %v14696_v45, %s14349_s3 }
 0x16d   : > { %13605 = vrot.lane.b32.xlu1 %v14728_v54, %s14347_s22 }
 0x16e   : > { %13660 = vrot.lane.b32.xlu0 %v14692_v44, %s17684_s25 }
 0x171   : > { %13610 = vrot.lane.b32.xlu1 %v14732_v55, %s14348_s28 }
 0x172   : > { %13670 = vrot.lane.b32.xlu0 %v14696_v45, %s17684_s25 }
 0x175   : > { %13615 = vrot.lane.b32.xlu1 %v14728_v54, %s14348_s28 }
 0x176   : > { %13690 = vrot.lane.b32.xlu0 %v14692_v44, %s17682_s24 }
 0x179   : > { %13620 = vrot.lane.b32.xlu1 %v14732_v55, %s14349_s3 }
 0x17a   : > { %13700 = vrot.lane.b32.xlu0 %v14696_v45, %s17682_s24 }
 0x17d   : > { %13625 = vrot.lane.b32.xlu1 %v14728_v54, %s14349_s3 }
 0x17e   : > { %13720 = vrot.lane.b32.xlu0 %v14692_v44, %s17680_s29 }
 0x181   : > { %13630 = vrot.lane.b32.xlu1 %v14740_v58, %s14346_s0 }
 0x182   : > { %13730 = vrot.lane.b32.xlu0 %v14744_v59, %s14346_s0 }
 0x185   : > { %13635 = vrot.lane.b32.xlu1 %v14682_v41, %s14349_s3 }
 0x186   : > { %13735 = vrot.lane.b32.xlu0 %v14740_v58, %s14347_s22 }
 0x189   : > { %13645 = vrot.lane.b32.xlu1 %v14732_v55, %s17684_s25 }
 0x18a   : > { %13740 = vrot.lane.b32.xlu0 %v14744_v59, %s14347_s22 }
 0x18d   : > { %13650 = vrot.lane.b32.xlu1 %v14728_v54, %s17684_s25 }
 0x18e   : > { %13745 = vrot.lane.b32.xlu0 %v14740_v58, %s14348_s28 }
 0x191   : > { %13655 = vrot.lane.b32.xlu1 %v14678_v40, %s17684_s25 }
 0x192   : > { %13750 = vrot.lane.b32.xlu0 %v14744_v59, %s14348_s28 }
 0x195   : > { %13665 = vrot.lane.b32.xlu1 %v14682_v41, %s17684_s25 }
 0x196   : > { %13755 = vrot.lane.b32.xlu0 %v14740_v58, %s14349_s3 }
 0x199   : > { %13675 = vrot.lane.b32.xlu1 %v14732_v55, %s17682_s24 }
 0x19a   : > { %13760 = vrot.lane.b32.xlu0 %v14744_v59, %s14349_s3 }
 0x19d   : > { %13680 = vrot.lane.b32.xlu1 %v14728_v54, %s17682_s24 }
 0x19e   : > { %13765 = vrot.lane.b32.xlu0 %v14696_v45, %s17680_s29 }
 0x1a1   : > { %13685 = vrot.lane.b32.xlu1 %v14678_v40, %s17682_s24 }
 0x1a2   : > { %13785 = vrot.lane.b32.xlu0 %v14692_v44, %s17678_s30 }
 0x1a5   : > { %13695 = vrot.lane.b32.xlu1 %v14682_v41, %s17682_s24 }
 0x1a6   : > { %13795 = vrot.lane.b32.xlu0 %v14740_v58, %s17684_s25 }
 0x1a9   : > { %13705 = vrot.lane.b32.xlu1 %v14732_v55, %s17680_s29 }
 0x1aa   : > { %13800 = vrot.lane.b32.xlu0 %v14744_v59, %s17684_s25  ;;  %s17773_s25 = smov 113  }
 0x1ad   : > { %13710 = vrot.lane.b32.xlu1 %v14728_v54, %s17680_s29 }
 0x1ae   : > { %13805 = vrot.lane.b32.xlu0 %v14740_v58, %s17682_s24 }
 0x1b1   : > { %13715 = vrot.lane.b32.xlu1 %v14678_v40, %s17680_s29 }
 0x1b2   : > { %13810 = vrot.lane.b32.xlu0 %v14744_v59, %s17682_s24  ;;  %s17774_s24 = smov 112  }
 0x1b5   : > { %13725 = vrot.lane.b32.xlu1 %v14682_v41, %s17680_s29 }
 0x1b6   : > { %13815 = vrot.lane.b32.xlu0 %v14740_v58, %s17680_s29 }
 0x1b9   : > { %13770 = vrot.lane.b32.xlu1 %v14732_v55, %s17678_s30 }
 0x1ba   : > { %13820 = vrot.lane.b32.xlu0 %v14744_v59, %s17680_s29  ;;  %s17775_s29 = smov 111  }
 0x1bb   : > { %v13521_v62 = vpop.permute.xlu1 %13520 }
 0x1bc   : > { %v13556_v63 = vpop.permute.xlu0 %13555  ;;  %v13523_v44 = vunpack.i.h.bf16 %v13521_v62 }
 0x1bd   : > { %13775 = vrot.lane.b32.xlu1 %v14728_v54, %s17678_s30  ;;  %v13522_v54 = vunpack.i.l.bf16 %v13521_v62  ;;  %v13558_v55 = vunpack.i.h.bf16 %v13556_v63 }
 0x1be   : > { %13825 = vrot.lane.b32.xlu0 %v14740_v58, %s17678_s30  ;;  %v13557_v58 = vunpack.i.l.bf16 %v13556_v63 }
 0x1bf   : > { %v13526_v0 = vpop.permute.xlu1 %13525 }
 0x1c0   : > { %v13561_v2 = vpop.permute.xlu0 %13560 }
 0x1c1   : > { %13780 = vrot.lane.b32.xlu1 %v14678_v40, %s17678_s30  ;;  %v14917_v40 = vand.u32 127, %v846_v9  ;;  %v13562_v53 = vunpack.i.l.bf16 %v13561_v2 }
 0x1c2   : > { %13830 = vrot.lane.b32.xlu0 %v14744_v59, %s17678_s30  ;;  %v13528_v59 = vunpack.i.h.bf16 %v13526_v0 }
 0x1c3   : > { %v14870_v3 = vpop.permute.xlu1 %13530  ;;  %vm943_vm3 = vcmp.lt.s32.totalorder %v14917_v40, 17  ;;  %vm1200_vm4 = vcmp.lt.s32.totalorder %v14917_v40, 16  ;;  %vm1456_vm6 = vcmp.lt.s32.totalorder %v14917_v40, 15  ;;  %vm1712_vm10 = vcmp.lt.s32.totalorder %v14917_v40, 1 }
 0x1c4   : > { %v14872_v4 = vpop.permute.xlu0 %13565  ;;  %v17658_v52 = vunpack.i.h.bf16 %v14870_v3  ;;  %v17659_v49 = vunpack.i.l.bf16 %v14870_v3  ;;  %v14935_v63 = vsel %vm943_vm3, %v13522_v54, %v13557_v58  ;;  %v14959_v60 = vsel %vm943_vm3, %v13562_v53, %v13522_v54 }
 0x1c5   : > { %13790 = vrot.lane.b32.xlu1 %v14682_v41, %s17678_s30  ;;  %v13568_v9 = vunpack.i.h.bf16 %v14872_v4  ;;  %v13567_v57 = vunpack.i.l.bf16 %v14872_v4  ;;  %vm2151_vm11 = vcmp.lt.s32.totalorder %v14917_v40, 127  ;;  %vm2407_vm12 = vcmp.lt.s32.totalorder %v14917_v40, 113 }
 0x1c6   : > { %13835 = vrot.lane.b32.xlu0 %v14696_v45, %s17678_s30  ;;  %vm2663_vm13 = vcmp.lt.s32.totalorder %v14917_v40, 112  ;;  %vm2919_vm14 = vcmp.lt.s32.totalorder %v14917_v40, 111  ;;  %v17515_v40 = vld [vmem:[%s17763_s18 + $0x10] sm:$0xff]  ;;  %s17782_s30 = sld [smem:[#allocation16_spill]] }
 0x1c7   : > { %v14878_v5 = vpop.permute.xlu1 %13535 }
 0x1c8   : > { %v14883_v7 = vpop.permute.xlu0 %13570 }
 0x1c9   : > { %3147 = vperm.xlu1 %13839, %v3143_v8   ;;  %v13563_v8 = vunpack.i.h.bf16 %v13561_v2  ;;  %v14943_v2 = vsel %vm943_vm3, %v13558_v55, %v13528_v59 }
 0x1ca   : > { %3152 = vperm.xlu0 %13518, %v3144_v6   ;;  %v13527_v6 = vunpack.i.l.bf16 %v13526_v0  ;;  %v14939_v0 = vsel %vm943_vm3, %v13523_v44, %v13558_v55 }
 0x1cb   : > { %v14888_v10 = vpop.permute.xlu1 %13540  ;;  %v14955_v61 = vsel %vm943_vm3, %v13528_v59, %v13563_v8  ;;  %v14963_v55 = vsel %vm943_vm3, %v13563_v8, %v13523_v44  ;;  %v14975_v59 = vsel %vm1200_vm4, %v17658_v52, %v13568_v9  ;;  %v13537_v44 = vunpack.i.l.bf16 %v14878_v5 }
 0x1cc   : > { %v14890_v12 = vpop.permute.xlu0 %13575  ;;  %v14947_v4 = vsel %vm943_vm3, %v13557_v58, %v13527_v6  ;;  %v14951_v56 = vsel %vm943_vm3, %v13527_v6, %v13562_v53  ;;  %v14969_v58 = vsel %vm1200_vm4, %v17659_v49, %v13567_v57  ;;  %v13538_v6 = vunpack.i.h.bf16 %v14878_v5  ;;  %s13130_s19 = sshll.u32 %s17782_s30, 6 }
 0x1cd   : > { %v13572_v8 = vunpack.i.l.bf16 %v14883_v7  ;;  %v13135_v1 = vpack.c.bf16 %v14939_v0, %v14935_v63  ;;  %v13145_v11 = vpack.c.bf16 %v14955_v61, %v14951_v56  ;;  %v13573_v63 = vunpack.i.h.bf16 %v14883_v7 }
 0x1ce   : > { %v14997_v5 = vsel %vm1200_vm4, %v13568_v9, %v13538_v6  ;;  %v15006_v15 = vsel %vm1200_vm4, %v13567_v57, %v13537_v44 }
 0x1cf   : > { %v14892_v13 = vpop.permute.xlu1 %13545  ;;  %v15010_v9 = vsel %vm1200_vm4, %v13537_v44, %v13572_v8 }
 0x1d0   : > { %v14894_v14 = vpop.permute.xlu0 %13580 }
 0x1d3   : > { %v14896_v18 = vpop.permute.xlu1 %13550 }
 0x1d4   : > { %v14898_v21 = vpop.permute.xlu0 %13585 }
 0x1d7   : > { %v14900_v22 = vpop.permute.xlu1 %13595 }
 0x1d8   : > { %v14902_v23 = vpop.permute.xlu0 %13590  ;;  %v13598_v0 = vunpack.i.h.bf16 %v14900_v22  ;;  %v13597_v20 = vunpack.i.l.bf16 %v14900_v22 }
 0x1d9   : > { %v13593_v17 = vunpack.i.h.bf16 %v14902_v23  ;;  %v13592_v49 = vunpack.i.l.bf16 %v14902_v23 }
 0x1db   : > { %v14904_v24 = vpop.permute.xlu1 %13600 }
 0x1dc   : > { %v14906_v25 = vpop.permute.xlu0 %13640  ;;  %v13603_v28 = vunpack.i.h.bf16 %v14904_v24 }
 0x1df   : > { %v14908_v26 = vpop.permute.xlu1 %13605 }
 0x1e0   : > { %v14910_v27 = vpop.permute.xlu0 %13660 }
 0x1e3   : > { %v14912_v32 = vpop.permute.xlu1 %13610 }
 0x1e4   : > { %v14914_v33 = vpop.permute.xlu0 %13670 }
 0x1e7   : > { %v14919_v41 = vpop.permute.xlu1 %13615 }
 0x1e8   : > { %v14921_v45 = vpop.permute.xlu0 %13690 }
 0x1eb   : > { %v14928_v48 = vpop.permute.xlu1 %13620 }
 0x1ec   : > { %v14931_v62 = vpop.permute.xlu0 %13700 }
 0x1ef   : > { %v14978_v53 = vpop.permute.xlu1 %13625 }
 0x1f0   : > { %v14980_v54 = vpop.permute.xlu0 %13720 }
 0x1f3   : > { %v13631_v52 = vpop.permute.xlu1 %13630 }
 0x1f4   : > { %v13633_v16 = vunpack.i.h.bf16 %v13631_v52  ;;  %v13632_v56 = vunpack.i.l.bf16 %v13631_v52  ;;  %v13731_v61 = vpop.permute.xlu0 %13730 }
 0x1f5   : > { %v13733_v7 = vunpack.i.h.bf16 %v13731_v61  ;;  %v13732_v19 = vunpack.i.l.bf16 %v13731_v61 }
 0x1f6   : > { %v949_v22 = vsel %vm943_vm3, %v13633_v16, %v13598_v0  ;;  %v948_v31 = vsel %vm943_vm3, %v13632_v56, %v13597_v20  ;;  %v952_v52 = vsel %vm943_vm3, %v13592_v49, %v13632_v56  ;;  %v953_v23 = vsel %vm943_vm3, %v13593_v17, %v13633_v16 }
 0x1f7   : > { %v956_v57 = vsel %vm943_vm3, %v13732_v19, %v13592_v49  ;;  %v957_v44 = vsel %vm943_vm3, %v13733_v7, %v13593_v17  ;;  %v15024_v29 = vpop.permute.xlu1 %13635  ;;  %v13131_v61 = vpack.c.bf16 %v953_v23, %v952_v52  ;;  %v944_v30 = vsel %vm943_vm3, %v13597_v20, %v13732_v19 }
 0x1f8   : > { %v13736_v56 = vpop.permute.xlu0 %13735  ;;  %v13133_v35 = vpack.c.bf16 %v957_v44, %v956_v57  ;;  %v945_v16 = vsel %vm943_vm3, %v13598_v0, %v13733_v7  ;;  %v13577_v17 = vunpack.i.l.bf16 %v14890_v12  ;;  %v13578_v20 = vunpack.i.h.bf16 %v14890_v12 }
 0x1f9   : > { %v13738_v52 = vunpack.i.h.bf16 %v13736_v56  ;;  %v13737_v23 = vunpack.i.l.bf16 %v13736_v56  ;;  %13132 = vmatprep.subr.bf16.mxu0 %v13131_v61  ;;  %v13141_v19 = vpack.c.bf16 %v945_v16, %v944_v30  ;;  %v13602_v57 = vunpack.i.l.bf16 %v14904_v24 }
 0x1fa   : > { %13134 = vmatpush1.bf16.msra.mxu0 %v13133_v35  ;;  %v13143_v0 = vpack.c.bf16 %v949_v22, %v948_v31  ;;  %v15043_v7 = vsel %vm1200_vm4, %v13538_v6, %v13573_v63  ;;  %v17738_v44 = vunpack.i.l.bf16 %v14870_v3  ;;  %v17739_v30 = vunpack.i.h.bf16 %v14870_v3 }
 0x1fb   : > { %13142 = vmatprep.subr.bf16.mxu1 %v13141_v19  ;;  %v15057_v24 = vpop.permute.xlu1 %13645  ;;  %13137 = vmatprep.subr.msk.bf16.mxu0 %vm15033_vm8, %v13135_v1  ;;  %v13608_v31 = vunpack.i.h.bf16 %v14908_v26  ;;  %v13607_v35 = vunpack.i.l.bf16 %v14908_v26  ;;  %v1209_v3 = vsel %vm1200_vm4, %v13602_v57, %v13737_v23  ;;  %v17741_v16 = vunpack.i.h.bf16 %v14888_v10 }
 0x1fc   : > { %v15049_v37 = vsel %vm1200_vm4, %v13572_v8, %v17738_v44  ;;  %v15055_v61 = vsel %vm1200_vm4, %v13573_v63, %v17739_v30  ;;  %13144 = vmatpush1.bf16.msra.mxu1 %v13143_v0  ;;  %v13741_v6 = vpop.permute.xlu0 %13740  ;;  %v1210_v8 = vsel %vm1200_vm4, %v13603_v28, %v13738_v52  ;;  %v17740_v63 = vunpack.i.l.bf16 %v14888_v10 }
 0x1fd   : > { %v13743_v22 = vunpack.i.h.bf16 %v13741_v6  ;;  %v13742_v56 = vunpack.i.l.bf16 %v13741_v6  ;;  %13147 = vmatprep.subr.msk.bf16.mxu1 %vm15033_vm8, %v13145_v11  ;;  %v13151_v26 = vpack.c.bf16 %v1210_v8, %v1209_v3  ;;  %v15081_v19 = vsel %vm1456_vm6, %v17741_v16, %v13578_v20  ;;  %v960_v11 = vld [vmem:[%s17625_s5] sm:$0xff] }
 0x1fe   : > { %v15073_v1 = vsel %vm1456_vm6, %v17740_v63, %v13577_v17  ;;  %v13548_v0 = vunpack.i.h.bf16 %v14892_v13  ;;  %v1206_v44 = vsel %vm1200_vm4, %v13738_v52, %v13608_v31  ;;  %v1205_v30 = vsel %vm1200_vm4, %v13737_v23, %v13607_v35 }
 0x1ff   : > { %v17742_v6 = vpack.c.bf16 %v14963_v55, %v14959_v60  ;;  %v1214_v3 = vsel %vm1200_vm4, %v13743_v22, %v13603_v28  ;;  %v1213_v8 = vsel %vm1200_vm4, %v13742_v56, %v13602_v57  ;;  %v15100_v52 = vpop.permute.xlu1 %13650  ;;  %v1201_v23 = vsel %vm1200_vm4, %v13607_v35, %v13742_v56 }
 0x200   : > { %v1202_v60 = vsel %vm1200_vm4, %v13608_v31, %v13743_v22  ;;  %v13547_v55 = vunpack.i.l.bf16 %v14892_v13  ;;  %v13582_v63 = vunpack.i.l.bf16 %v14894_v14  ;;  %v17743_v16 = vpack.c.bf16 %v14943_v2, %v14947_v4  ;;  %v15113_v28 = vpop.permute.xlu0 %13745 }
 0x201   : > { %13140 = vmatpush1.bf16.msk.msra.mxu0 %vm15033_vm8, %v17742_v6  ;;  %v13153_v57 = vpack.c.bf16 %v1214_v3, %v1213_v8  ;;  %v13583_v6 = vunpack.i.h.bf16 %v14894_v14  ;;  %v13612_v35 = vunpack.i.l.bf16 %v14912_v32  ;;  %v13748_v31 = vunpack.i.h.bf16 %v15113_v28  ;;  %v961_v14 = vld [vmem:[%s17625_s5 + $0x8] sm:$0xff] }
 0x202   : > { %13152 = vmatprep.subr.bf16.mxu0 %v13151_v26  ;;  %13150 = vmatpush1.bf16.msk.msra.mxu1 %vm15033_vm8, %v17743_v16  ;;  %v13161_v26 = vpack.c.bf16 %v1202_v60, %v1201_v23  ;;  %v13747_v13 = vunpack.i.l.bf16 %v15113_v28  ;;  %v13168_v2 = vpack.c.bf16 %v14997_v5, %v15006_v15  ;;  %v13613_v4 = vunpack.i.h.bf16 %v14912_v32 }
 0x203   : > { %v13163_v22 = vpack.c.bf16 %v1206_v44, %v1205_v30  ;;  %v13165_v56 = vpack.c.bf16 %v15043_v7, %v15010_v9  ;;  %v13158_v3 = vpack.c.bf16 %v15055_v61, %v15049_v37  ;;  %v15131_v8 = vpop.permute.xlu1 %13655  ;;  %v17744_v15 = vpack.c.bf16 %v14975_v59, %v14969_v58 }
 0x204   : > { %12847 = vmatmul.mubr.msk.f32.vlgmr.msra.gmra.mrb[2].mxu0 %vm962_vm9, %v960_v11  ;;  %13162 = vmatprep.subr.bf16.mxu1 %v13161_v26  ;;  %v1465_v32 = vsel %vm1456_vm6, %v13612_v35, %v13747_v13  ;;  %v13175_v5 = vpack.c.bf16 %v15081_v19, %v15073_v1  ;;  %v15145_v37 = vsel %vm1456_vm6, %v13578_v20, %v13548_v0  ;;  %v13751_v58 = vpop.permute.xlu0 %13750  ;;  %v17745_v59 = vmov 0.0  }
 0x205   : > { %13154 = vmatpush1.bf16.msra.mxu0 %v13153_v57  ;;  %12851 = vmatmul.mubr.msk.f32.vlgmr.msra.gmra.mrb[2].mxu1 %vm962_vm9, %v960_v11  ;;  %v15149_v9 = vsel %vm1456_vm6, %v13547_v55, %v13582_v63  ;;  %v1466_v7 = vsel %vm1456_vm6, %v13613_v4, %v13748_v31  ;;  %v15156_v61 = vsel %vm1456_vm6, %v13548_v0, %v13583_v6  ;;  %v13753_v1 = vunpack.i.h.bf16 %v13751_v58 }
 0x206   : > { %13157 = vmatprep.subr.msk.bf16.mxu0 %vm15033_vm8, %v17744_v15  ;;  %13164 = vmatpush1.bf16.msra.mxu1 %v13163_v22  ;;  %v13752_v19 = vunpack.i.l.bf16 %v13751_v58  ;;  %v13171_v20 = vpack.c.bf16 %v1466_v7, %v1465_v32  ;;  %v15165_v44 = vsel %vm1456_vm6, %v13577_v17, %v13547_v55  ;;  %v17746_v30 = vunpack.i.l.bf16 %v14888_v10 }
 0x207   : > { %1052 = vmatprep.mubr.f32.mxu0 %v17745_v59  ;;  %13167 = vmatprep.subr.msk.bf16.mxu1 %vm15033_vm8, %v13165_v56  ;;  %v13552_v11 = vunpack.i.l.bf16 %v14896_v18  ;;  %v13587_v23 = vunpack.i.l.bf16 %v14898_v21  ;;  %v13618_v60 = vunpack.i.h.bf16 %v14919_v41  ;;  %v13617_v16 = vunpack.i.l.bf16 %v14919_v41  ;;  %v15183_v55 = vpop.permute.xlu1 %13665 }
 0x208   : > { %12848 = vmatmul.mubr.msk.f32.gmra.mrb[4].mxu0 %vm962_vm9, %v961_v14  ;;  %v1471_v0 = vsel %vm1456_vm6, %v13582_v63, %v17746_v30  ;;  %1129 = vmatprep.mubr.f32.mxu1 %v17745_v59  ;;  %v1470_v12 = vsel %vm1456_vm6, %v13753_v1, %v13613_v4  ;;  %v1469_v17 = vsel %vm1456_vm6, %v13752_v19, %v13612_v35  ;;  %v12853_v63 = vld [vmem:[%s17625_s5 + $0x10] sm:$0xff]  ;;  %v17747_v28 = vunpack.i.h.bf16 %v14888_v10  ;;  %v13756_v26 = vpop.permute.xlu0 %13755 }
 0x209   : > { %12852 = vmatmul.mubr.msk.f32.gmra.mrb[4].mxu1 %vm962_vm9, %v961_v14  ;;  %13160 = vmatpush1.bf16.msk.msra.mxu0 %vm15033_vm8, %v13158_v3  ;;  %v13553_v57 = vunpack.i.h.bf16 %v14896_v18  ;;  %v13173_v35 = vpack.c.bf16 %v1470_v12, %v1469_v17  ;;  %v13185_v4 = vpack.c.bf16 %v15156_v61, %v15149_v9  ;;  %v13758_v22 = vunpack.i.h.bf16 %v13756_v26 }
 0x20a   : > { %v1472_v41 = vsel %vm1456_vm6, %v13583_v6, %v17747_v28  ;;  %13170 = vmatpush1.bf16.msk.msra.mxu1 %vm15033_vm8, %v13168_v2  ;;  %13172 = vmatprep.subr.bf16.mxu0 %v13171_v20  ;;  %v13757_v56 = vunpack.i.l.bf16 %v13756_v26  ;;  %v1457_v10 = vsel %vm1456_vm6, %v13617_v16, %v13752_v19  ;;  %v1458_v6 = vsel %vm1456_vm6, %v13618_v60, %v13753_v1 }
 0x20b   : > { %1302 = vmatprep.mubr.f32.mxu0 %v17745_v59  ;;  %1379 = vmatprep.mubr.f32.mxu1 %v17745_v59  ;;  %v13588_v2 = vunpack.i.h.bf16 %v14898_v21  ;;  %v13622_v14 = vunpack.i.l.bf16 %v14928_v48  ;;  %v1462_v3 = vsel %vm1456_vm6, %v13748_v31, %v13618_v60  ;;  %v1461_v15 = vsel %vm1456_vm6, %v13747_v13, %v13617_v16  ;;  %v15219_v31 = vpop.permute.xlu1 %13675  ;;  %v12854_v13 = vld [vmem:[%s17625_s5 + $0x18] sm:$0xff] }
 0x20c   : > { %12857 = vmatmul.mubr.msk.f32.vlgmr.msra.gmra.mrb[6].mxu0 %vm962_vm9, %v12853_v63  ;;  %v13178_v32 = vpack.c.bf16 %v1472_v41, %v1471_v0  ;;  %v1723_v9 = vsel %vm1712_vm10, %v13552_v11, %v13587_v23  ;;  %v13643_v58 = vunpack.i.h.bf16 %v14906_v25  ;;  %v13623_v7 = vunpack.i.h.bf16 %v14928_v48  ;;  %v13761_v20 = vpop.permute.xlu0 %13760 }
 0x20d   : > { %12861 = vmatmul.mubr.msk.f32.vlgmr.msra.gmra.mrb[6].mxu1 %vm962_vm9, %v12853_v63  ;;  %13174 = vmatpush1.bf16.msra.mxu0 %v13173_v35  ;;  %v13642_v61 = vunpack.i.l.bf16 %v14906_v25  ;;  %v13627_v1 = vunpack.i.l.bf16 %v14978_v53  ;;  %v13181_v19 = vpack.c.bf16 %v1458_v6, %v1457_v10  ;;  %v1721_v48 = vsel %vm1712_vm10, %v13622_v14, %v13757_v56 }
 0x20e   : > { %13177 = vmatprep.subr.msk.bf16.mxu0 %vm15033_vm8, %v13175_v5  ;;  %1308 = vmatprep.mubr.f32.mxu0 %v17745_v59  ;;  %v13183_v30 = vpack.c.bf16 %v1462_v3, %v1461_v15  ;;  %v13763_v0 = vunpack.i.h.bf16 %v13761_v20  ;;  %v13762_v60 = vunpack.i.l.bf16 %v13761_v20  ;;  %v1722_v25 = vsel %vm1712_vm10, %v13623_v7, %v13758_v22 }
 0x20f   : > { %1385 = vmatprep.mubr.f32.mxu1 %v17745_v59  ;;  %v1724_v16 = vsel %vm1712_vm10, %v13553_v57, %v13588_v2  ;;  %v13628_v5 = vunpack.i.h.bf16 %v14978_v53  ;;  %v13638_v12 = vunpack.i.h.bf16 %v15024_v29  ;;  %13182 = vmatprep.subr.bf16.mxu1 %v13181_v19  ;;  %v13191_v17 = vpack.c.bf16 %v1722_v25, %v1721_v48  ;;  %v15248_v26 = vpop.permute.xlu1 %13680  ;;  %v12863_v53 = vld [vmem:[%s17625_s5 + $0x20] sm:$0xff] }
 0x210   : > { %12858 = vmatmul.mubr.msk.f32.gmra.mrb[8].mxu0 %vm962_vm9, %v12854_v13  ;;  %v13637_v63 = vunpack.i.l.bf16 %v15024_v29  ;;  %13184 = vmatpush1.bf16.msra.mxu1 %v13183_v30  ;;  %v1726_v28 = vsel %vm1712_vm10, %v13763_v0, %v13623_v7  ;;  %v1725_v41 = vsel %vm1712_vm10, %v13762_v60, %v13622_v14  ;;  %v1713_v35 = vsel %vm1712_vm10, %v13627_v1, %v13762_v60  ;;  %v15260_v10 = vpop.permute.xlu0 %13765 }
 0x211   : > { %13180 = vmatpush1.bf16.msk.msra.mxu0 %vm15033_vm8, %v13178_v32  ;;  %v13188_v29 = vpack.c.bf16 %v15145_v37, %v15165_v44  ;;  %13187 = vmatprep.subr.msk.bf16.mxu1 %vm15033_vm8, %v13185_v4  ;;  %v13193_v6 = vpack.c.bf16 %v1726_v28, %v1725_v41  ;;  %v1714_v14 = vsel %vm1712_vm10, %v13628_v5, %v13763_v0  ;;  %v13663_v32 = vunpack.i.h.bf16 %v14910_v27 }
 0x212   : > { %12862 = vmatmul.mubr.msk.f32.gmra.mrb[8].mxu1 %vm962_vm9, %v12854_v13  ;;  %v1728_v3 = vsel %vm1712_vm10, %v13643_v58, %v13553_v57  ;;  %v1727_v15 = vsel %vm1712_vm10, %v13642_v61, %v13552_v11  ;;  %13192 = vmatprep.subr.bf16.mxu0 %v13191_v17  ;;  %v13201_v37 = vpack.c.bf16 %v1714_v14, %v1713_v35  ;;  %v13662_v7 = vunpack.i.l.bf16 %v14910_v27  ;;  %v12864_v13 = vld [vmem:[%s17625_s5 + $0x28] sm:$0xff] }
 0x213   : > { %1558 = vmatprep.mubr.f32.mxu0 %v17745_v59  ;;  %v1718_v44 = vsel %vm1712_vm10, %v13758_v22, %v13628_v5  ;;  %v1717_v4 = vsel %vm1712_vm10, %v13757_v56, %v13627_v1  ;;  %1635 = vmatprep.mubr.f32.mxu1 %v17745_v59  ;;  %v13195_v57 = vpack.c.bf16 %v1724_v16, %v1723_v9  ;;  %v15284_v22 = vpop.permute.xlu1 %13685  ;;  %v13657_v1 = vunpack.i.l.bf16 %v15131_v8 }
 0x214   : > { %12867 = vmatmul.mubr.msk.f32.vlgmr.msra.gmra.mrb[10].mxu0 %vm962_vm9, %v12863_v53  ;;  %v1715_v18 = vsel %vm1712_vm10, %v13637_v63, %v13642_v61  ;;  %v1716_v11 = vsel %vm1712_vm10, %v13638_v12, %v13643_v58  ;;  %13190 = vmatpush1.bf16.msk.msra.mxu1 %vm15033_vm8, %v13188_v29  ;;  %v13198_v56 = vpack.c.bf16 %v1728_v3, %v1727_v15  ;;  %v15294_v58 = vpop.permute.xlu0 %13785  ;;  %v13658_v61 = vunpack.i.h.bf16 %v15131_v8 }
 0x215   : > { %13194 = vmatpush1.bf16.msra.mxu0 %v13193_v6  ;;  %v1720_v9 = vsel %vm1712_vm10, %v13588_v2, %v13638_v12  ;;  %13202 = vmatprep.subr.bf16.mxu1 %v13201_v37  ;;  %v1719_v27 = vsel %vm1712_vm10, %v13587_v23, %v13637_v63  ;;  %v13203_v2 = vpack.c.bf16 %v1718_v44, %v1717_v4  ;;  %v13673_v19 = vunpack.i.h.bf16 %v14914_v33 }
 0x216   : > { %13197 = vmatprep.subr.msk.bf16.mxu0 %vm15033_vm8, %v13195_v57  ;;  %1564 = vmatprep.mubr.f32.mxu0 %v17745_v59  ;;  %v13668_v20 = vunpack.i.h.bf16 %v15183_v55  ;;  %v13667_v48 = vunpack.i.l.bf16 %v15183_v55  ;;  %v13205_v30 = vpack.c.bf16 %v1716_v11, %v1715_v18  ;;  %v13672_v21 = vunpack.i.l.bf16 %v14914_v33 }
 0x217   : > { %12871 = vmatmul.mubr.msk.f32.vlgmr.msra.gmra.mrb[10].mxu1 %vm962_vm9, %v12863_v53  ;;  %v13693_v23 = vunpack.i.h.bf16 %v14921_v45  ;;  %v13692_v8 = vunpack.i.l.bf16 %v14921_v45  ;;  %v13703_v0 = vunpack.i.h.bf16 %v14931_v62  ;;  %v15316_v60 = vpop.permute.xlu1 %13695  ;;  %v13702_v55 = vunpack.i.l.bf16 %v14931_v62  ;;  %v12884_v62 = vld [vmem:[%s17625_s5 + $0x48] sm:$0xff] }
 0x218   : > { %13204 = vmatpush1.bf16.msra.mxu1 %v13203_v2  ;;  %12868 = vmatmul.mubr.msk.f32.gmra.mrb[12].mxu0 %vm962_vm9, %v12864_v13  ;;  %v13208_v25 = vpack.c.bf16 %v1720_v9, %v1719_v27  ;;  %v13653_v16 = vunpack.i.h.bf16 %v15100_v52  ;;  %v13652_v5 = vunpack.i.l.bf16 %v15100_v52  ;;  %v13796_v33 = vpop.permute.xlu0 %13795  ;;  %v15326_v12 = vsel %vm2151_vm11, %v13657_v1, %v13662_v7  ;;  %v12873_v52 = vld [vmem:[%s17625_s5 + $0x30] sm:$0xff] }
 0x219   : > { %13207 = vmatprep.subr.msk.bf16.mxu1 %vm15033_vm8, %v13205_v30  ;;  %1641 = vmatprep.mubr.f32.mxu1 %v17745_v59  ;;  %v15330_v17 = vsel %vm2151_vm11, %v13658_v61, %v13663_v32  ;;  %v13798_v63 = vunpack.i.h.bf16 %v13796_v33  ;;  %v13797_v28 = vunpack.i.l.bf16 %v13796_v33  ;;  %v15340_v41 = vsel %vm2151_vm11, %v13672_v21, %v13657_v1  ;;  %v17753_v30 = vld [vmem:[#allocation31_spill] sm:$0xff] }
 0x21a   : > { %13200 = vmatpush1.bf16.msk.msra.mxu0 %vm15033_vm8, %v13198_v56  ;;  %1814 = vmatprep.mubr.f32.mxu0 %v17745_v59  ;;  %v15344_v53 = vsel %vm2151_vm11, %v13673_v19, %v13658_v61  ;;  %v15348_v35 = vsel %vm2151_vm11, %v13667_v48, %v13672_v21  ;;  %v15352_v29 = vsel %vm2151_vm11, %v13668_v20, %v13673_v19  ;;  %v13723_v6 = vunpack.i.h.bf16 %v14980_v54  ;;  %v17754_v21 = vld [vmem:[#allocation32_spill] sm:$0xff] }
 0x21b   : > { %12872 = vmatmul.mubr.msk.f32.gmra.mrb[12].mxu1 %vm962_vm9, %v12864_v13  ;;  %v13648_v14 = vunpack.i.h.bf16 %v15057_v24  ;;  %v15359_v3 = vsel %vm2151_vm11, %v13662_v7, %v13667_v48  ;;  %v15363_v15 = vsel %vm2151_vm11, %v13663_v32, %v13668_v20  ;;  %v17748_v37 = vpack.c.bf16 %v14685_v42, %v14714_v50  ;;  %v15370_v44 = vpop.permute.xlu1 %13705  ;;  %v12874_v32 = vld [vmem:[%s17625_s5 + $0x38] sm:$0xff] }
 0x21c   : > { %13210 = vmatpush1.bf16.msk.msra.mxu1 %vm15033_vm8, %v13208_v25  ;;  %v13647_v4 = vunpack.i.l.bf16 %v15057_v24  ;;  %v13238_v57 = vpack.c.bf16 %v15330_v17, %v15326_v12  ;;  %v17749_v18 = vpack.c.bf16 %v14688_v43, %v14718_v51  ;;  %v13801_v11 = vpop.permute.xlu0 %13800  ;;  %v2156_v56 = vsel %vm2151_vm11, %v13797_v28, %v13652_v5  ;;  %1891 = vmatprep.mubr.f32.mxu1 %v17745_v59 }
 0x21d   : > { %13212 = vmatprep.subr.bf16.mxu0 %v17748_v37  ;;  %12877 = vmatmul.mubr.msk.f32.vlgmr.msra.gmra.mrb[14].mxu0 %vm962_vm9, %v12873_v52  ;;  %v2157_v42 = vsel %vm2151_vm11, %v13798_v63, %v13653_v16  ;;  %v13248_v50 = vpack.c.bf16 %v15352_v29, %v15348_v35  ;;  %v17750_v24 = vpack.c.bf16 %v14671_v38, %v14700_v46  ;;  %v13803_v43 = vunpack.i.h.bf16 %v13801_v11 }
 0x21e   : > { %13222 = vmatprep.subr.bf16.mxu1 %v17749_v18  ;;  %v13802_v51 = vunpack.i.l.bf16 %v13801_v11  ;;  %v13245_v7 = vpack.c.bf16 %v15344_v53, %v15340_v41  ;;  %v13688_v9 = vunpack.i.h.bf16 %v15284_v22  ;;  %v13687_v13 = vunpack.i.l.bf16 %v15284_v22  ;;  %1820 = vmatprep.mubr.f32.mxu0 %v17745_v59 }
 0x21f   : > { %13214 = vmatpush1.bf16.msra.mxu0 %v17750_v24  ;;  %12881 = vmatmul.mubr.msk.f32.vlgmr.msra.gmra.mrb[14].mxu1 %vm962_vm9, %v12873_v52  ;;  %v17751_v27 = vpack.c.bf16 %v14662_v34, %v14666_v36  ;;  %v13231_v38 = vpack.c.bf16 %v2157_v42, %v2156_v56  ;;  %v13235_v46 = vpack.c.bf16 %v15363_v15, %v15359_v3  ;;  %v13722_v61 = vunpack.i.l.bf16 %v14980_v54  ;;  %v15413_v34 = vpop.permute.xlu1 %13710  ;;  %v12883_v3 = vld [vmem:[%s17625_s5 + $0x40] sm:$0xff]  ;;  %v17759_v56 = vld [vmem:[#allocation28_spill] sm:$0xff] }
 0x220   : > { %v2161_v1 = vsel %vm2151_vm11, %v13648_v14, %v13798_v63  ;;  %v2160_v22 = vsel %vm2151_vm11, %v13647_v4, %v13797_v28  ;;  %v17752_v2 = vpack.c.bf16 %v14674_v39, %v14704_v47  ;;  %v2164_v36 = vsel %vm2151_vm11, %v13802_v51, %v13647_v4  ;;  %v13806_v39 = vpop.permute.xlu0 %13805  ;;  %1897 = vmatprep.mubr.f32.mxu1 %v17745_v59  ;;  %v17760_v42 = vld [vmem:[#allocation30_spill] sm:$0xff] }
 0x221   : > { %13217 = vmatprep.subr.msk.bf16.mxu0 %vm15033_vm8, %v17751_v27  ;;  %v13683_v19 = vunpack.i.h.bf16 %v15248_v26  ;;  %v2153_v20 = vsel %vm2151_vm11, %v13653_v16, %v13803_v43  ;;  %v2152_v48 = vsel %vm2151_vm11, %v13652_v5, %v13802_v51  ;;  %v17755_v25 = vpack.c.bf16 %v17753_v30, %v17754_v21  ;;  %12878 = vmatmul.mubr.msk.f32.gmra.mrb[16].mxu0 %vm962_vm9, %v12874_v32  ;;  %v17756_v16 = vld [vmem:[#allocation27_spill] sm:$0xff]  ;;  %v17757_v5 = vld [vmem:[#allocation29_spill] sm:$0xff] }
 0x222   : > { %13224 = vmatpush1.bf16.msra.mxu1 %v17752_v2  ;;  %v2165_v47 = vsel %vm2151_vm11, %v13803_v43, %v13648_v14  ;;  %v13697_v33 = vunpack.i.l.bf16 %v15316_v60  ;;  %v17758_v63 = vpack.c.bf16 %v17756_v16, %v17757_v5  ;;  %v13808_v28 = vunpack.i.h.bf16 %v13806_v39  ;;  %2021 = vmatprep.mubr.f32.mxu0 %v17745_v59 }
 0x223   : > { %13227 = vmatprep.subr.msk.bf16.mxu1 %vm15033_vm8, %v17755_v25  ;;  %v13807_v52 = vunpack.i.l.bf16 %v13806_v39  ;;  %v13241_v15 = vpack.c.bf16 %v2165_v47, %v2164_v36  ;;  %v13682_v14 = vunpack.i.l.bf16 %v15248_v26  ;;  %v15446_v37 = vsel %vm2407_vm12, %v13687_v13, %v13692_v8  ;;  %12882 = vmatmul.mubr.msk.f32.gmra.mrb[16].mxu1 %vm962_vm9, %v12874_v32  ;;  %v15469_v43 = vpop.permute.xlu1 %13715 }
 0x224   : > { %13220 = vmatpush1.bf16.msk.msra.mxu0 %vm15033_vm8, %v17758_v63  ;;  %v15452_v4 = vsel %vm2407_vm12, %v13688_v9, %v13693_v23  ;;  %v13698_v18 = vunpack.i.h.bf16 %v15316_v60  ;;  %v13678_v11 = vunpack.i.h.bf16 %v15219_v31  ;;  %v15461_v26 = vsel %vm2407_vm12, %v13702_v55, %v13687_v13  ;;  %2098 = vmatprep.mubr.f32.mxu1 %v17745_v59  ;;  %v13811_v27 = vpop.permute.xlu0 %13810  ;;  %v12893_v63 = vld [vmem:[%s17625_s5 + $0x50] sm:$0xff] }
 0x225   : > { %13232 = vmatprep.subr.bf16.mxu0 %v13231_v38  ;;  %v17761_v24 = vpack.c.bf16 %v17759_v56, %v17760_v42  ;;  %v13233_v60 = vpack.c.bf16 %v2161_v1, %v2160_v22  ;;  %v13243_v51 = vpack.c.bf16 %v2153_v20, %v2152_v48  ;;  %v13677_v32 = vunpack.i.l.bf16 %v15219_v31 }
 0x226   : > { %v15476_v13 = vsel %vm2407_vm12, %v13703_v0, %v13688_v9  ;;  %v2412_v38 = vsel %vm2407_vm12, %v13807_v52, %v13682_v14  ;;  %v2413_v1 = vsel %vm2407_vm12, %v13808_v28, %v13683_v19  ;;  %v13258_v31 = vpack.c.bf16 %v15452_v4, %v15446_v37 }
 0x227   : > { %13230 = vmatpush1.bf16.msk.msra.mxu1 %vm15033_vm8, %v17761_v24  ;;  %12887 = vmatmul.mubr.msk.f32.vlgmr.msra.gmra.mrb[18].mxu0 %vm962_vm9, %v12883_v3  ;;  %v15490_v9 = vsel %vm2407_vm12, %v13697_v33, %v13702_v55  ;;  %v13813_v22 = vunpack.i.h.bf16 %v13811_v27  ;;  %v13812_v2 = vunpack.i.l.bf16 %v13811_v27  ;;  %v15496_v36 = vsel %vm2407_vm12, %v13698_v18, %v13703_v0 }
 0x228   : > { %13234 = vmatpush1.bf16.msra.mxu0 %v13233_v60  ;;  %13242 = vmatprep.subr.bf16.mxu1 %v13241_v15  ;;  %v2414_v20 = vsel %vm2407_vm12, %v13692_v8, %v13697_v33  ;;  %v2415_v55 = vsel %vm2407_vm12, %v13693_v23, %v13698_v18  ;;  %v2417_v48 = vsel %vm2407_vm12, %v13678_v11, %v13808_v28  ;;  %v13767_v0 = vunpack.i.l.bf16 %v15260_v10  ;;  %v15519_v23 = vpop.permute.xlu1 %13725  ;;  %v12894_v60 = vld [vmem:[%s17625_s5 + $0x58] sm:$0xff] }
 0x229   : > { %v2416_v30 = vsel %vm2407_vm12, %v13677_v32, %v13807_v52  ;;  %13237 = vmatprep.subr.msk.bf16.mxu0 %vm15033_vm8, %v13235_v46  ;;  %v2409_v45 = vsel %vm2407_vm12, %v13683_v19, %v13813_v22  ;;  %v13251_v8 = vpack.c.bf16 %v2413_v1, %v2412_v38  ;;  %v13717_v21 = vunpack.i.l.bf16 %v15469_v43  ;;  %2027 = vmatprep.mubr.f32.mxu0 %v17745_v59  ;;  %v13816_v46 = vpop.permute.xlu0 %13815 }
 0x22a   : > { %12891 = vmatmul.mubr.msk.f32.vlgmr.msra.gmra.mrb[18].mxu1 %vm962_vm9, %v12883_v3  ;;  %v2408_v25 = vsel %vm2407_vm12, %v13682_v14, %v13812_v2  ;;  %v2420_v19 = vsel %vm2407_vm12, %v13812_v2, %v13677_v32  ;;  %v2421_v39 = vsel %vm2407_vm12, %v13813_v22, %v13678_v11  ;;  %v13718_v47 = vunpack.i.h.bf16 %v15469_v43 }
 0x22b   : > { %13244 = vmatpush1.bf16.msra.mxu1 %v13243_v51  ;;  %12888 = vmatmul.mubr.msk.f32.gmra.mrb[20].mxu0 %vm962_vm9, %v12884_v62  ;;  %v13818_v33 = vunpack.i.h.bf16 %v13816_v46  ;;  %v13817_v41 = vunpack.i.l.bf16 %v13816_v46  ;;  %v13261_v53 = vpack.c.bf16 %v2421_v39, %v2420_v19  ;;  %v13712_v16 = vunpack.i.l.bf16 %v15413_v34 }
 0x22c   : > { %13247 = vmatprep.subr.msk.bf16.mxu1 %vm15033_vm8, %v13245_v7  ;;  %2104 = vmatprep.mubr.f32.mxu1 %v17745_v59  ;;  %v13268_v7 = vpack.c.bf16 %v15496_v36, %v15490_v9  ;;  %v13727_v5 = vunpack.i.l.bf16 %v15519_v23  ;;  %v13265_v28 = vpack.c.bf16 %v15476_v13, %v15461_v26  ;;  %v13708_v52 = vunpack.i.h.bf16 %v15370_v44  ;;  %v15560_v12 = vpop.permute.xlu1 %13770 }
 0x22d   : > { %13240 = vmatpush1.bf16.msk.msra.mxu0 %vm15033_vm8, %v13238_v57  ;;  %v13713_v3 = vunpack.i.h.bf16 %v15413_v34  ;;  %v13255_v17 = vpack.c.bf16 %v2415_v55, %v2414_v20  ;;  %v13263_v57 = vpack.c.bf16 %v2409_v45, %v2408_v25  ;;  %v13707_v15 = vunpack.i.l.bf16 %v15370_v44  ;;  %2253 = vmatprep.mubr.f32.mxu0 %v17745_v59  ;;  %v13821_v29 = vpop.permute.xlu0 %13820 }
 0x22e   : > { %12892 = vmatmul.mubr.msk.f32.gmra.mrb[20].mxu1 %vm962_vm9, %v12884_v62  ;;  %13252 = vmatprep.subr.bf16.mxu0 %v13251_v8  ;;  %v15567_v14 = vsel %vm2663_vm13, %v13717_v21, %v13722_v61  ;;  %v13253_v35 = vpack.c.bf16 %v2417_v48, %v2416_v30  ;;  %v15579_v44 = vsel %vm2663_vm13, %v13718_v47, %v13723_v6  ;;  %v13823_v34 = vunpack.i.h.bf16 %v13821_v29 }
 0x22f   : > { %13250 = vmatpush1.bf16.msk.msra.mxu1 %vm15033_vm8, %v13248_v50  ;;  %2330 = vmatprep.mubr.f32.mxu1 %v17745_v59  ;;  %v2668_v50 = vsel %vm2663_vm13, %v13817_v41, %v13712_v16  ;;  %v13822_v18 = vunpack.i.l.bf16 %v13821_v29  ;;  %v2669_v11 = vsel %vm2663_vm13, %v13818_v33, %v13713_v3  ;;  %v15586_v26 = vsel %vm2663_vm13, %v13767_v0, %v13717_v21  ;;  %v12903_v21 = vld [vmem:[%s17625_s5 + $0x60] sm:$0xff] }
 0x230   : > { %12897 = vmatmul.mubr.msk.f32.vlgmr.msra.gmra.mrb[22].mxu0 %vm962_vm9, %v12893_v63  ;;  %13262 = vmatprep.subr.bf16.mxu1 %v13261_v53  ;;  %v13728_v56 = vunpack.i.h.bf16 %v15519_v23  ;;  %v15591_v42 = vsel %vm2663_vm13, %v13727_v5, %v13767_v0  ;;  %v2673_v24 = vsel %vm2663_vm13, %v13708_v52, %v13818_v33  ;;  %v13768_v51 = vunpack.i.h.bf16 %v15260_v10  ;;  %v13776_v13 = vpop.permute.xlu1 %13775 }
 0x231   : > { %13254 = vmatpush1.bf16.msra.mxu0 %v13253_v35  ;;  %v2665_v32 = vsel %vm2663_vm13, %v13713_v3, %v13823_v34  ;;  %v13271_v27 = vpack.c.bf16 %v2669_v11, %v2668_v50  ;;  %v2676_v38 = vsel %vm2663_vm13, %v13822_v18, %v13707_v15  ;;  %v2664_v1 = vsel %vm2663_vm13, %v13712_v16, %v13822_v18  ;;  %v13826_v2 = vpop.permute.xlu0 %13825  ;;  %v12904_v16 = vld [vmem:[%s17625_s5 + $0x68] sm:$0xff]  ;;  %v12913_v11 = vld [vmem:[%s17625_s5 + $0x70] sm:$0xff] }
 0x232   : > { %12901 = vmatmul.mubr.msk.f32.vlgmr.msra.gmra.mrb[22].mxu1 %vm962_vm9, %v12893_v63  ;;  %13257 = vmatprep.subr.msk.bf16.mxu0 %vm15033_vm8, %v13255_v17  ;;  %v13778_v10 = vunpack.i.h.bf16 %v13776_v13  ;;  %v13777_v22 = vunpack.i.l.bf16 %v13776_v13  ;;  %v2677_v20 = vsel %vm2663_vm13, %v13823_v34, %v13708_v52  ;;  %v2672_v55 = vsel %vm2663_vm13, %v13707_v15, %v13817_v41 }
 0x233   : > { %13264 = vmatpush1.bf16.msra.mxu1 %v13263_v57  ;;  %2259 = vmatprep.mubr.f32.mxu0 %v17745_v59  ;;  %v13828_v48 = vunpack.i.h.bf16 %v13826_v2  ;;  %v13827_v62 = vunpack.i.l.bf16 %v13826_v2  ;;  %v13281_v0 = vpack.c.bf16 %v2677_v20, %v2676_v38  ;;  %v13788_v30 = vunpack.i.h.bf16 %v15294_v58  ;;  %v12924_v2 = vld [vmem:[%s17625_s5 + $0x88] sm:$0xff] }
 0x234   : > { %13267 = vmatprep.subr.msk.bf16.mxu1 %vm15033_vm8, %v13265_v28  ;;  %12898 = vmatmul.mubr.msk.f32.gmra.mrb[24].mxu0 %vm962_vm9, %v12894_v60  ;;  %v2667_v45 = vsel %vm2663_vm13, %v13728_v56, %v13768_v51  ;;  %v2670_v23 = vsel %vm2663_vm13, %v13722_v61, %v13727_v5  ;;  %v2671_v8 = vsel %vm2663_vm13, %v13723_v6, %v13728_v56  ;;  %v13773_v61 = vunpack.i.h.bf16 %v15560_v12  ;;  %v13781_v37 = vpop.permute.xlu1 %13780 }
 0x235   : > { %2336 = vmatprep.mubr.f32.mxu1 %v17745_v59  ;;  %13260 = vmatpush1.bf16.msk.msra.mxu0 %vm15033_vm8, %v13258_v31  ;;  %v2679_v54 = vsel %vm2663_vm13, %v13768_v51, %v13718_v47  ;;  %v13278_v6 = vpack.c.bf16 %v15579_v44, %v15567_v14  ;;  %v13283_v4 = vpack.c.bf16 %v2665_v32, %v2664_v1  ;;  %v13772_v31 = vunpack.i.l.bf16 %v15560_v12  ;;  %v13831_v25 = vpop.permute.xlu0 %13830  ;;  %v12914_v1 = vld [vmem:[%s17625_s5 + $0x78] sm:$0xff] }
 0x236   : > { %12902 = vmatmul.mubr.msk.f32.gmra.mrb[24].mxu1 %vm962_vm9, %v12894_v60  ;;  %13272 = vmatprep.subr.bf16.mxu0 %v13271_v27  ;;  %v13273_v43 = vpack.c.bf16 %v2673_v24, %v2672_v55  ;;  %v2924_v46 = vsel %vm2919_vm14, %v13827_v62, %v13777_v22  ;;  %v2925_v9 = vsel %vm2919_vm14, %v13828_v48, %v13778_v10  ;;  %v13833_v39 = vunpack.i.h.bf16 %v13831_v25 }
 0x237   : > { %13270 = vmatpush1.bf16.msk.msra.mxu1 %vm15033_vm8, %v13268_v7  ;;  %2509 = vmatprep.mubr.f32.mxu0 %v17745_v59  ;;  %v13288_v36 = vpack.c.bf16 %v2667_v45, %v15591_v42  ;;  %v13275_v19 = vpack.c.bf16 %v2671_v8, %v2670_v23  ;;  %v13832_v47 = vunpack.i.l.bf16 %v13831_v25  ;;  %v13787_v33 = vunpack.i.l.bf16 %v15294_v58  ;;  %v12923_v58 = vld [vmem:[%s17625_s5 + $0x80] sm:$0xff]  ;;  %v15764_v23 = vld [vmem:[%s17763_s18 + $0x18] sm:$0xff] }
 0x238   : > { %2586 = vmatprep.mubr.f32.mxu1 %v17745_v59  ;;  %12907 = vmatmul.mubr.msk.f32.vlgmr.msra.gmra.mrb[26].mxu0 %vm962_vm9, %v12903_v21  ;;  %v2929_v41 = vsel %vm2919_vm14, %v13773_v61, %v13828_v48  ;;  %v2928_v53 = vsel %vm2919_vm14, %v13772_v31, %v13827_v62  ;;  %v13285_v7 = vpack.c.bf16 %v2679_v54, %v15586_v26  ;;  %v13783_v5 = vunpack.i.h.bf16 %v13781_v37  ;;  %v13791_v52 = vpop.permute.xlu1 %13790  ;;  %v15749_v48 = vld [vmem:[%s17762_s20] sm:$0xff]  ;;  %s17785_s20 = sshll.u32 %s14602_s2, 2 }
 0x239   : > { %13282 = vmatprep.subr.bf16.mxu1 %v13281_v0  ;;  %13274 = vmatpush1.bf16.msra.mxu0 %v13273_v43  ;;  %v2921_v63 = vsel %vm2919_vm14, %v13778_v10, %v13833_v39  ;;  %v2920_v28 = vsel %vm2919_vm14, %v13777_v22, %v13832_v47  ;;  %v13291_v3 = vpack.c.bf16 %v2925_v9, %v2924_v46  ;;  %v13793_v12 = vunpack.i.h.bf16 %v13791_v52  ;;  %v13836_v57 = vpop.permute.xlu0 %13835  ;;  %v15754_v0 = vld [vmem:[%s17763_s18 + $0x8] sm:$0xff]  ;;  %s658_s27 = scalar_lea.vmem [#allocation9], %s17785_s20 }
 0x23a   : > { %12911 = vmatmul.mubr.msk.f32.vlgmr.msra.gmra.mrb[26].mxu1 %vm962_vm9, %v12903_v21  ;;  %13277 = vmatprep.subr.msk.bf16.mxu0 %vm15033_vm8, %v13275_v19  ;;  %v13792_v17 = vunpack.i.l.bf16 %v13791_v52  ;;  %v2932_v15 = vsel %vm2919_vm14, %v13832_v47, %v13772_v31  ;;  %v2933_v14 = vsel %vm2919_vm14, %v13833_v39, %v13773_v61  ;;  %v13782_v35 = vunpack.i.l.bf16 %v13781_v37  ;;  %v17764_v21 = vld [vmem:[#allocation25_spill] sm:$0xff] }
 0x23b   : > { %13284 = vmatpush1.bf16.msra.mxu1 %v13283_v4  ;;  %2515 = vmatprep.mubr.f32.mxu0 %v17745_v59  ;;  %v13838_v29 = vunpack.i.h.bf16 %v13836_v57  ;;  %v13837_v50 = vunpack.i.l.bf16 %v13836_v57  ;;  %v13301_v44 = vpack.c.bf16 %v2933_v14, %v2932_v15  ;;  %v2927_v18 = vsel %vm2919_vm14, %v13788_v30, %v13793_v12  ;;  %v17766_v15 = vld [vmem:[#allocation24_spill] sm:$0xff] }
 0x23c   : > { %13287 = vmatprep.subr.msk.bf16.mxu1 %vm15033_vm8, %v13285_v7  ;;  %12908 = vmatmul.mubr.msk.f32.gmra.mrb[28].mxu0 %vm962_vm9, %v12904_v16  ;;  %v2926_v34 = vsel %vm2919_vm14, %v13787_v33, %v13792_v17  ;;  %v13293_v26 = vpack.c.bf16 %v2929_v41, %v2928_v53  ;;  %v13303_v24 = vpack.c.bf16 %v2921_v63, %v2920_v28 }
 0x23d   : > { %2592 = vmatprep.mubr.f32.mxu1 %v17745_v59  ;;  %13280 = vmatpush1.bf16.msk.msra.mxu0 %vm15033_vm8, %v13278_v6  ;;  %v2923_v56 = vsel %vm2919_vm14, %v13793_v12, %v13838_v29  ;;  %v2935_v42 = vsel %vm2919_vm14, %v13838_v29, %v13783_v5  ;;  %v2922_v60 = vsel %vm2919_vm14, %v13792_v17, %v13837_v50  ;;  %v17765_v6 = vld [vmem:[#allocation23_spill] sm:$0xff] }
 0x23e   : > { %12912 = vmatmul.mubr.msk.f32.gmra.mrb[28].mxu1 %vm962_vm9, %v12904_v16  ;;  %13292 = vmatprep.subr.bf16.mxu0 %v13291_v3  ;;  %v2934_v51 = vsel %vm2919_vm14, %v13837_v50, %v13782_v35  ;;  %v13295_v32 = vpack.c.bf16 %v2927_v18, %v2926_v34  ;;  %v2930_v13 = vsel %vm2919_vm14, %v13782_v35, %v13787_v33 }
 0x23f   : > { %13290 = vmatpush1.bf16.msk.msra.mxu1 %vm15033_vm8, %v13288_v36  ;;  %2765 = vmatprep.mubr.f32.mxu0 %v17745_v59  ;;  %v2931_v27 = vsel %vm2919_vm14, %v13783_v5, %v13788_v30  ;;  %v13305_v38 = vpack.c.bf16 %v2935_v42, %v2934_v51  ;;  %v13308_v10 = vpack.c.bf16 %v2923_v56, %v2922_v60  ;;  %v15759_v30 = vld [vmem:[%s17763_s18 + $0x10] sm:$0xff] }
 0x240   : > { %2842 = vmatprep.mubr.f32.mxu1 %v17745_v59  ;;  %12917 = vmatmul.mubr.msk.f32.vlgmr.msra.gmra.mrb[30].mxu0 %vm962_vm9, %v12913_v11  ;;  %v13298_v22 = vpack.c.bf16 %v2931_v27, %v2930_v13  ;;  %v15768_v54 = vrot.slane %v15749_v48, %v17764_v21  ;;  %v15772_v61 = vrot.slane %v15749_v48, %v17765_v6 }
 0x241   : > { %13302 = vmatprep.subr.bf16.mxu1 %v13301_v44  ;;  %13294 = vmatpush1.bf16.msra.mxu0 %v13293_v26  ;;  %v15776_v4 = vrot.slane %v15754_v0, %v17764_v21  ;;  %v15780_v31 = vrot.slane %v15759_v30, %v17764_v21  ;;  %v15784_v43 = vrot.slane %v15754_v0, %v17765_v6 }
 0x242   : > { %12921 = vmatmul.mubr.msk.f32.vlgmr.msra.gmra.mrb[30].mxu1 %vm962_vm9, %v12913_v11  ;;  %2771 = vmatprep.mubr.f32.mxu0 %v17745_v59  ;;  %v15788_v25 = vrot.slane %v15759_v30, %v17765_v6  ;;  %v15792_v9 = vrot.slane %v15764_v23, %v17764_v21  ;;  %v15796_v36 = vrot.slane %v15764_v23, %v17765_v6 }
 0x243   : > { %13304 = vmatpush1.bf16.msra.mxu1 %v13303_v24  ;;  %2848 = vmatprep.mubr.f32.mxu1 %v17745_v59  ;;  %v15808_v14 = vrot.slane %v15749_v48, %v17766_v15  ;;  %v15814_v34 = vrot.slane %v15754_v0, %v17766_v15 }
 0x244   : > { %13297 = vmatprep.subr.msk.bf16.mxu0 %vm15033_vm8, %v13295_v32  ;;  %12918 = vmatmul.mubr.msk.f32.gmra.mrb[32].mxu0 %vm962_vm9, %v12914_v1 }
 0x245   : > { %13307 = vmatprep.subr.msk.bf16.mxu1 %vm15033_vm8, %v13305_v38  ;;  %13300 = vmatpush1.bf16.msk.msra.mxu0 %vm15033_vm8, %v13298_v22  ;;  %v15824_v38 = vrot.slane %v15759_v30, %v17766_v15 }
 0x246   : > { %12922 = vmatmul.mubr.msk.f32.gmra.mrb[32].mxu1 %vm962_vm9, %v12914_v1  ;;  %3021 = vmatprep.mubr.f32.mxu0 %v17745_v59 }
 0x247   : > { %13310 = vmatpush1.bf16.msk.msra.mxu1 %vm15033_vm8, %v13308_v10  ;;  %3098 = vmatprep.mubr.f32.mxu1 %v17745_v59 }
 0x248   : > { %12927 = vmatmul.mubr.msk.f32.vlgmr.msra.gmra.mrb[34].mxu0 %vm962_vm9, %v12923_v58 }
 0x249   : > { %3027 = vmatprep.mubr.f32.mxu0 %v17745_v59 }
 0x24a   : > { %12931 = vmatmul.mubr.msk.f32.vlgmr.msra.gmra.mrb[34].mxu1 %vm962_vm9, %v12923_v58  ;;  %v15829_v58 = vrot.slane %v15764_v23, %v17766_v15 }
 0x24b   : > { %3104 = vmatprep.mubr.f32.mxu1 %v17745_v59 }
 0x24c   : > { %12928 = vmatmul.mubr.msk.f32.gmra.mrb[36].mxu0 %vm962_vm9, %v12924_v2 }
 0x24d   : > { %3268 = vmatprep.mubr.f32.mxu0 %v17745_v59 }
 0x24e   : > { %12932 = vmatmul.mubr.msk.f32.gmra.mrb[36].mxu1 %vm962_vm9, %v12924_v2 }
 0x24f   : > { %3345 = vmatprep.mubr.f32.mxu1 %v17745_v59 }
 0x2d7   : > { %v1048_v49 = vpop.f32.mrb[2].mxu0 }
 0x2d8   : > { %v1050_v20 = vpop.f32.mrb[3].mxu0  ;;  %v1125_v55 = vpop.f32.mrb[2].mxu1  ;;  %v1152_v39 = vmul.f32 %v15772_v61, %v1048_v49 }
 0x2d9   : > { %v1127_v62 = vpop.f32.mrb[3].mxu1  ;;  %v1153_v53 = vmul.f32 %v15784_v43, %v1050_v20  ;;  %v1154_v7 = vmul.f32 %v15788_v25, %v1125_v55 }
 0x2da   : > { %v1155_v28 = vmul.f32 %v15796_v36, %v1127_v62 }
 0x2db   : > { %v1054_v45 = vpop.f32.mrb[4].mxu0 }
 0x2dc   : > { %v1056_v8 = vpop.f32.mrb[5].mxu0  ;;  %v1131_v37 = vpop.f32.mrb[4].mxu1  ;;  %v1156_v35 = vmul.f32 %v15772_v61, %v1054_v45 }
 0x2dd   : > { %v1133_v46 = vpop.f32.mrb[5].mxu1  ;;  %v1157_v18 = vmul.f32 %v15784_v43, %v1056_v8  ;;  %v1158_v56 = vmul.f32 %v15788_v25, %v1131_v37 }
 0x2de   : > { %v1159_v51 = vmul.f32 %v15796_v36, %v1133_v46 }
 0x2df   : > { %v1304_v19 = vpop.f32.mrb[6].mxu0 }
 0x2e0   : > { %v1408_v47 = vmul.f32 %v15768_v54, %v1304_v19  ;;  %v1306_v33 = vpop.f32.mrb[7].mxu0  ;;  %v1381_v41 = vpop.f32.mrb[6].mxu1 }
 0x2e1   : > { %v1409_v16 = vmul.f32 %v15776_v4, %v1306_v33  ;;  %v1410_v5 = vmul.f32 %v15780_v31, %v1381_v41  ;;  %v1383_v63 = vpop.f32.mrb[7].mxu1 }
 0x2e2   : > { %v1416_v52 = vadd.f32 %v1408_v47, %v1152_v39  ;;  %v1411_v3 = vmul.f32 %v15792_v9, %v1383_v63  ;;  %v17767_v39 = vld [vmem:[#allocation26_spill] sm:$0xff] }
 0x2e3   : > { %v1417_v12 = vadd.f32 %v1409_v16, %v1153_v53  ;;  %v1418_v17 = vadd.f32 %v1410_v5, %v1154_v7  ;;  %v1310_v57 = vpop.f32.mrb[8].mxu0  ;;  %v15837_v47 = vrot.slane %v15749_v48, %v17767_v39  ;;  %v15842_v53 = vrot.slane %v15754_v0, %v17767_v39 }
 0x2e4   : > { %v1419_v29 = vadd.f32 %v1411_v3, %v1155_v28  ;;  %v1412_v50 = vmul.f32 %v15768_v54, %v1310_v57  ;;  %v1312_v44 = vpop.f32.mrb[9].mxu0  ;;  %v15846_v63 = vrot.slane %v15759_v30, %v17767_v39 }
 0x2e5   : > { %v1413_v11 = vmul.f32 %v15776_v4, %v1312_v44  ;;  %v1387_v26 = vpop.f32.mrb[8].mxu1 }
 0x2e6   : > { %v1420_v42 = vadd.f32 %v1412_v50, %v1156_v35  ;;  %v1414_v24 = vmul.f32 %v15780_v31, %v1387_v26  ;;  %v1389_v60 = vpop.f32.mrb[9].mxu1 }
 0x2e7   : > { %v1421_v32 = vadd.f32 %v1413_v11, %v1157_v18  ;;  %v1415_v13 = vmul.f32 %v15792_v9, %v1389_v60  ;;  %v1560_v27 = vpop.f32.mrb[10].mxu0 }
 0x2e8   : > { %v1422_v1 = vadd.f32 %v1414_v24, %v1158_v56  ;;  %v1664_v10 = vmul.f32 %v15808_v14, %v1560_v27  ;;  %v1562_v22 = vpop.f32.mrb[11].mxu0 }
 0x2e9   : > { %v1423_v2 = vadd.f32 %v1415_v13, %v1159_v51  ;;  %v1665_v49 = vmul.f32 %v15814_v34, %v1562_v22 }
 0x2ea   : > { %v1672_v20 = vadd.f32 %v1664_v10, %v1416_v52  ;;  %v1637_v62 = vpop.f32.mrb[10].mxu1 }
 0x2eb   : > { %v1673_v55 = vadd.f32 %v1665_v49, %v1417_v12  ;;  %v1666_v45 = vmul.f32 %v15824_v38, %v1637_v62  ;;  %v1639_v8 = vpop.f32.mrb[11].mxu1  ;;  %v1566_v21 = vpop.f32.mrb[12].mxu0  ;;  %v15851_v12 = vrot.slane %v15764_v23, %v17767_v39  ;;  %v17768_v39 = vld [vmem:[#allocation22_spill] sm:$0xff] }
 0x2ec   : > { %v1667_v37 = vmul.f32 %v15829_v58, %v1639_v8  ;;  %v1668_v46 = vmul.f32 %v15808_v14, %v1566_v21  ;;  %v1568_v19 = vpop.f32.mrb[13].mxu0 }
 0x2ed   : > { %v1674_v33 = vadd.f32 %v1666_v45, %v1418_v17  ;;  %v1669_v41 = vmul.f32 %v15814_v34, %v1568_v19 }
 0x2ee   : > { %v1675_v7 = vadd.f32 %v1667_v37, %v1419_v29  ;;  %v1676_v16 = vadd.f32 %v1668_v46, %v1420_v42  ;;  %v1643_v5 = vpop.f32.mrb[12].mxu1 }
 0x2ef   : > { %v1677_v28 = vadd.f32 %v1669_v41, %v1421_v32  ;;  %v1670_v52 = vmul.f32 %v15824_v38, %v1643_v5  ;;  %v1645_v3 = vpop.f32.mrb[13].mxu1 }
 0x2f0   : > { %v1671_v17 = vmul.f32 %v15829_v58, %v1645_v3  ;;  %v1816_v57 = vpop.f32.mrb[14].mxu0 }
 0x2f1   : > { %v1678_v15 = vadd.f32 %v1670_v52, %v1422_v1  ;;  %v1920_v35 = vmul.f32 %v15837_v47, %v1816_v57  ;;  %v1818_v29 = vpop.f32.mrb[15].mxu0 }
 0x2f2   : > { %v1679_v50 = vadd.f32 %v1671_v17, %v1423_v2  ;;  %v1921_v44 = vmul.f32 %v15842_v53, %v1818_v29  ;;  %v1893_v18 = vpop.f32.mrb[14].mxu1 }
 0x2f3   : > { %v1922_v11 = vmul.f32 %v15846_v63, %v1893_v18  ;;  %v1895_v26 = vpop.f32.mrb[15].mxu1  ;;  %v1928_v56 = vadd.f32 %v1920_v35, %v1672_v20 }
 0x2f4   : > { %v1923_v42 = vmul.f32 %v15851_v12, %v1895_v26  ;;  %v1822_v24 = vpop.f32.mrb[16].mxu0  ;;  %v1929_v60 = vadd.f32 %v1921_v44, %v1673_v55 }
 0x2f5   : > { %v1924_v51 = vmul.f32 %v15837_v47, %v1822_v24  ;;  %v1824_v32 = vpop.f32.mrb[17].mxu0  ;;  %v1930_v13 = vadd.f32 %v1922_v11, %v1674_v33  ;;  %v2345_v33 = vsub.s32 5, %v17768_v39  ;;  %v2601_v24 = vsub.s32 6, %v17768_v39 }
 0x2f6   : > { %v1925_v27 = vmul.f32 %v15842_v53, %v1824_v32  ;;  %v1899_v1 = vpop.f32.mrb[16].mxu1  ;;  %v1931_v10 = vadd.f32 %v1923_v42, %v1675_v7 }
 0x2f7   : > { %v1926_v22 = vmul.f32 %v15846_v63, %v1899_v1  ;;  %v1901_v2 = vpop.f32.mrb[17].mxu1  ;;  %v1932_v49 = vadd.f32 %v1924_v51, %v1676_v16  ;;  %v15864_v16 = vrot.slane %v15749_v48, %v2345_v33  ;;  %v15873_v18 = vrot.slane %v15764_v23, %v2345_v33 }
 0x2f8   : > { %v1927_v62 = vmul.f32 %v15851_v12, %v1901_v2  ;;  %v1933_v20 = vadd.f32 %v1925_v27, %v1677_v28 }
 0x2f9   : > { %v1934_v37 = vadd.f32 %v1926_v22, %v1678_v15  ;;  %v15867_v15 = vrot.slane %v15754_v0, %v2345_v33 }
 0x2fa   : > { %v2023_v45 = vpop.f32.mrb[18].mxu0  ;;  %v1935_v19 = vadd.f32 %v1927_v62, %v1679_v50  ;;  %v15870_v50 = vrot.slane %v15759_v30, %v2345_v33 }
 0x2fb   : > { %v2111_v8 = vadd.f32 %v2023_v45, %v1928_v56  ;;  %v2025_v21 = vpop.f32.mrb[19].mxu0 }
 0x2fc   : > { %v2112_v55 = vadd.f32 %v2025_v21, %v1929_v60 }
 0x2fd   : > { %v2100_v46 = vpop.f32.mrb[18].mxu1 }
 0x2fe   : > { %v2113_v41 = vadd.f32 %v2100_v46, %v1930_v13  ;;  %v2102_v5 = vpop.f32.mrb[19].mxu1  ;;  %v2029_v7 = vpop.f32.mrb[20].mxu0 }
 0x2ff   : > { %v2114_v52 = vadd.f32 %v2102_v5, %v1931_v10  ;;  %v2115_v3 = vadd.f32 %v2029_v7, %v1932_v49  ;;  %v2031_v17 = vpop.f32.mrb[21].mxu0 }
 0x300   : > { %v2116_v35 = vadd.f32 %v2031_v17, %v1933_v20  ;;  %v15882_v20 = vrot.slane %v15749_v48, %v2601_v24 }
 0x301   : > { %v2106_v57 = vpop.f32.mrb[20].mxu1 }
 0x302   : > { %v2117_v28 = vadd.f32 %v2106_v57, %v1934_v37  ;;  %v2108_v29 = vpop.f32.mrb[21].mxu1 }
 0x303   : > { %v2118_v44 = vadd.f32 %v2108_v29, %v1935_v19  ;;  %v2255_v11 = vpop.f32.mrb[22].mxu0 }
 0x304   : > { %v2359_v26 = vmul.f32 %v15864_v16, %v2255_v11  ;;  %v2257_v56 = vpop.f32.mrb[23].mxu0 }
 0x305   : > { %v2332_v42 = vpop.f32.mrb[22].mxu1  ;;  %v2360_v60 = vmul.f32 %v15867_v15, %v2257_v56 }
 0x306   : > { %v2361_v51 = vmul.f32 %v15870_v50, %v2332_v42  ;;  %v2334_v32 = vpop.f32.mrb[23].mxu1  ;;  %v2367_v13 = vadd.f32 %v2359_v26, %v2111_v8  ;;  %v15887_v8 = vrot.slane %v15754_v0, %v2601_v24  ;;  %v2857_v26 = vsub.s32 7, %v17768_v39 }
 0x307   : > { %v2362_v27 = vmul.f32 %v15873_v18, %v2334_v32  ;;  %v2368_v1 = vadd.f32 %v2360_v60, %v2112_v55  ;;  %v2261_v22 = vpop.f32.mrb[24].mxu0  ;;  %v15890_v55 = vrot.slane %v15759_v30, %v2601_v24 }
 0x308   : > { %v2369_v10 = vadd.f32 %v2361_v51, %v2113_v41  ;;  %v2363_v49 = vmul.f32 %v15864_v16, %v2261_v22  ;;  %v2263_v62 = vpop.f32.mrb[25].mxu0  ;;  %v15894_v41 = vrot.slane %v15764_v23, %v2601_v24 }
 0x309   : > { %v2370_v2 = vadd.f32 %v2362_v27, %v2114_v52  ;;  %v2338_v45 = vpop.f32.mrb[24].mxu1  ;;  %v2364_v21 = vmul.f32 %v15867_v15, %v2263_v62 }
 0x30a   : > { %v2365_v37 = vmul.f32 %v15870_v50, %v2338_v45  ;;  %v2340_v46 = vpop.f32.mrb[25].mxu1  ;;  %v2371_v19 = vadd.f32 %v2363_v49, %v2115_v3  ;;  %v15903_v49 = vrot.slane %v15749_v48, %v2857_v26 }
 0x30b   : > { %v2366_v33 = vmul.f32 %v15873_v18, %v2340_v46  ;;  %v2372_v5 = vadd.f32 %v2364_v21, %v2116_v35  ;;  %v2511_v7 = vpop.f32.mrb[26].mxu0 }
 0x30c   : > { %v2373_v52 = vadd.f32 %v2365_v37, %v2117_v28  ;;  %v2615_v57 = vmul.f32 %v15882_v20, %v2511_v7  ;;  %v2513_v29 = vpop.f32.mrb[27].mxu0  ;;  %v15915_v37 = vrot.slane %v15764_v23, %v2857_v26 }
 0x30d   : > { %v2374_v17 = vadd.f32 %v2366_v33, %v2118_v44  ;;  %v2588_v11 = vpop.f32.mrb[26].mxu1  ;;  %v2616_v56 = vmul.f32 %v15887_v8, %v2513_v29 }
 0x30e   : > { %v2617_v42 = vmul.f32 %v15890_v55, %v2588_v11  ;;  %v2590_v3 = vpop.f32.mrb[27].mxu1  ;;  %v2623_v60 = vadd.f32 %v2615_v57, %v2367_v13  ;;  %v15908_v13 = vrot.slane %v15754_v0, %v2857_v26 }
 0x30f   : > { %v2618_v51 = vmul.f32 %v15894_v41, %v2590_v3  ;;  %v2624_v24 = vadd.f32 %v2616_v56, %v2368_v1  ;;  %v2517_v35 = vpop.f32.mrb[28].mxu0  ;;  %v15911_v1 = vrot.slane %v15759_v30, %v2857_v26 }
 0x310   : > { %v2625_v32 = vadd.f32 %v2617_v42, %v2369_v10  ;;  %v2619_v44 = vmul.f32 %v15882_v20, %v2517_v35  ;;  %v2519_v27 = vpop.f32.mrb[29].mxu0 }
 0x311   : > { %v2626_v28 = vadd.f32 %v2618_v51, %v2370_v2  ;;  %v2594_v22 = vpop.f32.mrb[28].mxu1  ;;  %v2620_v62 = vmul.f32 %v15887_v8, %v2519_v27  ;;  %v15939_v51 = vld [vmem:[%s17763_s18 + $0x38] ss:$0 sm:$0xff] }
 0x312   : > { %v2621_v45 = vmul.f32 %v15890_v55, %v2594_v22  ;;  %v2596_v21 = vpop.f32.mrb[29].mxu1  ;;  %v2627_v10 = vadd.f32 %v2619_v44, %v2371_v19  ;;  %v15923_v19 = vld [vmem:[%s17763_s18 + $0x20] ss:$0 sm:$0xff]  ;;  %17771 = vst [vmem:[#allocation27_spill] sm:$0xff] %v15939_v51 }
 0x313   : > { %v2622_v2 = vmul.f32 %v15894_v41, %v2596_v21  ;;  %v2628_v46 = vadd.f32 %v2620_v62, %v2372_v5  ;;  %v2767_v33 = vpop.f32.mrb[30].mxu0 }
 0x314   : > { %v2629_v48 = vadd.f32 %v2621_v45, %v2373_v52  ;;  %v2871_v57 = vmul.f32 %v15903_v49, %v2767_v33  ;;  %v2769_v29 = vpop.f32.mrb[31].mxu0  ;;  %v15929_v52 = vld [vmem:[%s17763_s18 + $0x28] ss:$0 sm:$0xff] }
 0x315   : > { %v2630_v7 = vadd.f32 %v2622_v2, %v2374_v17  ;;  %v2844_v11 = vpop.f32.mrb[30].mxu1  ;;  %v2872_v0 = vmul.f32 %v15908_v13, %v2769_v29  ;;  %17769 = vst [vmem:[#allocation31_spill] sm:$0xff] %v15929_v52  ;;  %v15934_v17 = vld [vmem:[%s17763_s18 + $0x30] ss:$0 sm:$0xff] }
 0x316   : > { %v2873_v56 = vmul.f32 %v15911_v1, %v2844_v11  ;;  %v2846_v30 = vpop.f32.mrb[31].mxu1  ;;  %v2879_v23 = vadd.f32 %v2871_v57, %v2623_v60  ;;  %17770 = vst [vmem:[#allocation32_spill] sm:$0xff] %v15934_v17 }
 0x317   : > { %v2874_v5 = vmul.f32 %v15915_v37, %v2846_v30  ;;  %v2880_v26 = vadd.f32 %v2872_v0, %v2624_v24  ;;  %v2773_v3 = vpop.f32.mrb[32].mxu0 }
 0x318   : > { %v2881_v42 = vadd.f32 %v2873_v56, %v2625_v32  ;;  %v2875_v35 = vmul.f32 %v15903_v49, %v2773_v3  ;;  %v2775_v44 = vpop.f32.mrb[33].mxu0 }
 0x319   : > { %v2882_v60 = vadd.f32 %v2874_v5, %v2626_v28  ;;  %v2850_v27 = vpop.f32.mrb[32].mxu1  ;;  %v2876_v22 = vmul.f32 %v15908_v13, %v2775_v44 }
 0x31a   : > { %v2877_v62 = vmul.f32 %v15911_v1, %v2850_v27  ;;  %v2852_v45 = vpop.f32.mrb[33].mxu1  ;;  %v2883_v21 = vadd.f32 %v2875_v35, %v2627_v10  ;;  %v3148_v35 = vpop.permute.xlu1 %3147 }
 0x31b   : > { %v2878_v24 = vmul.f32 %v15915_v37, %v2852_v45  ;;  %v2884_v32 = vadd.f32 %v2876_v22, %v2628_v46  ;;  %v3023_v33 = vpop.f32.mrb[34].mxu0 }
 0x31c   : > { %v2885_v2 = vadd.f32 %v2877_v62, %v2629_v48  ;;  %v3127_v29 = vmul.f32 %v15923_v19, %v3023_v33  ;;  %v3025_v11 = vpop.f32.mrb[35].mxu0 }
 0x31d   : > { %v2886_v57 = vadd.f32 %v2878_v24, %v2630_v7  ;;  %v3100_v28 = vpop.f32.mrb[34].mxu1  ;;  %v3128_v0 = vmul.f32 %v15929_v52, %v3025_v11 }
 0x31e   : > { %v3129_v56 = vmul.f32 %v15934_v17, %v3100_v28  ;;  %v3102_v30 = vpop.f32.mrb[35].mxu1  ;;  %v3135_v5 = vadd.f32 %v3127_v29, %v2879_v23  ;;  %v3153_v29 = vpop.permute.xlu0 %3152 }
 0x31f   : > { %v3130_v3 = vmul.f32 %v15939_v51, %v3102_v30  ;;  %v3136_v44 = vadd.f32 %v3128_v0, %v2880_v26  ;;  %v3029_v27 = vpop.f32.mrb[36].mxu0 }
 0x320   : > { %v3137_v10 = vadd.f32 %v3129_v56, %v2881_v42  ;;  %v3131_v48 = vmul.f32 %v15923_v19, %v3029_v27  ;;  %v3031_v7 = vpop.f32.mrb[37].mxu0  ;;  %v3155_v33 = vadd.f32 %v3148_v35, %v3135_v5 }
 0x321   : > { %v3138_v46 = vadd.f32 %v3130_v3, %v2882_v60  ;;  %v3106_v22 = vpop.f32.mrb[36].mxu1  ;;  %v3132_v62 = vmul.f32 %v15929_v52, %v3031_v7  ;;  %v3156_v11 = vadd.f32 %v3148_v35, %v3136_v44 }
 0x322   : > { %v3133_v45 = vmul.f32 %v15934_v17, %v3106_v22  ;;  %v3108_v24 = vpop.f32.mrb[37].mxu1  ;;  %v3139_v28 = vadd.f32 %v3131_v48, %v2883_v21  ;;  %v3157_v26 = vadd.f32 %v3148_v35, %v3137_v10  ;;  %v3163_v39 = vmax.f32 %v3155_v33, 0.0 }
 0x323   : > { %v3134_v23 = vmul.f32 %v15939_v51, %v3108_v24  ;;  %v3158_v42 = vadd.f32 %v3148_v35, %v3138_v46  ;;  %v3140_v0 = vadd.f32 %v3132_v62, %v2884_v32  ;;  %v3164_v6 = vmax.f32 %v3156_v11, 0.0 }
 0x324   : > { %v3141_v56 = vadd.f32 %v3133_v45, %v2885_v2  ;;  %v3159_v60 = vadd.f32 %v3153_v29, %v3139_v28  ;;  %v3165_v22 = vmax.f32 %v3157_v26, 0.0 }
 0x325   : > { %v3142_v30 = vadd.f32 %v3134_v23, %v2886_v57  ;;  %v3160_v3 = vadd.f32 %v3153_v29, %v3140_v0  ;;  %v3166_v17 = vmax.f32 %v3158_v42, 0.0 }
 0x326   : > { %v3161_v27 = vadd.f32 %v3153_v29, %v3141_v56  ;;  %v3167_v7 = vmax.f32 %v3159_v60, 0.0 }
 0x327   : > { %v3162_v52 = vadd.f32 %v3153_v29, %v3142_v30  ;;  %v3168_v5 = vmax.f32 %v3160_v3, 0.0 }
 0x328   : > { %v3169_v44 = vmax.f32 %v3161_v27, 0.0  ;;  %v13840_v48 = vpack.i.bf16 %v3167_v7, %v3163_v39  ;;  %v15961_v10 = vpack.c.bf16 %v3167_v7, %v3163_v39  ;;  %v4967_v39 = vld [vmem:[%s17628_s8 + $0x8] sm:$0xff] }
 0x329   : > { %v3170_v21 = vmax.f32 %v3162_v52, 0.0  ;;  %v13880_v24 = vpack.i.bf16 %v3168_v5, %v3164_v6  ;;  %v15957_v2 = vpack.c.bf16 %v3168_v5, %v3164_v6  ;;  %v4966_v6 = vld [vmem:[%s17628_s8] sm:$0xff] }
 0x32a   : > { %v13845_v51 = vpack.i.bf16 %v3169_v44, %v3165_v22  ;;  %13841 = vrot.lane.b32.xlu1 %v13840_v48, %s14346_s0  ;;  %v15963_v35 = vpack.c.bf16 %v3169_v44, %v3165_v22 }
 0x32b   : > { %v13885_v32 = vpack.i.bf16 %v3170_v21, %v3166_v17  ;;  %13881 = vrot.lane.b32.xlu0 %v13880_v24, %s14346_s0  ;;  %v15959_v57 = vpack.c.bf16 %v3170_v21, %v3166_v17 }
 0x32e   : > { %13846 = vrot.lane.b32.xlu1 %v13845_v51, %s14346_s0 }
 0x32f   : > { %13886 = vrot.lane.b32.xlu0 %v13885_v32, %s14346_s0 }
 0x332   : > { %13851 = vrot.lane.b32.xlu1 %v13840_v48, %s14347_s22 }
 0x333   : > { %13891 = vrot.lane.b32.xlu0 %v13880_v24, %s14347_s22 }
 0x336   : > { %13856 = vrot.lane.b32.xlu1 %v13845_v51, %s14347_s22 }
 0x337   : > { %13896 = vrot.lane.b32.xlu0 %v13885_v32, %s14347_s22 }
 0x33a   : > { %13861 = vrot.lane.b32.xlu1 %v13840_v48, %s14348_s28 }
 0x33b   : > { %13901 = vrot.lane.b32.xlu0 %v13880_v24, %s14348_s28 }
 0x33e   : > { %13866 = vrot.lane.b32.xlu1 %v13845_v51, %s14348_s28 }
 0x33f   : > { %13906 = vrot.lane.b32.xlu0 %v13885_v32, %s14348_s28 }
 0x342   : > { %13871 = vrot.lane.b32.xlu1 %v13840_v48, %s14349_s3 }
 0x343   : > { %13911 = vrot.lane.b32.xlu0 %v13880_v24, %s14349_s3 }
 0x346   : > { %13876 = vrot.lane.b32.xlu1 %v13845_v51, %s14349_s3 }
 0x347   : > { %13916 = vrot.lane.b32.xlu0 %v13885_v32, %s14349_s3 }
 0x34a   : > { %13921 = vrot.lane.b32.xlu1 %v13840_v48, %s17772_s23 }
 0x34b   : > { %13961 = vrot.lane.b32.xlu0 %v13880_v24, %s17772_s23 }
 0x34e   : > { %13926 = vrot.lane.b32.xlu1 %v13845_v51, %s17772_s23 }
 0x34f   : > { %13966 = vrot.lane.b32.xlu0 %v13885_v32, %s17772_s23 }
 0x352   : > { %13931 = vrot.lane.b32.xlu1 %v13840_v48, %s17773_s25 }
 0x353   : > { %13971 = vrot.lane.b32.xlu0 %v13880_v24, %s17773_s25 }
 0x356   : > { %13936 = vrot.lane.b32.xlu1 %v13845_v51, %s17773_s25 }
 0x357   : > { %13976 = vrot.lane.b32.xlu0 %v13885_v32, %s17773_s25 }
 0x35a   : > { %13941 = vrot.lane.b32.xlu1 %v13840_v48, %s17774_s24 }
 0x35b   : > { %13981 = vrot.lane.b32.xlu0 %v13880_v24, %s17774_s24 }
 0x35e   : > { %13946 = vrot.lane.b32.xlu1 %v13845_v51, %s17774_s24 }
 0x35f   : > { %13986 = vrot.lane.b32.xlu0 %v13885_v32, %s17774_s24 }
 0x362   : > { %13951 = vrot.lane.b32.xlu1 %v13840_v48, %s17775_s29 }
 0x363   : > { %13991 = vrot.lane.b32.xlu0 %v13880_v24, %s17775_s29 }
 0x366   : > { %13956 = vrot.lane.b32.xlu1 %v13845_v51, %s17775_s29 }
 0x367   : > { %13996 = vrot.lane.b32.xlu0 %v13885_v32, %s17775_s29 }
 0x36a   : > { %4970 = vperm.xlu1 %13839, %v4966_v6  }
 0x36b   : > { %4975 = vperm.xlu0 %13518, %v4967_v39  }
 0x39c   : > { %v13842_v52 = vpop.permute.xlu1 %13841 }
 0x39d   : > { %v13844_v17 = vunpack.i.h.bf16 %v13842_v52  ;;  %v13843_v46 = vunpack.i.l.bf16 %v13842_v52  ;;  %v13882_v62 = vpop.permute.xlu0 %13881 }
 0x39e   : > { %v13884_v45 = vunpack.i.h.bf16 %v13882_v62  ;;  %v13883_v33 = vunpack.i.l.bf16 %v13882_v62 }
 0x3a0   : > { %v13847_v11 = vpop.permute.xlu1 %13846  ;;  %v3191_v51 = vsel %vm943_vm3, %v13843_v46, %v13883_v33  ;;  %v3192_v28 = vsel %vm943_vm3, %v13844_v17, %v13884_v45 }
 0x3a1   : > { %v13849_v23 = vunpack.i.h.bf16 %v13847_v11  ;;  %v13848_v29 = vunpack.i.l.bf16 %v13847_v11  ;;  %v13887_v26 = vpop.permute.xlu0 %13886  ;;  %v13311_v42 = vpack.c.bf16 %v3192_v28, %v3191_v51 }
 0x3a2   : > { %v13889_v0 = vunpack.i.h.bf16 %v13887_v26  ;;  %v13888_v56 = vunpack.i.l.bf16 %v13887_v26 }
 0x3a3   : > { %v3190_v60 = vsel %vm943_vm3, %v13884_v45, %v13849_v23  ;;  %v3189_v30 = vsel %vm943_vm3, %v13883_v33, %v13848_v29  ;;  %13312 = vmatprep.subr.bf16.mxu0 %v13311_v42 }
 0x3a4   : > { %v3193_v3 = vsel %vm943_vm3, %v13888_v56, %v13843_v46  ;;  %v3194_v27 = vsel %vm943_vm3, %v13889_v0, %v13844_v17  ;;  %v13852_v7 = vpop.permute.xlu1 %13851  ;;  %v3187_v22 = vsel %vm943_vm3, %v13848_v29, %v13888_v56  ;;  %v3188_v5 = vsel %vm943_vm3, %v13849_v23, %v13889_v0  ;;  %v3195_v17 = vld [vmem:[%s17627_s7] sm:$0xff]  ;;  %v3196_v0 = vld [vmem:[%s17627_s7 + $0x8] sm:$0xff] }
 0x3a5   : > { %v13854_v44 = vunpack.i.h.bf16 %v13852_v7  ;;  %v13853_v21 = vunpack.i.l.bf16 %v13852_v7  ;;  %v13892_v48 = vpop.permute.xlu0 %13891  ;;  %v13313_v24 = vpack.c.bf16 %v3194_v27, %v3193_v3  ;;  %v13315_v32 = vpack.c.bf16 %v3188_v5, %v3187_v22 }
 0x3a6   : > { %v13894_v6 = vunpack.i.h.bf16 %v13892_v48  ;;  %v13893_v39 = vunpack.i.l.bf16 %v13892_v48  ;;  %v13317_v52 = vpack.c.bf16 %v3190_v60, %v3189_v30 }
 0x3a7   : > { %13314 = vmatpush1.bf16.msra.mxu0 %v13313_v24  ;;  %13316 = vmatprep.subr.bf16.mxu1 %v13315_v32 }
 0x3a8   : > { %v13857_v46 = vpop.permute.xlu1 %13856  ;;  %13318 = vmatpush1.bf16.msra.mxu1 %v13317_v52  ;;  %v3394_v62 = vsel %vm1200_vm4, %v13853_v21, %v13893_v39  ;;  %v3395_v45 = vsel %vm1200_vm4, %v13854_v44, %v13894_v6 }
 0x3a9   : > { %v13859_v33 = vunpack.i.h.bf16 %v13857_v46  ;;  %v13858_v11 = vunpack.i.l.bf16 %v13857_v46  ;;  %v13897_v51 = vpop.permute.xlu0 %13896  ;;  %v13319_v28 = vpack.c.bf16 %v3395_v45, %v3394_v62 }
 0x3aa   : > { %v13899_v23 = vunpack.i.h.bf16 %v13897_v51  ;;  %v13898_v29 = vunpack.i.l.bf16 %v13897_v51  ;;  %12933 = vmatmul.mubr.msk.f32.vlgmr.msra.gmra.mrb[38].mxu0 %vm3197_vm15, %v3195_v17 }
 0x3ab   : > { %v3393_v26 = vsel %vm1200_vm4, %v13894_v6, %v13859_v33  ;;  %v3392_v42 = vsel %vm1200_vm4, %v13893_v39, %v13858_v11  ;;  %12935 = vmatmul.mubr.msk.f32.vlgmr.msra.gmra.mrb[38].mxu1 %vm3197_vm15, %v3195_v17  ;;  %13320 = vmatprep.subr.bf16.mxu0 %v13319_v28  ;;  %v12937_v6 = vld [vmem:[%s17627_s7 + $0x10] sm:$0xff] }
 0x3ac   : > { %v3396_v56 = vsel %vm1200_vm4, %v13898_v29, %v13853_v21  ;;  %v3397_v60 = vsel %vm1200_vm4, %v13899_v23, %v13854_v44  ;;  %v13862_v30 = vpop.permute.xlu1 %13861  ;;  %3274 = vmatprep.mubr.f32.mxu0 %v17745_v59  ;;  %3351 = vmatprep.mubr.f32.mxu1 %v17745_v59  ;;  %v3390_v3 = vsel %vm1200_vm4, %v13858_v11, %v13898_v29  ;;  %v12938_v29 = vld [vmem:[%s17627_s7 + $0x18] sm:$0xff] }
 0x3ad   : > { %v13864_v27 = vunpack.i.h.bf16 %v13862_v30  ;;  %v13863_v7 = vunpack.i.l.bf16 %v13862_v30  ;;  %v13902_v22 = vpop.permute.xlu0 %13901  ;;  %v13321_v5 = vpack.c.bf16 %v3397_v60, %v3396_v56  ;;  %v3391_v48 = vsel %vm1200_vm4, %v13859_v33, %v13899_v23 }
 0x3ae   : > { %v13904_v24 = vunpack.i.h.bf16 %v13902_v22  ;;  %v13903_v21 = vunpack.i.l.bf16 %v13902_v22  ;;  %12934 = vmatmul.mubr.msk.f32.gmra.mrb[40].mxu0 %vm3197_vm15, %v3196_v0  ;;  %v13323_v44 = vpack.c.bf16 %v3391_v48, %v3390_v3  ;;  %v13325_v32 = vpack.c.bf16 %v3393_v26, %v3392_v42 }
 0x3af   : > { %12936 = vmatmul.mubr.msk.f32.gmra.mrb[40].mxu1 %vm3197_vm15, %v3196_v0  ;;  %13322 = vmatpush1.bf16.msra.mxu0 %v13321_v5 }
 0x3b0   : > { %13324 = vmatprep.subr.bf16.mxu1 %v13323_v44  ;;  %v13867_v39 = vpop.permute.xlu1 %13866  ;;  %3471 = vmatprep.mubr.f32.mxu0 %v17745_v59  ;;  %v3597_v52 = vsel %vm1456_vm6, %v13863_v7, %v13903_v21  ;;  %v3598_v17 = vsel %vm1456_vm6, %v13864_v27, %v13904_v24 }
 0x3b1   : > { %v13869_v46 = vunpack.i.h.bf16 %v13867_v39  ;;  %v13868_v62 = vunpack.i.l.bf16 %v13867_v39  ;;  %13326 = vmatpush1.bf16.msra.mxu1 %v13325_v32  ;;  %v13907_v45 = vpop.permute.xlu0 %13906  ;;  %3548 = vmatprep.mubr.f32.mxu1 %v17745_v59  ;;  %v13327_v33 = vpack.c.bf16 %v3598_v17, %v3597_v52 }
 0x3b2   : > { %v13909_v11 = vunpack.i.h.bf16 %v13907_v45  ;;  %v13908_v51 = vunpack.i.l.bf16 %v13907_v45  ;;  %12939 = vmatmul.mubr.msk.f32.vlgmr.msra.gmra.mrb[42].mxu0 %vm3197_vm15, %v12937_v6 }
 0x3b3   : > { %v3596_v28 = vsel %vm1456_vm6, %v13904_v24, %v13869_v46  ;;  %v3595_v23 = vsel %vm1456_vm6, %v13903_v21, %v13868_v62  ;;  %13328 = vmatprep.subr.bf16.mxu0 %v13327_v33  ;;  %3477 = vmatprep.mubr.f32.mxu0 %v17745_v59  ;;  %v12943_v21 = vld [vmem:[%s17627_s7 + $0x20] sm:$0xff] }
 0x3b4   : > { %v3599_v26 = vsel %vm1456_vm6, %v13908_v51, %v13863_v7  ;;  %v3600_v42 = vsel %vm1456_vm6, %v13909_v11, %v13864_v27  ;;  %12941 = vmatmul.mubr.msk.f32.vlgmr.msra.gmra.mrb[42].mxu1 %vm3197_vm15, %v12937_v6  ;;  %v13872_v0 = vpop.permute.xlu1 %13871  ;;  %v3593_v56 = vsel %vm1456_vm6, %v13868_v62, %v13908_v51  ;;  %v3594_v60 = vsel %vm1456_vm6, %v13869_v46, %v13909_v11  ;;  %v12944_v51 = vld [vmem:[%s17627_s7 + $0x28] sm:$0xff] }
 0x3b5   : > { %v13874_v30 = vunpack.i.h.bf16 %v13872_v0  ;;  %v13873_v3 = vunpack.i.l.bf16 %v13872_v0  ;;  %v13912_v22 = vpop.permute.xlu0 %13911  ;;  %3554 = vmatprep.mubr.f32.mxu1 %v17745_v59  ;;  %v13329_v5 = vpack.c.bf16 %v3600_v42, %v3599_v26  ;;  %v13331_v48 = vpack.c.bf16 %v3594_v60, %v3593_v56 }
 0x3b6   : > { %v13914_v7 = vunpack.i.h.bf16 %v13912_v22  ;;  %v13913_v24 = vunpack.i.l.bf16 %v13912_v22  ;;  %12940 = vmatmul.mubr.msk.f32.gmra.mrb[44].mxu0 %vm3197_vm15, %v12938_v29  ;;  %v13333_v27 = vpack.c.bf16 %v3596_v28, %v3595_v23 }
 0x3b7   : > { %13330 = vmatpush1.bf16.msra.mxu0 %v13329_v5  ;;  %13332 = vmatprep.subr.bf16.mxu1 %v13331_v48 }
 0x3b8   : > { %12942 = vmatmul.mubr.msk.f32.gmra.mrb[44].mxu1 %vm3197_vm15, %v12938_v29  ;;  %v13877_v44 = vpop.permute.xlu1 %13876  ;;  %3674 = vmatprep.mubr.f32.mxu0 %v17745_v59  ;;  %v3800_v32 = vsel %vm1712_vm10, %v13873_v3, %v13913_v24  ;;  %v3801_v6 = vsel %vm1712_vm10, %v13874_v30, %v13914_v7 }
 0x3b9   : > { %v13879_v39 = vunpack.i.h.bf16 %v13877_v44  ;;  %v13878_v52 = vunpack.i.l.bf16 %v13877_v44  ;;  %13334 = vmatpush1.bf16.msra.mxu1 %v13333_v27  ;;  %v13917_v17 = vpop.permute.xlu0 %13916  ;;  %3751 = vmatprep.mubr.f32.mxu1 %v17745_v59  ;;  %v13335_v46 = vpack.c.bf16 %v3801_v6, %v3800_v32 }
 0x3ba   : > { %v13919_v62 = vunpack.i.h.bf16 %v13917_v17  ;;  %v13918_v45 = vunpack.i.l.bf16 %v13917_v17  ;;  %12945 = vmatmul.mubr.msk.f32.vlgmr.msra.gmra.mrb[46].mxu0 %vm3197_vm15, %v12943_v21 }
 0x3bb   : > { %v3799_v33 = vsel %vm1712_vm10, %v13914_v7, %v13879_v39  ;;  %v3798_v11 = vsel %vm1712_vm10, %v13913_v24, %v13878_v52  ;;  %13336 = vmatprep.subr.bf16.mxu0 %v13335_v46  ;;  %3680 = vmatprep.mubr.f32.mxu0 %v17745_v59 }
 0x3bc   : > { %v3802_v28 = vsel %vm1712_vm10, %v13918_v45, %v13873_v3  ;;  %v3803_v23 = vsel %vm1712_vm10, %v13919_v62, %v13874_v30  ;;  %12947 = vmatmul.mubr.msk.f32.vlgmr.msra.gmra.mrb[46].mxu1 %vm3197_vm15, %v12943_v21  ;;  %v13922_v29 = vpop.permute.xlu1 %13921  ;;  %v3796_v26 = vsel %vm1712_vm10, %v13878_v52, %v13918_v45  ;;  %v3797_v42 = vsel %vm1712_vm10, %v13879_v39, %v13919_v62  ;;  %v12949_v30 = vld [vmem:[%s17627_s7 + $0x30] sm:$0xff] }
 0x3bd   : > { %v13962_v0 = vpop.permute.xlu0 %13961  ;;  %3757 = vmatprep.mubr.f32.mxu1 %v17745_v59  ;;  %v13337_v56 = vpack.c.bf16 %v3803_v23, %v3802_v28  ;;  %v13339_v60 = vpack.c.bf16 %v3797_v42, %v3796_v26  ;;  %v13341_v3 = vpack.c.bf16 %v3799_v33, %v3798_v11  ;;  %v13924_v21 = vunpack.i.h.bf16 %v13922_v29  ;;  %v12955_v28 = vld [vmem:[%s17627_s7 + $0x40] sm:$0xff] }
 0x3be   : > { %12946 = vmatmul.mubr.msk.f32.gmra.mrb[48].mxu0 %vm3197_vm15, %v12944_v51  ;;  %v13964_v5 = vunpack.i.h.bf16 %v13962_v0  ;;  %v13963_v48 = vunpack.i.l.bf16 %v13962_v0  ;;  %v13923_v44 = vunpack.i.l.bf16 %v13922_v29 }
 0x3bf   : > { %13338 = vmatpush1.bf16.msra.mxu0 %v13337_v56  ;;  %13340 = vmatprep.subr.bf16.mxu1 %v13339_v60 }
 0x3c0   : > { %12948 = vmatmul.mubr.msk.f32.gmra.mrb[48].mxu1 %vm3197_vm15, %v12944_v51  ;;  %v13927_v22 = vpop.permute.xlu1 %13926  ;;  %13344 = vmatprep.subr.bf16.mxu0 %v15957_v2  ;;  %v12950_v2 = vld [vmem:[%s17627_s7 + $0x38] sm:$0xff]  ;;  %v4174_v45 = vsel %vm2151_vm11, %v13923_v44, %v13963_v48  ;;  %v4175_v33 = vsel %vm2151_vm11, %v13924_v21, %v13964_v5 }
 0x3c1   : > { %v13929_v7 = vunpack.i.h.bf16 %v13927_v22  ;;  %v13928_v24 = vunpack.i.l.bf16 %v13927_v22  ;;  %13342 = vmatpush1.bf16.msra.mxu1 %v13341_v3  ;;  %v13967_v27 = vpop.permute.xlu0 %13966  ;;  %3877 = vmatprep.mubr.f32.mxu0 %v17745_v59 }
 0x3c2   : > { %v13969_v32 = vunpack.i.h.bf16 %v13967_v27  ;;  %v13968_v6 = vunpack.i.l.bf16 %v13967_v27  ;;  %13348 = vmatprep.subr.bf16.mxu1 %v15959_v57  ;;  %12951 = vmatmul.mubr.msk.f32.vlgmr.msra.gmra.mrb[50].mxu0 %vm3197_vm15, %v12949_v30 }
 0x3c3   : > { %3954 = vmatprep.mubr.f32.mxu1 %v17745_v59  ;;  %13346 = vmatpush1.bf16.msra.mxu0 %v15961_v10  ;;  %v4172_v39 = vsel %vm2151_vm11, %v13963_v48, %v13928_v24  ;;  %v4173_v52 = vsel %vm2151_vm11, %v13964_v5, %v13929_v7 }
 0x3c4   : > { %12953 = vmatmul.mubr.msk.f32.vlgmr.msra.gmra.mrb[50].mxu1 %vm3197_vm15, %v12949_v30  ;;  %v13932_v17 = vpop.permute.xlu1 %13931  ;;  %3883 = vmatprep.mubr.f32.mxu0 %v17745_v59  ;;  %v13351_v57 = vpack.c.bf16 %v4173_v52, %v4172_v39  ;;  %v4176_v10 = vsel %vm2151_vm11, %v13968_v6, %v13923_v44  ;;  %v4177_v62 = vsel %vm2151_vm11, %v13969_v32, %v13924_v21 }
 0x3c5   : > { %13350 = vmatpush1.bf16.msra.mxu1 %v15963_v35  ;;  %v13972_v46 = vpop.permute.xlu0 %13971  ;;  %3960 = vmatprep.mubr.f32.mxu1 %v17745_v59  ;;  %v13355_v11 = vpack.c.bf16 %v4177_v62, %v4176_v10  ;;  %v4170_v35 = vsel %vm2151_vm11, %v13928_v24, %v13968_v6  ;;  %v4171_v51 = vsel %vm2151_vm11, %v13929_v7, %v13969_v32  ;;  %v13934_v23 = vunpack.i.h.bf16 %v13932_v17  ;;  %v12956_v7 = vld [vmem:[%s17627_s7 + $0x48] sm:$0xff] }
 0x3c6   : > { %12952 = vmatmul.mubr.msk.f32.gmra.mrb[52].mxu0 %vm3197_vm15, %v12950_v2  ;;  %13352 = vmatprep.subr.bf16.mxu0 %v13351_v57  ;;  %v13933_v29 = vunpack.i.l.bf16 %v13932_v17  ;;  %v13974_v26 = vunpack.i.h.bf16 %v13972_v46  ;;  %v13973_v42 = vunpack.i.l.bf16 %v13972_v46  ;;  %v13353_v30 = vpack.c.bf16 %v4175_v33, %v4174_v45  ;;  %v12961_v57 = vld [vmem:[%s17627_s7 + $0x50] sm:$0xff] }
 0x3c7   : > { %4056 = vmatprep.mubr.f32.mxu0 %v17745_v59  ;;  %13356 = vmatprep.subr.bf16.mxu1 %v13355_v11  ;;  %v13357_v48 = vpack.c.bf16 %v4171_v51, %v4170_v35 }
 0x3c8   : > { %12954 = vmatmul.mubr.msk.f32.gmra.mrb[52].mxu1 %vm3197_vm15, %v12950_v2  ;;  %v13937_v0 = vpop.permute.xlu1 %13936  ;;  %v4377_v21 = vsel %vm2407_vm12, %v13933_v29, %v13973_v42  ;;  %v4378_v44 = vsel %vm2407_vm12, %v13934_v23, %v13974_v26 }
 0x3c9   : > { %v13939_v56 = vunpack.i.h.bf16 %v13937_v0  ;;  %v13938_v60 = vunpack.i.l.bf16 %v13937_v0  ;;  %v13977_v3 = vpop.permute.xlu0 %13976  ;;  %4133 = vmatprep.mubr.f32.mxu1 %v17745_v59  ;;  %v13361_v46 = vpack.c.bf16 %v4378_v44, %v4377_v21  ;;  %v12967_v44 = vld [vmem:[%s17627_s7 + $0x60] sm:$0xff] }
 0x3ca   : > { %v13979_v22 = vunpack.i.h.bf16 %v13977_v3  ;;  %v13978_v5 = vunpack.i.l.bf16 %v13977_v3  ;;  %12957 = vmatmul.mubr.msk.f32.vlgmr.msra.gmra.mrb[54].mxu0 %vm3197_vm15, %v12955_v28 }
 0x3cb   : > { %13354 = vmatpush1.bf16.msra.mxu0 %v13353_v30  ;;  %4062 = vmatprep.mubr.f32.mxu0 %v17745_v59  ;;  %v4375_v24 = vsel %vm2407_vm12, %v13973_v42, %v13938_v60  ;;  %v4376_v27 = vsel %vm2407_vm12, %v13974_v26, %v13939_v56 }
 0x3cc   : > { %12959 = vmatmul.mubr.msk.f32.vlgmr.msra.gmra.mrb[54].mxu1 %vm3197_vm15, %v12955_v28  ;;  %v13942_v32 = vpop.permute.xlu1 %13941  ;;  %v13359_v6 = vpack.c.bf16 %v4376_v27, %v4375_v24  ;;  %v4379_v2 = vsel %vm2407_vm12, %v13978_v5, %v13933_v29  ;;  %v4380_v52 = vsel %vm2407_vm12, %v13979_v22, %v13934_v23  ;;  %v4373_v10 = vsel %vm2407_vm12, %v13938_v60, %v13978_v5 }
 0x3cd   : > { %13358 = vmatpush1.bf16.msra.mxu1 %v13357_v48  ;;  %v13982_v39 = vpop.permute.xlu0 %13981  ;;  %4139 = vmatprep.mubr.f32.mxu1 %v17745_v59  ;;  %v13363_v17 = vpack.c.bf16 %v4380_v52, %v4379_v2  ;;  %v4374_v62 = vsel %vm2407_vm12, %v13939_v56, %v13979_v22  ;;  %v13944_v45 = vunpack.i.h.bf16 %v13942_v32  ;;  %v13943_v33 = vunpack.i.l.bf16 %v13942_v32  ;;  %v12962_v56 = vld [vmem:[%s17627_s7 + $0x58] sm:$0xff] }
 0x3ce   : > { %12958 = vmatmul.mubr.msk.f32.gmra.mrb[56].mxu0 %vm3197_vm15, %v12956_v7  ;;  %13360 = vmatprep.subr.bf16.mxu0 %v13359_v6  ;;  %v13984_v35 = vunpack.i.h.bf16 %v13982_v39  ;;  %v13983_v51 = vunpack.i.l.bf16 %v13982_v39  ;;  %v13365_v0 = vpack.c.bf16 %v4374_v62, %v4373_v10 }
 0x3cf   : > { %4251 = vmatprep.mubr.f32.mxu0 %v17745_v59  ;;  %13364 = vmatprep.subr.bf16.mxu1 %v13363_v17 }
 0x3d0   : > { %12960 = vmatmul.mubr.msk.f32.gmra.mrb[56].mxu1 %vm3197_vm15, %v12956_v7  ;;  %v13947_v11 = vpop.permute.xlu1 %13946  ;;  %v4580_v48 = vsel %vm2663_vm13, %v13943_v33, %v13983_v51  ;;  %v4581_v7 = vsel %vm2663_vm13, %v13944_v45, %v13984_v35 }
 0x3d1   : > { %v13949_v28 = vunpack.i.h.bf16 %v13947_v11  ;;  %v13948_v23 = vunpack.i.l.bf16 %v13947_v11  ;;  %v13987_v29 = vpop.permute.xlu0 %13986  ;;  %4328 = vmatprep.mubr.f32.mxu1 %v17745_v59  ;;  %v13369_v39 = vpack.c.bf16 %v4581_v7, %v4580_v48  ;;  %v12974_v7 = vld [vmem:[%s17627_s7 + $0x78] sm:$0xff] }
 0x3d2   : > { %v13989_v26 = vunpack.i.h.bf16 %v13987_v29  ;;  %v13988_v42 = vunpack.i.l.bf16 %v13987_v29  ;;  %12963 = vmatmul.mubr.msk.f32.vlgmr.msra.gmra.mrb[58].mxu0 %vm3197_vm15, %v12961_v57 }
 0x3d3   : > { %13362 = vmatpush1.bf16.msra.mxu0 %v13361_v46  ;;  %4257 = vmatprep.mubr.f32.mxu0 %v17745_v59  ;;  %v4578_v60 = vsel %vm2663_vm13, %v13983_v51, %v13948_v23  ;;  %v4579_v3 = vsel %vm2663_vm13, %v13984_v35, %v13949_v28  ;;  %v12968_v51 = vld [vmem:[%s17627_s7 + $0x68] sm:$0xff] }
 0x3d4   : > { %12965 = vmatmul.mubr.msk.f32.vlgmr.msra.gmra.mrb[58].mxu1 %vm3197_vm15, %v12961_v57  ;;  %v13952_v30 = vpop.permute.xlu1 %13951  ;;  %v13367_v22 = vpack.c.bf16 %v4579_v3, %v4578_v60  ;;  %v4582_v5 = vsel %vm2663_vm13, %v13988_v42, %v13943_v33  ;;  %v4583_v27 = vsel %vm2663_vm13, %v13989_v26, %v13944_v45  ;;  %v4576_v32 = vsel %vm2663_vm13, %v13948_v23, %v13988_v42  ;;  %v12973_v3 = vld [vmem:[%s17627_s7 + $0x70] sm:$0xff] }
 0x3d5   : > { %13366 = vmatpush1.bf16.msra.mxu1 %v13365_v0  ;;  %v13992_v24 = vpop.permute.xlu0 %13991  ;;  %4334 = vmatprep.mubr.f32.mxu1 %v17745_v59  ;;  %v13371_v21 = vpack.c.bf16 %v4583_v27, %v4582_v5  ;;  %v4577_v6 = vsel %vm2663_vm13, %v13949_v28, %v13989_v26  ;;  %v13954_v62 = vunpack.i.h.bf16 %v13952_v30  ;;  %v13953_v45 = vunpack.i.l.bf16 %v13952_v30  ;;  %v12980_v27 = vld [vmem:[%s17627_s7 + $0x88] sm:$0xff] }
 0x3d6   : > { %12964 = vmatmul.mubr.msk.f32.gmra.mrb[60].mxu0 %vm3197_vm15, %v12962_v56  ;;  %13368 = vmatprep.subr.bf16.mxu0 %v13367_v22  ;;  %v13994_v52 = vunpack.i.h.bf16 %v13992_v24  ;;  %v13993_v17 = vunpack.i.l.bf16 %v13992_v24  ;;  %v13373_v35 = vpack.c.bf16 %v4577_v6, %v4576_v32  ;;  %v12979_v24 = vld [vmem:[%s17627_s7 + $0x80] sm:$0xff] }
 0x3d7   : > { %4454 = vmatprep.mubr.f32.mxu0 %v17745_v59  ;;  %13372 = vmatprep.subr.bf16.mxu1 %v13371_v21 }
 0x3d8   : > { %12966 = vmatmul.mubr.msk.f32.gmra.mrb[60].mxu1 %vm3197_vm15, %v12962_v56  ;;  %v13957_v2 = vpop.permute.xlu1 %13956  ;;  %v4783_v0 = vsel %vm2919_vm14, %v13953_v45, %v13993_v17  ;;  %v4784_v56 = vsel %vm2919_vm14, %v13954_v62, %v13994_v52 }
 0x3d9   : > { %v13959_v57 = vunpack.i.h.bf16 %v13957_v2  ;;  %v13958_v46 = vunpack.i.l.bf16 %v13957_v2  ;;  %v13997_v10 = vpop.permute.xlu0 %13996  ;;  %4531 = vmatprep.mubr.f32.mxu1 %v17745_v59  ;;  %v13377_v5 = vpack.c.bf16 %v4784_v56, %v4783_v0 }
 0x3da   : > { %v13999_v33 = vunpack.i.h.bf16 %v13997_v10  ;;  %v13998_v11 = vunpack.i.l.bf16 %v13997_v10  ;;  %12969 = vmatmul.mubr.msk.f32.vlgmr.msra.gmra.mrb[62].mxu0 %vm3197_vm15, %v12967_v44 }
 0x3db   : > { %13370 = vmatpush1.bf16.msra.mxu0 %v13369_v39  ;;  %4460 = vmatprep.mubr.f32.mxu0 %v17745_v59  ;;  %v4781_v28 = vsel %vm2919_vm14, %v13993_v17, %v13958_v46  ;;  %v4782_v23 = vsel %vm2919_vm14, %v13994_v52, %v13959_v57 }
 0x3dc   : > { %12971 = vmatmul.mubr.msk.f32.vlgmr.msra.gmra.mrb[62].mxu1 %vm3197_vm15, %v12967_v44  ;;  %v13375_v29 = vpack.c.bf16 %v4782_v23, %v4781_v28  ;;  %v4785_v26 = vsel %vm2919_vm14, %v13998_v11, %v13953_v45  ;;  %v4786_v42 = vsel %vm2919_vm14, %v13999_v33, %v13954_v62  ;;  %v4779_v30 = vsel %vm2919_vm14, %v13958_v46, %v13998_v11 }
 0x3dd   : > { %13374 = vmatpush1.bf16.msra.mxu1 %v13373_v35  ;;  %4537 = vmatprep.mubr.f32.mxu1 %v17745_v59  ;;  %v13379_v60 = vpack.c.bf16 %v4786_v42, %v4785_v26  ;;  %v4780_v22 = vsel %vm2919_vm14, %v13959_v57, %v13999_v33 }
 0x3de   : > { %12970 = vmatmul.mubr.msk.f32.gmra.mrb[64].mxu0 %vm3197_vm15, %v12968_v51  ;;  %13376 = vmatprep.subr.bf16.mxu0 %v13375_v29  ;;  %v13381_v48 = vpack.c.bf16 %v4780_v22, %v4779_v30 }
 0x3df   : > { %4657 = vmatprep.mubr.f32.mxu0 %v17745_v59  ;;  %13380 = vmatprep.subr.bf16.mxu1 %v13379_v60 }
 0x3e0   : > { %12972 = vmatmul.mubr.msk.f32.gmra.mrb[64].mxu1 %vm3197_vm15, %v12968_v51 }
 0x3e1   : > { %4734 = vmatprep.mubr.f32.mxu1 %v17745_v59 }
 0x3e2   : > { %12975 = vmatmul.mubr.msk.f32.vlgmr.msra.gmra.mrb[66].mxu0 %vm3197_vm15, %v12973_v3 }
 0x3e3   : > { %13378 = vmatpush1.bf16.msra.mxu0 %v13377_v5  ;;  %4663 = vmatprep.mubr.f32.mxu0 %v17745_v59 }
 0x3e4   : > { %12977 = vmatmul.mubr.msk.f32.vlgmr.msra.gmra.mrb[66].mxu1 %vm3197_vm15, %v12973_v3 }
 0x3e5   : > { %13382 = vmatpush1.bf16.msra.mxu1 %v13381_v48  ;;  %4740 = vmatprep.mubr.f32.mxu1 %v17745_v59 }
 0x3e6   : > { %12976 = vmatmul.mubr.msk.f32.gmra.mrb[68].mxu0 %vm3197_vm15, %v12974_v7 }
 0x3e7   : > { %4860 = vmatprep.mubr.f32.mxu0 %v17745_v59 }
 0x3e8   : > { %12978 = vmatmul.mubr.msk.f32.gmra.mrb[68].mxu1 %vm3197_vm15, %v12974_v7 }
 0x3e9   : > { %4937 = vmatprep.mubr.f32.mxu1 %v17745_v59 }
 0x3ea   : > { %12981 = vmatmul.mubr.msk.f32.vlgmr.msra.gmra.mrb[70].mxu0 %vm3197_vm15, %v12979_v24 }
 0x3eb   : > { %4866 = vmatprep.mubr.f32.mxu0 %v17745_v59 }
 0x3ec   : > { %12983 = vmatmul.mubr.msk.f32.vlgmr.msra.gmra.mrb[70].mxu1 %vm3197_vm15, %v12979_v24 }
 0x3ed   : > { %4943 = vmatprep.mubr.f32.mxu1 %v17745_v59 }
 0x3ee   : > { %12982 = vmatmul.mubr.msk.f32.gmra.mrb[72].mxu0 %vm3197_vm15, %v12980_v27 }
 0x3ef   : > { %5086 = vmatprep.mubr.f32.mxu0 %v17745_v59 }
 0x3f0   : > { %12984 = vmatmul.mubr.msk.f32.gmra.mrb[72].mxu1 %vm3197_vm15, %v12980_v27 }
 0x3f1   : > { %5157 = vmatprep.mubr.f32.mxu1 %v17745_v59 }
 0x47d   : > { %v3270_v21 = vpop.f32.mrb[38].mxu0 }
 0x47e   : > { %v3272_v44 = vpop.f32.mrb[39].mxu0  ;;  %v3347_v32 = vpop.f32.mrb[38].mxu1  ;;  %v3358_v46 = vmul.f32 %v3270_v21, %v15772_v61 }
 0x47f   : > { %v3349_v6 = vpop.f32.mrb[39].mxu1  ;;  %v3359_v45 = vmul.f32 %v3272_v44, %v15784_v43  ;;  %v3360_v35 = vmul.f32 %v3347_v32, %v15788_v25 }
 0x480   : > { %v3361_v29 = vmul.f32 %v3349_v6, %v15796_v36 }
 0x481   : > { %v3276_v2 = vpop.f32.mrb[40].mxu0 }
 0x482   : > { %v3278_v39 = vpop.f32.mrb[41].mxu0  ;;  %v3353_v52 = vpop.f32.mrb[40].mxu1  ;;  %v3362_v56 = vmul.f32 %v3276_v2, %v15772_v61 }
 0x483   : > { %v3355_v17 = vpop.f32.mrb[41].mxu1  ;;  %v3363_v22 = vmul.f32 %v3278_v39, %v15784_v43  ;;  %v3364_v24 = vmul.f32 %v3353_v52, %v15788_v25 }
 0x484   : > { %v3365_v32 = vmul.f32 %v3355_v17, %v15796_v36 }
 0x485   : > { %v3473_v57 = vpop.f32.mrb[42].mxu0 }
 0x486   : > { %v3561_v10 = vmul.f32 %v3473_v57, %v15768_v54  ;;  %v3475_v62 = vpop.f32.mrb[43].mxu0 }
 0x487   : > { %v3562_v33 = vmul.f32 %v3475_v62, %v15776_v4  ;;  %v3550_v11 = vpop.f32.mrb[42].mxu1 }
 0x488   : > { %v3569_v51 = vadd.f32 %v3561_v10, %v3358_v46  ;;  %v3563_v28 = vmul.f32 %v3550_v11, %v15780_v31  ;;  %v3552_v23 = vpop.f32.mrb[43].mxu1 }
 0x489   : > { %v3570_v26 = vadd.f32 %v3562_v33, %v3359_v45  ;;  %v3564_v42 = vmul.f32 %v3552_v23, %v15792_v9  ;;  %v3479_v0 = vpop.f32.mrb[44].mxu0 }
 0x48a   : > { %v3571_v60 = vadd.f32 %v3563_v28, %v3360_v35  ;;  %v3565_v3 = vmul.f32 %v3479_v0, %v15768_v54  ;;  %v3481_v30 = vpop.f32.mrb[45].mxu0 }
 0x48b   : > { %v3572_v5 = vadd.f32 %v3564_v42, %v3361_v29  ;;  %v3566_v48 = vmul.f32 %v3481_v30, %v15776_v4  ;;  %v3556_v7 = vpop.f32.mrb[44].mxu1 }
 0x48c   : > { %v3573_v27 = vadd.f32 %v3565_v3, %v3362_v56  ;;  %v3567_v21 = vmul.f32 %v3556_v7, %v15780_v31  ;;  %v3558_v44 = vpop.f32.mrb[45].mxu1 }
 0x48d   : > { %v3574_v6 = vadd.f32 %v3566_v48, %v3363_v22  ;;  %v3568_v2 = vmul.f32 %v3558_v44, %v15792_v9  ;;  %v3676_v57 = vpop.f32.mrb[46].mxu0 }
 0x48e   : > { %v3575_v46 = vadd.f32 %v3567_v21, %v3364_v24  ;;  %v3764_v10 = vmul.f32 %v3676_v57, %v15808_v14  ;;  %v3678_v39 = vpop.f32.mrb[47].mxu0 }
 0x48f   : > { %v3576_v62 = vadd.f32 %v3568_v2, %v3365_v32  ;;  %v3765_v45 = vmul.f32 %v3678_v39, %v15814_v34  ;;  %v3753_v33 = vpop.f32.mrb[46].mxu1 }
 0x490   : > { %v3772_v11 = vadd.f32 %v3764_v10, %v3569_v51  ;;  %v3766_v52 = vmul.f32 %v3753_v33, %v15824_v38  ;;  %v3755_v35 = vpop.f32.mrb[47].mxu1 }
 0x491   : > { %v3773_v28 = vadd.f32 %v3765_v45, %v3570_v26  ;;  %v3767_v23 = vmul.f32 %v3755_v35, %v15829_v58  ;;  %v3682_v17 = vpop.f32.mrb[48].mxu0 }
 0x492   : > { %v3774_v29 = vadd.f32 %v3766_v52, %v3571_v60  ;;  %v3768_v42 = vmul.f32 %v3682_v17, %v15808_v14  ;;  %v3684_v0 = vpop.f32.mrb[49].mxu0 }
 0x493   : > { %v3775_v56 = vadd.f32 %v3767_v23, %v3572_v5  ;;  %v3769_v3 = vmul.f32 %v3684_v0, %v15814_v34  ;;  %v3759_v30 = vpop.f32.mrb[48].mxu1 }
 0x494   : > { %v3776_v22 = vadd.f32 %v3768_v42, %v3573_v27  ;;  %v3770_v48 = vmul.f32 %v3759_v30, %v15824_v38  ;;  %v3761_v7 = vpop.f32.mrb[49].mxu1 }
 0x495   : > { %v3777_v51 = vadd.f32 %v3769_v3, %v3574_v6  ;;  %v3771_v24 = vmul.f32 %v3761_v7, %v15829_v58  ;;  %v3879_v21 = vpop.f32.mrb[50].mxu0 }
 0x496   : > { %v3778_v26 = vadd.f32 %v3770_v48, %v3575_v46  ;;  %v3967_v44 = vmul.f32 %v3879_v21, %v15837_v47  ;;  %v3881_v32 = vpop.f32.mrb[51].mxu0 }
 0x497   : > { %v3779_v60 = vadd.f32 %v3771_v24, %v3576_v62  ;;  %v3968_v2 = vmul.f32 %v3881_v32, %v15842_v53  ;;  %v3956_v57 = vpop.f32.mrb[50].mxu1 }
 0x498   : > { %v3969_v5 = vmul.f32 %v3956_v57, %v15846_v63  ;;  %v3958_v10 = vpop.f32.mrb[51].mxu1  ;;  %v3975_v39 = vadd.f32 %v3967_v44, %v3772_v11 }
 0x499   : > { %v3970_v27 = vmul.f32 %v3958_v10, %v15851_v12  ;;  %v3885_v45 = vpop.f32.mrb[52].mxu0  ;;  %v3976_v33 = vadd.f32 %v3968_v2, %v3773_v28 }
 0x49a   : > { %v3971_v6 = vmul.f32 %v3885_v45, %v15837_v47  ;;  %v3887_v52 = vpop.f32.mrb[53].mxu0  ;;  %v3977_v35 = vadd.f32 %v3969_v5, %v3774_v29 }
 0x49b   : > { %v3972_v46 = vmul.f32 %v3887_v52, %v15842_v53  ;;  %v3962_v23 = vpop.f32.mrb[52].mxu1  ;;  %v3978_v17 = vadd.f32 %v3970_v27, %v3775_v56 }
 0x49c   : > { %v3973_v62 = vmul.f32 %v3962_v23, %v15846_v63  ;;  %v3964_v42 = vpop.f32.mrb[53].mxu1  ;;  %v3979_v0 = vadd.f32 %v3971_v6, %v3776_v22 }
 0x49d   : > { %v3974_v3 = vmul.f32 %v3964_v42, %v15851_v12  ;;  %v4058_v30 = vpop.f32.mrb[54].mxu0  ;;  %v3980_v11 = vadd.f32 %v3972_v46, %v3777_v51 }
 0x49e   : > { %v4146_v48 = vadd.f32 %v4058_v30, %v3975_v39  ;;  %v4060_v7 = vpop.f32.mrb[55].mxu0  ;;  %v3981_v24 = vadd.f32 %v3973_v62, %v3778_v26 }
 0x49f   : > { %v4147_v28 = vadd.f32 %v4060_v7, %v3976_v33  ;;  %v4135_v21 = vpop.f32.mrb[54].mxu1  ;;  %v3982_v44 = vadd.f32 %v3974_v3, %v3779_v60 }
 0x4a0   : > { %v4148_v32 = vadd.f32 %v4135_v21, %v3977_v35  ;;  %v4137_v29 = vpop.f32.mrb[55].mxu1 }
 0x4a1   : > { %v4149_v2 = vadd.f32 %v4137_v29, %v3978_v17  ;;  %v4064_v57 = vpop.f32.mrb[56].mxu0 }
 0x4a2   : > { %v4150_v5 = vadd.f32 %v4064_v57, %v3979_v0  ;;  %v4066_v56 = vpop.f32.mrb[57].mxu0 }
 0x4a3   : > { %v4151_v10 = vadd.f32 %v4066_v56, %v3980_v11  ;;  %v4141_v27 = vpop.f32.mrb[56].mxu1 }
 0x4a4   : > { %v4152_v45 = vadd.f32 %v4141_v27, %v3981_v24  ;;  %v4143_v22 = vpop.f32.mrb[57].mxu1 }
 0x4a5   : > { %v4153_v6 = vadd.f32 %v4143_v22, %v3982_v44  ;;  %v4253_v52 = vpop.f32.mrb[58].mxu0 }
 0x4a6   : > { %v4341_v51 = vmul.f32 %v4253_v52, %v15864_v16  ;;  %v4255_v39 = vpop.f32.mrb[59].mxu0 }
 0x4a7   : > { %v4342_v26 = vmul.f32 %v4255_v39, %v15867_v15  ;;  %v4330_v33 = vpop.f32.mrb[58].mxu1 }
 0x4a8   : > { %v4349_v46 = vadd.f32 %v4341_v51, %v4146_v48  ;;  %v4343_v60 = vmul.f32 %v4330_v33, %v15870_v50  ;;  %v4332_v35 = vpop.f32.mrb[59].mxu1 }
 0x4a9   : > { %v4350_v23 = vadd.f32 %v4342_v26, %v4147_v28  ;;  %v4344_v17 = vmul.f32 %v4332_v35, %v15873_v18  ;;  %v4259_v62 = vpop.f32.mrb[60].mxu0 }
 0x4aa   : > { %v4351_v42 = vadd.f32 %v4343_v60, %v4148_v32  ;;  %v4345_v0 = vmul.f32 %v4259_v62, %v15864_v16  ;;  %v4261_v3 = vpop.f32.mrb[61].mxu0 }
 0x4ab   : > { %v4352_v30 = vadd.f32 %v4344_v17, %v4149_v2  ;;  %v4346_v11 = vmul.f32 %v4261_v3, %v15867_v15  ;;  %v4336_v7 = vpop.f32.mrb[60].mxu1 }
 0x4ac   : > { %v4353_v24 = vadd.f32 %v4345_v0, %v4150_v5  ;;  %v4347_v21 = vmul.f32 %v4336_v7, %v15870_v50  ;;  %v4338_v44 = vpop.f32.mrb[61].mxu1 }
 0x4ad   : > { %v4354_v48 = vadd.f32 %v4346_v11, %v4151_v10  ;;  %v4348_v29 = vmul.f32 %v4338_v44, %v15873_v18  ;;  %v4456_v57 = vpop.f32.mrb[62].mxu0 }
 0x4ae   : > { %v4355_v28 = vadd.f32 %v4347_v21, %v4152_v45  ;;  %v4544_v56 = vmul.f32 %v4456_v57, %v15882_v20  ;;  %v4458_v27 = vpop.f32.mrb[63].mxu0 }
 0x4af   : > { %v4356_v32 = vadd.f32 %v4348_v29, %v4153_v6  ;;  %v4545_v22 = vmul.f32 %v4458_v27, %v15887_v8  ;;  %v4533_v52 = vpop.f32.mrb[62].mxu1 }
 0x4b0   : > { %v4552_v2 = vadd.f32 %v4544_v56, %v4349_v46  ;;  %v4546_v51 = vmul.f32 %v4533_v52, %v15890_v55  ;;  %v4535_v39 = vpop.f32.mrb[63].mxu1 }
 0x4b1   : > { %v4553_v5 = vadd.f32 %v4545_v22, %v4350_v23  ;;  %v4547_v26 = vmul.f32 %v4535_v39, %v15894_v41  ;;  %v4462_v33 = vpop.f32.mrb[64].mxu0 }
 0x4b2   : > { %v4554_v10 = vadd.f32 %v4546_v51, %v4351_v42  ;;  %v4548_v60 = vmul.f32 %v4462_v33, %v15882_v20  ;;  %v4464_v35 = vpop.f32.mrb[65].mxu0 }
 0x4b3   : > { %v4555_v45 = vadd.f32 %v4547_v26, %v4352_v30  ;;  %v4549_v17 = vmul.f32 %v4464_v35, %v15887_v8  ;;  %v4539_v62 = vpop.f32.mrb[64].mxu1 }
 0x4b4   : > { %v4556_v6 = vadd.f32 %v4548_v60, %v4353_v24  ;;  %v4550_v0 = vmul.f32 %v4539_v62, %v15890_v55  ;;  %v4541_v3 = vpop.f32.mrb[65].mxu1 }
 0x4b5   : > { %v4557_v46 = vadd.f32 %v4549_v17, %v4354_v48  ;;  %v4551_v11 = vmul.f32 %v4541_v3, %v15894_v41  ;;  %v4659_v7 = vpop.f32.mrb[66].mxu0 }
 0x4b6   : > { %v4558_v23 = vadd.f32 %v4550_v0, %v4355_v28  ;;  %v4747_v21 = vmul.f32 %v4659_v7, %v15903_v49  ;;  %v4661_v44 = vpop.f32.mrb[67].mxu0 }
 0x4b7   : > { %v4559_v42 = vadd.f32 %v4551_v11, %v4356_v32  ;;  %v4748_v29 = vmul.f32 %v4661_v44, %v15908_v13  ;;  %v4736_v57 = vpop.f32.mrb[66].mxu1  ;;  %v17776_v11 = vld [vmem:[#allocation31_spill] sm:$0xff]  ;;  %v17777_v44 = vld [vmem:[#allocation32_spill] sm:$0xff] }
 0x4b8   : > { %v4755_v30 = vadd.f32 %v4747_v21, %v4552_v2  ;;  %v4749_v56 = vmul.f32 %v4736_v57, %v15911_v1  ;;  %v4738_v27 = vpop.f32.mrb[67].mxu1 }
 0x4b9   : > { %v4756_v24 = vadd.f32 %v4748_v29, %v4553_v5  ;;  %v4750_v22 = vmul.f32 %v4738_v27, %v15915_v37  ;;  %v4665_v52 = vpop.f32.mrb[68].mxu0 }
 0x4ba   : > { %v4757_v48 = vadd.f32 %v4749_v56, %v4554_v10  ;;  %v4751_v51 = vmul.f32 %v4665_v52, %v15903_v49  ;;  %v4667_v39 = vpop.f32.mrb[69].mxu0  ;;  %v17778_v56 = vld [vmem:[#allocation27_spill] sm:$0xff] }
 0x4bb   : > { %v4758_v28 = vadd.f32 %v4750_v22, %v4555_v45  ;;  %v4752_v26 = vmul.f32 %v4667_v39, %v15908_v13  ;;  %v4742_v33 = vpop.f32.mrb[68].mxu1 }
 0x4bc   : > { %v4759_v32 = vadd.f32 %v4751_v51, %v4556_v6  ;;  %v4753_v60 = vmul.f32 %v4742_v33, %v15911_v1  ;;  %v4744_v35 = vpop.f32.mrb[69].mxu1 }
 0x4bd   : > { %v4760_v2 = vadd.f32 %v4752_v26, %v4557_v46  ;;  %v4754_v17 = vmul.f32 %v4744_v35, %v15915_v37  ;;  %v4862_v62 = vpop.f32.mrb[70].mxu0 }
 0x4be   : > { %v4761_v5 = vadd.f32 %v4753_v60, %v4558_v23  ;;  %v4950_v0 = vmul.f32 %v15923_v19, %v4862_v62  ;;  %v4864_v3 = vpop.f32.mrb[71].mxu0  ;;  %v4971_v23 = vpop.permute.xlu1 %4970 }
 0x4bf   : > { %v4762_v10 = vadd.f32 %v4754_v17, %v4559_v42  ;;  %v4951_v7 = vmul.f32 %v17776_v11, %v4864_v3  ;;  %v4939_v21 = vpop.f32.mrb[70].mxu1  ;;  %v4976_v62 = vpop.permute.xlu0 %4975 }
 0x4c0   : > { %v4958_v45 = vadd.f32 %v4950_v0, %v4755_v30  ;;  %v4952_v29 = vmul.f32 %v17777_v44, %v4939_v21  ;;  %v4941_v57 = vpop.f32.mrb[71].mxu1 }
 0x4c1   : > { %v4959_v6 = vadd.f32 %v4951_v7, %v4756_v24  ;;  %v4953_v27 = vmul.f32 %v17778_v56, %v4941_v57  ;;  %v4868_v22 = vpop.f32.mrb[72].mxu0 }
 0x4c2   : > { %v4960_v46 = vadd.f32 %v4952_v29, %v4757_v48  ;;  %v4954_v52 = vmul.f32 %v15923_v19, %v4868_v22  ;;  %v4870_v51 = vpop.f32.mrb[73].mxu0  ;;  %v4978_v33 = vadd.f32 %v4971_v23, %v4958_v45 }
 0x4c3   : > { %v4961_v39 = vadd.f32 %v4953_v27, %v4758_v28  ;;  %v4955_v26 = vmul.f32 %v17776_v11, %v4870_v51  ;;  %v4945_v42 = vpop.f32.mrb[72].mxu1  ;;  %v4979_v60 = vadd.f32 %v4971_v23, %v4959_v6 }
 0x4c4   : > { %v4962_v35 = vadd.f32 %v4954_v52, %v4759_v32  ;;  %v4956_v30 = vmul.f32 %v17777_v44, %v4945_v42  ;;  %v4947_v17 = vpop.f32.mrb[73].mxu1  ;;  %v4980_v24 = vadd.f32 %v4971_v23, %v4960_v46  ;;  %v4986_v28 = vmax.f32 %v4978_v33, 0.0 }
 0x4c5   : > { %v4981_v0 = vadd.f32 %v4971_v23, %v4961_v39  ;;  %v4963_v3 = vadd.f32 %v4955_v26, %v4760_v2  ;;  %v4957_v48 = vmul.f32 %v17778_v56, %v4947_v17  ;;  %v4987_v27 = vmax.f32 %v4979_v60, 0.0 }
 0x4c6   : > { %v4982_v7 = vadd.f32 %v4976_v62, %v4962_v35  ;;  %v4964_v21 = vadd.f32 %v4956_v30, %v4761_v5  ;;  %v4988_v45 = vmax.f32 %v4980_v24, 0.0 }
 0x4c7   : > { %v4983_v29 = vadd.f32 %v4976_v62, %v4963_v3  ;;  %v4965_v57 = vadd.f32 %v4957_v48, %v4762_v10  ;;  %v4989_v6 = vmax.f32 %v4981_v0, 0.0 }
 0x4c8   : > { %v4990_v22 = vmax.f32 %v4982_v7, 0.0  ;;  %v4984_v51 = vadd.f32 %v4976_v62, %v4964_v21 }
 0x4c9   : > { %v4991_v32 = vmax.f32 %v4983_v29, 0.0  ;;  %v4985_v52 = vadd.f32 %v4976_v62, %v4965_v57 }
 0x4ca   : > { %v4992_v42 = vmax.f32 %v4984_v51, 0.0  ;;  %v14000_v44 = vpack.i.bf16 %v4990_v22, %v4986_v28  ;;  %v16329_v39 = vpack.c.bf16 %v4990_v22, %v4986_v28 }
 0x4cb   : > { %v4993_v11 = vmax.f32 %v4985_v52, 0.0  ;;  %v14080_v46 = vpack.i.bf16 %v4991_v32, %v4987_v27  ;;  %v16325_v10 = vpack.c.bf16 %v4991_v32, %v4987_v27 }
 0x4cc   : > { %14001 = vrot.lane.b32.xlu1 %v14000_v44, %s14346_s0  ;;  %v14005_v2 = vpack.i.bf16 %v4992_v42, %v4988_v45  ;;  %v16331_v26 = vpack.c.bf16 %v4992_v42, %v4988_v45 }
 0x4cd   : > { %14081 = vrot.lane.b32.xlu0 %v14080_v46, %s14346_s0  ;;  %v14085_v5 = vpack.i.bf16 %v4993_v11, %v4989_v6  ;;  %v16327_v23 = vpack.c.bf16 %v4993_v11, %v4989_v6  ;;  %v6576_v11 = vld [vmem:[%s17630_s10] sm:$0xff] }
 0x4d0   : > { %14006 = vrot.lane.b32.xlu1 %v14005_v2, %s14346_s0 }
 0x4d1   : > { %14086 = vrot.lane.b32.xlu0 %v14085_v5, %s14346_s0 }
 0x4d4   : > { %14011 = vrot.lane.b32.xlu1 %v14000_v44, %s14347_s22 }
 0x4d5   : > { %14091 = vrot.lane.b32.xlu0 %v14080_v46, %s14347_s22 }
 0x4d8   : > { %14016 = vrot.lane.b32.xlu1 %v14005_v2, %s14347_s22 }
 0x4d9   : > { %14096 = vrot.lane.b32.xlu0 %v14085_v5, %s14347_s22 }
 0x4dc   : > { %14021 = vrot.lane.b32.xlu1 %v14000_v44, %s14348_s28 }
 0x4dd   : > { %14101 = vrot.lane.b32.xlu0 %v14080_v46, %s14348_s28 }
 0x4e0   : > { %14026 = vrot.lane.b32.xlu1 %v14005_v2, %s14348_s28 }
 0x4e1   : > { %14106 = vrot.lane.b32.xlu0 %v14085_v5, %s14348_s28 }
 0x4e4   : > { %14031 = vrot.lane.b32.xlu1 %v14000_v44, %s14349_s3 }
 0x4e5   : > { %14111 = vrot.lane.b32.xlu0 %v14080_v46, %s14349_s3 }
 0x4e8   : > { %14036 = vrot.lane.b32.xlu1 %v14005_v2, %s14349_s3 }
 0x4e9   : > { %14116 = vrot.lane.b32.xlu0 %v14085_v5, %s14349_s3 }
 0x4ec   : > { %14041 = vrot.lane.b32.xlu1 %v14000_v44, %s17772_s23 }
 0x4ed   : > { %14121 = vrot.lane.b32.xlu0 %v14080_v46, %s17772_s23 }
 0x4f0   : > { %14046 = vrot.lane.b32.xlu1 %v14005_v2, %s17772_s23 }
 0x4f1   : > { %14126 = vrot.lane.b32.xlu0 %v14085_v5, %s17772_s23 }
 0x4f4   : > { %14051 = vrot.lane.b32.xlu1 %v14000_v44, %s17773_s25 }
 0x4f5   : > { %14131 = vrot.lane.b32.xlu0 %v14080_v46, %s17773_s25 }
 0x4f8   : > { %14056 = vrot.lane.b32.xlu1 %v14005_v2, %s17773_s25 }
 0x4f9   : > { %14136 = vrot.lane.b32.xlu0 %v14085_v5, %s17773_s25 }
 0x4fc   : > { %14061 = vrot.lane.b32.xlu1 %v14000_v44, %s17774_s24 }
 0x4fd   : > { %14141 = vrot.lane.b32.xlu0 %v14080_v46, %s17774_s24 }
 0x500   : > { %14066 = vrot.lane.b32.xlu1 %v14005_v2, %s17774_s24 }
 0x501   : > { %14146 = vrot.lane.b32.xlu0 %v14085_v5, %s17774_s24 }
 0x504   : > { %14071 = vrot.lane.b32.xlu1 %v14000_v44, %s17775_s29 }
 0x505   : > { %14151 = vrot.lane.b32.xlu0 %v14080_v46, %s17775_s29 }
 0x508   : > { %14076 = vrot.lane.b32.xlu1 %v14005_v2, %s17775_s29 }
 0x509   : > { %14156 = vrot.lane.b32.xlu0 %v14085_v5, %s17775_s29 }
 0x50c   : > { %6579 = vperm.xlu1 %13839, %v6576_v11  }
 0x53e   : > { %v14002_v33 = vpop.permute.xlu1 %14001 }
 0x53f   : > { %v14004_v60 = vunpack.i.h.bf16 %v14002_v33  ;;  %v14003_v35 = vunpack.i.l.bf16 %v14002_v33  ;;  %v14082_v30 = vpop.permute.xlu0 %14081 }
 0x540   : > { %v14084_v17 = vunpack.i.h.bf16 %v14082_v30  ;;  %v14083_v62 = vunpack.i.l.bf16 %v14082_v30 }
 0x542   : > { %v14007_v24 = vpop.permute.xlu1 %14006  ;;  %v5014_v44 = vsel %vm943_vm3, %v14003_v35, %v14083_v62  ;;  %v5015_v0 = vsel %vm943_vm3, %v14004_v60, %v14084_v17 }
 0x543   : > { %v14009_v3 = vunpack.i.h.bf16 %v14007_v24  ;;  %v14008_v48 = vunpack.i.l.bf16 %v14007_v24  ;;  %v14087_v7 = vpop.permute.xlu0 %14086  ;;  %v13383_v21 = vpack.c.bf16 %v5015_v0, %v5014_v44 }
 0x544   : > { %v14089_v29 = vunpack.i.h.bf16 %v14087_v7  ;;  %v14088_v57 = vunpack.i.l.bf16 %v14087_v7 }
 0x545   : > { %v5012_v28 = vsel %vm943_vm3, %v14083_v62, %v14008_v48  ;;  %v5013_v27 = vsel %vm943_vm3, %v14084_v17, %v14009_v3  ;;  %13384 = vmatprep.subr.bf16.mxu0 %v13383_v21 }
 0x546   : > { %v5017_v22 = vsel %vm943_vm3, %v14089_v29, %v14004_v60  ;;  %v5016_v51 = vsel %vm943_vm3, %v14088_v57, %v14003_v35  ;;  %v14012_v45 = vpop.permute.xlu1 %14011  ;;  %v5010_v6 = vsel %vm943_vm3, %v14008_v48, %v14088_v57  ;;  %v5011_v32 = vsel %vm943_vm3, %v14009_v3, %v14089_v29  ;;  %v5018_v60 = vld [vmem:[%s17629_s9] sm:$0xff] }
 0x547   : > { %v14014_v52 = vunpack.i.h.bf16 %v14012_v45  ;;  %v14013_v42 = vunpack.i.l.bf16 %v14012_v45  ;;  %v14092_v46 = vpop.permute.xlu0 %14091  ;;  %v13385_v2 = vpack.c.bf16 %v5017_v22, %v5016_v51  ;;  %v13387_v5 = vpack.c.bf16 %v5011_v32, %v5010_v6 }
 0x548   : > { %v14094_v11 = vunpack.i.h.bf16 %v14092_v46  ;;  %v14093_v33 = vunpack.i.l.bf16 %v14092_v46  ;;  %v13389_v30 = vpack.c.bf16 %v5013_v27, %v5012_v28 }
 0x549   : > { %13386 = vmatpush1.bf16.msra.mxu0 %v13385_v2  ;;  %13388 = vmatprep.subr.bf16.mxu1 %v13387_v5 }
 0x54a   : > { %v14017_v35 = vpop.permute.xlu1 %14016  ;;  %13390 = vmatpush1.bf16.msra.mxu1 %v13389_v30  ;;  %v5192_v17 = vsel %vm1200_vm4, %v14013_v42, %v14093_v33  ;;  %v5193_v62 = vsel %vm1200_vm4, %v14014_v52, %v14094_v11 }
 0x54b   : > { %v14019_v24 = vunpack.i.h.bf16 %v14017_v35  ;;  %v14018_v44 = vunpack.i.l.bf16 %v14017_v35  ;;  %v14097_v0 = vpop.permute.xlu0 %14096  ;;  %v13391_v3 = vpack.c.bf16 %v5193_v62, %v5192_v17 }
 0x54c   : > { %v14099_v48 = vunpack.i.h.bf16 %v14097_v0  ;;  %v14098_v7 = vunpack.i.l.bf16 %v14097_v0  ;;  %12985 = vmatmul.mubr.msk.f32.vlgmr.msra.gmra.mrb[74].mxu0 %vm3197_vm15, %v5018_v60 }
 0x54d   : > { %v5190_v21 = vsel %vm1200_vm4, %v14093_v33, %v14018_v44  ;;  %v5191_v29 = vsel %vm1200_vm4, %v14094_v11, %v14019_v24  ;;  %13392 = vmatprep.subr.bf16.mxu0 %v13391_v3  ;;  %12986 = vmatmul.mubr.msk.f32.vlgmr.msra.gmra.mrb[74].mxu1 %vm3197_vm15, %v5018_v60 }
 0x54e   : > { %v5195_v57 = vsel %vm1200_vm4, %v14099_v48, %v14014_v52  ;;  %v5194_v28 = vsel %vm1200_vm4, %v14098_v7, %v14013_v42  ;;  %v14022_v27 = vpop.permute.xlu1 %14021  ;;  %v5188_v22 = vsel %vm1200_vm4, %v14018_v44, %v14098_v7  ;;  %v5189_v51 = vsel %vm1200_vm4, %v14019_v24, %v14099_v48  ;;  %5265 = vmatprep.mubr.f32.mxu0 %v17745_v59  ;;  %v12987_v42 = vld [vmem:[%s17629_s9 + $0x8] sm:$0xff] }
 0x54f   : > { %v14024_v45 = vunpack.i.h.bf16 %v14022_v27  ;;  %v14023_v6 = vunpack.i.l.bf16 %v14022_v27  ;;  %v14102_v32 = vpop.permute.xlu0 %14101  ;;  %v13393_v46 = vpack.c.bf16 %v5195_v57, %v5194_v28  ;;  %v13395_v2 = vpack.c.bf16 %v5189_v51, %v5188_v22  ;;  %5336 = vmatprep.mubr.f32.mxu1 %v17745_v59 }
 0x550   : > { %v14104_v52 = vunpack.i.h.bf16 %v14102_v32  ;;  %v14103_v5 = vunpack.i.l.bf16 %v14102_v32  ;;  %v13397_v11 = vpack.c.bf16 %v5191_v29, %v5190_v21 }
 0x551   : > { %13394 = vmatpush1.bf16.msra.mxu0 %v13393_v46  ;;  %13396 = vmatprep.subr.bf16.mxu1 %v13395_v2 }
 0x552   : > { %v14027_v33 = vpop.permute.xlu1 %14026  ;;  %13398 = vmatpush1.bf16.msra.mxu1 %v13397_v11  ;;  %v5371_v30 = vsel %vm1456_vm6, %v14023_v6, %v14103_v5  ;;  %v5372_v60 = vsel %vm1456_vm6, %v14024_v45, %v14104_v52 }
 0x553   : > { %v14029_v35 = vunpack.i.h.bf16 %v14027_v33  ;;  %v14028_v17 = vunpack.i.l.bf16 %v14027_v33  ;;  %v14107_v62 = vpop.permute.xlu0 %14106  ;;  %v13399_v24 = vpack.c.bf16 %v5372_v60, %v5371_v30 }
 0x554   : > { %v14109_v44 = vunpack.i.h.bf16 %v14107_v62  ;;  %v14108_v0 = vunpack.i.l.bf16 %v14107_v62  ;;  %12988 = vmatmul.mubr.msk.f32.vlgmr.msra.gmra.mrb[76].mxu0 %vm3197_vm15, %v12987_v42 }
 0x555   : > { %v5369_v3 = vsel %vm1456_vm6, %v14103_v5, %v14028_v17  ;;  %v5370_v48 = vsel %vm1456_vm6, %v14104_v52, %v14029_v35  ;;  %13400 = vmatprep.subr.bf16.mxu0 %v13399_v24  ;;  %12989 = vmatmul.mubr.msk.f32.vlgmr.msra.gmra.mrb[76].mxu1 %vm3197_vm15, %v12987_v42 }
 0x556   : > { %v5374_v7 = vsel %vm1456_vm6, %v14109_v44, %v14024_v45  ;;  %v5373_v21 = vsel %vm1456_vm6, %v14108_v0, %v14023_v6  ;;  %v14032_v29 = vpop.permute.xlu1 %14031  ;;  %v5367_v57 = vsel %vm1456_vm6, %v14028_v17, %v14108_v0  ;;  %v5368_v28 = vsel %vm1456_vm6, %v14029_v35, %v14109_v44  ;;  %5444 = vmatprep.mubr.f32.mxu0 %v17745_v59  ;;  %v12990_v6 = vld [vmem:[%s17629_s9 + $0x10] sm:$0xff] }
 0x557   : > { %v14034_v27 = vunpack.i.h.bf16 %v14032_v29  ;;  %v14033_v22 = vunpack.i.l.bf16 %v14032_v29  ;;  %v14112_v51 = vpop.permute.xlu0 %14111  ;;  %v13401_v32 = vpack.c.bf16 %v5374_v7, %v5373_v21  ;;  %v13403_v46 = vpack.c.bf16 %v5368_v28, %v5367_v57  ;;  %5515 = vmatprep.mubr.f32.mxu1 %v17745_v59 }
 0x558   : > { %v14114_v45 = vunpack.i.h.bf16 %v14112_v51  ;;  %v14113_v2 = vunpack.i.l.bf16 %v14112_v51  ;;  %v13405_v52 = vpack.c.bf16 %v5370_v48, %v5369_v3 }
 0x559   : > { %13402 = vmatpush1.bf16.msra.mxu0 %v13401_v32  ;;  %13404 = vmatprep.subr.bf16.mxu1 %v13403_v46 }
 0x55a   : > { %v14037_v5 = vpop.permute.xlu1 %14036  ;;  %13406 = vmatpush1.bf16.msra.mxu1 %v13405_v52  ;;  %v5550_v11 = vsel %vm1712_vm10, %v14033_v22, %v14113_v2  ;;  %v5551_v42 = vsel %vm1712_vm10, %v14034_v27, %v14114_v45 }
 0x55b   : > { %v14039_v33 = vunpack.i.h.bf16 %v14037_v5  ;;  %v14038_v30 = vunpack.i.l.bf16 %v14037_v5  ;;  %v14117_v60 = vpop.permute.xlu0 %14116  ;;  %v13407_v35 = vpack.c.bf16 %v5551_v42, %v5550_v11 }
 0x55c   : > { %v14119_v17 = vunpack.i.h.bf16 %v14117_v60  ;;  %v14118_v62 = vunpack.i.l.bf16 %v14117_v60  ;;  %12991 = vmatmul.mubr.msk.f32.vlgmr.msra.gmra.mrb[78].mxu0 %vm3197_vm15, %v12990_v6 }
 0x55d   : > { %v5548_v24 = vsel %vm1712_vm10, %v14113_v2, %v14038_v30  ;;  %v5549_v44 = vsel %vm1712_vm10, %v14114_v45, %v14039_v33  ;;  %13408 = vmatprep.subr.bf16.mxu0 %v13407_v35  ;;  %12992 = vmatmul.mubr.msk.f32.vlgmr.msra.gmra.mrb[78].mxu1 %vm3197_vm15, %v12990_v6 }
 0x55e   : > { %v5553_v0 = vsel %vm1712_vm10, %v14119_v17, %v14034_v27  ;;  %v5552_v3 = vsel %vm1712_vm10, %v14118_v62, %v14033_v22  ;;  %v14042_v48 = vpop.permute.xlu1 %14041  ;;  %v5546_v7 = vsel %vm1712_vm10, %v14038_v30, %v14118_v62  ;;  %v5547_v21 = vsel %vm1712_vm10, %v14039_v33, %v14119_v17  ;;  %5623 = vmatprep.mubr.f32.mxu0 %v17745_v59  ;;  %v12993_v22 = vld [vmem:[%s17629_s9 + $0x18] sm:$0xff] }
 0x55f   : > { %v14044_v29 = vunpack.i.h.bf16 %v14042_v48  ;;  %v14043_v57 = vunpack.i.l.bf16 %v14042_v48  ;;  %v14122_v28 = vpop.permute.xlu0 %14121  ;;  %v13409_v51 = vpack.c.bf16 %v5553_v0, %v5552_v3  ;;  %v13411_v32 = vpack.c.bf16 %v5547_v21, %v5546_v7  ;;  %5694 = vmatprep.mubr.f32.mxu1 %v17745_v59 }
 0x560   : > { %v14124_v27 = vunpack.i.h.bf16 %v14122_v28  ;;  %v14123_v46 = vunpack.i.l.bf16 %v14122_v28  ;;  %v13413_v45 = vpack.c.bf16 %v5549_v44, %v5548_v24 }
 0x561   : > { %13410 = vmatpush1.bf16.msra.mxu0 %v13409_v51  ;;  %13412 = vmatprep.subr.bf16.mxu1 %v13411_v32  ;;  %v12999_v32 = vld [vmem:[%s17629_s9 + $0x28] sm:$0xff] }
 0x562   : > { %v5881_v2 = vsel %vm2151_vm11, %v14044_v29, %v14124_v27  ;;  %v5880_v52 = vsel %vm2151_vm11, %v14043_v57, %v14123_v46  ;;  %v14047_v6 = vpop.permute.xlu1 %14046  ;;  %13414 = vmatpush1.bf16.msra.mxu1 %v13413_v45  ;;  %13416 = vmatprep.subr.bf16.mxu0 %v16325_v10  ;;  %v12996_v10 = vld [vmem:[%s17629_s9 + $0x20] sm:$0xff] }
 0x563   : > { %v14049_v5 = vunpack.i.h.bf16 %v14047_v6  ;;  %v14048_v11 = vunpack.i.l.bf16 %v14047_v6  ;;  %v14127_v42 = vpop.permute.xlu0 %14126  ;;  %13420 = vmatprep.subr.bf16.mxu1 %v16327_v23  ;;  %v13425_v17 = vpack.c.bf16 %v5881_v2, %v5880_v52 }
 0x564   : > { %v14129_v33 = vunpack.i.h.bf16 %v14127_v42  ;;  %v14128_v30 = vunpack.i.l.bf16 %v14127_v42  ;;  %12994 = vmatmul.mubr.msk.f32.vlgmr.msra.gmra.mrb[80].mxu0 %vm3197_vm15, %v12993_v22 }
 0x565   : > { %13418 = vmatpush1.bf16.msra.mxu0 %v16329_v39  ;;  %12995 = vmatmul.mubr.msk.f32.vlgmr.msra.gmra.mrb[80].mxu1 %vm3197_vm15, %v12993_v22  ;;  %v5878_v60 = vsel %vm2151_vm11, %v14123_v46, %v14048_v11  ;;  %v5879_v35 = vsel %vm2151_vm11, %v14124_v27, %v14049_v5 }
 0x566   : > { %v5877_v23 = vsel %vm2151_vm11, %v14049_v5, %v14129_v33  ;;  %v5876_v62 = vsel %vm2151_vm11, %v14048_v11, %v14128_v30  ;;  %v14052_v39 = vpop.permute.xlu1 %14051  ;;  %13422 = vmatpush1.bf16.msra.mxu1 %v16331_v26  ;;  %5778 = vmatprep.mubr.f32.mxu0 %v17745_v59  ;;  %v13423_v24 = vpack.c.bf16 %v5879_v35, %v5878_v60 }
 0x567   : > { %v14054_v44 = vunpack.i.h.bf16 %v14052_v39  ;;  %v14053_v0 = vunpack.i.l.bf16 %v14052_v39  ;;  %v14132_v3 = vpop.permute.xlu0 %14131  ;;  %5849 = vmatprep.mubr.f32.mxu1 %v17745_v59  ;;  %v5882_v48 = vsel %vm2151_vm11, %v14128_v30, %v14043_v57  ;;  %v5883_v7 = vsel %vm2151_vm11, %v14129_v33, %v14044_v29 }
 0x568   : > { %v14134_v21 = vunpack.i.h.bf16 %v14132_v3  ;;  %v14133_v28 = vunpack.i.l.bf16 %v14132_v3  ;;  %13424 = vmatprep.subr.bf16.mxu0 %v13423_v24  ;;  %12997 = vmatmul.mubr.msk.f32.vlgmr.msra.gmra.mrb[82].mxu0 %vm3197_vm15, %v12996_v10  ;;  %v13427_v26 = vpack.c.bf16 %v5883_v7, %v5882_v48  ;;  %v13429_v51 = vpack.c.bf16 %v5877_v23, %v5876_v62  ;;  %v13002_v7 = vld [vmem:[%s17629_s9 + $0x30] sm:$0xff] }
 0x569   : > { %13426 = vmatpush1.bf16.msra.mxu0 %v13425_v17  ;;  %12998 = vmatmul.mubr.msk.f32.vlgmr.msra.gmra.mrb[82].mxu1 %vm3197_vm15, %v12996_v10 }
 0x56a   : > { %13428 = vmatprep.subr.bf16.mxu1 %v13427_v26  ;;  %v14057_v27 = vpop.permute.xlu1 %14056  ;;  %5953 = vmatprep.mubr.f32.mxu0 %v17745_v59  ;;  %v6060_v45 = vsel %vm2407_vm12, %v14054_v44, %v14134_v21  ;;  %v6059_v22 = vsel %vm2407_vm12, %v14053_v0, %v14133_v28 }
 0x56b   : > { %v14059_v57 = vunpack.i.h.bf16 %v14057_v27  ;;  %v14058_v29 = vunpack.i.l.bf16 %v14057_v27  ;;  %13430 = vmatpush1.bf16.msra.mxu1 %v13429_v51  ;;  %v14137_v46 = vpop.permute.xlu0 %14136  ;;  %6024 = vmatprep.mubr.f32.mxu1 %v17745_v59  ;;  %v13433_v17 = vpack.c.bf16 %v6060_v45, %v6059_v22 }
 0x56c   : > { %v14139_v2 = vunpack.i.h.bf16 %v14137_v46  ;;  %v14138_v52 = vunpack.i.l.bf16 %v14137_v46  ;;  %13000 = vmatmul.mubr.msk.f32.vlgmr.msra.gmra.mrb[84].mxu0 %vm3197_vm15, %v12999_v32 }
 0x56d   : > { %v6057_v6 = vsel %vm2407_vm12, %v14133_v28, %v14058_v29  ;;  %v6058_v5 = vsel %vm2407_vm12, %v14134_v21, %v14059_v57  ;;  %6132 = vmatprep.mubr.f32.mxu0 %v17745_v59 }
 0x56e   : > { %v6056_v11 = vsel %vm2407_vm12, %v14059_v57, %v14139_v2  ;;  %v6055_v42 = vsel %vm2407_vm12, %v14058_v29, %v14138_v52  ;;  %v14062_v33 = vpop.permute.xlu1 %14061  ;;  %v13431_v30 = vpack.c.bf16 %v6058_v5, %v6057_v6  ;;  %13001 = vmatmul.mubr.msk.f32.vlgmr.msra.gmra.mrb[84].mxu1 %vm3197_vm15, %v12999_v32  ;;  %v6061_v60 = vsel %vm2407_vm12, %v14138_v52, %v14053_v0 }
 0x56f   : > { %v14064_v35 = vunpack.i.h.bf16 %v14062_v33  ;;  %v14142_v10 = vpop.permute.xlu0 %14141  ;;  %v6062_v23 = vsel %vm2407_vm12, %v14139_v2, %v14054_v44  ;;  %v13437_v62 = vpack.c.bf16 %v6056_v11, %v6055_v42  ;;  %6203 = vmatprep.mubr.f32.mxu1 %v17745_v59  ;;  %v14063_v39 = vunpack.i.l.bf16 %v14062_v33 }
 0x570   : > { %v14144_v24 = vunpack.i.h.bf16 %v14142_v10  ;;  %v14143_v3 = vunpack.i.l.bf16 %v14142_v10  ;;  %13432 = vmatprep.subr.bf16.mxu0 %v13431_v30  ;;  %v13435_v48 = vpack.c.bf16 %v6062_v23, %v6061_v60  ;;  %v13005_v23 = vld [vmem:[%s17629_s9 + $0x38] sm:$0xff] }
 0x571   : > { %13434 = vmatpush1.bf16.msra.mxu0 %v13433_v17 }
 0x572   : > { %13436 = vmatprep.subr.bf16.mxu1 %v13435_v48  ;;  %v14067_v0 = vpop.permute.xlu1 %14066  ;;  %v6239_v44 = vsel %vm2663_vm13, %v14064_v35, %v14144_v24  ;;  %v6238_v51 = vsel %vm2663_vm13, %v14063_v39, %v14143_v3 }
 0x573   : > { %v14069_v21 = vunpack.i.h.bf16 %v14067_v0  ;;  %v14068_v28 = vunpack.i.l.bf16 %v14067_v0  ;;  %13438 = vmatpush1.bf16.msra.mxu1 %v13437_v62  ;;  %v14147_v26 = vpop.permute.xlu0 %14146  ;;  %v13441_v11 = vpack.c.bf16 %v6239_v44, %v6238_v51 }
 0x574   : > { %v14149_v32 = vunpack.i.h.bf16 %v14147_v26  ;;  %v14148_v27 = vunpack.i.l.bf16 %v14147_v26  ;;  %13003 = vmatmul.mubr.msk.f32.vlgmr.msra.gmra.mrb[86].mxu0 %vm3197_vm15, %v13002_v7 }
 0x575   : > { %v6236_v57 = vsel %vm2663_vm13, %v14143_v3, %v14068_v28  ;;  %v6237_v29 = vsel %vm2663_vm13, %v14144_v24, %v14069_v21  ;;  %6311 = vmatprep.mubr.f32.mxu0 %v17745_v59 }
 0x576   : > { %v6235_v46 = vsel %vm2663_vm13, %v14069_v21, %v14149_v32  ;;  %v6234_v45 = vsel %vm2663_vm13, %v14068_v28, %v14148_v27  ;;  %13004 = vmatmul.mubr.msk.f32.vlgmr.msra.gmra.mrb[86].mxu1 %vm3197_vm15, %v13002_v7  ;;  %v14072_v22 = vpop.permute.xlu1 %14071  ;;  %v13439_v2 = vpack.c.bf16 %v6237_v29, %v6236_v57  ;;  %v6240_v52 = vsel %vm2663_vm13, %v14148_v27, %v14063_v39 }
 0x577   : > { %v14074_v6 = vunpack.i.h.bf16 %v14072_v22  ;;  %v14152_v5 = vpop.permute.xlu0 %14151  ;;  %v6241_v42 = vsel %vm2663_vm13, %v14149_v32, %v14064_v35  ;;  %v13445_v33 = vpack.c.bf16 %v6235_v46, %v6234_v45  ;;  %6382 = vmatprep.mubr.f32.mxu1 %v17745_v59  ;;  %v14073_v30 = vunpack.i.l.bf16 %v14072_v22  ;;  %v13008_v45 = vld [vmem:[%s17629_s9 + $0x40] sm:$0xff] }
 0x578   : > { %v14154_v60 = vunpack.i.h.bf16 %v14152_v5  ;;  %v14153_v10 = vunpack.i.l.bf16 %v14152_v5  ;;  %13440 = vmatprep.subr.bf16.mxu0 %v13439_v2  ;;  %v13443_v17 = vpack.c.bf16 %v6241_v42, %v6240_v52 }
 0x579   : > { %13442 = vmatpush1.bf16.msra.mxu0 %v13441_v11 }
 0x57a   : > { %13444 = vmatprep.subr.bf16.mxu1 %v13443_v17  ;;  %v14077_v62 = vpop.permute.xlu1 %14076  ;;  %v6418_v35 = vsel %vm2919_vm14, %v14074_v6, %v14154_v60  ;;  %v6417_v48 = vsel %vm2919_vm14, %v14073_v30, %v14153_v10 }
 0x57b   : > { %v14079_v39 = vunpack.i.h.bf16 %v14077_v62  ;;  %v14078_v24 = vunpack.i.l.bf16 %v14077_v62  ;;  %13446 = vmatpush1.bf16.msra.mxu1 %v13445_v33  ;;  %v14157_v3 = vpop.permute.xlu0 %14156  ;;  %v13449_v27 = vpack.c.bf16 %v6418_v35, %v6417_v48 }
 0x57c   : > { %v14159_v7 = vunpack.i.h.bf16 %v14157_v3  ;;  %v14158_v0 = vunpack.i.l.bf16 %v14157_v3  ;;  %13006 = vmatmul.mubr.msk.f32.vlgmr.msra.gmra.mrb[88].mxu0 %vm3197_vm15, %v13005_v23 }
 0x57d   : > { %v6415_v21 = vsel %vm2919_vm14, %v14153_v10, %v14078_v24  ;;  %v6416_v28 = vsel %vm2919_vm14, %v14154_v60, %v14079_v39  ;;  %6490 = vmatprep.mubr.f32.mxu0 %v17745_v59 }
 0x57e   : > { %v6414_v26 = vsel %vm2919_vm14, %v14079_v39, %v14159_v7  ;;  %v6413_v44 = vsel %vm2919_vm14, %v14078_v24, %v14158_v0  ;;  %13007 = vmatmul.mubr.msk.f32.vlgmr.msra.gmra.mrb[88].mxu1 %vm3197_vm15, %v13005_v23  ;;  %v13447_v51 = vpack.c.bf16 %v6416_v28, %v6415_v21  ;;  %v6419_v32 = vsel %vm2919_vm14, %v14158_v0, %v14073_v30 }
 0x57f   : > { %v6420_v57 = vsel %vm2919_vm14, %v14159_v7, %v14074_v6  ;;  %v13453_v29 = vpack.c.bf16 %v6414_v26, %v6413_v44  ;;  %6561 = vmatprep.mubr.f32.mxu1 %v17745_v59 }
 0x580   : > { %13448 = vmatprep.subr.bf16.mxu0 %v13447_v51  ;;  %v13451_v46 = vpack.c.bf16 %v6420_v57, %v6419_v32 }
 0x581   : > { %13450 = vmatpush1.bf16.msra.mxu0 %v13449_v27 }
 0x582   : > { %13452 = vmatprep.subr.bf16.mxu1 %v13451_v46 }
 0x583   : > { %13454 = vmatpush1.bf16.msra.mxu1 %v13453_v29 }
 0x584   : > { %13009 = vmatmul.mubr.msk.f32.vlgmr.msra.gmra.mrb[90].mxu0 %vm3197_vm15, %v13008_v45 }
 0x585   : > { %6691 = vmatprep.mubr.f32.mxu0 %v17745_v59 }
 0x586   : > { %13010 = vmatmul.mubr.msk.f32.vlgmr.msra.gmra.mrb[90].mxu1 %vm3197_vm15, %v13008_v45 }
 0x587   : > { %6762 = vmatprep.mubr.f32.mxu1 %v17745_v59 }
 0x61f   : > { %v5088_v22 = vpop.f32.mrb[74].mxu0 }
 0x620   : > { %v5090_v2 = vpop.f32.mrb[75].mxu0  ;;  %v5159_v52 = vpop.f32.mrb[74].mxu1  ;;  %v5164_v5 = vmul.f32 %v5088_v22, %v15772_v61 }
 0x621   : > { %v5161_v6 = vpop.f32.mrb[75].mxu1  ;;  %v5165_v11 = vmul.f32 %v5090_v2, %v15784_v43  ;;  %v5166_v33 = vmul.f32 %v5159_v52, %v15788_v25 }
 0x622   : > { %v5167_v10 = vmul.f32 %v5161_v6, %v15796_v36 }
 0x627   : > { %v5267_v42 = vpop.f32.mrb[76].mxu0 }
 0x628   : > { %v5343_v30 = vmul.f32 %v5267_v42, %v15768_v54  ;;  %v5269_v60 = vpop.f32.mrb[77].mxu0  ;;  %v5338_v17 = vpop.f32.mrb[76].mxu1 }
 0x629   : > { %v5344_v23 = vmul.f32 %v5269_v60, %v15776_v4  ;;  %v5345_v62 = vmul.f32 %v5338_v17, %v15780_v31  ;;  %v5340_v39 = vpop.f32.mrb[77].mxu1 }
 0x62a   : > { %v5347_v24 = vadd.f32 %v5343_v30, %v5164_v5  ;;  %v5346_v3 = vmul.f32 %v5340_v39, %v15792_v9 }
 0x62b   : > { %v5348_v35 = vadd.f32 %v5344_v23, %v5165_v11  ;;  %v5349_v48 = vadd.f32 %v5345_v62, %v5166_v33 }
 0x62c   : > { %v5350_v7 = vadd.f32 %v5346_v3, %v5167_v10 }
 0x62f   : > { %v5446_v0 = vpop.f32.mrb[78].mxu0 }
 0x630   : > { %v5522_v21 = vmul.f32 %v5446_v0, %v15808_v14  ;;  %v5448_v28 = vpop.f32.mrb[79].mxu0  ;;  %v5517_v26 = vpop.f32.mrb[78].mxu1 }
 0x631   : > { %v5523_v44 = vmul.f32 %v5448_v28, %v15814_v34  ;;  %v5524_v51 = vmul.f32 %v5517_v26, %v15824_v38  ;;  %v5519_v32 = vpop.f32.mrb[79].mxu1 }
 0x632   : > { %v5526_v27 = vadd.f32 %v5522_v21, %v5347_v24  ;;  %v5525_v57 = vmul.f32 %v5519_v32, %v15829_v58 }
 0x633   : > { %v5527_v29 = vadd.f32 %v5523_v44, %v5348_v35  ;;  %v5528_v46 = vadd.f32 %v5524_v51, %v5349_v48 }
 0x634   : > { %v5529_v45 = vadd.f32 %v5525_v57, %v5350_v7 }
 0x637   : > { %v5625_v22 = vpop.f32.mrb[80].mxu0 }
 0x638   : > { %v5701_v2 = vmul.f32 %v5625_v22, %v15837_v47  ;;  %v5627_v52 = vpop.f32.mrb[81].mxu0  ;;  %v5696_v6 = vpop.f32.mrb[80].mxu1 }
 0x639   : > { %v5702_v5 = vmul.f32 %v5627_v52, %v15842_v53  ;;  %v5703_v11 = vmul.f32 %v5696_v6, %v15846_v63  ;;  %v5698_v42 = vpop.f32.mrb[81].mxu1 }
 0x63a   : > { %v5705_v33 = vadd.f32 %v5701_v2, %v5526_v27  ;;  %v5704_v30 = vmul.f32 %v5698_v42, %v15851_v12 }
 0x63b   : > { %v5780_v60 = vpop.f32.mrb[82].mxu0  ;;  %v5706_v10 = vadd.f32 %v5702_v5, %v5527_v29  ;;  %v5707_v17 = vadd.f32 %v5703_v11, %v5528_v46 }
 0x63c   : > { %v5856_v23 = vadd.f32 %v5780_v60, %v5705_v33  ;;  %v5782_v62 = vpop.f32.mrb[83].mxu0  ;;  %v5851_v39 = vpop.f32.mrb[82].mxu1  ;;  %v5708_v24 = vadd.f32 %v5704_v30, %v5529_v45 }
 0x63d   : > { %v5857_v3 = vadd.f32 %v5782_v62, %v5706_v10  ;;  %v5858_v35 = vadd.f32 %v5851_v39, %v5707_v17  ;;  %v5853_v48 = vpop.f32.mrb[83].mxu1 }
 0x63e   : > { %v5859_v7 = vadd.f32 %v5853_v48, %v5708_v24 }
 0x63f   : > { %v5955_v0 = vpop.f32.mrb[84].mxu0 }
 0x640   : > { %v6031_v21 = vmul.f32 %v5955_v0, %v15864_v16  ;;  %v5957_v28 = vpop.f32.mrb[85].mxu0 }
 0x641   : > { %v6032_v26 = vmul.f32 %v5957_v28, %v15867_v15  ;;  %v6026_v44 = vpop.f32.mrb[84].mxu1 }
 0x642   : > { %v6035_v51 = vadd.f32 %v6031_v21, %v5856_v23  ;;  %v6033_v32 = vmul.f32 %v6026_v44, %v15870_v50  ;;  %v6028_v27 = vpop.f32.mrb[85].mxu1 }
 0x643   : > { %v6036_v57 = vadd.f32 %v6032_v26, %v5857_v3  ;;  %v6034_v29 = vmul.f32 %v6028_v27, %v15873_v18  ;;  %v17779_v27 = vld [vmem:[#allocation31_spill] sm:$0xff] }
 0x644   : > { %v6037_v46 = vadd.f32 %v6033_v32, %v5858_v35 }
 0x645   : > { %v6038_v45 = vadd.f32 %v6034_v29, %v5859_v7 }
 0x647   : > { %v6134_v22 = vpop.f32.mrb[86].mxu0 }
 0x648   : > { %v6210_v2 = vmul.f32 %v6134_v22, %v15882_v20  ;;  %v6136_v52 = vpop.f32.mrb[87].mxu0 }
 0x649   : > { %v6211_v6 = vmul.f32 %v6136_v52, %v15887_v8  ;;  %v6205_v5 = vpop.f32.mrb[86].mxu1  ;;  %v6580_v52 = vpop.permute.xlu1 %6579 }
 0x64a   : > { %v6214_v11 = vadd.f32 %v6210_v2, %v6035_v51  ;;  %v6212_v42 = vmul.f32 %v6205_v5, %v15890_v55  ;;  %v6207_v33 = vpop.f32.mrb[87].mxu1 }
 0x64b   : > { %v6215_v30 = vadd.f32 %v6211_v6, %v6036_v57  ;;  %v6213_v60 = vmul.f32 %v6207_v33, %v15894_v41 }
 0x64c   : > { %v6216_v10 = vadd.f32 %v6212_v42, %v6037_v46 }
 0x64d   : > { %v6217_v17 = vadd.f32 %v6213_v60, %v6038_v45  ;;  %v17780_v45 = vld [vmem:[#allocation32_spill] sm:$0xff] }
 0x64f   : > { %v6313_v23 = vpop.f32.mrb[88].mxu0 }
 0x650   : > { %v6389_v62 = vmul.f32 %v6313_v23, %v15903_v49  ;;  %v6315_v39 = vpop.f32.mrb[89].mxu0 }
 0x651   : > { %v6390_v24 = vmul.f32 %v6315_v39, %v15908_v13  ;;  %v6384_v3 = vpop.f32.mrb[88].mxu1 }
 0x652   : > { %v6393_v35 = vadd.f32 %v6389_v62, %v6214_v11  ;;  %v6391_v48 = vmul.f32 %v6384_v3, %v15911_v1  ;;  %v6386_v7 = vpop.f32.mrb[89].mxu1 }
 0x653   : > { %v6394_v0 = vadd.f32 %v6390_v24, %v6215_v30  ;;  %v6392_v21 = vmul.f32 %v6386_v7, %v15915_v37 }
 0x654   : > { %v6395_v28 = vadd.f32 %v6391_v48, %v6216_v10 }
 0x655   : > { %v6396_v26 = vadd.f32 %v6392_v21, %v6217_v17 }
 0x657   : > { %v6492_v44 = vpop.f32.mrb[90].mxu0 }
 0x658   : > { %v6568_v51 = vmul.f32 %v15923_v19, %v6492_v44  ;;  %v6494_v32 = vpop.f32.mrb[91].mxu0 }
 0x659   : > { %v6569_v57 = vmul.f32 %v17779_v27, %v6494_v32  ;;  %v6563_v29 = vpop.f32.mrb[90].mxu1 }
 0x65a   : > { %v6572_v46 = vadd.f32 %v6568_v51, %v6393_v35  ;;  %v6570_v22 = vmul.f32 %v17780_v45, %v6563_v29  ;;  %v6565_v2 = vpop.f32.mrb[91].mxu1 }
 0x65b   : > { %v6573_v6 = vadd.f32 %v6569_v57, %v6394_v0  ;;  %v6571_v5 = vmul.f32 %v17778_v56, %v6565_v2  ;;  %v8097_v57 = vld [vmem:[%s17632_s12] sm:$0xff] }
 0x65c   : > { %v6582_v11 = vadd.f32 %v6580_v52, %v6572_v46  ;;  %v6574_v42 = vadd.f32 %v6570_v22, %v6395_v28 }
 0x65d   : > { %v6583_v33 = vadd.f32 %v6580_v52, %v6573_v6  ;;  %v6575_v30 = vadd.f32 %v6571_v5, %v6396_v26  ;;  %v6622_v6 = vld [vmem:[%s17631_s11] sm:$0xff] }
 0x65e   : > { %v13011_v60 = vmul.f32 -1.442695, %v6582_v11  ;;  %v6584_v10 = vadd.f32 %v6580_v52, %v6574_v42 }
 0x65f   : > { %v13012_v17 = vmul.f32 -1.442695, %v6583_v33  ;;  %v6585_v23 = vadd.f32 %v6580_v52, %v6575_v30 }
 0x660   : > { %14166 = vpow2.f32 %v13011_v60  ;;  %v13013_v62 = vmul.f32 -1.442695, %v6584_v10 }
 0x661   : > { %14168 = vpow2.f32 %v13012_v17  ;;  %v13014_v39 = vmul.f32 -1.442695, %v6585_v23  ;;  %v13017_v23 = vld [vmem:[%s17631_s11 + $0x8] sm:$0xff] }
 0x662   : > { %14170 = vpow2.f32 %v13013_v62 }
 0x663   : > { %14172 = vpow2.f32 %v13014_v39 }
 0x66a   : > { %v14167_v24 = vpop.eup %14166 }
 0x66b   : > { %v14169_v3 = vpop.eup %14168  ;;  %v6598_v35 = vadd.f32 1.0, %v14167_v24 }
 0x66c   : > { %v14171_v48 = vpop.eup %14170  ;;  %v6599_v7 = vadd.f32 1.0, %v14169_v3 }
 0x66d   : > { %v14173_v0 = vpop.eup %14172  ;;  %14174 = vrcp.f32 %v6598_v35  ;;  %v6600_v21 = vadd.f32 1.0, %v14171_v48 }
 0x66e   : > { %14176 = vrcp.f32 %v6599_v7  ;;  %v6601_v28 = vadd.f32 1.0, %v14173_v0 }
 0x66f   : > { %14178 = vrcp.f32 %v6600_v21  ;;  %v13020_v21 = vld [vmem:[%s17631_s11 + $0x10] sm:$0xff] }
 0x670   : > { %14180 = vrcp.f32 %v6601_v28 }
 0x677   : > { %v16591_v26 = vpop.eup %14174 }
 0x678   : > { %v16593_v44 = vpop.eup %14176  ;;  %6610 = vrot.lane.b32.xlu0 %v16591_v26, %s14346_s0 }
 0x679   : > { %6612 = vrot.lane.b32.xlu1 %v16593_v44, %s14346_s0  ;;  %v16599_v51 = vpop.eup %14178 }
 0x67a   : > { %v16601_v32 = vpop.eup %14180 }
 0x67c   : > { %6614 = vrot.lane.b32.xlu0 %v16599_v51, %s14346_s0 }
 0x67d   : > { %6616 = vrot.lane.b32.xlu1 %v16601_v32, %s14346_s0 }
 0x680   : > { %6777 = vrot.lane.b32.xlu0 %v16591_v26, %s14347_s22 }
 0x681   : > { %6779 = vrot.lane.b32.xlu1 %v16593_v44, %s14347_s22 }
 0x684   : > { %6781 = vrot.lane.b32.xlu0 %v16599_v51, %s14347_s22 }
 0x685   : > { %6783 = vrot.lane.b32.xlu1 %v16601_v32, %s14347_s22 }
 0x688   : > { %6944 = vrot.lane.b32.xlu0 %v16591_v26, %s14348_s28 }
 0x689   : > { %6946 = vrot.lane.b32.xlu1 %v16593_v44, %s14348_s28 }
 0x68c   : > { %6948 = vrot.lane.b32.xlu0 %v16599_v51, %s14348_s28 }
 0x68d   : > { %6950 = vrot.lane.b32.xlu1 %v16601_v32, %s14348_s28 }
 0x690   : > { %7111 = vrot.lane.b32.xlu0 %v16591_v26, %s14349_s3 }
 0x691   : > { %7113 = vrot.lane.b32.xlu1 %v16593_v44, %s14349_s3 }
 0x694   : > { %7115 = vrot.lane.b32.xlu0 %v16599_v51, %s14349_s3 }
 0x695   : > { %7117 = vrot.lane.b32.xlu1 %v16601_v32, %s14349_s3 }
 0x698   : > { %7429 = vrot.lane.b32.xlu0 %v16591_v26, %s17772_s23 }
 0x699   : > { %7431 = vrot.lane.b32.xlu1 %v16593_v44, %s17772_s23 }
 0x69c   : > { %7433 = vrot.lane.b32.xlu0 %v16599_v51, %s17772_s23 }
 0x69d   : > { %7435 = vrot.lane.b32.xlu1 %v16601_v32, %s17772_s23 }
 0x6a0   : > { %7596 = vrot.lane.b32.xlu0 %v16591_v26, %s17773_s25 }
 0x6a1   : > { %7598 = vrot.lane.b32.xlu1 %v16593_v44, %s17773_s25 }
 0x6a4   : > { %7600 = vrot.lane.b32.xlu0 %v16599_v51, %s17773_s25 }
 0x6a5   : > { %7602 = vrot.lane.b32.xlu1 %v16601_v32, %s17773_s25 }
 0x6a8   : > { %7763 = vrot.lane.b32.xlu0 %v16591_v26, %s17774_s24 }
 0x6a9   : > { %7765 = vrot.lane.b32.xlu1 %v16593_v44, %s17774_s24 }
 0x6ac   : > { %7767 = vrot.lane.b32.xlu0 %v16599_v51, %s17774_s24 }
 0x6ad   : > { %7769 = vrot.lane.b32.xlu1 %v16601_v32, %s17774_s24 }
 0x6b0   : > { %7930 = vrot.lane.b32.xlu0 %v16591_v26, %s17775_s29 }
 0x6b1   : > { %7932 = vrot.lane.b32.xlu1 %v16593_v44, %s17775_s29 }
 0x6b4   : > { %7934 = vrot.lane.b32.xlu0 %v16599_v51, %s17775_s29 }
 0x6b5   : > { %7936 = vrot.lane.b32.xlu1 %v16601_v32, %s17775_s29 }
 0x6b8   : > { %8100 = vperm.xlu0 %13518, %v8097_v57  }
 0x6ea   : > { %v6611_v29 = vpop.permute.xlu0 %6610 }
 0x6eb   : > { %v6613_v46 = vpop.permute.xlu1 %6612 }
 0x6ec   : > { %v6620_v22 = vsel %vm943_vm3, %v6611_v29, %v6613_v46 }
 0x6ed   : > { %6627 = vmatprep.subr.mxu0 %v6620_v22 }
 0x6ee   : > { %v6615_v2 = vpop.permute.xlu0 %6614 }
 0x6ef   : > { %v6617_v52 = vpop.permute.xlu1 %6616  ;;  %v6619_v42 = vsel %vm943_vm3, %v6613_v46, %v6615_v2 }
 0x6f0   : > { %v6621_v5 = vsel %vm943_vm3, %v6617_v52, %v6611_v29  ;;  %v6618_v11 = vsel %vm943_vm3, %v6615_v2, %v6617_v52 }
 0x6f1   : > { %6628 = vmatpush1.msra.mxu0 %v6621_v5  ;;  %6698 = vmatprep.subr.mxu1 %v6618_v11 }
 0x6f2   : > { %v6778_v33 = vpop.permute.xlu0 %6777  ;;  %6699 = vmatpush1.msra.mxu1 %v6619_v42  ;;  %13015 = vmatmul.mubr.msk.f32.vlgmr.msra.gmra.mrb[92].mxu0 %vm6623_vm0, %v6622_v6  ;;  %v13023_v42 = vld [vmem:[%s17631_s11 + $0x18] sm:$0xff] }
 0x6f3   : > { %v6780_v30 = vpop.permute.xlu1 %6779  ;;  %13016 = vmatmul.mubr.msk.f32.vlgmr.msra.gmra.mrb[92].mxu1 %vm6623_vm0, %v6622_v6  ;;  %6858 = vmatprep.mubr.f32.mxu0 %v17745_v59 }
 0x6f4   : > { %v6787_v60 = vsel %vm1200_vm4, %v6778_v33, %v6780_v30  ;;  %6929 = vmatprep.mubr.f32.mxu1 %v17745_v59 }
 0x6f5   : > { %6794 = vmatprep.subr.mxu0 %v6787_v60 }
 0x6f6   : > { %v6782_v10 = vpop.permute.xlu0 %6781 }
 0x6f7   : > { %v6784_v17 = vpop.permute.xlu1 %6783  ;;  %v6786_v24 = vsel %vm1200_vm4, %v6780_v30, %v6782_v10 }
 0x6f8   : > { %v6788_v62 = vsel %vm1200_vm4, %v6784_v17, %v6778_v33  ;;  %v6785_v39 = vsel %vm1200_vm4, %v6782_v10, %v6784_v17  ;;  %v13026_v10 = vld [vmem:[%s17631_s11 + $0x20] sm:$0xff] }
 0x6f9   : > { %6795 = vmatpush1.msra.mxu0 %v6788_v62  ;;  %6865 = vmatprep.subr.mxu1 %v6785_v39  ;;  %v13029_v62 = vld [vmem:[%s17631_s11 + $0x28] sm:$0xff] }
 0x6fa   : > { %v6945_v3 = vpop.permute.xlu0 %6944  ;;  %6866 = vmatpush1.msra.mxu1 %v6786_v24  ;;  %13018 = vmatmul.mubr.msk.f32.vlgmr.msra.gmra.mrb[94].mxu0 %vm6623_vm0, %v13017_v23 }
 0x6fb   : > { %v6947_v35 = vpop.permute.xlu1 %6946  ;;  %13019 = vmatmul.mubr.msk.f32.vlgmr.msra.gmra.mrb[94].mxu1 %vm6623_vm0, %v13017_v23  ;;  %7025 = vmatprep.mubr.f32.mxu0 %v17745_v59 }
 0x6fc   : > { %v6954_v48 = vsel %vm1456_vm6, %v6945_v3, %v6947_v35  ;;  %7096 = vmatprep.mubr.f32.mxu1 %v17745_v59 }
 0x6fd   : > { %6961 = vmatprep.subr.mxu0 %v6954_v48 }
 0x6fe   : > { %v6949_v7 = vpop.permute.xlu0 %6948 }
 0x6ff   : > { %v6951_v0 = vpop.permute.xlu1 %6950  ;;  %v6953_v29 = vsel %vm1456_vm6, %v6947_v35, %v6949_v7 }
 0x700   : > { %v6955_v28 = vsel %vm1456_vm6, %v6951_v0, %v6945_v3  ;;  %v6952_v57 = vsel %vm1456_vm6, %v6949_v7, %v6951_v0  ;;  %v13032_v7 = vld [vmem:[%s17631_s11 + $0x30] sm:$0xff] }
 0x701   : > { %6962 = vmatpush1.msra.mxu0 %v6955_v28  ;;  %7032 = vmatprep.subr.mxu1 %v6952_v57 }
 0x702   : > { %v7112_v46 = vpop.permute.xlu0 %7111  ;;  %7033 = vmatpush1.msra.mxu1 %v6953_v29  ;;  %13021 = vmatmul.mubr.msk.f32.vlgmr.msra.gmra.mrb[96].mxu0 %vm6623_vm0, %v13020_v21 }
 0x703   : > { %v7114_v22 = vpop.permute.xlu1 %7113  ;;  %13022 = vmatmul.mubr.msk.f32.vlgmr.msra.gmra.mrb[96].mxu1 %vm6623_vm0, %v13020_v21  ;;  %7192 = vmatprep.mubr.f32.mxu0 %v17745_v59 }
 0x704   : > { %v7121_v2 = vsel %vm1712_vm10, %v7112_v46, %v7114_v22  ;;  %7263 = vmatprep.mubr.f32.mxu1 %v17745_v59 }
 0x705   : > { %7128 = vmatprep.subr.mxu0 %v7121_v2 }
 0x706   : > { %v7116_v52 = vpop.permute.xlu0 %7115 }
 0x707   : > { %v7118_v6 = vpop.permute.xlu1 %7117  ;;  %v7120_v33 = vsel %vm1712_vm10, %v7114_v22, %v7116_v52 }
 0x708   : > { %v7122_v5 = vsel %vm1712_vm10, %v7118_v6, %v7112_v46  ;;  %v7119_v11 = vsel %vm1712_vm10, %v7116_v52, %v7118_v6  ;;  %v13035_v52 = vld [vmem:[%s17631_s11 + $0x38] sm:$0xff] }
 0x709   : > { %7129 = vmatpush1.msra.mxu0 %v7122_v5  ;;  %7199 = vmatprep.subr.mxu1 %v7119_v11 }
 0x70a   : > { %v7430_v30 = vpop.permute.xlu0 %7429  ;;  %7200 = vmatpush1.msra.mxu1 %v7120_v33  ;;  %7283 = vmatprep.subr.mxu0 %v16593_v44 }
 0x70b   : > { %13024 = vmatmul.mubr.msk.f32.vlgmr.msra.gmra.mrb[98].mxu0 %vm6623_vm0, %v13023_v42  ;;  %7354 = vmatprep.subr.mxu1 %v16601_v32  ;;  %v7432_v60 = vpop.permute.xlu1 %7431 }
 0x70c   : > { %7284 = vmatpush1.msra.mxu0 %v16591_v26  ;;  %13025 = vmatmul.mubr.msk.f32.vlgmr.msra.gmra.mrb[98].mxu1 %vm6623_vm0, %v13023_v42  ;;  %v7439_v26 = vsel %vm2151_vm11, %v7430_v30, %v7432_v60 }
 0x70d   : > { %7355 = vmatpush1.msra.mxu1 %v16599_v51  ;;  %7347 = vmatprep.mubr.f32.mxu0 %v17745_v59 }
 0x70e   : > { %v7434_v17 = vpop.permute.xlu0 %7433  ;;  %7418 = vmatprep.mubr.f32.mxu1 %v17745_v59 }
 0x70f   : > { %13027 = vmatmul.mubr.msk.f32.vlgmr.msra.gmra.mrb[100].mxu0 %vm6623_vm0, %v13026_v10  ;;  %v7436_v44 = vpop.permute.xlu1 %7435  ;;  %v7438_v32 = vsel %vm2151_vm11, %v7432_v60, %v7434_v17 }
 0x710   : > { %7446 = vmatprep.subr.mxu0 %v7438_v32  ;;  %v7440_v23 = vsel %vm2151_vm11, %v7436_v44, %v7430_v30  ;;  %13028 = vmatmul.mubr.msk.f32.vlgmr.msra.gmra.mrb[100].mxu1 %vm6623_vm0, %v13026_v10  ;;  %v7437_v51 = vsel %vm2151_vm11, %v7434_v17, %v7436_v44  ;;  %v13038_v17 = vld [vmem:[%s17631_s11 + $0x40] sm:$0xff] }
 0x711   : > { %7447 = vmatpush1.msra.mxu0 %v7439_v26  ;;  %7517 = vmatprep.subr.mxu1 %v7440_v23 }
 0x712   : > { %v7597_v39 = vpop.permute.xlu0 %7596  ;;  %7510 = vmatprep.mubr.f32.mxu0 %v17745_v59  ;;  %7518 = vmatpush1.msra.mxu1 %v7437_v51 }
 0x713   : > { %13030 = vmatmul.mubr.msk.f32.vlgmr.msra.gmra.mrb[102].mxu0 %vm6623_vm0, %v13029_v62  ;;  %v7599_v24 = vpop.permute.xlu1 %7598  ;;  %7581 = vmatprep.mubr.f32.mxu1 %v17745_v59 }
 0x714   : > { %13031 = vmatmul.mubr.msk.f32.vlgmr.msra.gmra.mrb[102].mxu1 %vm6623_vm0, %v13029_v62  ;;  %7677 = vmatprep.mubr.f32.mxu0 %v17745_v59  ;;  %v7606_v0 = vsel %vm2407_vm12, %v7597_v39, %v7599_v24 }
 0x715   : > { %7748 = vmatprep.mubr.f32.mxu1 %v17745_v59 }
 0x716   : > { %v7601_v3 = vpop.permute.xlu0 %7600 }
 0x717   : > { %v7603_v35 = vpop.permute.xlu1 %7602  ;;  %v7605_v48 = vsel %vm2407_vm12, %v7599_v24, %v7601_v3 }
 0x718   : > { %7613 = vmatprep.subr.mxu0 %v7605_v48  ;;  %v7607_v21 = vsel %vm2407_vm12, %v7603_v35, %v7597_v39  ;;  %v7604_v28 = vsel %vm2407_vm12, %v7601_v3, %v7603_v35 }
 0x719   : > { %7614 = vmatpush1.msra.mxu0 %v7606_v0  ;;  %7684 = vmatprep.subr.mxu1 %v7607_v21 }
 0x71a   : > { %v7764_v57 = vpop.permute.xlu0 %7763  ;;  %13033 = vmatmul.mubr.msk.f32.vlgmr.msra.gmra.mrb[104].mxu0 %vm6623_vm0, %v13032_v7  ;;  %7685 = vmatpush1.msra.mxu1 %v7604_v28 }
 0x71b   : > { %13034 = vmatmul.mubr.msk.f32.vlgmr.msra.gmra.mrb[104].mxu1 %vm6623_vm0, %v13032_v7  ;;  %v7766_v29 = vpop.permute.xlu1 %7765  ;;  %7844 = vmatprep.mubr.f32.mxu0 %v17745_v59 }
 0x71c   : > { %7915 = vmatprep.mubr.f32.mxu1 %v17745_v59  ;;  %v7773_v6 = vsel %vm2663_vm13, %v7764_v57, %v7766_v29 }
 0x71e   : > { %v7768_v46 = vpop.permute.xlu0 %7767 }
 0x71f   : > { %v7770_v22 = vpop.permute.xlu1 %7769  ;;  %v7772_v2 = vsel %vm2663_vm13, %v7766_v29, %v7768_v46 }
 0x720   : > { %7780 = vmatprep.subr.mxu0 %v7772_v2  ;;  %v7774_v5 = vsel %vm2663_vm13, %v7770_v22, %v7764_v57  ;;  %v7771_v11 = vsel %vm2663_vm13, %v7768_v46, %v7770_v22 }
 0x721   : > { %7781 = vmatpush1.msra.mxu0 %v7773_v6  ;;  %7851 = vmatprep.subr.mxu1 %v7774_v5 }
 0x722   : > { %v7931_v42 = vpop.permute.xlu0 %7930  ;;  %13036 = vmatmul.mubr.msk.f32.vlgmr.msra.gmra.mrb[106].mxu0 %vm6623_vm0, %v13035_v52  ;;  %7852 = vmatpush1.msra.mxu1 %v7771_v11 }
 0x723   : > { %13037 = vmatmul.mubr.msk.f32.vlgmr.msra.gmra.mrb[106].mxu1 %vm6623_vm0, %v13035_v52  ;;  %v7933_v33 = vpop.permute.xlu1 %7932  ;;  %8011 = vmatprep.mubr.f32.mxu0 %v17745_v59 }
 0x724   : > { %8082 = vmatprep.mubr.f32.mxu1 %v17745_v59  ;;  %v7940_v44 = vsel %vm2919_vm14, %v7931_v42, %v7933_v33 }
 0x726   : > { %v7935_v30 = vpop.permute.xlu0 %7934 }
 0x727   : > { %v7937_v60 = vpop.permute.xlu1 %7936  ;;  %v7939_v10 = vsel %vm2919_vm14, %v7933_v33, %v7935_v30 }
 0x728   : > { %7947 = vmatprep.subr.mxu0 %v7939_v10  ;;  %v7941_v32 = vsel %vm2919_vm14, %v7937_v60, %v7931_v42  ;;  %v7938_v26 = vsel %vm2919_vm14, %v7935_v30, %v7937_v60 }
 0x729   : > { %7948 = vmatpush1.msra.mxu0 %v7940_v44  ;;  %8018 = vmatprep.subr.mxu1 %v7941_v32 }
 0x72a   : > { %13039 = vmatmul.mubr.msk.f32.vlgmr.msra.gmra.mrb[108].mxu0 %vm6623_vm0, %v13038_v17  ;;  %8019 = vmatpush1.msra.mxu1 %v7938_v26 }
 0x72b   : > { %13040 = vmatmul.mubr.msk.f32.vlgmr.msra.gmra.mrb[108].mxu1 %vm6623_vm0, %v13038_v17  ;;  %8191 = vmatprep.mubr.f32.mxu0 %v17745_v59 }
 0x72c   : > { %8262 = vmatprep.mubr.f32.mxu1 %v17745_v59 }
 0x7c5   : > { %v6693_v23 = vpop.f32.mrb[92].mxu0 }
 0x7c6   : > { %v6695_v51 = vpop.f32.mrb[93].mxu0  ;;  %v6764_v62 = vpop.f32.mrb[92].mxu1  ;;  %v6769_v24 = vmul.f32 %v6693_v23, %v15772_v61 }
 0x7c7   : > { %v6766_v39 = vpop.f32.mrb[93].mxu1  ;;  %v6770_v3 = vmul.f32 %v6695_v51, %v15784_v43  ;;  %v6771_v48 = vmul.f32 %v6764_v62, %v15788_v25 }
 0x7c8   : > { %v6772_v21 = vmul.f32 %v6766_v39, %v15796_v36 }
 0x7cd   : > { %v6860_v35 = vpop.f32.mrb[94].mxu0 }
 0x7ce   : > { %v6936_v7 = vmul.f32 %v6860_v35, %v15768_v54  ;;  %v6862_v0 = vpop.f32.mrb[95].mxu0  ;;  %v6931_v28 = vpop.f32.mrb[94].mxu1 }
 0x7cf   : > { %v6937_v57 = vmul.f32 %v6862_v0, %v15776_v4  ;;  %v6938_v29 = vmul.f32 %v6931_v28, %v15780_v31  ;;  %v6933_v46 = vpop.f32.mrb[95].mxu1 }
 0x7d0   : > { %v6940_v22 = vadd.f32 %v6936_v7, %v6769_v24  ;;  %v6939_v2 = vmul.f32 %v6933_v46, %v15792_v9 }
 0x7d1   : > { %v6941_v52 = vadd.f32 %v6937_v57, %v6770_v3  ;;  %v6942_v6 = vadd.f32 %v6938_v29, %v6771_v48 }
 0x7d2   : > { %v6943_v5 = vadd.f32 %v6939_v2, %v6772_v21 }
 0x7d5   : > { %v7027_v11 = vpop.f32.mrb[96].mxu0 }
 0x7d6   : > { %v7103_v42 = vmul.f32 %v7027_v11, %v15808_v14  ;;  %v7029_v33 = vpop.f32.mrb[97].mxu0  ;;  %v7098_v30 = vpop.f32.mrb[96].mxu1 }
 0x7d7   : > { %v7104_v60 = vmul.f32 %v7029_v33, %v15814_v34  ;;  %v7105_v10 = vmul.f32 %v7098_v30, %v15824_v38  ;;  %v7100_v17 = vpop.f32.mrb[97].mxu1 }
 0x7d8   : > { %v7107_v44 = vadd.f32 %v7103_v42, %v6940_v22  ;;  %v7106_v32 = vmul.f32 %v7100_v17, %v15829_v58 }
 0x7d9   : > { %v7108_v26 = vadd.f32 %v7104_v60, %v6941_v52  ;;  %v7109_v23 = vadd.f32 %v7105_v10, %v6942_v6 }
 0x7da   : > { %v7110_v51 = vadd.f32 %v7106_v32, %v6943_v5 }
 0x7de   : > { %v7194_v62 = vpop.f32.mrb[98].mxu0 }
 0x7df   : > { %v7270_v39 = vmul.f32 %v7194_v62, %v15837_v47  ;;  %v7196_v24 = vpop.f32.mrb[99].mxu0  ;;  %v7265_v3 = vpop.f32.mrb[98].mxu1 }
 0x7e0   : > { %v7271_v35 = vmul.f32 %v7196_v24, %v15842_v53  ;;  %v7272_v48 = vmul.f32 %v7265_v3, %v15846_v63  ;;  %v7267_v7 = vpop.f32.mrb[99].mxu1 }
 0x7e1   : > { %v7274_v0 = vadd.f32 %v7270_v39, %v7107_v44  ;;  %v7273_v21 = vmul.f32 %v7267_v7, %v15851_v12 }
 0x7e2   : > { %v7349_v28 = vpop.f32.mrb[100].mxu0  ;;  %v7275_v57 = vadd.f32 %v7271_v35, %v7108_v26  ;;  %v7276_v29 = vadd.f32 %v7272_v48, %v7109_v23 }
 0x7e3   : > { %v7425_v46 = vadd.f32 %v7349_v28, %v7274_v0  ;;  %v7351_v22 = vpop.f32.mrb[101].mxu0  ;;  %v7420_v2 = vpop.f32.mrb[100].mxu1  ;;  %v7277_v52 = vadd.f32 %v7273_v21, %v7110_v51 }
 0x7e4   : > { %v7426_v6 = vadd.f32 %v7351_v22, %v7275_v57  ;;  %v7427_v5 = vadd.f32 %v7420_v2, %v7276_v29  ;;  %v7422_v11 = vpop.f32.mrb[101].mxu1 }
 0x7e5   : > { %v7428_v42 = vadd.f32 %v7422_v11, %v7277_v52 }
 0x7e6   : > { %v7512_v33 = vpop.f32.mrb[102].mxu0 }
 0x7e7   : > { %v7588_v30 = vmul.f32 %v7512_v33, %v15864_v16  ;;  %v7514_v60 = vpop.f32.mrb[103].mxu0  ;;  %v7583_v10 = vpop.f32.mrb[102].mxu1 }
 0x7e8   : > { %v7589_v17 = vmul.f32 %v7514_v60, %v15867_v15  ;;  %v7590_v44 = vmul.f32 %v7583_v10, %v15870_v50  ;;  %v7585_v32 = vpop.f32.mrb[103].mxu1 }
 0x7e9   : > { %v7592_v26 = vadd.f32 %v7588_v30, %v7425_v46  ;;  %v7591_v23 = vmul.f32 %v7585_v32, %v15873_v18 }
 0x7ea   : > { %v7593_v62 = vadd.f32 %v7589_v17, %v7426_v6  ;;  %v7594_v39 = vadd.f32 %v7590_v44, %v7427_v5 }
 0x7eb   : > { %v7595_v51 = vadd.f32 %v7591_v23, %v7428_v42 }
 0x7ed   : > { %v7679_v24 = vpop.f32.mrb[104].mxu0 }
 0x7ee   : > { %v7755_v3 = vmul.f32 %v7679_v24, %v15882_v20  ;;  %v7681_v35 = vpop.f32.mrb[105].mxu0  ;;  %v7750_v48 = vpop.f32.mrb[104].mxu1 }
 0x7ef   : > { %v7756_v7 = vmul.f32 %v7681_v35, %v15887_v8  ;;  %v7757_v0 = vmul.f32 %v7750_v48, %v15890_v55  ;;  %v7752_v21 = vpop.f32.mrb[105].mxu1  ;;  %v8101_v48 = vpop.permute.xlu0 %8100 }
 0x7f0   : > { %v7759_v28 = vadd.f32 %v7755_v3, %v7592_v26  ;;  %v7758_v57 = vmul.f32 %v7752_v21, %v15894_v41 }
 0x7f1   : > { %v7760_v29 = vadd.f32 %v7756_v7, %v7593_v62  ;;  %v7761_v46 = vadd.f32 %v7757_v0, %v7594_v39 }
 0x7f2   : > { %v7762_v22 = vadd.f32 %v7758_v57, %v7595_v51 }
 0x7f5   : > { %v7846_v2 = vpop.f32.mrb[106].mxu0 }
 0x7f6   : > { %v7922_v52 = vmul.f32 %v7846_v2, %v15903_v49  ;;  %v7848_v6 = vpop.f32.mrb[107].mxu0  ;;  %v7917_v5 = vpop.f32.mrb[106].mxu1 }
 0x7f7   : > { %v7923_v11 = vmul.f32 %v7848_v6, %v15908_v13  ;;  %v7924_v42 = vmul.f32 %v7917_v5, %v15911_v1  ;;  %v7919_v33 = vpop.f32.mrb[107].mxu1  ;;  %v9597_v5 = vld [vmem:[%s17634_s14] sm:$0xff] }
 0x7f8   : > { %v7926_v30 = vadd.f32 %v7922_v52, %v7759_v28  ;;  %v7925_v60 = vmul.f32 %v7919_v33, %v15915_v37 }
 0x7f9   : > { %v7927_v10 = vadd.f32 %v7923_v11, %v7760_v29  ;;  %v7928_v17 = vadd.f32 %v7924_v42, %v7761_v46 }
 0x7fa   : > { %v7929_v44 = vadd.f32 %v7925_v60, %v7762_v22 }
 0x7fd   : > { %v8013_v32 = vpop.f32.mrb[108].mxu0 }
 0x7fe   : > { %v8089_v26 = vmul.f32 %v15923_v19, %v8013_v32  ;;  %v8015_v23 = vpop.f32.mrb[109].mxu0  ;;  %v8084_v62 = vpop.f32.mrb[108].mxu1 }
 0x7ff   : > { %v8090_v39 = vmul.f32 %v17779_v27, %v8015_v23  ;;  %v8091_v51 = vmul.f32 %v17780_v45, %v8084_v62  ;;  %v8086_v24 = vpop.f32.mrb[109].mxu1 }
 0x800   : > { %v8093_v3 = vadd.f32 %v8089_v26, %v7926_v30  ;;  %v8092_v35 = vmul.f32 %v17778_v56, %v8086_v24  ;;  %v13043_v24 = vld [vmem:[%s17633_s13 + $0x8] sm:$0xff] }
 0x801   : > { %v8094_v7 = vadd.f32 %v8090_v39, %v7927_v10  ;;  %v8095_v0 = vadd.f32 %v8091_v51, %v7928_v17  ;;  %v8123_v10 = vld [vmem:[%s17633_s13] sm:$0xff] }
 0x802   : > { %v8103_v21 = vadd.f32 %v8101_v48, %v8093_v3  ;;  %v8096_v28 = vadd.f32 %v8092_v35, %v7929_v44 }
 0x803   : > { %v8104_v57 = vadd.f32 %v8101_v48, %v8094_v7  ;;  %v8105_v46 = vadd.f32 %v8101_v48, %v8095_v0 }
 0x804   : > { %v16829_v29 = vmax.f32 %v8103_v21, 0.0  ;;  %v8106_v2 = vadd.f32 %v8101_v48, %v8096_v28 }
 0x805   : > { %v16831_v22 = vmax.f32 %v8104_v57, 0.0  ;;  %v16837_v52 = vmax.f32 %v8105_v46, 0.0  ;;  %v13046_v46 = vld [vmem:[%s17633_s13 + $0x10] sm:$0xff] }
 0x806   : > { %8111 = vrot.lane.b32.xlu1 %v16829_v29, %s14346_s0  ;;  %v16839_v6 = vmax.f32 %v8106_v2, 0.0 }
 0x807   : > { %8113 = vrot.lane.b32.xlu0 %v16831_v22, %s14346_s0 }
 0x80a   : > { %8115 = vrot.lane.b32.xlu1 %v16837_v52, %s14346_s0 }
 0x80b   : > { %8117 = vrot.lane.b32.xlu0 %v16839_v6, %s14346_s0 }
 0x80e   : > { %8277 = vrot.lane.b32.xlu1 %v16829_v29, %s14347_s22 }
 0x80f   : > { %8279 = vrot.lane.b32.xlu0 %v16831_v22, %s14347_s22 }
 0x812   : > { %8281 = vrot.lane.b32.xlu1 %v16837_v52, %s14347_s22 }
 0x813   : > { %8283 = vrot.lane.b32.xlu0 %v16839_v6, %s14347_s22 }
 0x816   : > { %8444 = vrot.lane.b32.xlu1 %v16829_v29, %s14348_s28 }
 0x817   : > { %8446 = vrot.lane.b32.xlu0 %v16831_v22, %s14348_s28 }
 0x81a   : > { %8448 = vrot.lane.b32.xlu1 %v16837_v52, %s14348_s28 }
 0x81b   : > { %8450 = vrot.lane.b32.xlu0 %v16839_v6, %s14348_s28 }
 0x81e   : > { %8611 = vrot.lane.b32.xlu1 %v16829_v29, %s14349_s3 }
 0x81f   : > { %8613 = vrot.lane.b32.xlu0 %v16831_v22, %s14349_s3 }
 0x822   : > { %8615 = vrot.lane.b32.xlu1 %v16837_v52, %s14349_s3 }
 0x823   : > { %8617 = vrot.lane.b32.xlu0 %v16839_v6, %s14349_s3 }
 0x826   : > { %8929 = vrot.lane.b32.xlu1 %v16829_v29, %s17772_s23 }
 0x827   : > { %8931 = vrot.lane.b32.xlu0 %v16831_v22, %s17772_s23 }
 0x82a   : > { %8933 = vrot.lane.b32.xlu1 %v16837_v52, %s17772_s23 }
 0x82b   : > { %8935 = vrot.lane.b32.xlu0 %v16839_v6, %s17772_s23 }
 0x82e   : > { %9096 = vrot.lane.b32.xlu1 %v16829_v29, %s17773_s25 }
 0x82f   : > { %9098 = vrot.lane.b32.xlu0 %v16831_v22, %s17773_s25 }
 0x832   : > { %9100 = vrot.lane.b32.xlu1 %v16837_v52, %s17773_s25 }
 0x833   : > { %9102 = vrot.lane.b32.xlu0 %v16839_v6, %s17773_s25 }
 0x836   : > { %9263 = vrot.lane.b32.xlu1 %v16829_v29, %s17774_s24 }
 0x837   : > { %9265 = vrot.lane.b32.xlu0 %v16831_v22, %s17774_s24 }
 0x83a   : > { %9267 = vrot.lane.b32.xlu1 %v16837_v52, %s17774_s24 }
 0x83b   : > { %9269 = vrot.lane.b32.xlu0 %v16839_v6, %s17774_s24 }
 0x83e   : > { %9430 = vrot.lane.b32.xlu1 %v16829_v29, %s17775_s29 }
 0x83f   : > { %9432 = vrot.lane.b32.xlu0 %v16831_v22, %s17775_s29 }
 0x842   : > { %9434 = vrot.lane.b32.xlu1 %v16837_v52, %s17775_s29 }
 0x843   : > { %9436 = vrot.lane.b32.xlu0 %v16839_v6, %s17775_s29 }
 0x846   : > { %9600 = vperm.xlu1 %13839, %v9597_v5  }
 0x878   : > { %v8112_v11 = vpop.permute.xlu1 %8111 }
 0x879   : > { %v8114_v42 = vpop.permute.xlu0 %8113 }
 0x87a   : > { %v8121_v33 = vsel %vm943_vm3, %v8112_v11, %v8114_v42 }
 0x87b   : > { %8127 = vmatprep.subr.mxu0 %v8121_v33 }
 0x87c   : > { %v8116_v30 = vpop.permute.xlu1 %8115 }
 0x87d   : > { %v8118_v60 = vpop.permute.xlu0 %8117  ;;  %v8120_v32 = vsel %vm943_vm3, %v8114_v42, %v8116_v30 }
 0x87e   : > { %v8122_v17 = vsel %vm943_vm3, %v8118_v60, %v8112_v11  ;;  %v8119_v44 = vsel %vm943_vm3, %v8116_v30, %v8118_v60 }
 0x87f   : > { %8128 = vmatpush1.msra.mxu0 %v8122_v17  ;;  %8198 = vmatprep.subr.mxu1 %v8119_v44 }
 0x880   : > { %8199 = vmatpush1.msra.mxu1 %v8120_v32  ;;  %v8278_v26 = vpop.permute.xlu1 %8277  ;;  %13041 = vmatmul.mubr.msk.f32.vlgmr.msra.gmra.mrb[110].mxu0 %vm6623_vm0, %v8123_v10  ;;  %v13049_v32 = vld [vmem:[%s17633_s13 + $0x18] sm:$0xff] }
 0x881   : > { %v8280_v23 = vpop.permute.xlu0 %8279  ;;  %13042 = vmatmul.mubr.msk.f32.vlgmr.msra.gmra.mrb[110].mxu1 %vm6623_vm0, %v8123_v10  ;;  %8358 = vmatprep.mubr.f32.mxu0 %v17745_v59 }
 0x882   : > { %v8287_v62 = vsel %vm1200_vm4, %v8278_v26, %v8280_v23  ;;  %8429 = vmatprep.mubr.f32.mxu1 %v17745_v59 }
 0x883   : > { %8294 = vmatprep.subr.mxu0 %v8287_v62 }
 0x884   : > { %v8282_v39 = vpop.permute.xlu1 %8281 }
 0x885   : > { %v8284_v51 = vpop.permute.xlu0 %8283  ;;  %v8286_v48 = vsel %vm1200_vm4, %v8280_v23, %v8282_v39 }
 0x886   : > { %v8288_v3 = vsel %vm1200_vm4, %v8284_v51, %v8278_v26  ;;  %v8285_v35 = vsel %vm1200_vm4, %v8282_v39, %v8284_v51  ;;  %v13052_v39 = vld [vmem:[%s17633_s13 + $0x20] sm:$0xff] }
 0x887   : > { %8295 = vmatpush1.msra.mxu0 %v8288_v3  ;;  %8365 = vmatprep.subr.mxu1 %v8285_v35  ;;  %v13055_v3 = vld [vmem:[%s17633_s13 + $0x28] sm:$0xff] }
 0x888   : > { %8366 = vmatpush1.msra.mxu1 %v8286_v48  ;;  %v8445_v7 = vpop.permute.xlu1 %8444  ;;  %13044 = vmatmul.mubr.msk.f32.vlgmr.msra.gmra.mrb[112].mxu0 %vm6623_vm0, %v13043_v24 }
 0x889   : > { %v8447_v0 = vpop.permute.xlu0 %8446  ;;  %13045 = vmatmul.mubr.msk.f32.vlgmr.msra.gmra.mrb[112].mxu1 %vm6623_vm0, %v13043_v24  ;;  %8525 = vmatprep.mubr.f32.mxu0 %v17745_v59 }
 0x88a   : > { %v8454_v21 = vsel %vm1456_vm6, %v8445_v7, %v8447_v0  ;;  %8596 = vmatprep.mubr.f32.mxu1 %v17745_v59 }
 0x88b   : > { %8461 = vmatprep.subr.mxu0 %v8454_v21 }
 0x88c   : > { %v8449_v28 = vpop.permute.xlu1 %8448 }
 0x88d   : > { %v8451_v57 = vpop.permute.xlu0 %8450  ;;  %v8453_v11 = vsel %vm1456_vm6, %v8447_v0, %v8449_v28 }
 0x88e   : > { %v8455_v2 = vsel %vm1456_vm6, %v8451_v57, %v8445_v7  ;;  %v8452_v5 = vsel %vm1456_vm6, %v8449_v28, %v8451_v57  ;;  %v13058_v28 = vld [vmem:[%s17633_s13 + $0x30] sm:$0xff] }
 0x88f   : > { %8462 = vmatpush1.msra.mxu0 %v8455_v2  ;;  %8532 = vmatprep.subr.mxu1 %v8452_v5 }
 0x890   : > { %8533 = vmatpush1.msra.mxu1 %v8453_v11  ;;  %v8612_v42 = vpop.permute.xlu1 %8611  ;;  %13047 = vmatmul.mubr.msk.f32.vlgmr.msra.gmra.mrb[114].mxu0 %vm6623_vm0, %v13046_v46 }
 0x891   : > { %v8614_v33 = vpop.permute.xlu0 %8613  ;;  %13048 = vmatmul.mubr.msk.f32.vlgmr.msra.gmra.mrb[114].mxu1 %vm6623_vm0, %v13046_v46  ;;  %8692 = vmatprep.mubr.f32.mxu0 %v17745_v59 }
 0x892   : > { %v8621_v30 = vsel %vm1712_vm10, %v8612_v42, %v8614_v33  ;;  %8763 = vmatprep.mubr.f32.mxu1 %v17745_v59 }
 0x893   : > { %8628 = vmatprep.subr.mxu0 %v8621_v30 }
 0x894   : > { %v8616_v60 = vpop.permute.xlu1 %8615 }
 0x895   : > { %v8618_v10 = vpop.permute.xlu0 %8617  ;;  %v8620_v26 = vsel %vm1712_vm10, %v8614_v33, %v8616_v60 }
 0x896   : > { %v8622_v17 = vsel %vm1712_vm10, %v8618_v10, %v8612_v42  ;;  %v8619_v44 = vsel %vm1712_vm10, %v8616_v60, %v8618_v10  ;;  %v13061_v60 = vld [vmem:[%s17633_s13 + $0x38] sm:$0xff] }
 0x897   : > { %8629 = vmatpush1.msra.mxu0 %v8622_v17  ;;  %8699 = vmatprep.subr.mxu1 %v8619_v44 }
 0x898   : > { %8700 = vmatpush1.msra.mxu1 %v8620_v26  ;;  %8783 = vmatprep.subr.mxu0 %v16831_v22  ;;  %v8930_v23 = vpop.permute.xlu1 %8929 }
 0x899   : > { %v8932_v62 = vpop.permute.xlu0 %8931  ;;  %13050 = vmatmul.mubr.msk.f32.vlgmr.msra.gmra.mrb[116].mxu0 %vm6623_vm0, %v13049_v32  ;;  %8854 = vmatprep.subr.mxu1 %v16839_v6 }
 0x89a   : > { %8784 = vmatpush1.msra.mxu0 %v16829_v29  ;;  %13051 = vmatmul.mubr.msk.f32.vlgmr.msra.gmra.mrb[116].mxu1 %vm6623_vm0, %v13049_v32  ;;  %v8939_v29 = vsel %vm2151_vm11, %v8930_v23, %v8932_v62 }
 0x89b   : > { %8855 = vmatpush1.msra.mxu1 %v16837_v52  ;;  %8847 = vmatprep.mubr.f32.mxu0 %v17745_v59 }
 0x89c   : > { %v8934_v51 = vpop.permute.xlu1 %8933  ;;  %8918 = vmatprep.mubr.f32.mxu1 %v17745_v59 }
 0x89d   : > { %v8936_v22 = vpop.permute.xlu0 %8935  ;;  %13053 = vmatmul.mubr.msk.f32.vlgmr.msra.gmra.mrb[118].mxu0 %vm6623_vm0, %v13052_v39  ;;  %v8938_v6 = vsel %vm2151_vm11, %v8932_v62, %v8934_v51 }
 0x89e   : > { %v8937_v24 = vsel %vm2151_vm11, %v8934_v51, %v8936_v22  ;;  %8946 = vmatprep.subr.mxu0 %v8938_v6  ;;  %v8940_v52 = vsel %vm2151_vm11, %v8936_v22, %v8930_v23  ;;  %13054 = vmatmul.mubr.msk.f32.vlgmr.msra.gmra.mrb[118].mxu1 %vm6623_vm0, %v13052_v39  ;;  %v13064_v51 = vld [vmem:[%s17633_s13 + $0x40] sm:$0xff] }
 0x89f   : > { %8947 = vmatpush1.msra.mxu0 %v8939_v29  ;;  %9017 = vmatprep.subr.mxu1 %v8940_v52 }
 0x8a0   : > { %9010 = vmatprep.mubr.f32.mxu0 %v17745_v59  ;;  %9018 = vmatpush1.msra.mxu1 %v8937_v24  ;;  %v9097_v35 = vpop.permute.xlu1 %9096 }
 0x8a1   : > { %v9099_v48 = vpop.permute.xlu0 %9098  ;;  %13056 = vmatmul.mubr.msk.f32.vlgmr.msra.gmra.mrb[120].mxu0 %vm6623_vm0, %v13055_v3  ;;  %9081 = vmatprep.mubr.f32.mxu1 %v17745_v59 }
 0x8a2   : > { %13057 = vmatmul.mubr.msk.f32.vlgmr.msra.gmra.mrb[120].mxu1 %vm6623_vm0, %v13055_v3  ;;  %9177 = vmatprep.mubr.f32.mxu0 %v17745_v59  ;;  %v9106_v57 = vsel %vm2407_vm12, %v9097_v35, %v9099_v48 }
 0x8a3   : > { %9248 = vmatprep.mubr.f32.mxu1 %v17745_v59 }
 0x8a4   : > { %v9101_v7 = vpop.permute.xlu1 %9100 }
 0x8a5   : > { %v9103_v0 = vpop.permute.xlu0 %9102  ;;  %v9105_v21 = vsel %vm2407_vm12, %v9099_v48, %v9101_v7 }
 0x8a6   : > { %v9104_v46 = vsel %vm2407_vm12, %v9101_v7, %v9103_v0  ;;  %9113 = vmatprep.subr.mxu0 %v9105_v21  ;;  %v9107_v2 = vsel %vm2407_vm12, %v9103_v0, %v9097_v35 }
 0x8a7   : > { %9114 = vmatpush1.msra.mxu0 %v9106_v57  ;;  %9184 = vmatprep.subr.mxu1 %v9107_v2 }
 0x8a8   : > { %13059 = vmatmul.mubr.msk.f32.vlgmr.msra.gmra.mrb[122].mxu0 %vm6623_vm0, %v13058_v28  ;;  %9185 = vmatpush1.msra.mxu1 %v9104_v46  ;;  %v9264_v5 = vpop.permute.xlu1 %9263 }
 0x8a9   : > { %v9266_v11 = vpop.permute.xlu0 %9265  ;;  %13060 = vmatmul.mubr.msk.f32.vlgmr.msra.gmra.mrb[122].mxu1 %vm6623_vm0, %v13058_v28  ;;  %9344 = vmatprep.mubr.f32.mxu0 %v17745_v59 }
 0x8aa   : > { %9415 = vmatprep.mubr.f32.mxu1 %v17745_v59  ;;  %v9273_v10 = vsel %vm2663_vm13, %v9264_v5, %v9266_v11 }
 0x8ac   : > { %v9268_v42 = vpop.permute.xlu1 %9267 }
 0x8ad   : > { %v9270_v33 = vpop.permute.xlu0 %9269  ;;  %v9272_v30 = vsel %vm2663_vm13, %v9266_v11, %v9268_v42 }
 0x8ae   : > { %v9271_v17 = vsel %vm2663_vm13, %v9268_v42, %v9270_v33  ;;  %9280 = vmatprep.subr.mxu0 %v9272_v30  ;;  %v9274_v44 = vsel %vm2663_vm13, %v9270_v33, %v9264_v5 }
 0x8af   : > { %9281 = vmatpush1.msra.mxu0 %v9273_v10  ;;  %9351 = vmatprep.subr.mxu1 %v9274_v44 }
 0x8b0   : > { %13062 = vmatmul.mubr.msk.f32.vlgmr.msra.gmra.mrb[124].mxu0 %vm6623_vm0, %v13061_v60  ;;  %9352 = vmatpush1.msra.mxu1 %v9271_v17  ;;  %v9431_v32 = vpop.permute.xlu1 %9430 }
 0x8b1   : > { %v9433_v26 = vpop.permute.xlu0 %9432  ;;  %13063 = vmatmul.mubr.msk.f32.vlgmr.msra.gmra.mrb[124].mxu1 %vm6623_vm0, %v13061_v60  ;;  %9511 = vmatprep.mubr.f32.mxu0 %v17745_v59 }
 0x8b2   : > { %9582 = vmatprep.mubr.f32.mxu1 %v17745_v59  ;;  %v9440_v22 = vsel %vm2919_vm14, %v9431_v32, %v9433_v26 }
 0x8b4   : > { %v9435_v23 = vpop.permute.xlu1 %9434 }
 0x8b5   : > { %v9437_v62 = vpop.permute.xlu0 %9436  ;;  %v9439_v39 = vsel %vm2919_vm14, %v9433_v26, %v9435_v23 }
 0x8b6   : > { %v9438_v6 = vsel %vm2919_vm14, %v9435_v23, %v9437_v62  ;;  %9447 = vmatprep.subr.mxu0 %v9439_v39  ;;  %v9441_v29 = vsel %vm2919_vm14, %v9437_v62, %v9431_v32 }
 0x8b7   : > { %9448 = vmatpush1.msra.mxu0 %v9440_v22  ;;  %9518 = vmatprep.subr.mxu1 %v9441_v29 }
 0x8b8   : > { %13065 = vmatmul.mubr.msk.f32.vlgmr.msra.gmra.mrb[126].mxu0 %vm6623_vm0, %v13064_v51  ;;  %9519 = vmatpush1.msra.mxu1 %v9438_v6 }
 0x8b9   : > { %13066 = vmatmul.mubr.msk.f32.vlgmr.msra.gmra.mrb[126].mxu1 %vm6623_vm0, %v13064_v51  ;;  %9691 = vmatprep.mubr.f32.mxu0 %v17745_v59 }
 0x8ba   : > { %9762 = vmatprep.mubr.f32.mxu1 %v17745_v59 }
 0x953   : > { %v8193_v24 = vpop.f32.mrb[110].mxu0 }
 0x954   : > { %v8195_v52 = vpop.f32.mrb[111].mxu0  ;;  %v8264_v3 = vpop.f32.mrb[110].mxu1  ;;  %v8269_v48 = vmul.f32 %v8193_v24, %v15772_v61 }
 0x955   : > { %v8266_v35 = vpop.f32.mrb[111].mxu1  ;;  %v8270_v7 = vmul.f32 %v8195_v52, %v15784_v43  ;;  %v8271_v21 = vmul.f32 %v8264_v3, %v15788_v25 }
 0x956   : > { %v8272_v46 = vmul.f32 %v8266_v35, %v15796_v36 }
 0x95b   : > { %v8360_v0 = vpop.f32.mrb[112].mxu0 }
 0x95c   : > { %v8436_v28 = vmul.f32 %v8360_v0, %v15768_v54  ;;  %v8362_v57 = vpop.f32.mrb[113].mxu0  ;;  %v8431_v2 = vpop.f32.mrb[112].mxu1 }
 0x95d   : > { %v8437_v5 = vmul.f32 %v8362_v57, %v15776_v4  ;;  %v8438_v11 = vmul.f32 %v8431_v2, %v15780_v31  ;;  %v8433_v42 = vpop.f32.mrb[113].mxu1 }
 0x95e   : > { %v8440_v33 = vadd.f32 %v8436_v28, %v8269_v48  ;;  %v8439_v30 = vmul.f32 %v8433_v42, %v15792_v9 }
 0x95f   : > { %v8441_v60 = vadd.f32 %v8437_v5, %v8270_v7  ;;  %v8442_v10 = vadd.f32 %v8438_v11, %v8271_v21 }
 0x960   : > { %v8443_v17 = vadd.f32 %v8439_v30, %v8272_v46 }
 0x963   : > { %v8527_v44 = vpop.f32.mrb[114].mxu0 }
 0x964   : > { %v8603_v32 = vmul.f32 %v8527_v44, %v15808_v14  ;;  %v8529_v26 = vpop.f32.mrb[115].mxu0  ;;  %v8598_v23 = vpop.f32.mrb[114].mxu1 }
 0x965   : > { %v8604_v62 = vmul.f32 %v8529_v26, %v15814_v34  ;;  %v8605_v39 = vmul.f32 %v8598_v23, %v15824_v38  ;;  %v8600_v51 = vpop.f32.mrb[115].mxu1 }
 0x966   : > { %v8607_v22 = vadd.f32 %v8603_v32, %v8440_v33  ;;  %v8606_v6 = vmul.f32 %v8600_v51, %v15829_v58 }
 0x967   : > { %v8608_v29 = vadd.f32 %v8604_v62, %v8441_v60  ;;  %v8609_v24 = vadd.f32 %v8605_v39, %v8442_v10 }
 0x968   : > { %v8610_v52 = vadd.f32 %v8606_v6, %v8443_v17 }
 0x96c   : > { %v8694_v3 = vpop.f32.mrb[116].mxu0 }
 0x96d   : > { %v8770_v35 = vmul.f32 %v8694_v3, %v15837_v47  ;;  %v8696_v48 = vpop.f32.mrb[117].mxu0  ;;  %v8765_v7 = vpop.f32.mrb[116].mxu1 }
 0x96e   : > { %v8771_v0 = vmul.f32 %v8696_v48, %v15842_v53  ;;  %v8772_v21 = vmul.f32 %v8765_v7, %v15846_v63  ;;  %v8767_v28 = vpop.f32.mrb[117].mxu1 }
 0x96f   : > { %v8774_v57 = vadd.f32 %v8770_v35, %v8607_v22  ;;  %v8773_v46 = vmul.f32 %v8767_v28, %v15851_v12 }
 0x970   : > { %v8849_v2 = vpop.f32.mrb[118].mxu0  ;;  %v8775_v5 = vadd.f32 %v8771_v0, %v8608_v29  ;;  %v8776_v11 = vadd.f32 %v8772_v21, %v8609_v24 }
 0x971   : > { %v8925_v42 = vadd.f32 %v8849_v2, %v8774_v57  ;;  %v8851_v33 = vpop.f32.mrb[119].mxu0  ;;  %v8920_v30 = vpop.f32.mrb[118].mxu1  ;;  %v8777_v60 = vadd.f32 %v8773_v46, %v8610_v52 }
 0x972   : > { %v8926_v10 = vadd.f32 %v8851_v33, %v8775_v5  ;;  %v8927_v17 = vadd.f32 %v8920_v30, %v8776_v11  ;;  %v8922_v44 = vpop.f32.mrb[119].mxu1 }
 0x973   : > { %v8928_v32 = vadd.f32 %v8922_v44, %v8777_v60 }
 0x974   : > { %v9012_v26 = vpop.f32.mrb[120].mxu0 }
 0x975   : > { %v9088_v23 = vmul.f32 %v9012_v26, %v15864_v16  ;;  %v9014_v62 = vpop.f32.mrb[121].mxu0  ;;  %v9083_v39 = vpop.f32.mrb[120].mxu1 }
 0x976   : > { %v9089_v51 = vmul.f32 %v9014_v62, %v15867_v15  ;;  %v9090_v22 = vmul.f32 %v9083_v39, %v15870_v50  ;;  %v9085_v6 = vpop.f32.mrb[121].mxu1 }
 0x977   : > { %v9092_v29 = vadd.f32 %v9088_v23, %v8925_v42  ;;  %v9091_v24 = vmul.f32 %v9085_v6, %v15873_v18 }
 0x978   : > { %v9093_v3 = vadd.f32 %v9089_v51, %v8926_v10  ;;  %v9094_v35 = vadd.f32 %v9090_v22, %v8927_v17 }
 0x979   : > { %v9095_v52 = vadd.f32 %v9091_v24, %v8928_v32 }
 0x97b   : > { %v9179_v48 = vpop.f32.mrb[122].mxu0 }
 0x97c   : > { %v9255_v7 = vmul.f32 %v9179_v48, %v15882_v20  ;;  %v9181_v0 = vpop.f32.mrb[123].mxu0  ;;  %v9250_v21 = vpop.f32.mrb[122].mxu1 }
 0x97d   : > { %v9256_v28 = vmul.f32 %v9181_v0, %v15887_v8  ;;  %v9257_v57 = vmul.f32 %v9250_v21, %v15890_v55  ;;  %v9252_v46 = vpop.f32.mrb[123].mxu1  ;;  %v9601_v21 = vpop.permute.xlu1 %9600 }
 0x97e   : > { %v9259_v2 = vadd.f32 %v9255_v7, %v9092_v29  ;;  %v9258_v5 = vmul.f32 %v9252_v46, %v15894_v41 }
 0x97f   : > { %v9260_v11 = vadd.f32 %v9256_v28, %v9093_v3  ;;  %v9261_v42 = vadd.f32 %v9257_v57, %v9094_v35 }
 0x980   : > { %v9262_v33 = vadd.f32 %v9258_v5, %v9095_v52 }
 0x983   : > { %v9346_v30 = vpop.f32.mrb[124].mxu0 }
 0x984   : > { %v9422_v60 = vmul.f32 %v9346_v30, %v15903_v49  ;;  %v9348_v10 = vpop.f32.mrb[125].mxu0  ;;  %v9417_v17 = vpop.f32.mrb[124].mxu1 }
 0x985   : > { %v9423_v44 = vmul.f32 %v9348_v10, %v15908_v13  ;;  %v9424_v32 = vmul.f32 %v9417_v17, %v15911_v1  ;;  %v9419_v26 = vpop.f32.mrb[125].mxu1  ;;  %v11097_v17 = vld [vmem:[%s17636_s16] sm:$0xff] }
 0x986   : > { %v9426_v23 = vadd.f32 %v9422_v60, %v9259_v2  ;;  %v9425_v62 = vmul.f32 %v9419_v26, %v15915_v37 }
 0x987   : > { %v9427_v39 = vadd.f32 %v9423_v44, %v9260_v11  ;;  %v9428_v51 = vadd.f32 %v9424_v32, %v9261_v42 }
 0x988   : > { %v9429_v22 = vadd.f32 %v9425_v62, %v9262_v33 }
 0x98b   : > { %v9513_v6 = vpop.f32.mrb[126].mxu0 }
 0x98c   : > { %v9589_v29 = vmul.f32 %v15923_v19, %v9513_v6  ;;  %v9515_v24 = vpop.f32.mrb[127].mxu0  ;;  %v9584_v3 = vpop.f32.mrb[126].mxu1 }
 0x98d   : > { %v9590_v35 = vmul.f32 %v17779_v27, %v9515_v24  ;;  %v9591_v52 = vmul.f32 %v17780_v45, %v9584_v3  ;;  %v9586_v48 = vpop.f32.mrb[127].mxu1 }
 0x98e   : > { %v9593_v7 = vadd.f32 %v9589_v29, %v9426_v23  ;;  %v9592_v0 = vmul.f32 %v17778_v56, %v9586_v48  ;;  %v13069_v48 = vld [vmem:[%s17635_s15 + $0x8] sm:$0xff] }
 0x98f   : > { %v9594_v28 = vadd.f32 %v9590_v35, %v9427_v39  ;;  %v9595_v57 = vadd.f32 %v9591_v52, %v9428_v51  ;;  %v9623_v39 = vld [vmem:[%s17635_s15] sm:$0xff] }
 0x990   : > { %v9603_v46 = vadd.f32 %v9601_v21, %v9593_v7  ;;  %v9596_v2 = vadd.f32 %v9592_v0, %v9429_v22 }
 0x991   : > { %v9604_v5 = vadd.f32 %v9601_v21, %v9594_v28  ;;  %v9605_v42 = vadd.f32 %v9601_v21, %v9595_v57 }
 0x992   : > { %v17067_v11 = vmax.f32 %v9603_v46, 0.0  ;;  %v9606_v30 = vadd.f32 %v9601_v21, %v9596_v2 }
 0x993   : > { %v17069_v33 = vmax.f32 %v9604_v5, 0.0  ;;  %v17075_v60 = vmax.f32 %v9605_v42, 0.0  ;;  %v13072_v42 = vld [vmem:[%s17635_s15 + $0x10] sm:$0xff] }
 0x994   : > { %9611 = vrot.lane.b32.xlu0 %v17067_v11, %s14346_s0  ;;  %v17077_v10 = vmax.f32 %v9606_v30, 0.0 }
 0x995   : > { %9613 = vrot.lane.b32.xlu1 %v17069_v33, %s14346_s0 }
 0x998   : > { %9615 = vrot.lane.b32.xlu0 %v17075_v60, %s14346_s0 }
 0x999   : > { %9617 = vrot.lane.b32.xlu1 %v17077_v10, %s14346_s0 }
 0x99c   : > { %9777 = vrot.lane.b32.xlu0 %v17067_v11, %s14347_s22 }
 0x99d   : > { %9779 = vrot.lane.b32.xlu1 %v17069_v33, %s14347_s22 }
 0x9a0   : > { %9781 = vrot.lane.b32.xlu0 %v17075_v60, %s14347_s22 }
 0x9a1   : > { %9783 = vrot.lane.b32.xlu1 %v17077_v10, %s14347_s22 }
 0x9a4   : > { %9944 = vrot.lane.b32.xlu0 %v17067_v11, %s14348_s28 }
 0x9a5   : > { %9946 = vrot.lane.b32.xlu1 %v17069_v33, %s14348_s28 }
 0x9a8   : > { %9948 = vrot.lane.b32.xlu0 %v17075_v60, %s14348_s28 }
 0x9a9   : > { %9950 = vrot.lane.b32.xlu1 %v17077_v10, %s14348_s28 }
 0x9ac   : > { %10111 = vrot.lane.b32.xlu0 %v17067_v11, %s14349_s3 }
 0x9ad   : > { %10113 = vrot.lane.b32.xlu1 %v17069_v33, %s14349_s3 }
 0x9b0   : > { %10115 = vrot.lane.b32.xlu0 %v17075_v60, %s14349_s3 }
 0x9b1   : > { %10117 = vrot.lane.b32.xlu1 %v17077_v10, %s14349_s3 }
 0x9b4   : > { %10429 = vrot.lane.b32.xlu0 %v17067_v11, %s17772_s23 }
 0x9b5   : > { %10431 = vrot.lane.b32.xlu1 %v17069_v33, %s17772_s23 }
 0x9b8   : > { %10433 = vrot.lane.b32.xlu0 %v17075_v60, %s17772_s23 }
 0x9b9   : > { %10435 = vrot.lane.b32.xlu1 %v17077_v10, %s17772_s23 }
 0x9bc   : > { %10596 = vrot.lane.b32.xlu0 %v17067_v11, %s17773_s25 }
 0x9bd   : > { %10598 = vrot.lane.b32.xlu1 %v17069_v33, %s17773_s25 }
 0x9c0   : > { %10600 = vrot.lane.b32.xlu0 %v17075_v60, %s17773_s25 }
 0x9c1   : > { %10602 = vrot.lane.b32.xlu1 %v17077_v10, %s17773_s25 }
 0x9c4   : > { %10763 = vrot.lane.b32.xlu0 %v17067_v11, %s17774_s24 }
 0x9c5   : > { %10765 = vrot.lane.b32.xlu1 %v17069_v33, %s17774_s24 }
 0x9c8   : > { %10767 = vrot.lane.b32.xlu0 %v17075_v60, %s17774_s24 }
 0x9c9   : > { %10769 = vrot.lane.b32.xlu1 %v17077_v10, %s17774_s24 }
 0x9cc   : > { %10930 = vrot.lane.b32.xlu0 %v17067_v11, %s17775_s29 }
 0x9cd   : > { %10932 = vrot.lane.b32.xlu1 %v17069_v33, %s17775_s29 }
 0x9d0   : > { %10934 = vrot.lane.b32.xlu0 %v17075_v60, %s17775_s29 }
 0x9d1   : > { %10936 = vrot.lane.b32.xlu1 %v17077_v10, %s17775_s29 }
 0x9d4   : > { %11100 = vperm.xlu0 %13518, %v11097_v17  }
 0xa06   : > { %v9612_v44 = vpop.permute.xlu0 %9611 }
 0xa07   : > { %v9614_v32 = vpop.permute.xlu1 %9613 }
 0xa08   : > { %v9621_v26 = vsel %vm943_vm3, %v9612_v44, %v9614_v32 }
 0xa09   : > { %9627 = vmatprep.subr.mxu0 %v9621_v26 }
 0xa0a   : > { %v9616_v23 = vpop.permute.xlu0 %9615 }
 0xa0b   : > { %v9618_v62 = vpop.permute.xlu1 %9617  ;;  %v9620_v6 = vsel %vm943_vm3, %v9614_v32, %v9616_v23 }
 0xa0c   : > { %v9622_v51 = vsel %vm943_vm3, %v9618_v62, %v9612_v44  ;;  %v9619_v22 = vsel %vm943_vm3, %v9616_v23, %v9618_v62 }
 0xa0d   : > { %9628 = vmatpush1.msra.mxu0 %v9622_v51  ;;  %9698 = vmatprep.subr.mxu1 %v9619_v22 }
 0xa0e   : > { %9699 = vmatpush1.msra.mxu1 %v9620_v6  ;;  %v9778_v29 = vpop.permute.xlu0 %9777  ;;  %13067 = vmatmul.mubr.msk.f32.vlgmr.msra.gmra.mrb[128].mxu0 %vm6623_vm0, %v9623_v39  ;;  %v13075_v6 = vld [vmem:[%s17635_s15 + $0x18] sm:$0xff] }
 0xa0f   : > { %v9780_v24 = vpop.permute.xlu1 %9779  ;;  %13068 = vmatmul.mubr.msk.f32.vlgmr.msra.gmra.mrb[128].mxu1 %vm6623_vm0, %v9623_v39  ;;  %9858 = vmatprep.mubr.f32.mxu0 %v17745_v59 }
 0xa10   : > { %v9787_v3 = vsel %vm1200_vm4, %v9778_v29, %v9780_v24  ;;  %9929 = vmatprep.mubr.f32.mxu1 %v17745_v59 }
 0xa11   : > { %9794 = vmatprep.subr.mxu0 %v9787_v3 }
 0xa12   : > { %v9782_v35 = vpop.permute.xlu0 %9781 }
 0xa13   : > { %v9784_v52 = vpop.permute.xlu1 %9783  ;;  %v9786_v21 = vsel %vm1200_vm4, %v9780_v24, %v9782_v35 }
 0xa14   : > { %v9788_v7 = vsel %vm1200_vm4, %v9784_v52, %v9778_v29  ;;  %v9785_v0 = vsel %vm1200_vm4, %v9782_v35, %v9784_v52  ;;  %v13078_v35 = vld [vmem:[%s17635_s15 + $0x20] sm:$0xff] }
 0xa15   : > { %9795 = vmatpush1.msra.mxu0 %v9788_v7  ;;  %9865 = vmatprep.subr.mxu1 %v9785_v0  ;;  %v13081_v7 = vld [vmem:[%s17635_s15 + $0x28] sm:$0xff] }
 0xa16   : > { %9866 = vmatpush1.msra.mxu1 %v9786_v21  ;;  %v9945_v28 = vpop.permute.xlu0 %9944  ;;  %13070 = vmatmul.mubr.msk.f32.vlgmr.msra.gmra.mrb[130].mxu0 %vm6623_vm0, %v13069_v48 }
 0xa17   : > { %v9947_v57 = vpop.permute.xlu1 %9946  ;;  %13071 = vmatmul.mubr.msk.f32.vlgmr.msra.gmra.mrb[130].mxu1 %vm6623_vm0, %v13069_v48  ;;  %10025 = vmatprep.mubr.f32.mxu0 %v17745_v59 }
 0xa18   : > { %v9954_v46 = vsel %vm1456_vm6, %v9945_v28, %v9947_v57  ;;  %10096 = vmatprep.mubr.f32.mxu1 %v17745_v59 }
 0xa19   : > { %9961 = vmatprep.subr.mxu0 %v9954_v46 }
 0xa1a   : > { %v9949_v2 = vpop.permute.xlu0 %9948 }
 0xa1b   : > { %v9951_v5 = vpop.permute.xlu1 %9950  ;;  %v9953_v44 = vsel %vm1456_vm6, %v9947_v57, %v9949_v2 }
 0xa1c   : > { %v9955_v30 = vsel %vm1456_vm6, %v9951_v5, %v9945_v28  ;;  %v9952_v17 = vsel %vm1456_vm6, %v9949_v2, %v9951_v5  ;;  %v13084_v2 = vld [vmem:[%s17635_s15 + $0x30] sm:$0xff] }
 0xa1d   : > { %9962 = vmatpush1.msra.mxu0 %v9955_v30  ;;  %10032 = vmatprep.subr.mxu1 %v9952_v17 }
 0xa1e   : > { %10033 = vmatpush1.msra.mxu1 %v9953_v44  ;;  %v10112_v32 = vpop.permute.xlu0 %10111  ;;  %13073 = vmatmul.mubr.msk.f32.vlgmr.msra.gmra.mrb[132].mxu0 %vm6623_vm0, %v13072_v42 }
 0xa1f   : > { %v10114_v26 = vpop.permute.xlu1 %10113  ;;  %13074 = vmatmul.mubr.msk.f32.vlgmr.msra.gmra.mrb[132].mxu1 %vm6623_vm0, %v13072_v42  ;;  %10192 = vmatprep.mubr.f32.mxu0 %v17745_v59 }
 0xa20   : > { %v10121_v23 = vsel %vm1712_vm10, %v10112_v32, %v10114_v26  ;;  %10263 = vmatprep.mubr.f32.mxu1 %v17745_v59 }
 0xa21   : > { %10128 = vmatprep.subr.mxu0 %v10121_v23 }
 0xa22   : > { %v10116_v62 = vpop.permute.xlu0 %10115 }
 0xa23   : > { %v10118_v39 = vpop.permute.xlu1 %10117  ;;  %v10120_v29 = vsel %vm1712_vm10, %v10114_v26, %v10116_v62 }
 0xa24   : > { %v10122_v51 = vsel %vm1712_vm10, %v10118_v39, %v10112_v32  ;;  %v10119_v22 = vsel %vm1712_vm10, %v10116_v62, %v10118_v39  ;;  %v13087_v62 = vld [vmem:[%s17635_s15 + $0x38] sm:$0xff] }
 0xa25   : > { %10129 = vmatpush1.msra.mxu0 %v10122_v51  ;;  %10199 = vmatprep.subr.mxu1 %v10119_v22 }
 0xa26   : > { %10200 = vmatpush1.msra.mxu1 %v10120_v29  ;;  %10283 = vmatprep.subr.mxu0 %v17069_v33  ;;  %v10430_v24 = vpop.permute.xlu0 %10429 }
 0xa27   : > { %v10432_v3 = vpop.permute.xlu1 %10431  ;;  %13076 = vmatmul.mubr.msk.f32.vlgmr.msra.gmra.mrb[134].mxu0 %vm6623_vm0, %v13075_v6  ;;  %10354 = vmatprep.subr.mxu1 %v17077_v10 }
 0xa28   : > { %10284 = vmatpush1.msra.mxu0 %v17067_v11  ;;  %13077 = vmatmul.mubr.msk.f32.vlgmr.msra.gmra.mrb[134].mxu1 %vm6623_vm0, %v13075_v6  ;;  %v10439_v11 = vsel %vm2151_vm11, %v10430_v24, %v10432_v3 }
 0xa29   : > { %10355 = vmatpush1.msra.mxu1 %v17075_v60  ;;  %10347 = vmatprep.mubr.f32.mxu0 %v17745_v59 }
 0xa2a   : > { %v10434_v52 = vpop.permute.xlu0 %10433  ;;  %10418 = vmatprep.mubr.f32.mxu1 %v17745_v59 }
 0xa2b   : > { %v10436_v33 = vpop.permute.xlu1 %10435  ;;  %13079 = vmatmul.mubr.msk.f32.vlgmr.msra.gmra.mrb[136].mxu0 %vm6623_vm0, %v13078_v35  ;;  %v10438_v10 = vsel %vm2151_vm11, %v10432_v3, %v10434_v52 }
 0xa2c   : > { %v10437_v48 = vsel %vm2151_vm11, %v10434_v52, %v10436_v33  ;;  %10446 = vmatprep.subr.mxu0 %v10438_v10  ;;  %v10440_v60 = vsel %vm2151_vm11, %v10436_v33, %v10430_v24  ;;  %13080 = vmatmul.mubr.msk.f32.vlgmr.msra.gmra.mrb[136].mxu1 %vm6623_vm0, %v13078_v35  ;;  %v13090_v52 = vld [vmem:[%s17635_s15 + $0x40] sm:$0xff] }
 0xa2d   : > { %10447 = vmatpush1.msra.mxu0 %v10439_v11  ;;  %10517 = vmatprep.subr.mxu1 %v10440_v60 }
 0xa2e   : > { %10510 = vmatprep.mubr.f32.mxu0 %v17745_v59  ;;  %10518 = vmatpush1.msra.mxu1 %v10437_v48  ;;  %v10597_v0 = vpop.permute.xlu0 %10596 }
 0xa2f   : > { %v10599_v21 = vpop.permute.xlu1 %10598  ;;  %13082 = vmatmul.mubr.msk.f32.vlgmr.msra.gmra.mrb[138].mxu0 %vm6623_vm0, %v13081_v7  ;;  %10581 = vmatprep.mubr.f32.mxu1 %v17745_v59 }
 0xa30   : > { %13083 = vmatmul.mubr.msk.f32.vlgmr.msra.gmra.mrb[138].mxu1 %vm6623_vm0, %v13081_v7  ;;  %10677 = vmatprep.mubr.f32.mxu0 %v17745_v59  ;;  %v10606_v5 = vsel %vm2407_vm12, %v10597_v0, %v10599_v21 }
 0xa31   : > { %10748 = vmatprep.mubr.f32.mxu1 %v17745_v59 }
 0xa32   : > { %v10601_v28 = vpop.permute.xlu0 %10600 }
 0xa33   : > { %v10603_v57 = vpop.permute.xlu1 %10602  ;;  %v10605_v46 = vsel %vm2407_vm12, %v10599_v21, %v10601_v28 }
 0xa34   : > { %v10604_v42 = vsel %vm2407_vm12, %v10601_v28, %v10603_v57  ;;  %10613 = vmatprep.subr.mxu0 %v10605_v46  ;;  %v10607_v30 = vsel %vm2407_vm12, %v10603_v57, %v10597_v0 }
 0xa35   : > { %10614 = vmatpush1.msra.mxu0 %v10606_v5  ;;  %10684 = vmatprep.subr.mxu1 %v10607_v30 }
 0xa36   : > { %13085 = vmatmul.mubr.msk.f32.vlgmr.msra.gmra.mrb[140].mxu0 %vm6623_vm0, %v13084_v2  ;;  %10685 = vmatpush1.msra.mxu1 %v10604_v42  ;;  %v10764_v17 = vpop.permute.xlu0 %10763 }
 0xa37   : > { %v10766_v44 = vpop.permute.xlu1 %10765  ;;  %13086 = vmatmul.mubr.msk.f32.vlgmr.msra.gmra.mrb[140].mxu1 %vm6623_vm0, %v13084_v2  ;;  %10844 = vmatprep.mubr.f32.mxu0 %v17745_v59 }
 0xa38   : > { %10915 = vmatprep.mubr.f32.mxu1 %v17745_v59  ;;  %v10773_v39 = vsel %vm2663_vm13, %v10764_v17, %v10766_v44 }
 0xa3a   : > { %v10768_v32 = vpop.permute.xlu0 %10767 }
 0xa3b   : > { %v10770_v26 = vpop.permute.xlu1 %10769  ;;  %v10772_v23 = vsel %vm2663_vm13, %v10766_v44, %v10768_v32 }
 0xa3c   : > { %v10771_v51 = vsel %vm2663_vm13, %v10768_v32, %v10770_v26  ;;  %10780 = vmatprep.subr.mxu0 %v10772_v23  ;;  %v10774_v22 = vsel %vm2663_vm13, %v10770_v26, %v10764_v17 }
 0xa3d   : > { %10781 = vmatpush1.msra.mxu0 %v10773_v39  ;;  %10851 = vmatprep.subr.mxu1 %v10774_v22 }
 0xa3e   : > { %13088 = vmatmul.mubr.msk.f32.vlgmr.msra.gmra.mrb[142].mxu0 %vm6623_vm0, %v13087_v62  ;;  %10852 = vmatpush1.msra.mxu1 %v10771_v51  ;;  %v10931_v6 = vpop.permute.xlu0 %10930 }
 0xa3f   : > { %v10933_v29 = vpop.permute.xlu1 %10932  ;;  %13089 = vmatmul.mubr.msk.f32.vlgmr.msra.gmra.mrb[142].mxu1 %vm6623_vm0, %v13087_v62  ;;  %11011 = vmatprep.mubr.f32.mxu0 %v17745_v59 }
 0xa40   : > { %11082 = vmatprep.mubr.f32.mxu1 %v17745_v59  ;;  %v10940_v33 = vsel %vm2919_vm14, %v10931_v6, %v10933_v29 }
 0xa42   : > { %v10935_v24 = vpop.permute.xlu0 %10934 }
 0xa43   : > { %v10937_v3 = vpop.permute.xlu1 %10936  ;;  %v10939_v35 = vsel %vm2919_vm14, %v10933_v29, %v10935_v24 }
 0xa44   : > { %v10938_v10 = vsel %vm2919_vm14, %v10935_v24, %v10937_v3  ;;  %10947 = vmatprep.subr.mxu0 %v10939_v35  ;;  %v10941_v11 = vsel %vm2919_vm14, %v10937_v3, %v10931_v6 }
 0xa45   : > { %10948 = vmatpush1.msra.mxu0 %v10940_v33  ;;  %11018 = vmatprep.subr.mxu1 %v10941_v11 }
 0xa46   : > { %13091 = vmatmul.mubr.msk.f32.vlgmr.msra.gmra.mrb[144].mxu0 %vm6623_vm0, %v13090_v52  ;;  %11019 = vmatpush1.msra.mxu1 %v10938_v10 }
 0xa47   : > { %13092 = vmatmul.mubr.msk.f32.vlgmr.msra.gmra.mrb[144].mxu1 %vm6623_vm0, %v13090_v52  ;;  %11191 = vmatprep.mubr.f32.mxu0 %v17745_v59 }
 0xa48   : > { %11262 = vmatprep.mubr.f32.mxu1 %v17745_v59 }
 0xae1   : > { %v9693_v48 = vpop.f32.mrb[128].mxu0 }
 0xae2   : > { %v9695_v60 = vpop.f32.mrb[129].mxu0  ;;  %v9764_v7 = vpop.f32.mrb[128].mxu1  ;;  %v9769_v21 = vmul.f32 %v9693_v48, %v15772_v61 }
 0xae3   : > { %v9766_v0 = vpop.f32.mrb[129].mxu1  ;;  %v9770_v28 = vmul.f32 %v9695_v60, %v15784_v43  ;;  %v9771_v46 = vmul.f32 %v9764_v7, %v15788_v25 }
 0xae4   : > { %v9772_v42 = vmul.f32 %v9766_v0, %v15796_v36 }
 0xae9   : > { %v9860_v57 = vpop.f32.mrb[130].mxu0 }
 0xaea   : > { %v9936_v2 = vmul.f32 %v9860_v57, %v15768_v54  ;;  %v9862_v5 = vpop.f32.mrb[131].mxu0  ;;  %v9931_v30 = vpop.f32.mrb[130].mxu1 }
 0xaeb   : > { %v9937_v17 = vmul.f32 %v9862_v5, %v15776_v4  ;;  %v9938_v44 = vmul.f32 %v9931_v30, %v15780_v31  ;;  %v9933_v32 = vpop.f32.mrb[131].mxu1 }
 0xaec   : > { %v9940_v26 = vadd.f32 %v9936_v2, %v9769_v21  ;;  %v9939_v23 = vmul.f32 %v9933_v32, %v15792_v9 }
 0xaed   : > { %v9941_v61 = vadd.f32 %v9937_v17, %v9770_v28  ;;  %v9942_v62 = vadd.f32 %v9938_v44, %v9771_v46 }
 0xaee   : > { %v9943_v43 = vadd.f32 %v9939_v23, %v9772_v42 }
 0xaf1   : > { %v10027_v39 = vpop.f32.mrb[132].mxu0 }
 0xaf2   : > { %v10103_v25 = vmul.f32 %v10027_v39, %v15808_v14  ;;  %v10029_v51 = vpop.f32.mrb[133].mxu0  ;;  %v10098_v54 = vpop.f32.mrb[132].mxu1 }
 0xaf3   : > { %v10104_v22 = vmul.f32 %v10029_v51, %v15814_v34  ;;  %v10105_v36 = vmul.f32 %v10098_v54, %v15824_v38  ;;  %v10100_v6 = vpop.f32.mrb[133].mxu1 }
 0xaf4   : > { %v10107_v4 = vadd.f32 %v10103_v25, %v9940_v26  ;;  %v10106_v31 = vmul.f32 %v10100_v6, %v15829_v58 }
 0xaf5   : > { %v10108_v29 = vadd.f32 %v10104_v22, %v9941_v61  ;;  %v10109_v24 = vadd.f32 %v10105_v36, %v9942_v62 }
 0xaf6   : > { %v10110_v3 = vadd.f32 %v10106_v31, %v9943_v43 }
 0xafa   : > { %v10194_v9 = vpop.f32.mrb[134].mxu0 }
 0xafb   : > { %v10270_v35 = vmul.f32 %v10194_v9, %v15837_v47  ;;  %v10196_v52 = vpop.f32.mrb[135].mxu0  ;;  %v10265_v33 = vpop.f32.mrb[134].mxu1 }
 0xafc   : > { %v10271_v14 = vmul.f32 %v10196_v52, %v15842_v53  ;;  %v10272_v10 = vmul.f32 %v10265_v33, %v15846_v63  ;;  %v10267_v11 = vpop.f32.mrb[135].mxu1 }
 0xafd   : > { %v10274_v34 = vadd.f32 %v10270_v35, %v10107_v4  ;;  %v10273_v38 = vmul.f32 %v10267_v11, %v15851_v12 }
 0xafe   : > { %v10349_v48 = vpop.f32.mrb[136].mxu0  ;;  %v10275_v60 = vadd.f32 %v10271_v14, %v10108_v29  ;;  %v10276_v7 = vadd.f32 %v10272_v10, %v10109_v24 }
 0xaff   : > { %v10425_v58 = vadd.f32 %v10349_v48, %v10274_v34  ;;  %v10351_v0 = vpop.f32.mrb[137].mxu0  ;;  %v10420_v21 = vpop.f32.mrb[136].mxu1  ;;  %v10277_v28 = vadd.f32 %v10273_v38, %v10110_v3 }
 0xb00   : > { %v10426_v57 = vadd.f32 %v10351_v0, %v10275_v60  ;;  %v10427_v46 = vadd.f32 %v10420_v21, %v10276_v7  ;;  %v10422_v47 = vpop.f32.mrb[137].mxu1  ;;  %v11101_v38 = vpop.permute.xlu0 %11100 }
 0xb01   : > { %v10428_v2 = vadd.f32 %v10422_v47, %v10277_v28 }
 0xb02   : > { %v10512_v5 = vpop.f32.mrb[138].mxu0 }
 0xb03   : > { %v10588_v53 = vmul.f32 %v10512_v5, %v15864_v16  ;;  %v10514_v42 = vpop.f32.mrb[139].mxu0  ;;  %v10583_v63 = vpop.f32.mrb[138].mxu1 }
 0xb04   : > { %v10589_v30 = vmul.f32 %v10514_v42, %v15867_v15  ;;  %v10590_v12 = vmul.f32 %v10583_v63, %v15870_v50  ;;  %v10585_v17 = vpop.f32.mrb[139].mxu1 }
 0xb05   : > { %v10592_v44 = vadd.f32 %v10588_v53, %v10425_v58  ;;  %v10591_v32 = vmul.f32 %v10585_v17, %v15873_v18  ;;  %v11123_v53 = vld [vmem:[%s17637_s17] sm:$0x1] }
 0xb06   : > { %v10593_v26 = vadd.f32 %v10589_v30, %v10426_v57  ;;  %v10594_v23 = vadd.f32 %v10590_v12, %v10427_v46 }
 0xb07   : > { %v10595_v61 = vadd.f32 %v10591_v32, %v10428_v2 }
 0xb09   : > { %v10679_v62 = vpop.f32.mrb[140].mxu0 }
 0xb0a   : > { %v10755_v43 = vmul.f32 %v10679_v62, %v15882_v20  ;;  %v10681_v39 = vpop.f32.mrb[141].mxu0  ;;  %v10750_v25 = vpop.f32.mrb[140].mxu1 }
 0xb0b   : > { %v10756_v16 = vmul.f32 %v10681_v39, %v15887_v8  ;;  %v10757_v51 = vmul.f32 %v10750_v25, %v15890_v55  ;;  %v10752_v54 = vpop.f32.mrb[141].mxu1 }
 0xb0c   : > { %v10759_v15 = vadd.f32 %v10755_v43, %v10592_v44  ;;  %v10758_v50 = vmul.f32 %v10752_v54, %v15894_v41 }
 0xb0d   : > { %v10760_v22 = vadd.f32 %v10756_v16, %v10593_v26  ;;  %v10761_v36 = vadd.f32 %v10757_v51, %v10594_v23  ;;  %v13095_v23 = vld [vmem:[%s17637_s17 + $0x1] sm:$0x1] }
 0xb0e   : > { %v10762_v6 = vadd.f32 %v10758_v50, %v10595_v61 }
 0xb11   : > { %v10846_v18 = vpop.f32.mrb[142].mxu0 }
 0xb12   : > { %v10922_v4 = vmul.f32 %v10846_v18, %v15903_v49  ;;  %v10848_v31 = vpop.f32.mrb[143].mxu0  ;;  %v10917_v29 = vpop.f32.mrb[142].mxu1 }
 0xb13   : > { %v10923_v20 = vmul.f32 %v10848_v31, %v15908_v13  ;;  %v10924_v24 = vmul.f32 %v10917_v29, %v15911_v1  ;;  %v10919_v3 = vpop.f32.mrb[143].mxu1 }
 0xb14   : > { %v10926_v8 = vadd.f32 %v10922_v4, %v10759_v15  ;;  %v10925_v55 = vmul.f32 %v10919_v3, %v15915_v37  ;;  %v13098_v15 = vld [vmem:[%s17637_s17 + $0x2] sm:$0x1]  ;;  %v13101_v3 = vld [vmem:[%s17637_s17 + $0x3] sm:$0x1] }
 0xb15   : > { %v10927_v9 = vadd.f32 %v10923_v20, %v10760_v22  ;;  %v10928_v35 = vadd.f32 %v10924_v24, %v10761_v36 }
 0xb16   : > { %v10929_v52 = vadd.f32 %v10925_v55, %v10762_v6 }
 0xb19   : > { %v11013_v41 = vpop.f32.mrb[144].mxu0 }
 0xb1a   : > { %v11089_v33 = vmul.f32 %v15923_v19, %v11013_v41  ;;  %v11015_v14 = vpop.f32.mrb[145].mxu0  ;;  %v11084_v10 = vpop.f32.mrb[144].mxu1 }
 0xb1b   : > { %v11090_v49 = vmul.f32 %v17779_v27, %v11015_v14  ;;  %v11091_v11 = vmul.f32 %v17780_v45, %v11084_v10  ;;  %v11086_v34 = vpop.f32.mrb[145].mxu1  ;;  %v12649_v45 = vld [vmem:[#allocation3] sm:$0x1] }
 0xb1c   : > { %v11093_v13 = vadd.f32 %v11089_v33, %v10926_v8  ;;  %v11092_v1 = vmul.f32 %v17778_v56, %v11086_v34 }
 0xb1d   : > { %v11094_v48 = vadd.f32 %v11090_v49, %v10927_v9  ;;  %v11095_v60 = vadd.f32 %v11091_v11, %v10928_v35  ;;  %v13104_v35 = vld [vmem:[%s17637_s17 + $0x4] sm:$0x1]  ;;  %v13107_v11 = vld [vmem:[%s17637_s17 + $0x5] sm:$0x1] }
 0xb1e   : > { %v11103_v37 = vadd.f32 %v11101_v38, %v11093_v13  ;;  %v11096_v7 = vadd.f32 %v11092_v1, %v10929_v52 }
 0xb1f   : > { %v11104_v58 = vadd.f32 %v11101_v38, %v11094_v48  ;;  %v11105_v21 = vadd.f32 %v11101_v38, %v11095_v60  ;;  %v13110_v60 = vld [vmem:[%s17637_s17 + $0x6] sm:$0x1] }
 0xb20   : > { %v17305_v0 = vmax.f32 %v11103_v37, 0.0  ;;  %v11106_v28 = vadd.f32 %v11101_v38, %v11096_v7 }
 0xb21   : > { %v17307_v19 = vmax.f32 %v11104_v58, 0.0  ;;  %v17313_v27 = vmax.f32 %v11105_v21, 0.0 }
 0xb22   : > { %11111 = vrot.lane.b32.xlu1 %v17305_v0, %s14346_s0  ;;  %v17315_v56 = vmax.f32 %v11106_v28, 0.0 }
 0xb23   : > { %11113 = vrot.lane.b32.xlu0 %v17307_v19, %s14346_s0 }
 0xb26   : > { %11115 = vrot.lane.b32.xlu1 %v17313_v27, %s14346_s0 }
 0xb27   : > { %11117 = vrot.lane.b32.xlu0 %v17315_v56, %s14346_s0  ;;  %s12732_s0 = sshll.u32 %s658_s27, 4  ;;  %s17576_s0 = int_to_ptr.vmem [resolvable:$true] %s12732_s0 }
 0xb2a   : > { %11277 = vrot.lane.b32.xlu1 %v17305_v0, %s14347_s22 }
 0xb2b   : > { %11279 = vrot.lane.b32.xlu0 %v17307_v19, %s14347_s22 }
 0xb2e   : > { %11281 = vrot.lane.b32.xlu1 %v17313_v27, %s14347_s22 }
 0xb2f   : > { %11283 = vrot.lane.b32.xlu0 %v17315_v56, %s14347_s22 }
 0xb32   : > { %11456 = vrot.lane.b32.xlu1 %v17305_v0, %s14348_s28 }
 0xb33   : > { %11458 = vrot.lane.b32.xlu0 %v17307_v19, %s14348_s28 }
 0xb36   : > { %11460 = vrot.lane.b32.xlu1 %v17313_v27, %s14348_s28 }
 0xb37   : > { %11462 = vrot.lane.b32.xlu0 %v17315_v56, %s14348_s28 }
 0xb3a   : > { %11631 = vrot.lane.b32.xlu1 %v17305_v0, %s14349_s3 }
 0xb3b   : > { %11633 = vrot.lane.b32.xlu0 %v17307_v19, %s14349_s3 }
 0xb3e   : > { %11635 = vrot.lane.b32.xlu1 %v17313_v27, %s14349_s3 }
 0xb3f   : > { %11637 = vrot.lane.b32.xlu0 %v17315_v56, %s14349_s3  ;;  %s17786_s3 = sld [smem:[#allocation37_spill]] }
 0xb42   : > { %11957 = vrot.lane.b32.xlu1 %v17305_v0, %s17772_s23 }
 0xb43   : > { %11959 = vrot.lane.b32.xlu0 %v17307_v19, %s17772_s23 }
 0xb46   : > { %11961 = vrot.lane.b32.xlu1 %v17313_v27, %s17772_s23 }
 0xb47   : > { %11963 = vrot.lane.b32.xlu0 %v17315_v56, %s17772_s23  ;;  %s17574_s23 = scalar_lea.hbm %s17786_s3, %s13130_s19 }
 0xb4a   : > { %12132 = vrot.lane.b32.xlu1 %v17305_v0, %s17773_s25 }
 0xb4b   : > { %12134 = vrot.lane.b32.xlu0 %v17307_v19, %s17773_s25 }
 0xb4e   : > { %12136 = vrot.lane.b32.xlu1 %v17313_v27, %s17773_s25 }
 0xb4f   : > { %12138 = vrot.lane.b32.xlu0 %v17315_v56, %s17773_s25  ;;  %s12718_s25 = scalar_lea.sflag [#allocation6], %s14602_s2 }
 0xb52   : > { %12307 = vrot.lane.b32.xlu1 %v17305_v0, %s17774_s24 }
 0xb53   : > { %12309 = vrot.lane.b32.xlu0 %v17307_v19, %s17774_s24 }
 0xb56   : > { %12311 = vrot.lane.b32.xlu1 %v17313_v27, %s17774_s24 }
 0xb57   : > { %12313 = vrot.lane.b32.xlu0 %v17315_v56, %s17774_s24  ;;  %s14270_s24 = scalar_lea.vmem %s17576_s0, 64 }
 0xb58   : > { %p14271_p6 = scmp.ne.s32.totalorder %s17576_s0, %s14270_s24 }
 0xb5a   : > { %12482 = vrot.lane.b32.xlu1 %v17305_v0, %s17775_s29  ;;  %p14272_p7 = pnand %p14271_p6, %p17788_p13 }
 0xb5b   : > { %12484 = vrot.lane.b32.xlu0 %v17307_v19, %s17775_s29 }
 0xb5c   : > { %p14273_p5 = pneg %p14272_p7 }
 0xb5e   : > { %12486 = vrot.lane.b32.xlu1 %v17313_v27, %s17775_s29 }
 0xb5f   : > { %12488 = vrot.lane.b32.xlu0 %v17315_v56, %s17775_s29  ;;  %s14356_s29 = smov [#allocation9]  }
 0xb60   : > { %s14274_s30 = sshll.u32 %s14356_s29, 4  ;;  %s14275_s30 = int_to_ptr.vmem [resolvable:$false] %s14274_s30 }
 0xb61   : > { %s14276_s20 = scalar_lea.vmem %s14275_s30, 128  ;;  %p14277_p8 = scmp.lt.s32.totalorder %s17576_s0, %s14275_s30 }
 0xb62   : > { %12652 = vperm.xlu1 %13839, %v12649_v45   ;;  %p14278_p9 = scmp.lt.s32.totalorder %s14276_s20, %s14270_s24 }
 0xb64   : > { %p14279_p0 = por %p14278_p9, %p14277_p8 }
 0xb66   : > { %p14280_p1 = pnand %p14279_p0, %p14273_p5 }
 0xb94   : > { %v11112_v57 = vpop.permute.xlu1 %11111 }
 0xb95   : > { %v11114_v46 = vpop.permute.xlu0 %11113 }
 0xb96   : > { %v11121_v47 = vsel %vm943_vm3, %v11112_v57, %v11114_v46 }
 0xb97   : > { %11127 = vmatprep.subr.mxu0 %v11121_v47 }
 0xb98   : > { %v11116_v2 = vpop.permute.xlu1 %11115 }
 0xb99   : > { %v11118_v5 = vpop.permute.xlu0 %11117  ;;  %v11120_v30 = vsel %vm943_vm3, %v11114_v46, %v11116_v2 }
 0xb9a   : > { %v11122_v42 = vsel %vm943_vm3, %v11118_v5, %v11112_v57  ;;  %v11119_v63 = vsel %vm943_vm3, %v11116_v2, %v11118_v5 }
 0xb9b   : > { %11128 = vmatpush1.msra.mxu0 %v11122_v42  ;;  %11198 = vmatprep.subr.mxu1 %v11119_v63  ;;  %v13116_v63 = vld [vmem:[%s17637_s17 + $0x8] sm:$0x1] }
 0xb9c   : > { %11199 = vmatpush1.msra.mxu1 %v11120_v30  ;;  %v11278_v12 = vpop.permute.xlu1 %11277  ;;  %13093 = vmatmul.mubr.msk.f32.vlgmr.msra.gmra.mrb[146].mxu0 %vm6623_vm0, %v11123_v53 }
 0xb9d   : > { %v11280_v17 = vpop.permute.xlu0 %11279  ;;  %13094 = vmatmul.mubr.msk.f32.vlgmr.msra.gmra.mrb[146].mxu1 %vm6623_vm0, %v11123_v53  ;;  %11358 = vmatprep.mubr.f32.mxu0 %v17745_v59 }
 0xb9e   : > { %v11287_v44 = vsel %vm1200_vm4, %v11278_v12, %v11280_v17  ;;  %11429 = vmatprep.mubr.f32.mxu1 %v17745_v59 }
 0xb9f   : > { %11294 = vmatprep.subr.mxu0 %v11287_v44 }
 0xba0   : > { %v11282_v32 = vpop.permute.xlu1 %11281 }
 0xba1   : > { %v11284_v26 = vpop.permute.xlu0 %11283  ;;  %v11286_v43 = vsel %vm1200_vm4, %v11280_v17, %v11282_v32 }
 0xba2   : > { %v11288_v61 = vsel %vm1200_vm4, %v11284_v26, %v11278_v12  ;;  %v11285_v62 = vsel %vm1200_vm4, %v11282_v32, %v11284_v26 }
 0xba3   : > { %11295 = vmatpush1.msra.mxu0 %v11288_v61  ;;  %11365 = vmatprep.subr.mxu1 %v11285_v62  ;;  %v11442_v62 = vrot.slane %v17515_v40, 1 }
 0xba4   : > { %11366 = vmatpush1.msra.mxu1 %v11286_v43  ;;  %v11457_v39 = vpop.permute.xlu1 %11456  ;;  %13096 = vmatmul.mubr.msk.f32.vlgmr.msra.gmra.mrb[148].mxu0 %vm6623_vm0, %v13095_v23  ;;  %v17521_v43 = vld [vmem:[%s17763_s18 + $0x8] sm:$0xff] }
 0xba5   : > { %v11459_v25 = vpop.permute.xlu0 %11458  ;;  %13097 = vmatmul.mubr.msk.f32.vlgmr.msra.gmra.mrb[148].mxu1 %vm6623_vm0, %v13095_v23  ;;  %11537 = vmatprep.mubr.f32.mxu0 %v17745_v59  ;;  %v17509_v23 = vld [vmem:[%s17763_s18] sm:$0xff] }
 0xba6   : > { %v11466_v16 = vsel %vm1456_vm6, %v11457_v39, %v11459_v25  ;;  %11608 = vmatprep.mubr.f32.mxu1 %v17745_v59  ;;  %v11440_v61 = vrot.slane %v17509_v23, 1 }
 0xba7   : > { %11473 = vmatprep.subr.mxu0 %v11466_v16  ;;  %v17528_v16 = vld [vmem:[%s17763_s18 + $0x18] sm:$0xff] }
 0xba8   : > { %v11461_v51 = vpop.permute.xlu1 %11460 }
 0xba9   : > { %v11463_v54 = vpop.permute.xlu0 %11462  ;;  %v11465_v36 = vsel %vm1456_vm6, %v11459_v25, %v11461_v51 }
 0xbaa   : > { %v11467_v50 = vsel %vm1456_vm6, %v11463_v54, %v11457_v39  ;;  %v11464_v22 = vsel %vm1456_vm6, %v11461_v51, %v11463_v54  ;;  %v11441_v39 = vrot.slane %v17521_v43, 1  ;;  %v11443_v51 = vrot.slane %v17528_v16, 1 }
 0xbab   : > { %11474 = vmatpush1.msra.mxu0 %v11467_v50  ;;  %11544 = vmatprep.subr.mxu1 %v11464_v22 }
 0xbac   : > { %11545 = vmatpush1.msra.mxu1 %v11465_v36  ;;  %v11632_v6 = vpop.permute.xlu1 %11631  ;;  %13099 = vmatmul.mubr.msk.f32.vlgmr.msra.gmra.mrb[150].mxu0 %vm6623_vm0, %v13098_v15 }
 0xbad   : > { %v11634_v18 = vpop.permute.xlu0 %11633  ;;  %13100 = vmatmul.mubr.msk.f32.vlgmr.msra.gmra.mrb[150].mxu1 %vm6623_vm0, %v13098_v15  ;;  %11712 = vmatprep.mubr.f32.mxu0 %v17745_v59 }
 0xbae   : > { %v11641_v4 = vsel %vm1712_vm10, %v11632_v6, %v11634_v18  ;;  %11783 = vmatprep.mubr.f32.mxu1 %v17745_v59 }
 0xbaf   : > { %11648 = vmatprep.subr.mxu0 %v11641_v4 }
 0xbb0   : > { %v11636_v31 = vpop.permute.xlu1 %11635 }
 0xbb1   : > { %v11638_v29 = vpop.permute.xlu0 %11637  ;;  %v11640_v8 = vsel %vm1712_vm10, %v11634_v18, %v11636_v31 }
 0xbb2   : > { %v11642_v20 = vsel %vm1712_vm10, %v11638_v29, %v11632_v6  ;;  %v11639_v24 = vsel %vm1712_vm10, %v11636_v31, %v11638_v29 }
 0xbb3   : > { %11649 = vmatpush1.msra.mxu0 %v11642_v20  ;;  %11719 = vmatprep.subr.mxu1 %v11639_v24 }
 0xbb4   : > { %11720 = vmatpush1.msra.mxu1 %v11640_v8  ;;  %11811 = vmatprep.subr.mxu0 %v17307_v19  ;;  %v11958_v55 = vpop.permute.xlu1 %11957 }
 0xbb5   : > { %v11960_v9 = vpop.permute.xlu0 %11959  ;;  %13102 = vmatmul.mubr.msk.f32.vlgmr.msra.gmra.mrb[152].mxu0 %vm6623_vm0, %v13101_v3  ;;  %11882 = vmatprep.subr.mxu1 %v17315_v56  ;;  %v13113_v56 = vld [vmem:[%s17637_s17 + $0x7] sm:$0x1] }
 0xbb6   : > { %11812 = vmatpush1.msra.mxu0 %v17305_v0  ;;  %13103 = vmatmul.mubr.msk.f32.vlgmr.msra.gmra.mrb[152].mxu1 %vm6623_vm0, %v13101_v3  ;;  %v11967_v14 = vsel %vm2151_vm11, %v11958_v55, %v11960_v9 }
 0xbb7   : > { %11883 = vmatpush1.msra.mxu1 %v17313_v27  ;;  %11875 = vmatprep.mubr.f32.mxu0 %v17745_v59 }
 0xbb8   : > { %v11962_v52 = vpop.permute.xlu1 %11961  ;;  %11946 = vmatprep.mubr.f32.mxu1 %v17745_v59 }
 0xbb9   : > { %v11964_v41 = vpop.permute.xlu0 %11963  ;;  %v11966_v33 = vsel %vm2151_vm11, %v11960_v9, %v11962_v52  ;;  %13105 = vmatmul.mubr.msk.f32.vlgmr.msra.gmra.mrb[154].mxu0 %vm6623_vm0, %v13104_v35  ;;  %v11615_v9 = vrot.slane %v17509_v23, 2 }
 0xbba   : > { %v11965_v10 = vsel %vm2151_vm11, %v11962_v52, %v11964_v41  ;;  %11974 = vmatprep.subr.mxu0 %v11966_v33  ;;  %v11968_v49 = vsel %vm2151_vm11, %v11964_v41, %v11958_v55  ;;  %13106 = vmatmul.mubr.msk.f32.vlgmr.msra.gmra.mrb[154].mxu1 %vm6623_vm0, %v13104_v35  ;;  %v11617_v35 = vrot.slane %v17515_v40, 2  ;;  %v11616_v52 = vrot.slane %v17521_v43, 2 }
 0xbbb   : > { %11975 = vmatpush1.msra.mxu0 %v11967_v14  ;;  %12045 = vmatprep.subr.mxu1 %v11968_v49  ;;  %v11618_v41 = vrot.slane %v17528_v16, 2 }
 0xbbc   : > { %12046 = vmatpush1.msra.mxu1 %v11965_v10  ;;  %v12133_v34 = vpop.permute.xlu1 %12132  ;;  %12038 = vmatprep.mubr.f32.mxu0 %v17745_v59 }
 0xbbd   : > { %v12135_v13 = vpop.permute.xlu0 %12134  ;;  %13108 = vmatmul.mubr.msk.f32.vlgmr.msra.gmra.mrb[156].mxu0 %vm6623_vm0, %v13107_v11  ;;  %12109 = vmatprep.mubr.f32.mxu1 %v17745_v59 }
 0xbbe   : > { %13109 = vmatmul.mubr.msk.f32.vlgmr.msra.gmra.mrb[156].mxu1 %vm6623_vm0, %v13107_v11  ;;  %12213 = vmatprep.mubr.f32.mxu0 %v17745_v59  ;;  %v12142_v37 = vsel %vm2407_vm12, %v12133_v34, %v12135_v13 }
 0xbbf   : > { %12284 = vmatprep.mubr.f32.mxu1 %v17745_v59 }
 0xbc0   : > { %v12137_v1 = vpop.permute.xlu1 %12136 }
 0xbc1   : > { %v12139_v38 = vpop.permute.xlu0 %12138  ;;  %v12141_v48 = vsel %vm2407_vm12, %v12135_v13, %v12137_v1 }
 0xbc2   : > { %v12140_v7 = vsel %vm2407_vm12, %v12137_v1, %v12139_v38  ;;  %12149 = vmatprep.subr.mxu0 %v12141_v48  ;;  %v12143_v58 = vsel %vm2407_vm12, %v12139_v38, %v12133_v34 }
 0xbc3   : > { %12150 = vmatpush1.msra.mxu0 %v12142_v37  ;;  %12220 = vmatprep.subr.mxu1 %v12143_v58  ;;  %v11792_v58 = vrot.slane %v17515_v40, 3 }
 0xbc4   : > { %13111 = vmatmul.mubr.msk.f32.vlgmr.msra.gmra.mrb[158].mxu0 %vm6623_vm0, %v13110_v60  ;;  %12221 = vmatpush1.msra.mxu1 %v12140_v7  ;;  %v12308_v0 = vpop.permute.xlu1 %12307  ;;  %v11790_v7 = vrot.slane %v17509_v23, 3 }
 0xbc5   : > { %v12310_v21 = vpop.permute.xlu0 %12309  ;;  %13112 = vmatmul.mubr.msk.f32.vlgmr.msra.gmra.mrb[158].mxu1 %vm6623_vm0, %v13110_v60  ;;  %12388 = vmatprep.mubr.f32.mxu0 %v17745_v59 }
 0xbc6   : > { %12459 = vmatprep.mubr.f32.mxu1 %v17745_v59  ;;  %v12317_v45 = vsel %vm2663_vm13, %v12308_v0, %v12310_v21 }
 0xbc8   : > { %v12312_v19 = vpop.permute.xlu1 %12311 }
 0xbc9   : > { %v12314_v28 = vpop.permute.xlu0 %12313  ;;  %v12316_v27 = vsel %vm2663_vm13, %v12310_v21, %v12312_v19  ;;  %v11793_v21 = vrot.slane %v17528_v16, 3 }
 0xbca   : > { %v12315_v57 = vsel %vm2663_vm13, %v12312_v19, %v12314_v28  ;;  %12324 = vmatprep.subr.mxu0 %v12316_v27  ;;  %v12318_v46 = vsel %vm2663_vm13, %v12314_v28, %v12308_v0  ;;  %v11791_v0 = vrot.slane %v17521_v43, 3 }
 0xbcb   : > { %12325 = vmatpush1.msra.mxu0 %v12317_v45  ;;  %12395 = vmatprep.subr.mxu1 %v12318_v46 }
 0xbcc   : > { %13114 = vmatmul.mubr.msk.f32.vlgmr.msra.gmra.mrb[160].mxu0 %vm6623_vm0, %v13113_v56  ;;  %12396 = vmatpush1.msra.mxu1 %v12315_v57  ;;  %v12483_v47 = vpop.permute.xlu1 %12482 }
 0xbcd   : > { %v12485_v2 = vpop.permute.xlu0 %12484  ;;  %13115 = vmatmul.mubr.msk.f32.vlgmr.msra.gmra.mrb[160].mxu1 %vm6623_vm0, %v13113_v56  ;;  %12563 = vmatprep.mubr.f32.mxu0 %v17745_v59 }
 0xbce   : > { %12634 = vmatprep.mubr.f32.mxu1 %v17745_v59  ;;  %v12492_v30 = vsel %vm2919_vm14, %v12483_v47, %v12485_v2 }
 0xbd0   : > { %v12487_v5 = vpop.permute.xlu1 %12486 }
 0xbd1   : > { %v12489_v53 = vpop.permute.xlu0 %12488  ;;  %v12491_v42 = vsel %vm2919_vm14, %v12485_v2, %v12487_v5 }
 0xbd2   : > { %v12490_v12 = vsel %vm2919_vm14, %v12487_v5, %v12489_v53  ;;  %12499 = vmatprep.subr.mxu0 %v12491_v42  ;;  %v12493_v17 = vsel %vm2919_vm14, %v12489_v53, %v12483_v47 }
 0xbd3   : > { %12500 = vmatpush1.msra.mxu0 %v12492_v30  ;;  %12570 = vmatprep.subr.mxu1 %v12493_v17 }
 0xbd4   : > { %13117 = vmatmul.mubr.msk.f32.vlgmr.msra.gmra.mrb[162].mxu0 %vm6623_vm0, %v13116_v63  ;;  %12571 = vmatpush1.msra.mxu1 %v12490_v12 }
 0xbd5   : > { %13118 = vmatmul.mubr.msk.f32.vlgmr.msra.gmra.mrb[162].mxu1 %vm6623_vm0, %v13116_v63 }
 0xc6f   : > { %v11193_v59 = vpop.f32.mrb[146].mxu0 }
 0xc70   : > { %v11264_v44 = vpop.f32.mrb[146].mxu1  ;;  %v11195_v32 = vpop.f32.mrb[147].mxu0  ;;  %v11269_v25 = vmul.f32 %v17509_v23, %v11193_v59  ;;  %v12116_v59 = vrot.slane %v17509_v23, 5 }
 0xc71   : > { %v11266_v26 = vpop.f32.mrb[147].mxu1  ;;  %v11271_v54 = vmul.f32 %v17515_v40, %v11264_v44  ;;  %v11270_v15 = vmul.f32 %v17521_v43, %v11195_v32 }
 0xc72   : > { %v11272_v22 = vmul.f32 %v17528_v16, %v11266_v26 }
 0xc77   : > { %v11360_v50 = vpop.f32.mrb[148].mxu0 }
 0xc78   : > { %v11448_v36 = vmul.f32 %v11440_v61, %v11360_v50  ;;  %v11431_v6 = vpop.f32.mrb[148].mxu1  ;;  %v11362_v18 = vpop.f32.mrb[149].mxu0  ;;  %v12118_v61 = vrot.slane %v17515_v40, 5 }
 0xc79   : > { %v11450_v4 = vmul.f32 %v11442_v62, %v11431_v6  ;;  %v11449_v31 = vmul.f32 %v11441_v39, %v11362_v18  ;;  %v11433_v29 = vpop.f32.mrb[149].mxu1  ;;  %v12117_v62 = vrot.slane %v17521_v43, 5 }
 0xc7a   : > { %v11452_v20 = vadd.f32 %v11448_v36, %v11269_v25  ;;  %v11451_v24 = vmul.f32 %v11443_v51, %v11433_v29  ;;  %v12119_v25 = vrot.slane %v17528_v16, 5 }
 0xc7b   : > { %v11454_v3 = vadd.f32 %v11450_v4, %v11271_v54  ;;  %v11453_v8 = vadd.f32 %v11449_v31, %v11270_v15 }
 0xc7c   : > { %v11455_v55 = vadd.f32 %v11451_v24, %v11272_v22 }
 0xc7f   : > { %v11539_v33 = vpop.f32.mrb[150].mxu0 }
 0xc80   : > { %v11623_v14 = vmul.f32 %v11615_v9, %v11539_v33  ;;  %v11610_v10 = vpop.f32.mrb[150].mxu1  ;;  %v11541_v49 = vpop.f32.mrb[151].mxu0 }
 0xc81   : > { %v11625_v11 = vmul.f32 %v11617_v35, %v11610_v10  ;;  %v11624_v34 = vmul.f32 %v11616_v52, %v11541_v49  ;;  %v11612_v13 = vpop.f32.mrb[151].mxu1 }
 0xc82   : > { %v11627_v1 = vadd.f32 %v11623_v14, %v11452_v20  ;;  %v11626_v38 = vmul.f32 %v11618_v41, %v11612_v13  ;;  %v12291_v20 = vrot.slane %v17509_v23, 6 }
 0xc83   : > { %v11629_v48 = vadd.f32 %v11625_v11, %v11454_v3  ;;  %v11628_v60 = vadd.f32 %v11624_v34, %v11453_v8  ;;  %v12292_v3 = vrot.slane %v17521_v43, 6  ;;  %v12293_v8 = vrot.slane %v17515_v40, 6 }
 0xc84   : > { %v11630_v37 = vadd.f32 %v11626_v38, %v11455_v55  ;;  %v12294_v55 = vrot.slane %v17528_v16, 6  ;;  %v12466_v38 = vrot.slane %v17509_v23, 7 }
 0xc88   : > { %v11714_v19 = vpop.f32.mrb[152].mxu0 }
 0xc89   : > { %v11798_v28 = vmul.f32 %v11790_v7, %v11714_v19  ;;  %v11785_v27 = vpop.f32.mrb[152].mxu1  ;;  %v11716_v56 = vpop.f32.mrb[153].mxu0 }
 0xc8a   : > { %v11800_v45 = vmul.f32 %v11792_v58, %v11785_v27  ;;  %v11799_v57 = vmul.f32 %v11791_v0, %v11716_v56  ;;  %v11787_v46 = vpop.f32.mrb[153].mxu1 }
 0xc8b   : > { %v11801_v47 = vmul.f32 %v11793_v21, %v11787_v46  ;;  %v11802_v2 = vadd.f32 %v11798_v28, %v11627_v1 }
 0xc8c   : > { %v11877_v5 = vpop.f32.mrb[154].mxu0  ;;  %v11804_v53 = vadd.f32 %v11800_v45, %v11629_v48  ;;  %v11803_v42 = vadd.f32 %v11799_v57, %v11628_v60  ;;  %v12467_v48 = vrot.slane %v17521_v43, 7  ;;  %v12468_v60 = vrot.slane %v17515_v40, 7  ;;  %v14202_v40 = vld [vmem:[%s17763_s18 + $0x20] sm:$0x1] }
 0xc8d   : > { %v11953_v63 = vadd.f32 %v11877_v5, %v11802_v2  ;;  %v11948_v30 = vpop.f32.mrb[154].mxu1  ;;  %v11879_v12 = vpop.f32.mrb[155].mxu0  ;;  %v11805_v17 = vadd.f32 %v11801_v47, %v11630_v37  ;;  %v12469_v37 = vrot.slane %v17528_v16, 7 }
 0xc8e   : > { %v11955_v44 = vadd.f32 %v11948_v30, %v11804_v53  ;;  %v11954_v32 = vadd.f32 %v11879_v12, %v11803_v42  ;;  %v11950_v26 = vpop.f32.mrb[155].mxu1  ;;  %v12653_v2 = vpop.permute.xlu1 %12652  ;;  %v14203_v53 = vld [vmem:[%s17763_s18 + $0x28] sm:$0x1] }
 0xc8f   : > { %v11956_v39 = vadd.f32 %v11950_v26, %v11805_v17  ;;  %v17781_v17 = vld [vmem:[#allocation23_spill] sm:$0xff] }
 0xc90   : > { %v12040_v51 = vpop.f32.mrb[156].mxu0 }
 0xc91   : > { %v12124_v54 = vmul.f32 %v12116_v59, %v12040_v51  ;;  %v12111_v15 = vpop.f32.mrb[156].mxu1  ;;  %v12042_v50 = vpop.f32.mrb[157].mxu0  ;;  %v12658_v59 = vrot.slane %v12653_v2, %v17781_v17 }
 0xc92   : > { %v12126_v22 = vmul.f32 %v12118_v61, %v12111_v15  ;;  %v12125_v36 = vmul.f32 %v12117_v62, %v12042_v50  ;;  %v12113_v6 = vpop.f32.mrb[157].mxu1 }
 0xc93   : > { %v12128_v18 = vadd.f32 %v12124_v54, %v11953_v63  ;;  %v12127_v4 = vmul.f32 %v12119_v25, %v12113_v6  ;;  %v14204_v63 = vld [vmem:[%s17763_s18 + $0x30] sm:$0x1] }
 0xc94   : > { %v12130_v31 = vadd.f32 %v12126_v22, %v11955_v44  ;;  %v12129_v29 = vadd.f32 %v12125_v36, %v11954_v32  ;;  %v14205_v32 = vld [vmem:[%s17763_s18 + $0x38] sm:$0x1] }
 0xc95   : > { %v12131_v24 = vadd.f32 %v12127_v4, %v11956_v39 }
 0xc97   : > { %v12215_v9 = vpop.f32.mrb[158].mxu0 }
 0xc98   : > { %v12299_v35 = vmul.f32 %v12291_v20, %v12215_v9  ;;  %v12217_v52 = vpop.f32.mrb[159].mxu0  ;;  %v12286_v41 = vpop.f32.mrb[158].mxu1 }
 0xc99   : > { %v12300_v33 = vmul.f32 %v12292_v3, %v12217_v52  ;;  %v12301_v14 = vmul.f32 %v12293_v8, %v12286_v41  ;;  %v12288_v10 = vpop.f32.mrb[159].mxu1  ;;  %v17783_v41 = vld [vmem:[#allocation22_spill] sm:$0xff] }
 0xc9a   : > { %v12303_v49 = vadd.f32 %v12299_v35, %v12128_v18  ;;  %v12302_v11 = vmul.f32 %v12294_v55, %v12288_v10  ;;  %v14355_v55 = vmov 1966171168  }
 0xc9b   : > { %v12304_v34 = vadd.f32 %v12300_v33, %v12129_v29  ;;  %v12305_v13 = vadd.f32 %v12301_v14, %v12130_v31  ;;  %v12694_v9 = vunpack.c.l.s4 %v14355_v55 }
 0xc9c   : > { %v12306_v1 = vadd.f32 %v12302_v11, %v12131_v24 }
 0xc9d   : > { %v12695_v35 = vunpack.c.0.s8 %v12694_v9 }
 0xc9f   : > { %v12390_v7 = vpop.f32.mrb[160].mxu0  ;;  %v12698_v33 = vsub.s32 %v12695_v35, %v17783_v41 }
 0xca0   : > { %v12474_v58 = vmul.f32 %v12466_v38, %v12390_v7  ;;  %v12392_v0 = vpop.f32.mrb[161].mxu0  ;;  %v12461_v21 = vpop.f32.mrb[160].mxu1 }
 0xca1   : > { %v12475_v19 = vmul.f32 %v12467_v48, %v12392_v0  ;;  %v12476_v28 = vmul.f32 %v12468_v60, %v12461_v21  ;;  %v12463_v27 = vpop.f32.mrb[161].mxu1 }
 0xca2   : > { %v12478_v56 = vadd.f32 %v12474_v58, %v12303_v49  ;;  %v12477_v45 = vmul.f32 %v12469_v37, %v12463_v27 }
 0xca3   : > { %v12479_v57 = vadd.f32 %v12475_v19, %v12304_v34  ;;  %v12480_v46 = vadd.f32 %v12476_v28, %v12305_v13 }
 0xca4   : > { %v12481_v47 = vadd.f32 %v12477_v45, %v12306_v1 }
 0xca7   : > { %v12565_v23 = vpop.f32.mrb[162].mxu0 }
 0xca8   : > { %v12641_v43 = vmul.f32 %v14202_v40, %v12565_v23  ;;  %v12567_v16 = vpop.f32.mrb[163].mxu0  ;;  %v12636_v5 = vpop.f32.mrb[162].mxu1 }
 0xca9   : > { %v12642_v42 = vmul.f32 %v14203_v53, %v12567_v16  ;;  %v12643_v30 = vmul.f32 %v14204_v63, %v12636_v5  ;;  %v12638_v12 = vpop.f32.mrb[163].mxu1 }
 0xcaa   : > { %v12645_v44 = vadd.f32 %v12641_v43, %v12478_v56  ;;  %v12644_v26 = vmul.f32 %v14205_v32, %v12638_v12 }
 0xcab   : > { %v12646_v61 = vadd.f32 %v12642_v42, %v12479_v57  ;;  %v12647_v62 = vadd.f32 %v12643_v30, %v12480_v46 }
 0xcac   : > { %v12659_v39 = vadd.f32 %v12658_v59, %v12645_v44  ;;  %v12648_v25 = vadd.f32 %v12644_v26, %v12481_v47 }
 0xcad   : > { %v12660_v51 = vadd.f32 %v12658_v59, %v12646_v61  ;;  %v12661_v54 = vadd.f32 %v12658_v59, %v12647_v62 }
 0xcae   : > { %v13119_v15 = vmul.f32 -1.442695, %v12659_v39  ;;  %v12662_v50 = vadd.f32 %v12658_v59, %v12648_v25 }
 0xcaf   : > { %v13120_v22 = vmul.f32 -1.442695, %v12660_v51  ;;  %v13121_v36 = vmul.f32 -1.442695, %v12661_v54 }
 0xcb0   : > { %14182 = vpow2.f32 %v13119_v15  ;;  %v13122_v6 = vmul.f32 -1.442695, %v12662_v50 }
 0xcb1   : > { %14184 = vpow2.f32 %v13120_v22 }
 0xcb2   : > { %14186 = vpow2.f32 %v13121_v36 }
 0xcb3   : > { %14188 = vpow2.f32 %v13122_v6 }
 0xcba   : > { %v14183_v18 = vpop.eup %14182 }
 0xcbb   : > { %v14185_v4 = vpop.eup %14184  ;;  %v12675_v31 = vadd.f32 1.0, %v14183_v18 }
 0xcbc   : > { %v14187_v29 = vpop.eup %14186  ;;  %v12676_v20 = vadd.f32 1.0, %v14185_v4 }
 0xcbd   : > { %v14189_v24 = vpop.eup %14188  ;;  %14190 = vrcp.f32 %v12675_v31  ;;  %v12677_v3 = vadd.f32 1.0, %v14187_v29 }
 0xcbe   : > { %14192 = vrcp.f32 %v12676_v20  ;;  %v12678_v8 = vadd.f32 1.0, %v14189_v24 }
 0xcbf   : > { %14194 = vrcp.f32 %v12677_v3 }
 0xcc0   : > { %14196 = vrcp.f32 %v12678_v8 }
 0xcc7   : > { %v14191_v52 = vpop.eup %14190 }
 0xcc8   : > { %v14193_v14 = vpop.eup %14192 }
 0xcc9   : > { %v14195_v10 = vpop.eup %14194  ;;  %v12691_v49 = vcombine.low %v14191_v52, %v14193_v14 }
 0xcca   : > { %v14197_v11 = vpop.eup %14196 }
 0xccb   : > { %v12692_v34 = vcombine.low %v14195_v10, %v14197_v11  ;;  %v12699_v13 = vrot.slane %v12691_v49, %v12698_v33 }
 0xccd   : > { %v12706_v1 = vrot.slane %v12692_v34, %v12698_v33 }
 0xccf   : > { %v12707_v38 = vcombine.low %v12699_v13, %v12706_v1 }
 0xcd1   : > { %v12714_v48 = vrot.slane %v12707_v38, %v12698_v33 }
 0xcd3   : > { %12716 = vst.msk [vmem:[%s658_s27] sm:$0xf] %vm14629_vm2, %v12714_v48 }
 0xcd4   : > { %14283 = shalt.err (!%p14280_p1)
}
 0xcd5   : > { %s14284_s2 = scalar_lea.hbm %s17574_s23, 64  ;;  %s14288_s22 = scalar_lea.hbm %s17786_s3, 128 }
 0xcd6   : > { %p14285_p11 = scmp.ne.s32.totalorder %s17574_s23, %s14284_s2  ;;  %p14289_p4 = scmp.lt.u32.totalorder %s17574_s23, %s17786_s3 }
 0xcd7   : > { %p14290_p10 = scmp.lt.u32.totalorder %s14288_s22, %s14284_s2  ;;  %p14292_p6 = scmp.lt.u32.totalorder %s14284_s2, %s17574_s23 }
 0xcd8   : > { %p14286_p12 = pnand %p14285_p11, %p17788_p13 }
 0xcd9   : > { %p14291_p3 = por %p14290_p10, %p14289_p4 }
 0xcda   : > { %p14287_p2 = pneg %p14286_p12 }
 0xcdb   : > { %p14293_p7 = por %p14292_p6, %p14291_p3 }
 0xcdd   : > { %p14294_p5 = pnand %p14293_p7, %p14287_p2 }
 0xcdf   : > { %14297 = shalt.err (!%p14294_p5)
}
 0xce0   : > { %13459 = dma.vmem_to_hbm [thread:$0]  (%p17788_p13), %s17576_s0, 64, %s17574_s23, %s12718_s25  }
 0xce1 PF: > { %s17789_s24 = sld [smem:[#allocation13_spill]]  ;;  %s17790_s30 = sld [smem:[#allocation20_spill]] }
 0xce2   : > { %s17791_s20 = sld [smem:[#allocation15_spill]] }
 0xce7   : > { %s12744_s19 = sand.u32 1, %s17789_s24   ;;  %p17792_p8 = scmp.ne.s32.totalorder %s17790_s30, 0 }
 0xce8   : > { %p17793_p9 = scmp.ge.s32.totalorder %s17791_s20, 2  ;;  %s12745_s27 = scalar_lea.sflag [#allocation6], %s12744_s19 }
 0xcea   : > { %p13469_p0 = pnand %p17793_p9, %p17792_p8 }
 0xcec   : > { %14323 = dma.done.wait (!%p13469_p0), %s12745_s27, 64  }
 0xced   : > { %14325 = vsyncadd (!%p13469_p0), %s12745_s27, 4294967232  ;;  %s17794_s22 = sld [smem:[#allocation17_spill]]  ;;  %s17795_s2 = sld [smem:[#allocation14_spill]] }
 0xcee   : > { %s17796_s1 = sld [smem:[#allocation18_spill]]  ;;  %s17797_s20 = smov %s14332_s21 }
 0xcf3   : > { %p37_p1 = scmp.ge.s32.totalorder %s17794_s22, 4   ;;  %s17798_s21 = smov %s17795_s2 }
 0xcf5   :  { %39 = sbr.rel (!%p37_p1) target bundleno = 13 (0xd), region = 211 }
 0xcfc   :  { %12750 = vsyncpa [#allocation5], 1 }
 0xcfd   :  { %12752 = vsyncpa [#allocation5 + $0x1], 1 }
 0xcfe   :  { %12753 = vsyncpa [#allocation8], 1 }
 0xcff   :  { %12755 = vsyncpa [#allocation8 + $0x1], 1 }
 0xd00   :  { %12756 = vsyncpa [#allocation6], 1 }
 0xd01   :  { %12758 = vsyncpa [#allocation6 + $0x1], 1 }

</bundles_post_ra>
